<compile_context>
chip_gen: v5e
topology: v5e:2x2
jax: 0.10.0
libtpu: 0.0.40
codegen_flags: <defaults>
</compile_context>

<pallas_src>
import functools

import jax
import jax.numpy as jnp
from jax.experimental import pallas as pl
from jax.experimental.pallas import tpu as pltpu

BN_EPS = 1e-5
NEG_BIG = -1e30
TM_MAX = 2048                          # max point-tile rows per grid step
VMEM_LIMIT_BYTES = 48 * 1024 * 1024    # headroom for tm=2048 tiles on all chips


def _round_up(x, m):
    return ((x + m - 1) // m) * m


def _cdiv(a, b):
    return -(-a // b)


# ---------------------------------------------------------------------------
# Fused kernel: point-MLP (conv1-3 + BN shift + relu) + global max pool
#               + FC head (fc1-3 [+identity | +log_softmax]) in the epilogue.
# Grid = (batch "parallel", point-tiles "arbitrary").
# ---------------------------------------------------------------------------

def _pointnet_branch_kernel(x_ref, w1_ref, s1_ref, w2_ref, s2_ref, w3_ref, s3_ref,
                            hw1_ref, hs1_ref, hw2_ref, hs2_ref, hw3_ref, hs3_ref,
                            o_ref, acc_ref, *, relu3, logsoftmax):
    m = pl.program_id(1)

    @pl.when(m == 0)
    def _():
        acc_ref[...] = jnp.full(acc_ref.shape, -jnp.inf, dtype=acc_ref.dtype)

    # ---- point MLP on this tile (BN scale pre-folded into the weights) ----
    # layer 1 (K=3) stays f32 for parity; layers 2/3 feed the MXU in bf16.
    h = jnp.dot(x_ref[0], w1_ref[0], preferred_element_type=jnp.float32)   # (tm, 64)
    h = jnp.maximum(h + s1_ref[...], 0.0)
    h = jnp.dot(h.astype(jnp.bfloat16), w2_ref[...],
                preferred_element_type=jnp.float32)                        # (tm, 128)
    h = jnp.maximum(h + s2_ref[...], 0.0)
    h = jnp.dot(h.astype(jnp.bfloat16), w3_ref[...],
                preferred_element_type=jnp.float32)                        # (tm, 1024)

    # conv3's bias/relu are hoisted past the point-max (exact: per-channel bias,
    # monotone relu).  Fold tm rows -> 8 rows with pure vreg maxima (VALU only);
    # the single cross-sublane reduce happens once, in the epilogue.
    tm, c3 = h.shape
    h8 = jnp.max(h.reshape(tm // 8, 8, c3), axis=0)
    acc_ref[...] = jnp.maximum(acc_ref[...], h8)

    # ---- epilogue at the last point tile: finish pooling + fused FC head ----
    @pl.when(m == pl.num_programs(1) - 1)
    def _():
        g = jnp.max(acc_ref[...], axis=0, keepdims=True) + s3_ref[...]     # (1, 1024)
        if relu3:
            g = jnp.maximum(g, 0.0)
        f = jnp.dot(g.astype(jnp.bfloat16), hw1_ref[...],
                    preferred_element_type=jnp.float32)
        f = jnp.maximum(f + hs1_ref[...], 0.0)
        f = jnp.dot(f.astype(jnp.bfloat16), hw2_ref[...],
                    preferred_element_type=jnp.float32)
        f = jnp.maximum(f + hs2_ref[...], 0.0)
        f = jnp.dot(f.astype(jnp.bfloat16), hw3_ref[...],
                    preferred_element_type=jnp.float32)
        f = f + hs3_ref[...]
        if logsoftmax:
            z = f - jnp.max(f, axis=-1, keepdims=True)
            f = z - jnp.log(jnp.sum(jnp.exp(z), axis=-1, keepdims=True))
        o_ref[0] = f


def fused_pointnet_branch(x, tm, w1, s1, w2, s2, w3, s3,
                          hw1, hs1, hw2, hs2, hw3, hs3,
                          *, relu3, logsoftmax, per_batch_w1):
    """x: (B, Np, Kin) f32 point-major (Np % tm == 0).  Returns (B, OUT) f32."""
    B, Np, Kin = x.shape
    C1, C2, C3 = w1.shape[-1], w2.shape[-1], w3.shape[-1]
    H1, H2, OUT = hw1.shape[-1], hw2.shape[-1], hw3.shape[-1]
    assert Np % tm == 0 and tm % 8 == 0
    grid = (B, Np // tm)
    w1_map = (lambda b, m: (b, 0, 0)) if per_batch_w1 else (lambda b, m: (0, 0, 0))
    const2 = lambda b, m: (0, 0)
    kern = functools.partial(_pointnet_branch_kernel,
                             relu3=relu3, logsoftmax=logsoftmax)
    out = pl.pallas_call(
        kern,
        out_shape=jax.ShapeDtypeStruct((B, 1, OUT), jnp.float32),
        grid_spec=pltpu.PrefetchScalarGridSpec(
            num_scalar_prefetch=0,
            grid=grid,
            in_specs=[
                pl.BlockSpec((1, tm, Kin), lambda b, m: (b, m, 0)),
                pl.BlockSpec((1, Kin, C1), w1_map),
                pl.BlockSpec((1, C1), const2),
                pl.BlockSpec((C1, C2), const2),
                pl.BlockSpec((1, C2), const2),
                pl.BlockSpec((C2, C3), const2),
                pl.BlockSpec((1, C3), const2),
                pl.BlockSpec((C3, H1), const2),
                pl.BlockSpec((1, H1), const2),
                pl.BlockSpec((H1, H2), const2),
                pl.BlockSpec((1, H2), const2),
                pl.BlockSpec((H2, OUT), const2),
                pl.BlockSpec((1, OUT), const2),
            ],
            out_specs=pl.BlockSpec((1, 1, OUT), lambda b, m: (b, 0, 0)),
            scratch_shapes=[pltpu.VMEM((8, C3), jnp.float32)],
        ),
        compiler_params=pltpu.CompilerParams(
            dimension_semantics=("parallel", "arbitrary"),
            vmem_limit_bytes=VMEM_LIMIT_BYTES),
    )(x, w1, s1, w2, s2, w3, s3, hw1, hs1, hw2, hs2, hw3, hs3)
    return out[:, 0, :]


# ---------------------------------------------------------------------------
# Parameter construction (deterministic, in-script; BN folded, bf16 pre-cast,
# head outputs pre-padded to 128 lanes).
# ---------------------------------------------------------------------------

def _init_wb(key, in_dim, out_dim, scale=0.05):
    kw, kb = jax.random.split(key)
    w = jax.random.normal(kw, (in_dim, out_dim), jnp.float32) * scale
    b = jax.random.normal(kb, (out_dim,), jnp.float32) * scale
    return w, b


def _bn_fold(w, b, out_dim):
    gamma = jnp.ones((out_dim,), jnp.float32)
    beta = jnp.zeros((out_dim,), jnp.float32)
    run_mean = jnp.zeros((out_dim,), jnp.float32)
    run_var = jnp.ones((out_dim,), jnp.float32)
    scale = gamma / jnp.sqrt(run_var + BN_EPS)
    return w * scale[None, :], (scale * (b - run_mean) + beta).reshape(1, out_dim)


def _make_bn_layer(key, in_dim, out_dim, dtype=jnp.bfloat16):
    """Conv1d(1x1)/Linear with inference-mode BN folded (scale -> w, shift kept)."""
    w, b = _init_wb(key, in_dim, out_dim)
    w, shift = _bn_fold(w, b, out_dim)
    return {"w": w.astype(dtype), "shift": shift}


def _make_head_out_layer(key, in_dim, out_dim, *, pad_bias_value=0.0,
                         extra_bias=None):
    """Final Linear of a head, pre-padded to 128 output lanes at build time."""
    w, b = _init_wb(key, in_dim, out_dim)
    if extra_bias is not None:
        b = b + extra_bias
    out_pad = _round_up(out_dim, 128)
    w_p = jnp.zeros((in_dim, out_pad), jnp.float32).at[:, :out_dim].set(w)
    b_p = jnp.full((out_pad,), pad_bias_value, jnp.float32).at[:out_dim].set(b)
    return {"w": w_p.astype(jnp.bfloat16), "shift": b_p.reshape(1, out_pad)}


def init_tnet(key, k):
    ks = jax.random.split(key, 6)
    c1 = _make_bn_layer(ks[0], k, 64, dtype=jnp.float32)   # layer 1 stays f32
    return {
        "c1": {"w": c1["w"][None], "shift": c1["shift"]},  # (1, k, 64)
        "c2": _make_bn_layer(ks[1], 64, 128),
        "c3": _make_bn_layer(ks[2], 128, 1024),
        "f1": _make_bn_layer(ks[3], 1024, 512),
        "f2": _make_bn_layer(ks[4], 512, 256),
        # "+ identity" folded into the final bias (same affine for every row)
        "f3": _make_head_out_layer(
            ks[5], 256, k * k,
            extra_bias=jnp.eye(k, dtype=jnp.float32).reshape(k * k)),
    }


def init_encoder(key):
    ks = jax.random.split(key, 4)
    c1 = _make_bn_layer(ks[1], 3, 64, dtype=jnp.float32)   # f32 for bmm folding
    return {
        "stn": init_tnet(ks[0], 3),
        "c1": {"w_f32": c1["w"], "shift": c1["shift"]},
        "c2": _make_bn_layer(ks[2], 64, 128),
        "c3": _make_bn_layer(ks[3], 128, 1024),
    }


def init_pointnet_cls(key, num_classes=40):
    ks = jax.random.split(key, 4)
    return {
        "feat": init_encoder(ks[0]),
        "f1": _make_bn_layer(ks[1], 1024, 512),
        "f2": _make_bn_layer(ks[2], 512, 256),
        # padded logit lanes get -1e30 bias so log_softmax over real classes is exact
        "f3": _make_head_out_layer(ks[3], 256, num_classes,
                                   pad_bias_value=NEG_BIG),
    }


# ---------------------------------------------------------------------------
# Forward passes (glue in JAX; hot path is exactly two fused Pallas kernels)
# ---------------------------------------------------------------------------

def _pad_points(x_bnc):
    """Pad the point axis by replicating point 0 (global max unchanged) and
    pick a point-tile so padding waste stays small (<~10%)."""
    B, N, C = x_bnc.shape
    if N <= TM_MAX:
        tm = _round_up(N, 8)
    else:
        tm = _round_up(_cdiv(N, _cdiv(N, TM_MAX)), 8)
    n_pad = _round_up(N, tm)
    if n_pad != N:
        pad = jnp.broadcast_to(x_bnc[:, :1, :], (B, n_pad - N, C))
        x_bnc = jnp.concatenate([x_bnc, pad], axis=1)
    return x_bnc, tm


def tnet_forward(p, x_pad, tm):
    """x_pad: (B, Np, k) padded point cloud -> (B, k, k) transform."""
    k = p["c1"]["w"].shape[1]
    out = fused_pointnet_branch(
        x_pad, tm,
        p["c1"]["w"], p["c1"]["shift"],
        p["c2"]["w"], p["c2"]["shift"],
        p["c3"]["w"], p["c3"]["shift"],            # conv3 + bn3 + relu
        p["f1"]["w"], p["f1"]["shift"],
        p["f2"]["w"], p["f2"]["shift"],
        p["f3"]["w"], p["f3"]["shift"],            # fc3 (+eye folded in bias)
        relu3=True, logsoftmax=False, per_batch_w1=False)
    return out[:, :k * k].reshape(-1, k, k)


def pointnet_cls_forward(params, x_bcn, *, num_classes=40):
    """x_bcn: PyTorch layout (B, 3, N).  Returns (log_probs, trans, trans_feat)."""
    feat = params["feat"]
    x_bnc = jnp.transpose(x_bcn, (0, 2, 1)).astype(jnp.float32)
    x_pad, tm = _pad_points(x_bnc)

    trans = tnet_forward(feat["stn"], x_pad, tm)                    # (B, 3, 3)

    # torch.bmm(trans, x) then conv1  ==  x @ (trans^T @ W1_fused) + shift
    w1_eff = jnp.einsum("bji,jc->bic", trans, feat["c1"]["w_f32"])  # (B, 3, 64)

    log_probs = fused_pointnet_branch(
        x_pad, tm,
        w1_eff, feat["c1"]["shift"],
        feat["c2"]["w"], feat["c2"]["shift"],
        feat["c3"]["w"], feat["c3"]["shift"],      # conv3 + bn3, NO relu
        params["f1"]["w"], params["f1"]["shift"],
        params["f2"]["w"], params["f2"]["shift"],  # dropout(eval) = identity
        params["f3"]["w"], params["f3"]["shift"],  # fc3 + log_softmax
        relu3=False, logsoftmax=True, per_batch_w1=True)
    return log_probs[:, :num_classes], trans, None                  # no feature_transform


# ---------------------------------------------------------------------------
# Driver
# ---------------------------------------------------------------------------

if __name__ == "__main__":
    key = jax.random.PRNGKey(0)
    k_params, k_data = jax.random.split(key)

    B, C, N = 2, 3, 16          # small point cloud: batch=2, 3 coords, 16 points
    NUM_CLASSES = 40

    params = init_pointnet_cls(k_params, NUM_CLASSES)
    x = jax.random.normal(k_data, (B, C, N), jnp.float32)

    fwd = jax.jit(functools.partial(pointnet_cls_forward, num_classes=NUM_CLASSES))
    log_probs, trans, trans_feat = fwd(params, x)
    jax.block_until_ready((log_probs, trans))

    assert log_probs.shape == (B, NUM_CLASSES)
    assert trans.shape == (B, 3, 3)
    assert trans_feat is None
    assert bool(jnp.all(jnp.isfinite(log_probs)))
    # log_softmax rows should sum (in prob space) to ~1
    assert bool(jnp.all(jnp.abs(jnp.sum(jnp.exp(log_probs), axis=1) - 1.0) < 1e-3))

    print("KERNEL_OK")
</pallas_src>

<mosaic_0001>
module attributes {stable_mosaic.version = 11 : i64} {
  func.func @_pointnet_branch_kernel(%arg0: i32, %arg1: i32, %arg2: memref<1x16x3xf32, #tpu.memory_space<vmem>>, %arg3: memref<1x3x64xf32, #tpu.memory_space<vmem>>, %arg4: memref<1x64xf32, #tpu.memory_space<vmem>>, %arg5: memref<64x128xbf16, #tpu.memory_space<vmem>>, %arg6: memref<1x128xf32, #tpu.memory_space<vmem>>, %arg7: memref<128x1024xbf16, #tpu.memory_space<vmem>>, %arg8: memref<1x1024xf32, #tpu.memory_space<vmem>>, %arg9: memref<1024x512xbf16, #tpu.memory_space<vmem>>, %arg10: memref<1x512xf32, #tpu.memory_space<vmem>>, %arg11: memref<512x256xbf16, #tpu.memory_space<vmem>>, %arg12: memref<1x256xf32, #tpu.memory_space<vmem>>, %arg13: memref<256x128xbf16, #tpu.memory_space<vmem>>, %arg14: memref<1x128xf32, #tpu.memory_space<vmem>>, %arg15: memref<1x1x128xf32, #tpu.memory_space<vmem>>, %arg16: memref<8x1024xf32, #tpu.memory_space<vmem>>) attributes {dimension_semantics = [#tpu.dimension_semantics<parallel>, #tpu.dimension_semantics<arbitrary>], iteration_bounds = array<i64: 2, 1>, scalar_prefetch = 0 : i64, scratch_operands = 1 : i64, tpu.core_type = #tpu.core_type<tc>, window_params = [{transform_indices = @transform_0, window_bounds = array<i64: 1, 16, 3>}, {pipeline_mode = #tpu.pipeline_mode<synchronous>, transform_indices = @transform_1, window_bounds = array<i64: 1, 3, 64>}, {pipeline_mode = #tpu.pipeline_mode<synchronous>, transform_indices = @transform_2, window_bounds = array<i64: 1, 64>}, {pipeline_mode = #tpu.pipeline_mode<synchronous>, transform_indices = @transform_3, window_bounds = array<i64: 64, 128>}, {pipeline_mode = #tpu.pipeline_mode<synchronous>, transform_indices = @transform_4, window_bounds = array<i64: 1, 128>}, {pipeline_mode = #tpu.pipeline_mode<synchronous>, transform_indices = @transform_5, window_bounds = array<i64: 128, 1024>}, {pipeline_mode = #tpu.pipeline_mode<synchronous>, transform_indices = @transform_6, window_bounds = array<i64: 1, 1024>}, {pipeline_mode = #tpu.pipeline_mode<synchronous>, transform_indices = @transform_7, window_bounds = array<i64: 1024, 512>}, {pipeline_mode = #tpu.pipeline_mode<synchronous>, transform_indices = @transform_8, window_bounds = array<i64: 1, 512>}, {pipeline_mode = #tpu.pipeline_mode<synchronous>, transform_indices = @transform_9, window_bounds = array<i64: 512, 256>}, {pipeline_mode = #tpu.pipeline_mode<synchronous>, transform_indices = @transform_10, window_bounds = array<i64: 1, 256>}, {pipeline_mode = #tpu.pipeline_mode<synchronous>, transform_indices = @transform_11, window_bounds = array<i64: 256, 128>}, {pipeline_mode = #tpu.pipeline_mode<synchronous>, transform_indices = @transform_12, window_bounds = array<i64: 1, 128>}, {transform_indices = @transform_13, window_bounds = array<i64: 1, 1, 128>}]} {
    %c0_i32 = arith.constant 0 : i32
    %0 = arith.cmpi eq, %arg1, %c0_i32 : i32
    %1 = arith.extui %0 : i1 to i32
    %c0_i32_0 = arith.constant 0 : i32
    %2 = arith.cmpi ne, %1, %c0_i32_0 : i32
    scf.if %2 {
      %cst_25 = arith.constant 0xFF800000 : f32
      %32 = vector.broadcast %cst_25 : f32 to vector<8x1024xf32>
      %c0_26 = arith.constant 0 : index
      %c0_27 = arith.constant 0 : index
      %33 = vector.load %arg16[%c0_26, %c0_27] : memref<8x1024xf32, #tpu.memory_space<vmem>>, vector<8x1024xf32>
      tpu.vector_store %arg16[%c0_26, %c0_27], %32 {strides = array<i32>} : memref<8x1024xf32, #tpu.memory_space<vmem>>, vector<8x1024xf32>,
    } else {
    }
    %c0 = arith.constant 0 : index
    %c0_1 = arith.constant 0 : index
    %c0_2 = arith.constant 0 : index
    %3 = vector.load %arg2[%c0, %c0_1, %c0_2] : memref<1x16x3xf32, #tpu.memory_space<vmem>>, vector<1x16x3xf32>
    %4 = vector.shape_cast %3 : vector<1x16x3xf32> to vector<16x3xf32>
    %c0_3 = arith.constant 0 : index
    %c0_4 = arith.constant 0 : index
    %c0_5 = arith.constant 0 : index
    %5 = vector.load %arg3[%c0_3, %c0_4, %c0_5] : memref<1x3x64xf32, #tpu.memory_space<vmem>>, vector<1x3x64xf32>
    %6 = vector.shape_cast %5 : vector<1x3x64xf32> to vector<3x64xf32>
    %cst = arith.constant dense<0.000000e+00> : vector<16x64xf32>
    %7 = tpu.matmul %4, %6, %cst {dimension_numbers = #tpu.dot_dimension_numbers<[1], [0], [0], [1], [0, 0, 1, 1], [], []>} : vector<16x3xf32>, vector<3x64xf32>, vector<16x64xf32> -> vector<16x64xf32>
    %c0_6 = arith.constant 0 : index
    %c0_7 = arith.constant 0 : index
    %8 = vector.load %arg4[%c0_6, %c0_7] : memref<1x64xf32, #tpu.memory_space<vmem>>, vector<1x64xf32>
    %9 = vector.broadcast %8 : vector<1x64xf32> to vector<16x64xf32>
    %10 = arith.addf %7, %9 : vector<16x64xf32>
    %cst_8 = arith.constant 0.000000e+00 : f32
    %11 = vector.broadcast %cst_8 : f32 to vector<16x64xf32>
    %12 = arith.maximumf %10, %11 : vector<16x64xf32>
    %13 = arith.truncf %12 : vector<16x64xf32> to vector<16x64xbf16>
    %c0_9 = arith.constant 0 : index
    %c0_10 = arith.constant 0 : index
    %14 = vector.load %arg5[%c0_9, %c0_10] : memref<64x128xbf16, #tpu.memory_space<vmem>>, vector<64x128xbf16>
    %cst_11 = arith.constant dense<0.000000e+00> : vector<16x128xf32>
    %15 = tpu.matmul %13, %14, %cst_11 {dimension_numbers = #tpu.dot_dimension_numbers<[1], [0], [0], [1], [0, 0, 1, 1], [], []>} : vector<16x64xbf16>, vector<64x128xbf16>, vector<16x128xf32> -> vector<16x128xf32>
    %c0_12 = arith.constant 0 : index
    %c0_13 = arith.constant 0 : index
    %16 = vector.load %arg6[%c0_12, %c0_13] : memref<1x128xf32, #tpu.memory_space<vmem>>, vector<1x128xf32>
    %17 = vector.broadcast %16 : vector<1x128xf32> to vector<16x128xf32>
    %18 = arith.addf %15, %17 : vector<16x128xf32>
    %cst_14 = arith.constant 0.000000e+00 : f32
    %19 = vector.broadcast %cst_14 : f32 to vector<16x128xf32>
    %20 = arith.maximumf %18, %19 : vector<16x128xf32>
    %21 = arith.truncf %20 : vector<16x128xf32> to vector<16x128xbf16>
    %c0_15 = arith.constant 0 : index
    %c0_16 = arith.constant 0 : index
    %22 = vector.load %arg7[%c0_15, %c0_16] : memref<128x1024xbf16, #tpu.memory_space<vmem>>, vector<128x1024xbf16>
    %cst_17 = arith.constant dense<0.000000e+00> : vector<16x1024xf32>
    %23 = tpu.matmul %21, %22, %cst_17 {dimension_numbers = #tpu.dot_dimension_numbers<[1], [0], [0], [1], [0, 0, 1, 1], [], []>} : vector<16x128xbf16>, vector<128x1024xbf16>, vector<16x1024xf32> -> vector<16x1024xf32>
    %24 = vector.shape_cast %23 : vector<16x1024xf32> to vector<2x8x1024xf32>
    %cst_18 = arith.constant dense<0xFF800000> : vector<8x1024xf32>
    %25 = vector.multi_reduction <maximumf>, %24, %cst_18 [0] : vector<2x8x1024xf32> to vector<8x1024xf32>
    %c0_19 = arith.constant 0 : index
    %c0_20 = arith.constant 0 : index
    %26 = vector.load %arg16[%c0_19, %c0_20] : memref<8x1024xf32, #tpu.memory_space<vmem>>, vector<8x1024xf32>
    %27 = arith.maximumf %26, %25 : vector<8x1024xf32>
    %c0_21 = arith.constant 0 : index
    %c0_22 = arith.constant 0 : index
    %28 = vector.load %arg16[%c0_21, %c0_22] : memref<8x1024xf32, #tpu.memory_space<vmem>>, vector<8x1024xf32>
    tpu.vector_store %arg16[%c0_21, %c0_22], %27 {strides = array<i32>} : memref<8x1024xf32, #tpu.memory_space<vmem>>, vector<8x1024xf32>,
    %c0_i32_23 = arith.constant 0 : i32
    %29 = arith.cmpi eq, %arg1, %c0_i32_23 : i32
    %30 = arith.extui %29 : i1 to i32
    %c0_i32_24 = arith.constant 0 : i32
    %31 = arith.cmpi ne, %30, %c0_i32_24 : i32
    scf.if %31 {
      %c0_25 = arith.constant 0 : index
      %c0_26 = arith.constant 0 : index
      %32 = vector.load %arg16[%c0_25, %c0_26] : memref<8x1024xf32, #tpu.memory_space<vmem>>, vector<8x1024xf32>
      %cst_27 = arith.constant dense<0xFF800000> : vector<1024xf32>
      %33 = vector.multi_reduction <maximumf>, %32, %cst_27 [0] : vector<8x1024xf32> to vector<1024xf32>
      %34 = vector.shape_cast %33 : vector<1024xf32> to vector<1x1024xf32>
      %c0_28 = arith.constant 0 : index
      %c0_29 = arith.constant 0 : index
      %35 = vector.load %arg8[%c0_28, %c0_29] : memref<1x1024xf32, #tpu.memory_space<vmem>>, vector<1x1024xf32>
      %36 = arith.addf %34, %35 : vector<1x1024xf32>
      %cst_30 = arith.constant 0.000000e+00 : f32
      %37 = vector.broadcast %cst_30 : f32 to vector<1x1024xf32>
      %38 = arith.maximumf %36, %37 : vector<1x1024xf32>
      %39 = arith.truncf %38 : vector<1x1024xf32> to vector<1x1024xbf16>
      %c0_31 = arith.constant 0 : index
      %c0_32 = arith.constant 0 : index
      %40 = vector.load %arg9[%c0_31, %c0_32] : memref<1024x512xbf16, #tpu.memory_space<vmem>>, vector<1024x512xbf16>
      %cst_33 = arith.constant dense<0.000000e+00> : vector<1x512xf32>
      %41 = tpu.matmul %39, %40, %cst_33 {dimension_numbers = #tpu.dot_dimension_numbers<[1], [0], [0], [1], [0, 0, 1, 1], [], []>} : vector<1x1024xbf16>, vector<1024x512xbf16>, vector<1x512xf32> -> vector<1x512xf32>
      %c0_34 = arith.constant 0 : index
      %c0_35 = arith.constant 0 : index
      %42 = vector.load %arg10[%c0_34, %c0_35] : memref<1x512xf32, #tpu.memory_space<vmem>>, vector<1x512xf32>
      %43 = arith.addf %41, %42 : vector<1x512xf32>
      %cst_36 = arith.constant 0.000000e+00 : f32
      %44 = vector.broadcast %cst_36 : f32 to vector<1x512xf32>
      %45 = arith.maximumf %43, %44 : vector<1x512xf32>
      %46 = arith.truncf %45 : vector<1x512xf32> to vector<1x512xbf16>
      %c0_37 = arith.constant 0 : index
      %c0_38 = arith.constant 0 : index
      %47 = vector.load %arg11[%c0_37, %c0_38] : memref<512x256xbf16, #tpu.memory_space<vmem>>, vector<512x256xbf16>
      %cst_39 = arith.constant dense<0.000000e+00> : vector<1x256xf32>
      %48 = tpu.matmul %46, %47, %cst_39 {dimension_numbers = #tpu.dot_dimension_numbers<[1], [0], [0], [1], [0, 0, 1, 1], [], []>} : vector<1x512xbf16>, vector<512x256xbf16>, vector<1x256xf32> -> vector<1x256xf32>
      %c0_40 = arith.constant 0 : index
      %c0_41 = arith.constant 0 : index
      %49 = vector.load %arg12[%c0_40, %c0_41] : memref<1x256xf32, #tpu.memory_space<vmem>>, vector<1x256xf32>
      %50 = arith.addf %48, %49 : vector<1x256xf32>
      %cst_42 = arith.constant 0.000000e+00 : f32
      %51 = vector.broadcast %cst_42 : f32 to vector<1x256xf32>
      %52 = arith.maximumf %50, %51 : vector<1x256xf32>
      %53 = arith.truncf %52 : vector<1x256xf32> to vector<1x256xbf16>
      %c0_43 = arith.constant 0 : index
      %c0_44 = arith.constant 0 : index
      %54 = vector.load %arg13[%c0_43, %c0_44] : memref<256x128xbf16, #tpu.memory_space<vmem>>, vector<256x128xbf16>
      %cst_45 = arith.constant dense<0.000000e+00> : vector<1x128xf32>
      %55 = tpu.matmul %53, %54, %cst_45 {dimension_numbers = #tpu.dot_dimension_numbers<[1], [0], [0], [1], [0, 0, 1, 1], [], []>} : vector<1x256xbf16>, vector<256x128xbf16>, vector<1x128xf32> -> vector<1x128xf32>
      %c0_46 = arith.constant 0 : index
      %c0_47 = arith.constant 0 : index
      %56 = vector.load %arg14[%c0_46, %c0_47] : memref<1x128xf32, #tpu.memory_space<vmem>>, vector<1x128xf32>
      %57 = arith.addf %55, %56 : vector<1x128xf32>
      %c0_48 = arith.constant 0 : index
      %c0_49 = arith.constant 0 : index
      %c0_50 = arith.constant 0 : index
      %58 = vector.load %arg15[%c0_48, %c0_49, %c0_50] : memref<1x1x128xf32, #tpu.memory_space<vmem>>, vector<1x1x128xf32>
      %59 = vector.shape_cast %58 : vector<1x1x128xf32> to vector<1x128xf32>
      %60 = vector.shape_cast %57 : vector<1x128xf32> to vector<1x1x128xf32>
      tpu.vector_store %arg15[%c0_48, %c0_49, %c0_50], %60 {strides = array<i32>} : memref<1x1x128xf32, #tpu.memory_space<vmem>>, vector<1x1x128xf32>,
    } else {
    }
    return
  }
  func.func @transform_0(%arg0: i32, %arg1: i32) -> (i32, i32, i32) {
    %c0_i32 = arith.constant 0 : i32
    %c0_i32_0 = arith.constant 0 : i32
    return %arg0, %arg1, %c0_i32 : i32, i32, i32
  }
  func.func @transform_1(%arg0: i32, %arg1: i32) -> (i32, i32, i32) {
    %c0_i32 = arith.constant 0 : i32
    %c0_i32_0 = arith.constant 0 : i32
    %c0_i32_1 = arith.constant 0 : i32
    %c0_i32_2 = arith.constant 0 : i32
    return %c0_i32, %c0_i32_0, %c0_i32_1 : i32, i32, i32
  }
  func.func @transform_2(%arg0: i32, %arg1: i32) -> (i32, i32) {
    %c0_i32 = arith.constant 0 : i32
    %c0_i32_0 = arith.constant 0 : i32
    %c0_i32_1 = arith.constant 0 : i32
    return %c0_i32, %c0_i32_0 : i32, i32
  }
  func.func @transform_3(%arg0: i32, %arg1: i32) -> (i32, i32) {
    %c0_i32 = arith.constant 0 : i32
    %c0_i32_0 = arith.constant 0 : i32
    %c0_i32_1 = arith.constant 0 : i32
    return %c0_i32, %c0_i32_0 : i32, i32
  }
  func.func @transform_4(%arg0: i32, %arg1: i32) -> (i32, i32) {
    %c0_i32 = arith.constant 0 : i32
    %c0_i32_0 = arith.constant 0 : i32
    %c0_i32_1 = arith.constant 0 : i32
    return %c0_i32, %c0_i32_0 : i32, i32
  }
  func.func @transform_5(%arg0: i32, %arg1: i32) -> (i32, i32) {
    %c0_i32 = arith.constant 0 : i32
    %c0_i32_0 = arith.constant 0 : i32
    %c0_i32_1 = arith.constant 0 : i32
    return %c0_i32, %c0_i32_0 : i32, i32
  }
  func.func @transform_6(%arg0: i32, %arg1: i32) -> (i32, i32) {
    %c0_i32 = arith.constant 0 : i32
    %c0_i32_0 = arith.constant 0 : i32
    %c0_i32_1 = arith.constant 0 : i32
    return %c0_i32, %c0_i32_0 : i32, i32
  }
  func.func @transform_7(%arg0: i32, %arg1: i32) -> (i32, i32) {
    %c0_i32 = arith.constant 0 : i32
    %c0_i32_0 = arith.constant 0 : i32
    %c0_i32_1 = arith.constant 0 : i32
    return %c0_i32, %c0_i32_0 : i32, i32
  }
  func.func @transform_8(%arg0: i32, %arg1: i32) -> (i32, i32) {
    %c0_i32 = arith.constant 0 : i32
    %c0_i32_0 = arith.constant 0 : i32
    %c0_i32_1 = arith.constant 0 : i32
    return %c0_i32, %c0_i32_0 : i32, i32
  }
  func.func @transform_9(%arg0: i32, %arg1: i32) -> (i32, i32) {
    %c0_i32 = arith.constant 0 : i32
    %c0_i32_0 = arith.constant 0 : i32
    %c0_i32_1 = arith.constant 0 : i32
    return %c0_i32, %c0_i32_0 : i32, i32
  }
  func.func @transform_10(%arg0: i32, %arg1: i32) -> (i32, i32) {
    %c0_i32 = arith.constant 0 : i32
    %c0_i32_0 = arith.constant 0 : i32
    %c0_i32_1 = arith.constant 0 : i32
    return %c0_i32, %c0_i32_0 : i32, i32
  }
  func.func @transform_11(%arg0: i32, %arg1: i32) -> (i32, i32) {
    %c0_i32 = arith.constant 0 : i32
    %c0_i32_0 = arith.constant 0 : i32
    %c0_i32_1 = arith.constant 0 : i32
    return %c0_i32, %c0_i32_0 : i32, i32
  }
  func.func @transform_12(%arg0: i32, %arg1: i32) -> (i32, i32) {
    %c0_i32 = arith.constant 0 : i32
    %c0_i32_0 = arith.constant 0 : i32
    %c0_i32_1 = arith.constant 0 : i32
    return %c0_i32, %c0_i32_0 : i32, i32
  }
  func.func @transform_13(%arg0: i32, %arg1: i32) -> (i32, i32, i32) {
    %c0_i32 = arith.constant 0 : i32
    %c0_i32_0 = arith.constant 0 : i32
    %c0_i32_1 = arith.constant 0 : i32
    return %arg0, %c0_i32, %c0_i32_0 : i32, i32, i32
  }
}

module attributes {stable_mosaic.version = 11 : i64} {
  func.func @_pointnet_branch_kernel(%arg0: i32, %arg1: i32, %arg2: memref<1x16x3xf32, #tpu.memory_space<vmem>>, %arg3: memref<1x3x64xf32, #tpu.memory_space<vmem>>, %arg4: memref<1x64xf32, #tpu.memory_space<vmem>>, %arg5: memref<64x128xbf16, #tpu.memory_space<vmem>>, %arg6: memref<1x128xf32, #tpu.memory_space<vmem>>, %arg7: memref<128x1024xbf16, #tpu.memory_space<vmem>>, %arg8: memref<1x1024xf32, #tpu.memory_space<vmem>>, %arg9: memref<1024x512xbf16, #tpu.memory_space<vmem>>, %arg10: memref<1x512xf32, #tpu.memory_space<vmem>>, %arg11: memref<512x256xbf16, #tpu.memory_space<vmem>>, %arg12: memref<1x256xf32, #tpu.memory_space<vmem>>, %arg13: memref<256x128xbf16, #tpu.memory_space<vmem>>, %arg14: memref<1x128xf32, #tpu.memory_space<vmem>>, %arg15: memref<1x1x128xf32, #tpu.memory_space<vmem>>, %arg16: memref<8x1024xf32, #tpu.memory_space<vmem>>) attributes {dimension_semantics = [#tpu.dimension_semantics<parallel>, #tpu.dimension_semantics<arbitrary>], iteration_bounds = array<i64: 2, 1>, scalar_prefetch = 0 : i64, scratch_operands = 1 : i64, tpu.core_type = #tpu.core_type<tc>, window_params = [{transform_indices = @transform_0, window_bounds = array<i64: 1, 16, 3>}, {transform_indices = @transform_1, window_bounds = array<i64: 1, 3, 64>}, {pipeline_mode = #tpu.pipeline_mode<synchronous>, transform_indices = @transform_2, window_bounds = array<i64: 1, 64>}, {pipeline_mode = #tpu.pipeline_mode<synchronous>, transform_indices = @transform_3, window_bounds = array<i64: 64, 128>}, {pipeline_mode = #tpu.pipeline_mode<synchronous>, transform_indices = @transform_4, window_bounds = array<i64: 1, 128>}, {pipeline_mode = #tpu.pipeline_mode<synchronous>, transform_indices = @transform_5, window_bounds = array<i64: 128, 1024>}, {pipeline_mode = #tpu.pipeline_mode<synchronous>, transform_indices = @transform_6, window_bounds = array<i64: 1, 1024>}, {pipeline_mode = #tpu.pipeline_mode<synchronous>, transform_indices = @transform_7, window_bounds = array<i64: 1024, 512>}, {pipeline_mode = #tpu.pipeline_mode<synchronous>, transform_indices = @transform_8, window_bounds = array<i64: 1, 512>}, {pipeline_mode = #tpu.pipeline_mode<synchronous>, transform_indices = @transform_9, window_bounds = array<i64: 512, 256>}, {pipeline_mode = #tpu.pipeline_mode<synchronous>, transform_indices = @transform_10, window_bounds = array<i64: 1, 256>}, {pipeline_mode = #tpu.pipeline_mode<synchronous>, transform_indices = @transform_11, window_bounds = array<i64: 256, 128>}, {pipeline_mode = #tpu.pipeline_mode<synchronous>, transform_indices = @transform_12, window_bounds = array<i64: 1, 128>}, {transform_indices = @transform_13, window_bounds = array<i64: 1, 1, 128>}]} {
    %c0_i32 = arith.constant 0 : i32
    %0 = arith.cmpi eq, %arg1, %c0_i32 : i32
    %1 = arith.extui %0 : i1 to i32
    %c0_i32_0 = arith.constant 0 : i32
    %2 = arith.cmpi ne, %1, %c0_i32_0 : i32
    scf.if %2 {
      %cst_25 = arith.constant 0xFF800000 : f32
      %32 = vector.broadcast %cst_25 : f32 to vector<8x1024xf32>
      %c0_26 = arith.constant 0 : index
      %c0_27 = arith.constant 0 : index
      %33 = vector.load %arg16[%c0_26, %c0_27] : memref<8x1024xf32, #tpu.memory_space<vmem>>, vector<8x1024xf32>
      tpu.vector_store %arg16[%c0_26, %c0_27], %32 {strides = array<i32>} : memref<8x1024xf32, #tpu.memory_space<vmem>>, vector<8x1024xf32>,
    } else {
    }
    %c0 = arith.constant 0 : index
    %c0_1 = arith.constant 0 : index
    %c0_2 = arith.constant 0 : index
    %3 = vector.load %arg2[%c0, %c0_1, %c0_2] : memref<1x16x3xf32, #tpu.memory_space<vmem>>, vector<1x16x3xf32>
    %4 = vector.shape_cast %3 : vector<1x16x3xf32> to vector<16x3xf32>
    %c0_3 = arith.constant 0 : index
    %c0_4 = arith.constant 0 : index
    %c0_5 = arith.constant 0 : index
    %5 = vector.load %arg3[%c0_3, %c0_4, %c0_5] : memref<1x3x64xf32, #tpu.memory_space<vmem>>, vector<1x3x64xf32>
    %6 = vector.shape_cast %5 : vector<1x3x64xf32> to vector<3x64xf32>
    %cst = arith.constant dense<0.000000e+00> : vector<16x64xf32>
    %7 = tpu.matmul %4, %6, %cst {dimension_numbers = #tpu.dot_dimension_numbers<[1], [0], [0], [1], [0, 0, 1, 1], [], []>} : vector<16x3xf32>, vector<3x64xf32>, vector<16x64xf32> -> vector<16x64xf32>
    %c0_6 = arith.constant 0 : index
    %c0_7 = arith.constant 0 : index
    %8 = vector.load %arg4[%c0_6, %c0_7] : memref<1x64xf32, #tpu.memory_space<vmem>>, vector<1x64xf32>
    %9 = vector.broadcast %8 : vector<1x64xf32> to vector<16x64xf32>
    %10 = arith.addf %7, %9 : vector<16x64xf32>
    %cst_8 = arith.constant 0.000000e+00 : f32
    %11 = vector.broadcast %cst_8 : f32 to vector<16x64xf32>
    %12 = arith.maximumf %10, %11 : vector<16x64xf32>
    %13 = arith.truncf %12 : vector<16x64xf32> to vector<16x64xbf16>
    %c0_9 = arith.constant 0 : index
    %c0_10 = arith.constant 0 : index
    %14 = vector.load %arg5[%c0_9, %c0_10] : memref<64x128xbf16, #tpu.memory_space<vmem>>, vector<64x128xbf16>
    %cst_11 = arith.constant dense<0.000000e+00> : vector<16x128xf32>
    %15 = tpu.matmul %13, %14, %cst_11 {dimension_numbers = #tpu.dot_dimension_numbers<[1], [0], [0], [1], [0, 0, 1, 1], [], []>} : vector<16x64xbf16>, vector<64x128xbf16>, vector<16x128xf32> -> vector<16x128xf32>
    %c0_12 = arith.constant 0 : index
    %c0_13 = arith.constant 0 : index
    %16 = vector.load %arg6[%c0_12, %c0_13] : memref<1x128xf32, #tpu.memory_space<vmem>>, vector<1x128xf32>
    %17 = vector.broadcast %16 : vector<1x128xf32> to vector<16x128xf32>
    %18 = arith.addf %15, %17 : vector<16x128xf32>
    %cst_14 = arith.constant 0.000000e+00 : f32
    %19 = vector.broadcast %cst_14 : f32 to vector<16x128xf32>
    %20 = arith.maximumf %18, %19 : vector<16x128xf32>
    %21 = arith.truncf %20 : vector<16x128xf32> to vector<16x128xbf16>
    %c0_15 = arith.constant 0 : index
    %c0_16 = arith.constant 0 : index
    %22 = vector.load %arg7[%c0_15, %c0_16] : memref<128x1024xbf16, #tpu.memory_space<vmem>>, vector<128x1024xbf16>
    %cst_17 = arith.constant dense<0.000000e+00> : vector<16x1024xf32>
    %23 = tpu.matmul %21, %22, %cst_17 {dimension_numbers = #tpu.dot_dimension_numbers<[1], [0], [0], [1], [0, 0, 1, 1], [], []>} : vector<16x128xbf16>, vector<128x1024xbf16>, vector<16x1024xf32> -> vector<16x1024xf32>
    %24 = vector.shape_cast %23 : vector<16x1024xf32> to vector<2x8x1024xf32>
    %cst_18 = arith.constant dense<0xFF800000> : vector<8x1024xf32>
    %25 = vector.multi_reduction <maximumf>, %24, %cst_18 [0] : vector<2x8x1024xf32> to vector<8x1024xf32>
    %c0_19 = arith.constant 0 : index
    %c0_20 = arith.constant 0 : index
    %26 = vector.load %arg16[%c0_19, %c0_20] : memref<8x1024xf32, #tpu.memory_space<vmem>>, vector<8x1024xf32>
    %27 = arith.maximumf %26, %25 : vector<8x1024xf32>
    %c0_21 = arith.constant 0 : index
    %c0_22 = arith.constant 0 : index
    %28 = vector.load %arg16[%c0_21, %c0_22] : memref<8x1024xf32, #tpu.memory_space<vmem>>, vector<8x1024xf32>
    tpu.vector_store %arg16[%c0_21, %c0_22], %27 {strides = array<i32>} : memref<8x1024xf32, #tpu.memory_space<vmem>>, vector<8x1024xf32>,
    %c0_i32_23 = arith.constant 0 : i32
    %29 = arith.cmpi eq, %arg1, %c0_i32_23 : i32
    %30 = arith.extui %29 : i1 to i32
    %c0_i32_24 = arith.constant 0 : i32
    %31 = arith.cmpi ne, %30, %c0_i32_24 : i32
    scf.if %31 {
      %c0_25 = arith.constant 0 : index
      %c0_26 = arith.constant 0 : index
      %32 = vector.load %arg16[%c0_25, %c0_26] : memref<8x1024xf32, #tpu.memory_space<vmem>>, vector<8x1024xf32>
      %cst_27 = arith.constant dense<0xFF800000> : vector<1024xf32>
      %33 = vector.multi_reduction <maximumf>, %32, %cst_27 [0] : vector<8x1024xf32> to vector<1024xf32>
      %34 = vector.shape_cast %33 : vector<1024xf32> to vector<1x1024xf32>
      %c0_28 = arith.constant 0 : index
      %c0_29 = arith.constant 0 : index
      %35 = vector.load %arg8[%c0_28, %c0_29] : memref<1x1024xf32, #tpu.memory_space<vmem>>, vector<1x1024xf32>
      %36 = arith.addf %34, %35 : vector<1x1024xf32>
      %37 = arith.truncf %36 : vector<1x1024xf32> to vector<1x1024xbf16>
      %c0_30 = arith.constant 0 : index
      %c0_31 = arith.constant 0 : index
      %38 = vector.load %arg9[%c0_30, %c0_31] : memref<1024x512xbf16, #tpu.memory_space<vmem>>, vector<1024x512xbf16>
      %cst_32 = arith.constant dense<0.000000e+00> : vector<1x512xf32>
      %39 = tpu.matmul %37, %38, %cst_32 {dimension_numbers = #tpu.dot_dimension_numbers<[1], [0], [0], [1], [0, 0, 1, 1], [], []>} : vector<1x1024xbf16>, vector<1024x512xbf16>, vector<1x512xf32> -> vector<1x512xf32>
      %c0_33 = arith.constant 0 : index
      %c0_34 = arith.constant 0 : index
      %40 = vector.load %arg10[%c0_33, %c0_34] : memref<1x512xf32, #tpu.memory_space<vmem>>, vector<1x512xf32>
      %41 = arith.addf %39, %40 : vector<1x512xf32>
      %cst_35 = arith.constant 0.000000e+00 : f32
      %42 = vector.broadcast %cst_35 : f32 to vector<1x512xf32>
      %43 = arith.maximumf %41, %42 : vector<1x512xf32>
      %44 = arith.truncf %43 : vector<1x512xf32> to vector<1x512xbf16>
      %c0_36 = arith.constant 0 : index
      %c0_37 = arith.constant 0 : index
      %45 = vector.load %arg11[%c0_36, %c0_37] : memref<512x256xbf16, #tpu.memory_space<vmem>>, vector<512x256xbf16>
      %cst_38 = arith.constant dense<0.000000e+00> : vector<1x256xf32>
      %46 = tpu.matmul %44, %45, %cst_38 {dimension_numbers = #tpu.dot_dimension_numbers<[1], [0], [0], [1], [0, 0, 1, 1], [], []>} : vector<1x512xbf16>, vector<512x256xbf16>, vector<1x256xf32> -> vector<1x256xf32>
      %c0_39 = arith.constant 0 : index
      %c0_40 = arith.constant 0 : index
      %47 = vector.load %arg12[%c0_39, %c0_40] : memref<1x256xf32, #tpu.memory_space<vmem>>, vector<1x256xf32>
      %48 = arith.addf %46, %47 : vector<1x256xf32>
      %cst_41 = arith.constant 0.000000e+00 : f32
      %49 = vector.broadcast %cst_41 : f32 to vector<1x256xf32>
      %50 = arith.maximumf %48, %49 : vector<1x256xf32>
      %51 = arith.truncf %50 : vector<1x256xf32> to vector<1x256xbf16>
      %c0_42 = arith.constant 0 : index
      %c0_43 = arith.constant 0 : index
      %52 = vector.load %arg13[%c0_42, %c0_43] : memref<256x128xbf16, #tpu.memory_space<vmem>>, vector<256x128xbf16>
      %cst_44 = arith.constant dense<0.000000e+00> : vector<1x128xf32>
      %53 = tpu.matmul %51, %52, %cst_44 {dimension_numbers = #tpu.dot_dimension_numbers<[1], [0], [0], [1], [0, 0, 1, 1], [], []>} : vector<1x256xbf16>, vector<256x128xbf16>, vector<1x128xf32> -> vector<1x128xf32>
      %c0_45 = arith.constant 0 : index
      %c0_46 = arith.constant 0 : index
      %54 = vector.load %arg14[%c0_45, %c0_46] : memref<1x128xf32, #tpu.memory_space<vmem>>, vector<1x128xf32>
      %55 = arith.addf %53, %54 : vector<1x128xf32>
      %cst_47 = arith.constant dense<0xFF800000> : vector<1xf32>
      %56 = vector.multi_reduction <maximumf>, %55, %cst_47 [1] : vector<1x128xf32> to vector<1xf32>
      %57 = vector.shape_cast %56 : vector<1xf32> to vector<1x1xf32>
      %58 = vector.broadcast %57 : vector<1x1xf32> to vector<1x128xf32>
      %59 = arith.subf %55, %58 : vector<1x128xf32>
      %60 = math.exp %59 : vector<1x128xf32>
      %cst_48 = arith.constant dense<0.000000e+00> : vector<1xf32>
      %61 = vector.multi_reduction <add>, %60, %cst_48 [1] : vector<1x128xf32> to vector<1xf32>
      %62 = vector.shape_cast %61 : vector<1xf32> to vector<1x1xf32>
      %63 = math.log %62 : vector<1x1xf32>
      %64 = vector.broadcast %63 : vector<1x1xf32> to vector<1x128xf32>
      %65 = arith.subf %59, %64 : vector<1x128xf32>
      %c0_49 = arith.constant 0 : index
      %c0_50 = arith.constant 0 : index
      %c0_51 = arith.constant 0 : index
      %66 = vector.load %arg15[%c0_49, %c0_50, %c0_51] : memref<1x1x128xf32, #tpu.memory_space<vmem>>, vector<1x1x128xf32>
      %67 = vector.shape_cast %66 : vector<1x1x128xf32> to vector<1x128xf32>
      %68 = vector.shape_cast %65 : vector<1x128xf32> to vector<1x1x128xf32>
      tpu.vector_store %arg15[%c0_49, %c0_50, %c0_51], %68 {strides = array<i32>} : memref<1x1x128xf32, #tpu.memory_space<vmem>>, vector<1x1x128xf32>,
    } else {
    }
    return
  }
  func.func @transform_0(%arg0: i32, %arg1: i32) -> (i32, i32, i32) {
    %c0_i32 = arith.constant 0 : i32
    %c0_i32_0 = arith.constant 0 : i32
    return %arg0, %arg1, %c0_i32 : i32, i32, i32
  }
  func.func @transform_1(%arg0: i32, %arg1: i32) -> (i32, i32, i32) {
    %c0_i32 = arith.constant 0 : i32
    %c0_i32_0 = arith.constant 0 : i32
    %c0_i32_1 = arith.constant 0 : i32
    return %arg0, %c0_i32, %c0_i32_0 : i32, i32, i32
  }
  func.func @transform_2(%arg0: i32, %arg1: i32) -> (i32, i32) {
    %c0_i32 = arith.constant 0 : i32
    %c0_i32_0 = arith.constant 0 : i32
    %c0_i32_1 = arith.constant 0 : i32
    return %c0_i32, %c0_i32_0 : i32, i32
  }
  func.func @transform_3(%arg0: i32, %arg1: i32) -> (i32, i32) {
    %c0_i32 = arith.constant 0 : i32
    %c0_i32_0 = arith.constant 0 : i32
    %c0_i32_1 = arith.constant 0 : i32
    return %c0_i32, %c0_i32_0 : i32, i32
  }
  func.func @transform_4(%arg0: i32, %arg1: i32) -> (i32, i32) {
    %c0_i32 = arith.constant 0 : i32
    %c0_i32_0 = arith.constant 0 : i32
    %c0_i32_1 = arith.constant 0 : i32
    return %c0_i32, %c0_i32_0 : i32, i32
  }
  func.func @transform_5(%arg0: i32, %arg1: i32) -> (i32, i32) {
    %c0_i32 = arith.constant 0 : i32
    %c0_i32_0 = arith.constant 0 : i32
    %c0_i32_1 = arith.constant 0 : i32
    return %c0_i32, %c0_i32_0 : i32, i32
  }
  func.func @transform_6(%arg0: i32, %arg1: i32) -> (i32, i32) {
    %c0_i32 = arith.constant 0 : i32
    %c0_i32_0 = arith.constant 0 : i32
    %c0_i32_1 = arith.constant 0 : i32
    return %c0_i32, %c0_i32_0 : i32, i32
  }
  func.func @transform_7(%arg0: i32, %arg1: i32) -> (i32, i32) {
    %c0_i32 = arith.constant 0 : i32
    %c0_i32_0 = arith.constant 0 : i32
    %c0_i32_1 = arith.constant 0 : i32
    return %c0_i32, %c0_i32_0 : i32, i32
  }
  func.func @transform_8(%arg0: i32, %arg1: i32) -> (i32, i32) {
    %c0_i32 = arith.constant 0 : i32
    %c0_i32_0 = arith.constant 0 : i32
    %c0_i32_1 = arith.constant 0 : i32
    return %c0_i32, %c0_i32_0 : i32, i32
  }
  func.func @transform_9(%arg0: i32, %arg1: i32) -> (i32, i32) {
    %c0_i32 = arith.constant 0 : i32
    %c0_i32_0 = arith.constant 0 : i32
    %c0_i32_1 = arith.constant 0 : i32
    return %c0_i32, %c0_i32_0 : i32, i32
  }
  func.func @transform_10(%arg0: i32, %arg1: i32) -> (i32, i32) {
    %c0_i32 = arith.constant 0 : i32
    %c0_i32_0 = arith.constant 0 : i32
    %c0_i32_1 = arith.constant 0 : i32
    return %c0_i32, %c0_i32_0 : i32, i32
  }
  func.func @transform_11(%arg0: i32, %arg1: i32) -> (i32, i32) {
    %c0_i32 = arith.constant 0 : i32
    %c0_i32_0 = arith.constant 0 : i32
    %c0_i32_1 = arith.constant 0 : i32
    return %c0_i32, %c0_i32_0 : i32, i32
  }
  func.func @transform_12(%arg0: i32, %arg1: i32) -> (i32, i32) {
    %c0_i32 = arith.constant 0 : i32
    %c0_i32_0 = arith.constant 0 : i32
    %c0_i32_1 = arith.constant 0 : i32
    return %c0_i32, %c0_i32_0 : i32, i32
  }
  func.func @transform_13(%arg0: i32, %arg1: i32) -> (i32, i32, i32) {
    %c0_i32 = arith.constant 0 : i32
    %c0_i32_0 = arith.constant 0 : i32
    %c0_i32_1 = arith.constant 0 : i32
    return %arg0, %c0_i32, %c0_i32_0 : i32, i32, i32
  }
}

</mosaic_0001>

<bundles_post_ra>
// kernel: pointnet_cls_forward.3
= control target key start
LH: loop header
LB: loop body
LE: loop exit
PB: predicated region body
PF: predicated region fallthrough
CT: control target
= control target key end

     0   :  { %s7088_s0 = inlined_call_operand.vmem [shape: f32[2,16,3], index: 0, kind: input, shape index: {}]   ;;  %s7089_s1 = inlined_call_operand.vmem [shape: f32[2,3,64], index: 1, kind: input, shape index: {}]   ;;  %s7090_s2 = inlined_call_operand.vmem [shape: f32[1,64], index: 2, kind: input, shape index: {}]   ;;  %s7091_s3 = inlined_call_operand.vmem [shape: bf16[64,128], index: 3, kind: input, shape index: {}]   ;;  %s7092_s4 = inlined_call_operand.hbm [shape: f32[1,128], index: 4, kind: input, shape index: {}]   ;;  %s7093_s5 = inlined_call_operand.hbm [shape: bf16[128,1024], index: 5, kind: input, shape index: {}]   ;;  %s7094_s6 = inlined_call_operand.vmem [shape: f32[1,1024], index: 6, kind: input, shape index: {}]   ;;  %s7095_s7 = inlined_call_operand.hbm [shape: bf16[1024,512], index: 7, kind: input, shape index: {}]   ;;  %s7096_s8 = inlined_call_operand.hbm [shape: f32[1,512], index: 8, kind: input, shape index: {}]   ;;  %s7097_s9 = inlined_call_operand.hbm [shape: bf16[512,256], index: 9, kind: input, shape index: {}]   ;;  %s7098_s10 = inlined_call_operand.hbm [shape: f32[1,256], index: 10, kind: input, shape index: {}]   ;;  %s7099_s11 = inlined_call_operand.hbm [shape: bf16[256,128], index: 11, kind: input, shape index: {}]   ;;  %s7100_s12 = inlined_call_operand.hbm [shape: f32[1,128], index: 12, kind: input, shape index: {}]   ;;  %s7101_s13 = inlined_call_operand.hbm [shape: f32[2,1,128], index: 13, kind: output, shape index: {}]  }
   0x1   :  { %7112 = sst [smem:[#allocation32_spill]] %s7093_s5 }
   0x2   :  { %7113 = sst [smem:[#allocation33_spill]] %s7101_s13 }
   0x3   :  { %18 = vsyncpa [#allocation4], 0 }
   0x4   :  { %19 = vsyncpa [#allocation7], 0 }
   0x5   :  { %20 = vsyncpa [#allocation10], 0 }
   0x6   :  { %21 = vsyncpa [#allocation13], 0 }
   0x7   :  { %22 = vsyncpa [#allocation16], 0 }
   0x8   :  { %23 = vsyncpa [#allocation5], 0 }
   0x9   :  { %25 = vsyncpa [#allocation5 + $0x1], 0  ;;  %s6781_s25 = smov 0   ;;  %s6783_s26 = smov 0  }
   0xa   :  { %s6785_s27 = smov 0   ;;  %s6787_s28 = smov 0  }
   0xb   :  { %s6789_s29 = smov 0   ;;  %s6791_s30 = smov 0  }
   0xc LB: > { %7114 = sst [smem:[#allocation24_spill]] %s6673_s25  ;;  %s4153_s14 = sadd.s32 4294967295, %s6693_s30   ;;  %s6693_s30 = sphi %s6791_s30, %s31_s30   ;;  %s6689_s29 = sphi %s6789_s29, %s7136_s29   ;;  %s6685_s28 = sphi %s6787_s28, %s7135_s28   ;;  %s6681_s27 = sphi %s6785_s27, %s7134_s27   ;;  %s6677_s26 = sphi %s6783_s26, %s7138_s26   ;;  %s6673_s25 = sphi %s6781_s25, %s7137_s25  }
   0xd   : > { %7115 = sst [smem:[#allocation25_spill]] %s6681_s27  ;;  %s4154_s15 = sadd.s32 4294967294, %s6693_s30  }
   0xe   : > { %7116 = sst [smem:[#allocation26_spill]] %s6689_s29  ;;  %s43_s16 = sadd.s32 1, %s6689_s29 }
   0xf   : > { %7117 = sst [smem:[#allocation27_spill]] %s6693_s30  ;;  %s335_s17 = sadd.s32 1, %s6681_s27 }
  0x10   : > { %p45_p0 = scmp.ge.s32.totalorder %s43_s16, 2  ;;  %p345_p1 = scmp.ne.s32.totalorder %s6681_s27, %s6677_s26 }
  0x11   : > { %p346_p2 = scmp.eq.s32.totalorder %s4153_s14, 1  ;;  %p351_p3 = scmp.ne.s32.totalorder %s6677_s26, %s6673_s25 }
  0x12   : > { %s7140_s16 = smov (%p45_p0, %s43_s16), 0  ;;  %p352_p5 = scmp.eq.s32.totalorder %s4154_s15, 1 }
  0x13   : > { %7118 = sst [smem:[#allocation28_spill]] %s7140_s16  ;;  %p6821_p4 = por %p346_p2, %p345_p1 }
  0x14   : > { %s332_s19 = ssub.s32 %s6689_s29, %s7140_s16  ;;  %p4155_p6 = scmp.ge.s32.totalorder %s6693_s30, 1 }
  0x15   : > { %s7119_s18 = scalar_select %p6821_p4, 1, 0 }
  0x16   : > { %p333_p7 = scmp.eq.s32.totalorder %s332_s19, 0  ;;  %p6828_p8 = por %p352_p5, %p351_p3 }
  0x17   : > { %7120 = sst [smem:[#allocation29_spill]] %s7119_s18  ;;  %p359_p9 = scmp.lt.s32.totalorder %s6693_s30, 3 }
  0x18   : > { %s7121_s20 = scalar_select %p6828_p8, 1, 0 }
  0x19   : > { %s6834_s21 = scalar_select %p333_p7, %s6681_s27, %s335_s17  }
  0x1a   : > { %7122 = sst [smem:[#allocation30_spill]] %s7121_s20  ;;  %p6836_p10 = pnand %p4155_p6, %p359_p9 }
  0x1b   : > { %7123 = sst [smem:[#allocation31_spill]] %s6834_s21  ;;  %p6840_p11 = scmp.eq.s32.totalorder %s4153_s14, 0 }
  0x1c   : > { %s7126_s5 = sld [smem:[#allocation32_spill]]  ;;  %p6238_p12 = pneg %p6836_p10 }
  0x1d   : > { %s6695_s16 = smov [#allocation6]   ;;  %s420_s24 = sshll.u32 %s7096_s8, 4  ;;  %s421_s24 = int_to_ptr.hbm [resolvable:$true] %s420_s24 }
  0x1e   : > { %s390_s17 = sshll.u32 %s6695_s16, 4  ;;  %p6851_p13 = pnand %p6840_p11, %p6238_p12  ;;  %s391_s17 = int_to_ptr.vmem [resolvable:$true] %s390_s17 }
  0x1f   : > { %s6696_s15 = smov 512   ;;  %s446_s20 = sshll.u32 %s7098_s10, 4  ;;  %s447_s20 = int_to_ptr.hbm [resolvable:$true] %s446_s20 }
  0x20   : > { %s6698_s25 = smov [#allocation9]   ;;  %s6699_s18 = smov [#allocation12]  }
  0x21   : > { %s422_s30 = sshll.u32 %s6698_s25, 4  ;;  %s448_s13 = sshll.u32 %s6699_s18, 4  ;;  %s423_s30 = int_to_ptr.vmem [resolvable:$true] %s422_s30  ;;  %s449_s13 = int_to_ptr.vmem [resolvable:$true] %s448_s13 }
  0x22   : > { %s388_s19 = sshll.u32 %s7126_s5, 4  ;;  %s6697_s5 = smov 32   ;;  %s389_s19 = int_to_ptr.hbm [resolvable:$true] %s388_s19 }
  0x23   : > { %6244 = dma.hbm_to_vmem [thread:$0]  (!%p6851_p13), %s389_s19, 8192, %s391_s17, [#allocation7], %s6696_s15, %s6696_s15, %s6697_s5  }
  0x24   : > { %6250 = dma.hbm_to_vmem [thread:$0]  (!%p6851_p13), %s421_s24, 64, %s423_s30, [#allocation10]  }
  0x25   : > { %6256 = dma.hbm_to_vmem [thread:$0]  (!%p6851_p13), %s447_s20, 32, %s449_s13, [#allocation13]  }
  0x26   : > { %s377_s5 = sshll.u32 %s7092_s4, 4  ;;  %s6700_s27 = smov [#allocation3]   ;;  %s378_s5 = int_to_ptr.hbm [resolvable:$true] %s377_s5 }
  0x27   : > { %s379_s19 = sshll.u32 %s6700_s27, 4  ;;  %s405_s15 = sshll.u32 %s7095_s7, 4  ;;  %s380_s19 = int_to_ptr.vmem [resolvable:$true] %s379_s19  ;;  %s406_s15 = int_to_ptr.hbm [resolvable:$true] %s405_s15 }
  0x28   : > { %6241 = dma.hbm_to_vmem [thread:$0]  (!%p6851_p13), %s378_s5, 16, %s380_s19, [#allocation4]  }
  0x29   : > { %s6701_s30 = smov [#allocation8]   ;;  %s6702_s13 = smov 256  }
  0x2a   : > { %s407_s18 = sshll.u32 %s6701_s30, 4  ;;  %s6703_s20 = smov 16   ;;  %s408_s18 = int_to_ptr.vmem [resolvable:$true] %s407_s18 }
  0x2b   : > { %6247 = dma.hbm_to_vmem [thread:$0]  (!%p6851_p13), %s406_s15, 32768, %s408_s18, [#allocation7], %s6702_s13, %s6702_s13, %s6703_s20  }
  0x2c   : > { %s431_s21 = sshll.u32 %s7097_s9, 4  ;;  %s6704_s14 = smov [#allocation11]   ;;  %s432_s21 = int_to_ptr.hbm [resolvable:$true] %s431_s21 }
  0x2d   : > { %s433_s27 = sshll.u32 %s6704_s14, 4  ;;  %s457_s19 = sshll.u32 %s7099_s11, 4  ;;  %s434_s27 = int_to_ptr.vmem [resolvable:$true] %s433_s27  ;;  %s458_s19 = int_to_ptr.hbm [resolvable:$true] %s457_s19 }
  0x2e   : > { %s6705_s25 = smov 128   ;;  %s6706_s30 = smov 8  }
  0x2f   : > { %6253 = dma.hbm_to_vmem [thread:$0]  (!%p6851_p13), %s432_s21, 8192, %s434_s27, [#allocation10], %s6705_s25, %s6705_s25, %s6706_s30  }
  0x30   : > { %s6707_s15 = smov [#allocation14]   ;;  %s6708_s13 = smov 64  }
  0x31   : > { %s459_s18 = sshll.u32 %s6707_s15, 4  ;;  %s6709_s20 = smov 4   ;;  %s460_s18 = int_to_ptr.vmem [resolvable:$true] %s459_s18 }
  0x32   : > { %6259 = dma.hbm_to_vmem [thread:$0]  (!%p6851_p13), %s458_s19, 2048, %s460_s18, [#allocation13], %s6708_s13, %s6708_s13, %s6709_s20  }
  0x33   : > { %s472_s14 = sshll.u32 %s7100_s12, 4  ;;  %s6710_s17 = smov [#allocation15]   ;;  %s473_s14 = int_to_ptr.hbm [resolvable:$true] %s472_s14 }
  0x34   : > { %s474_s5 = sshll.u32 %s6710_s17, 4  ;;  %507 = sbr.rel (%p6836_p10) target bundleno = 1390 (0x56e), region = 72  ;;  %s475_s5 = int_to_ptr.vmem [resolvable:$true] %s474_s5 }
  0x35   : > { %6262 = dma.hbm_to_vmem [thread:$0]  (!%p6851_p13), %s473_s14, 16, %s475_s5, [#allocation16]  }
  0x39   : > { %6648 = dma.done.wait (%p6840_p11), [#allocation4], 16  }
  0x3a   : > { %6650 = vsyncadd (%p6840_p11), [#allocation4], 4294967280 }
  0x3b   : > { %6652 = dma.done.wait (%p6840_p11), [#allocation7], 40960  }
  0x3c   : > { %6654 = vsyncadd (%p6840_p11), [#allocation7], 4294926336 }
  0x3d   : > { %6656 = dma.done.wait (%p6840_p11), [#allocation10], 8256  }
  0x3e   : > { %6658 = vsyncadd (%p6840_p11), [#allocation10], 4294959040 }
  0x3f   : > { %6660 = dma.done.wait (%p6840_p11), [#allocation13], 2080  }
  0x40   : > { %6662 = vsyncadd (%p6840_p11), [#allocation13], 4294965216 }
  0x41   : > { %6664 = dma.done.wait (%p6840_p11), [#allocation16], 16  }
  0x42   : > { %6666 = vsyncadd (%p6840_p11), [#allocation16], 4294967280  ;;  %p595_p0 = scmp.lt.s32.totalorder %s6685_s28, 1  ;;  %vm635_vm0 = vcmask 1042432   ;;  %vm628_vm1 = vcmask 23552   ;;  %v5803_v3 = vld [vmem:[%s7091_s3 + $0x18] sm:$0xff] }
  0x43   : > { %709 = vmatpush.bf16.msra.mxu1 %v5803_v3  ;;  %v5802_v4 = vld [vmem:[%s7091_s3 + $0x10] sm:$0xff]  ;;  %v5801_v5 = vld [vmem:[%s7091_s3 + $0x8] sm:$0xff]  ;;  %v5800_v6 = vld [vmem:[%s7091_s3] sm:$0xff]  ;;  %vm701_vm2 = vcmask 523264   ;;  %vm3966_vm3 = vcmask 1040384   ;;  %s592_s19 = sand.u32 1, %s6677_s26  }
  0x44   : > { %s596_s29 = scalar_select %p595_p0, %s6685_s28, 1  ;;  %v4423_v7 = vld [vmem:[#allocation6 + $0x1c0] sm:$0xf]  ;;  %v5860_v9 = vld [vmem:[#allocation6 + $0x1c4] sm:$0xf] }
  0x45   : > { %v5864_v8 = vld [vmem:[#allocation6 + $0x1dc] sm:$0xf0]  ;;  %v4425_v11 = vld [vmem:[#allocation6 + $0x1e0] sm:$0xf0]  ;;  %v4431_v12 = vld [vmem:[#allocation6 + $0x1c8] sm:$0xf] }
  0x46   : > { %s4176_s22 = sshll.u32 %s596_s29, 2  ;;  %s5799_s21 = sshll.u32 %s596_s29, 4  ;;  %v4424_v10 = vor.u32 %v5864_v8, %v4423_v7  ;;  %v5865_v13 = vld [vmem:[#allocation6 + $0x1e4] sm:$0xf0]  ;;  %v4428_v14 = vor.u32 %v5860_v9, %v4425_v11  ;;  %v5861_v16 = vld [vmem:[#allocation6 + $0x1cc] sm:$0xf] }
  0x47   : > { %s607_s25 = scalar_lea.vmem %s7089_s1, %s4176_s22  ;;  %s602_s18 = scalar_lea.vmem %s7088_s0, %s5799_s21  ;;  %710 = vmatpush.bf16.msra.mxu1 %v5802_v4  ;;  %v4432_v15 = vor.u32 %v5865_v13, %v4431_v12  ;;  %v4433_v17 = vld [vmem:[#allocation6 + $0x1e8] sm:$0xf0]  ;;  %v4391_v18 = vld [vmem:[#allocation6 + $0x180] sm:$0xf]  ;;  %v5852_v21 = vld [vmem:[#allocation6 + $0x184] sm:$0xf] }
  0x48   : > { %v623_v0 = vld [vmem:[%s607_s25] sm:$0x7]  ;;  %v622_v2 = vld [vmem:[%s602_s18 + $0x8] sm:$0xff]  ;;  %1106 = vmatpush.bf16.msra.mxu2 %v4424_v10  ;;  %v4436_v19 = vor.u32 %v5861_v16, %v4433_v17  ;;  %1120 = vmatpush.bf16.msra.mxu3 %v4428_v14  ;;  %s7128_s15 = sld [smem:[#allocation33_spill]]  ;;  %s593_s13 = scalar_lea.vmem [#allocation17], %s592_s19 }
  0x49   : > { %v621_v1 = vld [vmem:[%s602_s18] sm:$0xff]  ;;  %4177 = vmatpush.msk.msra.mxu0 %vm635_vm0, %v623_v0  ;;  %v4399_v25 = vld [vmem:[#allocation6 + $0x188] sm:$0xf]  ;;  %v5853_v27 = vld [vmem:[#allocation6 + $0x18c] sm:$0xf]  ;;  %s3991_s20 = sshll.u32 %s593_s13, 4  ;;  %s3992_s20 = int_to_ptr.vmem [resolvable:$true] %s3991_s20 }
  0x4a   : > { %4178 = vmatmul.msk.f32.vlgmr.msra.gmra.mxu0 %vm628_vm1, %v621_v1  ;;  %v5856_v20 = vld [vmem:[#allocation6 + $0x19c] sm:$0xf0]  ;;  %v4393_v22 = vld [vmem:[#allocation6 + $0x1a0] sm:$0xf0]  ;;  %v5857_v26 = vld [vmem:[#allocation6 + $0x1a4] sm:$0xf0] }
  0x4b   : > { %711 = vmatpush.bf16.msra.mxu1 %v5801_v5  ;;  %1134 = vmatpush.bf16.msrb.mxu0 %v4432_v15  ;;  %v4392_v23 = vor.u32 %v5856_v20, %v4391_v18  ;;  %v4396_v24 = vor.u32 %v5852_v21, %v4393_v22  ;;  %v4400_v28 = vor.u32 %v5857_v26, %v4399_v25  ;;  %v4401_v29 = vld [vmem:[#allocation6 + $0x1a8] sm:$0xf0]  ;;  %v4359_v30 = vld [vmem:[#allocation6 + $0x140] sm:$0xf]  ;;  %v5844_v33 = vld [vmem:[#allocation6 + $0x144] sm:$0xf] }
  0x4c   : > { %v5848_v31 = vld [vmem:[#allocation6 + $0x15c] sm:$0xf0]  ;;  %v4404_v32 = vor.u32 %v5853_v27, %v4401_v29  ;;  %v4361_v34 = vld [vmem:[#allocation6 + $0x160] sm:$0xf0]  ;;  %v4367_v35 = vld [vmem:[#allocation6 + $0x148] sm:$0xf] }
  0x4d   : > { %1107 = vmatpush.bf16.msra.mxu2 %v4392_v23  ;;  %v4360_v36 = vor.u32 %v5848_v31, %v4359_v30  ;;  %v5849_v37 = vld [vmem:[#allocation6 + $0x164] sm:$0xf0]  ;;  %v5845_v38 = vld [vmem:[#allocation6 + $0x14c] sm:$0xf]  ;;  %1121 = vmatpush.bf16.msra.mxu3 %v4396_v24  ;;  %v4364_v40 = vor.u32 %v5844_v33, %v4361_v34  ;;  %v4327_v42 = vld [vmem:[#allocation6 + $0x100] sm:$0xf] }
  0x4e   : > { %v4369_v39 = vld [vmem:[#allocation6 + $0x168] sm:$0xf0]  ;;  %v4368_v41 = vor.u32 %v5849_v37, %v4367_v35  ;;  %v5840_v43 = vld [vmem:[#allocation6 + $0x11c] sm:$0xf0]  ;;  %v5836_v44 = vld [vmem:[#allocation6 + $0x104] sm:$0xf]  ;;  %s3989_s23 = scalar_lea.hbm %s7128_s15, %s6685_s28 }
  0x4f   : > { %712 = vmatpush.bf16.msra.mxu1 %v5800_v6  ;;  %1135 = vmatpush.bf16.msrb.mxu0 %v4400_v28  ;;  %v4372_v45 = vor.u32 %v5845_v38, %v4369_v39  ;;  %v4329_v46 = vld [vmem:[#allocation6 + $0x120] sm:$0xf0]  ;;  %v4335_v47 = vld [vmem:[#allocation6 + $0x108] sm:$0xf]  ;;  %v5837_v49 = vld [vmem:[#allocation6 + $0x10c] sm:$0xf]  ;;  %v4328_v51 = vor.u32 %v5840_v43, %v4327_v42 }
  0x50   : > { %v5841_v48 = vld [vmem:[#allocation6 + $0x124] sm:$0xf0]  ;;  %v4337_v50 = vld [vmem:[#allocation6 + $0x128] sm:$0xf0]  ;;  %v4332_v52 = vor.u32 %v5836_v44, %v4329_v46  ;;  %v4295_v54 = vld [vmem:[#allocation6 + $0xc0] sm:$0xf] }
  0x51   : > { %1108 = vmatpush.bf16.msra.mxu2 %v4360_v36  ;;  %1122 = vmatpush.bf16.msra.mxu3 %v4364_v40  ;;  %v4336_v53 = vor.u32 %v5841_v48, %v4335_v47  ;;  %v5832_v55 = vld [vmem:[#allocation6 + $0xdc] sm:$0xf0]  ;;  %v5828_v56 = vld [vmem:[#allocation6 + $0xc4] sm:$0xf]  ;;  %v4340_v57 = vor.u32 %v5837_v49, %v4337_v50  ;;  %v4303_v59 = vld [vmem:[#allocation6 + $0xc8] sm:$0xf] }
  0x52   : > { %4179 = vmatmul.msk.f32.gmra.mxu0 %vm628_vm1, %v622_v2  ;;  %v4297_v58 = vld [vmem:[#allocation6 + $0xe0] sm:$0xf0]  ;;  %v5833_v60 = vld [vmem:[#allocation6 + $0xe4] sm:$0xf0]  ;;  %v5829_v61 = vld [vmem:[#allocation6 + $0xcc] sm:$0xf]  ;;  %v4296_v63 = vor.u32 %v5832_v55, %v4295_v54 }
  0x53   : > { %1148 = vmatpush.bf16.msrb.mxu1 %v4436_v19  ;;  %1136 = vmatpush.bf16.msrb.mxu0 %v4368_v41  ;;  %v4305_v62 = vld [vmem:[#allocation6 + $0xe8] sm:$0xf0]  ;;  %v4300_v0 = vor.u32 %v5828_v56, %v4297_v58  ;;  %v4304_v1 = vor.u32 %v5833_v60, %v4303_v59  ;;  %v4263_v2 = vld [vmem:[#allocation6 + $0x80] sm:$0xf]  ;;  %v5820_v4 = vld [vmem:[#allocation6 + $0x84] sm:$0xf] }
  0x54   : > { %v5824_v3 = vld [vmem:[#allocation6 + $0x9c] sm:$0xf0]  ;;  %v4308_v6 = vor.u32 %v5829_v61, %v4305_v62  ;;  %v4265_v7 = vld [vmem:[#allocation6 + $0xa0] sm:$0xf0]  ;;  %v4271_v8 = vld [vmem:[#allocation6 + $0x88] sm:$0xf] }
  0x55   : > { %1109 = vmatpush.bf16.msra.mxu2 %v4328_v51  ;;  %1123 = vmatpush.bf16.msra.mxu3 %v4332_v52  ;;  %v5825_v9 = vld [vmem:[#allocation6 + $0xa4] sm:$0xf0]  ;;  %v5821_v10 = vld [vmem:[#allocation6 + $0x8c] sm:$0xf]  ;;  %v6348_v12 = vld [vmem:[%s7090_s2] ss:$0 sm:$0xff]  ;;  %v4264_v13 = vor.u32 %v5824_v3, %v4263_v2  ;;  %v4268_v14 = vor.u32 %v5820_v4, %v4265_v7 }
  0x56   : > { %v4273_v11 = vld [vmem:[#allocation6 + $0xa8] sm:$0xf0]  ;;  %v4272_v15 = vor.u32 %v5825_v9, %v4271_v8  ;;  %v4231_v16 = vld [vmem:[#allocation6 + $0x40] sm:$0xf]  ;;  %v5812_v18 = vld [vmem:[#allocation6 + $0x44] sm:$0xf] }
  0x57   : > { %1149 = vmatpush.bf16.msrb.mxu1 %v4404_v32  ;;  %1137 = vmatpush.bf16.msrb.mxu0 %v4336_v53  ;;  %v5816_v17 = vld [vmem:[#allocation6 + $0x5c] sm:$0xf0]  ;;  %v4276_v19 = vor.u32 %v5821_v10, %v4273_v11  ;;  %v4233_v20 = vld [vmem:[#allocation6 + $0x60] sm:$0xf0]  ;;  %v4239_v21 = vld [vmem:[#allocation6 + $0x48] sm:$0xf] }
  0x58   : > { %v5817_v22 = vld [vmem:[#allocation6 + $0x64] sm:$0xf0]  ;;  %v5813_v23 = vld [vmem:[#allocation6 + $0x4c] sm:$0xf]  ;;  %v4232_v25 = vor.u32 %v5816_v17, %v4231_v16  ;;  %v4236_v27 = vor.u32 %v5812_v18, %v4233_v20  ;;  %v4199_v29 = vld [vmem:[#allocation6] sm:$0xf] }
  0x59   : > { %1110 = vmatpush.bf16.msra.mxu2 %v4296_v63  ;;  %1124 = vmatpush.bf16.msra.mxu3 %v4300_v0  ;;  %v4241_v24 = vld [vmem:[#allocation6 + $0x68] sm:$0xf0]  ;;  %v4240_v28 = vor.u32 %v5817_v22, %v4239_v21  ;;  %v5808_v30 = vld [vmem:[#allocation6 + $0x1c] sm:$0xf0]  ;;  %v5804_v33 = vld [vmem:[#allocation6 + $0x4] sm:$0xf] }
  0x5a   : > { %v4244_v32 = vor.u32 %v5813_v23, %v4241_v24  ;;  %v4201_v34 = vld [vmem:[#allocation6 + $0x20] sm:$0xf0]  ;;  %v4207_v35 = vld [vmem:[#allocation6 + $0x8] sm:$0xf]  ;;  %v5805_v38 = vld [vmem:[#allocation6 + $0xc] sm:$0xf]  ;;  %v4200_v40 = vor.u32 %v5808_v30, %v4199_v29 }
  0x5b   : > { %1150 = vmatpush.bf16.msrb.mxu1 %v4372_v45  ;;  %1138 = vmatpush.bf16.msrb.mxu0 %v4304_v1  ;;  %v5809_v37 = vld [vmem:[#allocation6 + $0x24] sm:$0xf0]  ;;  %v4209_v39 = vld [vmem:[#allocation6 + $0x28] sm:$0xf0]  ;;  %v4204_v43 = vor.u32 %v5804_v33, %v4201_v34  ;;  %v4439_v47 = vld [vmem:[#allocation6 + $0x1d0] sm:$0xf] }
  0x5c   : > { %v4208_v44 = vor.u32 %v5809_v37, %v4207_v35  ;;  %v4212_v45 = vor.u32 %v5805_v38, %v4209_v39  ;;  %v5866_v48 = vld [vmem:[#allocation6 + $0x1ec] sm:$0xf0]  ;;  %v5862_v49 = vld [vmem:[#allocation6 + $0x1d4] sm:$0xf]  ;;  %v4447_v52 = vld [vmem:[#allocation6 + $0x1d8] sm:$0xf] }
  0x5d   : > { %1111 = vmatpush.bf16.msra.mxu2 %v4264_v13  ;;  %1125 = vmatpush.bf16.msra.mxu3 %v4268_v14  ;;  %v4440_v50 = vor.u32 %v5866_v48, %v4439_v47  ;;  %v4441_v51 = vld [vmem:[#allocation6 + $0x1f0] sm:$0xf0]  ;;  %v5867_v53 = vld [vmem:[#allocation6 + $0x1f4] sm:$0xf0]  ;;  %v5863_v56 = vld [vmem:[#allocation6 + $0x1dc] sm:$0xf] }
  0x5e   : > { %v4444_v54 = vor.u32 %v5862_v49, %v4441_v51  ;;  %v4448_v55 = vor.u32 %v5867_v53, %v4447_v52  ;;  %v4407_v59 = vld [vmem:[#allocation6 + $0x190] sm:$0xf]  ;;  %v5854_v61 = vld [vmem:[#allocation6 + $0x194] sm:$0xf]  ;;  %v4415_v0 = vld [vmem:[#allocation6 + $0x198] sm:$0xf] }
  0x5f   : > { %1151 = vmatpush.bf16.msrb.mxu1 %v4340_v57  ;;  %1139 = vmatpush.bf16.msrb.mxu0 %v4272_v15  ;;  %v4449_v57 = vld [vmem:[#allocation6 + $0x1f8] sm:$0xf0]  ;;  %v5858_v60 = vld [vmem:[#allocation6 + $0x1ac] sm:$0xf0]  ;;  %v4409_v63 = vld [vmem:[#allocation6 + $0x1b0] sm:$0xf0] }
  0x60   : > { %v4452_v58 = vor.u32 %v5863_v56, %v4449_v57  ;;  %v4408_v62 = vor.u32 %v5858_v60, %v4407_v59  ;;  %v5859_v1 = vld [vmem:[#allocation6 + $0x1b4] sm:$0xf0]  ;;  %v4412_v2 = vor.u32 %v5854_v61, %v4409_v63  ;;  %v5855_v4 = vld [vmem:[#allocation6 + $0x19c] sm:$0xf]  ;;  %v4375_v7 = vld [vmem:[#allocation6 + $0x150] sm:$0xf] }
  0x61   : > { %1112 = vmatpush.bf16.msra.mxu2 %v4232_v25  ;;  %1126 = vmatpush.bf16.msra.mxu3 %v4236_v27  ;;  %v4416_v3 = vor.u32 %v5859_v1, %v4415_v0  ;;  %v5850_v8 = vld [vmem:[#allocation6 + $0x16c] sm:$0xf0]  ;;  %v5846_v9 = vld [vmem:[#allocation6 + $0x154] sm:$0xf]  ;;  %v5851_v13 = vld [vmem:[#allocation6 + $0x174] sm:$0xf0] }
  0x62   : > { %v4376_v10 = vor.u32 %v5850_v8, %v4375_v7  ;;  %v4377_v11 = vld [vmem:[#allocation6 + $0x170] sm:$0xf0]  ;;  %v5847_v16 = vld [vmem:[#allocation6 + $0x15c] sm:$0xf]  ;;  %v5842_v20 = vld [vmem:[#allocation6 + $0x12c] sm:$0xf0] }
  0x63   : > { %1152 = vmatpush.bf16.msrb.mxu1 %v4308_v6  ;;  %1140 = vmatpush.bf16.msrb.mxu0 %v4240_v28  ;;  %v4380_v14 = vor.u32 %v5846_v9, %v4377_v11  ;;  %v4385_v17 = vld [vmem:[#allocation6 + $0x178] sm:$0xf0]  ;;  %v5838_v21 = vld [vmem:[#allocation6 + $0x114] sm:$0xf]  ;;  %v4351_v24 = vld [vmem:[#allocation6 + $0x118] sm:$0xf] }
  0x64   : > { %v4388_v18 = vor.u32 %v5847_v16, %v4385_v17  ;;  %v4345_v23 = vld [vmem:[#allocation6 + $0x130] sm:$0xf0]  ;;  %v5843_v25 = vld [vmem:[#allocation6 + $0x134] sm:$0xf0]  ;;  %v5839_v28 = vld [vmem:[#allocation6 + $0x11c] sm:$0xf] }
  0x65   : > { %1113 = vmatpush.bf16.msra.mxu2 %v4200_v40  ;;  %1127 = vmatpush.bf16.msra.mxu3 %v4204_v43  ;;  %v4352_v27 = vor.u32 %v5843_v25, %v4351_v24  ;;  %v4353_v29 = vld [vmem:[#allocation6 + $0x138] sm:$0xf0]  ;;  %v5830_v33 = vld [vmem:[#allocation6 + $0xd4] sm:$0xf]  ;;  %v5835_v37 = vld [vmem:[#allocation6 + $0xf4] sm:$0xf0] }
  0x66   : > { %v4356_v30 = vor.u32 %v5839_v28, %v4353_v29  ;;  %v4313_v35 = vld [vmem:[#allocation6 + $0xf0] sm:$0xf0]  ;;  %v5831_v40 = vld [vmem:[#allocation6 + $0xdc] sm:$0xf]  ;;  %v4287_v49 = vld [vmem:[#allocation6 + $0x98] sm:$0xf] }
  0x67   : > { %1153 = vmatpush.bf16.msrb.mxu1 %v4276_v19  ;;  %1141 = vmatpush.bf16.msrb.mxu0 %v4208_v44  ;;  %v4343_v19 = vld [vmem:[#allocation6 + $0x110] sm:$0xf]  ;;  %v4316_v38 = vor.u32 %v5830_v33, %v4313_v35  ;;  %v5823_v51 = vld [vmem:[#allocation6 + $0x9c] sm:$0xf]  ;;  %v5814_v57 = vld [vmem:[#allocation6 + $0x54] sm:$0xf] }
  0x68   : > { %v4344_v22 = vor.u32 %v5842_v20, %v4343_v19  ;;  %v5826_v44 = vld [vmem:[#allocation6 + $0xac] sm:$0xf0]  ;;  %v4289_v53 = vld [vmem:[#allocation6 + $0xb8] sm:$0xf0]  ;;  %v4255_v59 = vld [vmem:[#allocation6 + $0x58] sm:$0xf] }
  0x69   : > { %1162 = vmatpush.bf16.msrb.mxu2 %v4440_v50  ;;  %1176 = vmatpush.bf16.msrb.mxu3 %v4444_v54  ;;  %v5827_v50 = vld [vmem:[#allocation6 + $0xb4] sm:$0xf0]  ;;  %v4247_v54 = vld [vmem:[#allocation6 + $0x50] sm:$0xf]  ;;  %v4292_v56 = vor.u32 %v5823_v51, %v4289_v53  ;;  %v4257_v63 = vld [vmem:[#allocation6 + $0x78] sm:$0xf0] }
  0x6a   : > { %v4288_v52 = vor.u32 %v5827_v50, %v4287_v49  ;;  %v5819_v61 = vld [vmem:[#allocation6 + $0x74] sm:$0xf0]  ;;  %v5807_v9 = vld [vmem:[#allocation6 + $0x1c] sm:$0xf]  ;;  %v4823_v20 = vld [vmem:[#allocation8 + $0x2e0] sm:$0xf] }
  0x6b   : > { %1154 = vmatpush.bf16.msrb.mxu1 %v4244_v32  ;;  %1190 = vmatpush.bf16.msra.mxu0 %v4448_v55  ;;  %v5834_v32 = vld [vmem:[#allocation6 + $0xec] sm:$0xf0]  ;;  %v4256_v1 = vor.u32 %v5819_v61, %v4255_v59  ;;  %v4223_v7 = vld [vmem:[#allocation6 + $0x18] sm:$0xf]  ;;  %v6349_v16 = vld [vmem:[#allocation3] ss:$0 sm:$0xff] }
  0x6c   : > { %v5818_v55 = vld [vmem:[#allocation6 + $0x6c] sm:$0xf0]  ;;  %v5811_v8 = vld [vmem:[#allocation6 + $0x34] sm:$0xf0]  ;;  %v4567_v24 = vld [vmem:[#allocation8 + $0xe0] sm:$0xf] }
  0x6d   : > { %1163 = vmatpush.bf16.msrb.mxu2 %v4408_v62  ;;  %1177 = vmatpush.bf16.msrb.mxu3 %v4412_v2  ;;  %v4248_v60 = vor.u32 %v5818_v55, %v4247_v54  ;;  %v5815_v62 = vld [vmem:[#allocation6 + $0x5c] sm:$0xf]  ;;  %v4215_v2 = vld [vmem:[#allocation6 + $0x10] sm:$0xf]  ;;  %v4695_v28 = vld [vmem:[#allocation8 + $0x1e0] sm:$0xf] }
  0x6e   : > { %v5898_v25 = vld [vmem:[#allocation8 + $0xec] sm:$0xf0]  ;;  %v4807_v33 = vld [vmem:[#allocation8 + $0x2c0] sm:$0xf]  ;;  %s3993_s24 = sshll.u32 %s3989_s23, 4  ;;  %s3981_s16 = scalar_lea.sflag [#allocation5], %s592_s19  ;;  %s3994_s24 = int_to_ptr.hbm [resolvable:$true] %s3993_s24 }
  0x6f   : > { %1155 = vmatpush.bf16.msrb.mxu1 %v4212_v45  ;;  %1191 = vmatpush.bf16.msra.mxu0 %v4416_v3  ;;  %v5822_v45 = vld [vmem:[#allocation6 + $0x94] sm:$0xf]  ;;  %v5810_v3 = vld [vmem:[#allocation6 + $0x2c] sm:$0xf0]  ;;  %v4935_v35 = vld [vmem:[#allocation8 + $0x3c0] sm:$0xf] }
  0x70   : > { %v4216_v11 = vor.u32 %v5810_v3, %v4215_v2  ;;  %v5930_v29 = vld [vmem:[#allocation8 + $0x1ec] sm:$0xf0]  ;;  %v4535_v51 = vld [vmem:[#allocation8 + $0xa0] sm:$0xf]  ;;  %s6609_s14 = sshra.s32 %s3994_s24, 4  ;;  %s6615_s28 = scalar_lea.hbm %s7128_s15, 2  ;;  %s6610_s14 = int_to_ptr.hbm [resolvable:$true] %s6609_s14 }
  0x71   : > { %1164 = vmatpush.bf16.msrb.mxu2 %v4376_v10  ;;  %1178 = vmatpush.bf16.msrb.mxu3 %v4380_v14  ;;  %v4225_v10 = vld [vmem:[#allocation6 + $0x38] sm:$0xf0]  ;;  %v4663_v53 = vld [vmem:[#allocation8 + $0x1a0] sm:$0xf]  ;;  %v5922_v54 = vld [vmem:[#allocation8 + $0x1ac] sm:$0xf0]  ;;  %p6616_p5 = scmp.lt.s32.totalorder %s6610_s14, %s7128_s15 }
  0x72   : > { %v4228_v14 = vor.u32 %v5807_v9, %v4225_v10  ;;  %v4903_v59 = vld [vmem:[#allocation8 + $0x380] sm:$0xf]  ;;  %v5918_v2 = vld [vmem:[#allocation8 + $0x18c] sm:$0xf0]  ;;  %s6611_s17 = scalar_lea.hbm %s6610_s14, 1 }
  0x73   : > { %p6612_p1 = scmp.ne.s32.totalorder %s6610_s14, %s6611_s17  ;;  %p6617_p6 = scmp.lt.s32.totalorder %s6615_s28, %s6611_s17 }
  0x75   : > { %1165 = vmatpush.bf16.msrb.mxu2 %v4344_v22  ;;  %v4951_v22 = vld [vmem:[#allocation8 + $0x3e0] sm:$0xf]  ;;  %p6613_p2 = pnand %p6612_p1, %p6821_p4  ;;  %p6618_p7 = por %p6617_p6, %p6616_p5 }
  0x77   : > { %p6614_p3 = pneg %p6613_p2 }
  0x79   : > { %p6619_p9 = pnand %p6618_p7, %p6614_p3 }
  0xc7   : > { %v656_v5 = vpop.f32.mrf.mxu0 }
  0xc8   : > { %v657_v26 = vadd.f32 %v6348_v12, %v656_v5  ;;  %v4417_v5 = vld [vmem:[#allocation6 + $0x1b8] sm:$0xf0] }
  0xc9   : > { %v4420_v6 = vor.u32 %v5855_v4, %v4417_v5  ;;  %v5806_v4 = vld [vmem:[#allocation6 + $0x14] sm:$0xf]  ;;  %v4260_v5 = vor.u32 %v5815_v62, %v4257_v63  ;;  %v4664_v62 = vor.u32 %v5922_v54, %v4663_v53  ;;  %v4519_v63 = vld [vmem:[#allocation8 + $0x80] sm:$0xf] }
  0xca   : > { %v662_v41 = vmax.f32 %v657_v26, 0.0  ;;  %v4348_v26 = vor.u32 %v5838_v21, %v4345_v23  ;;  %v5962_v21 = vld [vmem:[#allocation8 + $0x2ec] sm:$0xf0] }
  0xcb   : > { %v5994_v23 = vld [vmem:[#allocation8 + $0x3ec] sm:$0xf0] }
  0xcc   : > { %1179 = vmatpush.bf16.msrb.mxu3 %v4348_v26 }
  0xcf   : > { %v659_v31 = vpop.f32.mrf.mxu0 }
  0xd0   : > { %v660_v36 = vadd.f32 %v6348_v12, %v659_v31  ;;  %v4383_v12 = vld [vmem:[#allocation6 + $0x158] sm:$0xf]  ;;  %v4311_v31 = vld [vmem:[#allocation6 + $0xd0] sm:$0xf]  ;;  %1180 = vmatpush.bf16.msrb.mxu3 %v4316_v38  ;;  %v4696_v38 = vor.u32 %v5930_v29, %v4695_v28  ;;  %v4727_v29 = vld [vmem:[#allocation8 + $0x220] sm:$0xf] }
  0xd1   : > { %v4384_v15 = vor.u32 %v5851_v13, %v4383_v12  ;;  %v4312_v34 = vor.u32 %v5834_v32, %v4311_v31  ;;  %v4224_v13 = vor.u32 %v5811_v8, %v4223_v7  ;;  %v4824_v31 = vor.u32 %v5962_v21, %v4823_v20  ;;  %v4887_v7 = vld [vmem:[#allocation8 + $0x360] sm:$0xf]  ;;  %v5978_v8 = vld [vmem:[#allocation8 + $0x36c] sm:$0xf0] }
  0xd2   : > { %v663_v42 = vmax.f32 %v660_v36, 0.0  ;;  %v4319_v36 = vld [vmem:[#allocation6 + $0xd8] sm:$0xf]  ;;  %v4952_v32 = vor.u32 %v5994_v23, %v4951_v22  ;;  %v5974_v20 = vld [vmem:[#allocation8 + $0x34c] sm:$0xf0] }
  0xd3   : > { %1192 = vmatpush.bf16.msra.mxu0 %v4384_v15  ;;  %v4320_v39 = vor.u32 %v5835_v37, %v4319_v36  ;;  %1166 = vmatpush.bf16.msrb.mxu2 %v4312_v34  ;;  %v5958_v34 = vld [vmem:[#allocation8 + $0x2cc] sm:$0xf0]  ;;  %v4568_v37 = vor.u32 %v5898_v25, %v4567_v24  ;;  %v4487_v23 = vld [vmem:[#allocation8 + $0x40] sm:$0xf] }
  0xd4   : > { %v664_v46 = vpack.c.bf16 %v663_v42, %v662_v41  ;;  %v4321_v41 = vld [vmem:[#allocation6 + $0xf8] sm:$0xf0]  ;;  %v4279_v42 = vld [vmem:[#allocation6 + $0x90] sm:$0xf]  ;;  %v4615_v25 = vld [vmem:[#allocation8 + $0x140] sm:$0xf] }
  0xd5   : > { %v4324_v43 = vor.u32 %v5831_v40, %v4321_v41  ;;  %v4280_v47 = vor.u32 %v5826_v44, %v4279_v42  ;;  %v5990_v36 = vld [vmem:[#allocation8 + $0x3cc] sm:$0xf0]  ;;  %v4679_v41 = vld [vmem:[#allocation8 + $0x1c0] sm:$0xf] }
  0xd6   : > { %4196 = vmatmul.msk.bf16.vlgmr.msra.gmra.mxu1 %vm701_vm2, %v664_v46  ;;  %v4281_v46 = vld [vmem:[#allocation6 + $0xb0] sm:$0xf0]  ;;  %v5894_v40 = vld [vmem:[#allocation8 + $0xcc] sm:$0xf0]  ;;  %v4936_v44 = vor.u32 %v5990_v36, %v4935_v35  ;;  %v4471_v36 = vld [vmem:[#allocation8 + $0x20] sm:$0xf] }
  0xd7   : > { %1204 = vmatpush.bf16.msra.mxu1 %v4452_v58  ;;  %1193 = vmatpush.bf16.msra.mxu0 %v4352_v27  ;;  %v4284_v48 = vor.u32 %v5822_v45, %v4281_v46  ;;  %v4249_v58 = vld [vmem:[#allocation6 + $0x70] sm:$0xf0]  ;;  %v5926_v42 = vld [vmem:[#allocation8 + $0x1cc] sm:$0xf0]  ;;  %v4791_v45 = vld [vmem:[#allocation8 + $0x2a0] sm:$0xf] }
  0xd8   : > { %1167 = vmatpush.bf16.msrb.mxu2 %v4280_v47  ;;  %v4252_v0 = vor.u32 %v5814_v57, %v4249_v58  ;;  %v5954_v46 = vld [vmem:[#allocation8 + $0x2ac] sm:$0xf0]  ;;  %v4919_v47 = vld [vmem:[#allocation8 + $0x3a0] sm:$0xf]  ;;  %v4680_v50 = vor.u32 %v5926_v42, %v4679_v41 }
  0xd9   : > { %1181 = vmatpush.bf16.msrb.mxu3 %v4284_v48  ;;  %v5986_v48 = vld [vmem:[#allocation8 + $0x3ac] sm:$0xf0]  ;;  %v4792_v55 = vor.u32 %v5954_v46, %v4791_v45  ;;  %v4775_v57 = vld [vmem:[#allocation8 + $0x280] sm:$0xf] }
  0xda   : > { %v5950_v58 = vld [vmem:[#allocation8 + $0x28c] sm:$0xf0]  ;;  %v4711_v41 = vld [vmem:[#allocation8 + $0x200] sm:$0xf] }
  0xdb   : > { %1205 = vmatpush.bf16.msra.mxu1 %v4420_v6  ;;  %1194 = vmatpush.bf16.msra.mxu0 %v4320_v39  ;;  %v4217_v6 = vld [vmem:[#allocation6 + $0x30] sm:$0xf0]  ;;  %v4551_v39 = vld [vmem:[#allocation8 + $0xc0] sm:$0xf]  ;;  %v4776_v3 = vor.u32 %v5950_v58, %v4775_v57  ;;  %v5878_v24 = vld [vmem:[#allocation8 + $0x4c] sm:$0xf0] }
  0xdc   : > { %1168 = vmatpush.bf16.msrb.mxu2 %v4248_v60  ;;  %v4220_v12 = vor.u32 %v5806_v4, %v4217_v6  ;;  %v4552_v49 = vor.u32 %v5894_v40, %v4551_v39  ;;  %v5982_v60 = vld [vmem:[#allocation8 + $0x38c] sm:$0xf0]  ;;  %v5335_v45 = vld [vmem:[#allocation8 + $0x6e0] sm:$0xf] }
  0xdd   : > { %1182 = vmatpush.bf16.msrb.mxu3 %v4252_v0  ;;  %v5886_v0 = vld [vmem:[#allocation8 + $0x8c] sm:$0xf0]  ;;  %v4904_v4 = vor.u32 %v5982_v60, %v4903_v59  ;;  %v5447_v57 = vld [vmem:[#allocation8 + $0x7c0] sm:$0xf] }
  0xde   : > { %v5946_v6 = vld [vmem:[#allocation8 + $0x26c] sm:$0xf0]  ;;  %v4520_v9 = vor.u32 %v5886_v0, %v4519_v63  ;;  %v4455_v60 = vld [vmem:[#allocation8] sm:$0xf] }
  0xdf   : > { %1206 = vmatpush.bf16.msra.mxu1 %v4388_v18  ;;  %1195 = vmatpush.bf16.msra.mxu0 %v4288_v52  ;;  %v5890_v52 = vld [vmem:[#allocation8 + $0xac] sm:$0xf0]  ;;  %v4583_v0 = vld [vmem:[#allocation8 + $0x100] sm:$0xf] }
  0xe0   : > { %1169 = vmatpush.bf16.msrb.mxu2 %v4216_v11  ;;  %v4536_v61 = vor.u32 %v5890_v52, %v4535_v51  ;;  %v4503_v11 = vld [vmem:[#allocation8 + $0x60] sm:$0xf]  ;;  %v5906_v39 = vld [vmem:[#allocation8 + $0x12c] sm:$0xf0] }
  0xe1   : > { %1183 = vmatpush.bf16.msrb.mxu3 %v4220_v12  ;;  %v5882_v12 = vld [vmem:[#allocation8 + $0x6c] sm:$0xf0] }
  0xe2   : > { %v4504_v21 = vor.u32 %v5882_v12, %v4503_v11  ;;  %v5934_v42 = vld [vmem:[#allocation8 + $0x20c] sm:$0xf0]  ;;  %v5431_v11 = vld [vmem:[#allocation8 + $0x7a0] sm:$0xf] }
  0xe3   : > { %1207 = vmatpush.bf16.msra.mxu1 %v4356_v30  ;;  %1196 = vmatpush.bf16.msra.mxu0 %v4256_v1  ;;  %v4647_v1 = vld [vmem:[#allocation8 + $0x180] sm:$0xf]  ;;  %v4712_v51 = vor.u32 %v5934_v42, %v4711_v41  ;;  %v6118_v59 = vld [vmem:[#allocation8 + $0x7cc] sm:$0xf0] }
  0xe4   : > { %v4648_v10 = vor.u32 %v5918_v2, %v4647_v1  ;;  %v5902_v1 = vld [vmem:[#allocation8 + $0x10c] sm:$0xf0]  ;;  %v5079_v2 = vld [vmem:[#allocation8 + $0x4e0] sm:$0xf] }
  0xe5   : > { %v5159_v41 = vld [vmem:[#allocation8 + $0x580] sm:$0xf] }
  0xe7   : > { %1208 = vmatpush.bf16.msra.mxu1 %v4324_v43  ;;  %1197 = vmatpush.bf16.msra.mxu0 %v4224_v13  ;;  %v4808_v43 = vor.u32 %v5958_v34, %v4807_v33  ;;  %v4631_v13 = vld [vmem:[#allocation8 + $0x160] sm:$0xf]  ;;  %v5970_v33 = vld [vmem:[#allocation8 + $0x32c] sm:$0xf0]  ;;  %v4488_v34 = vor.u32 %v5878_v24, %v4487_v23 }
  0xe8   : > { %v5415_v23 = vld [vmem:[#allocation8 + $0x780] sm:$0xf] }
  0xeb   : > { %1209 = vmatpush.bf16.msra.mxu1 %v4292_v56  ;;  %v4920_v56 = vor.u32 %v5986_v48, %v4919_v47  ;;  %v6090_v48 = vld [vmem:[#allocation8 + $0x6ec] sm:$0xf0] }
  0xec   : > { %v5336_v53 = vor.u32 %v6090_v48, %v5335_v45  ;;  %v5255_v45 = vld [vmem:[#allocation8 + $0x640] sm:$0xf] }
  0xef   : > { %1210 = vmatpush.bf16.msra.mxu1 %v4260_v5  ;;  %v4759_v5 = vld [vmem:[#allocation8 + $0x260] sm:$0xf] }
  0xf3   : > { %1211 = vmatpush.bf16.msra.mxu1 %v4228_v14  ;;  %v5914_v14 = vld [vmem:[#allocation8 + $0x16c] sm:$0xf0] }
  0xf4   : > { %v4632_v22 = vor.u32 %v5914_v14, %v4631_v13  ;;  %v6114_v13 = vld [vmem:[#allocation8 + $0x7ac] sm:$0xf0] }
  0xf5   : > { %v5432_v14 = vor.u32 %v6114_v13, %v5431_v11  ;;  %v4983_v11 = vld [vmem:[#allocation8 + $0x420] sm:$0xf] }
  0xf6   : > { %v5111_v13 = vld [vmem:[#allocation8 + $0x520] sm:$0xf] }
 0x153   : > { %v714_v15 = vpop.f32.mrf.mxu1 }
 0x154   : > { %v715_v17 = vadd.f32 %v6349_v16, %v714_v15  ;;  %v4760_v15 = vor.u32 %v5946_v6, %v4759_v5  ;;  %v5207_v5 = vld [vmem:[#allocation8 + $0x5e0] sm:$0xf]  ;;  %v6058_v6 = vld [vmem:[#allocation8 + $0x5ec] sm:$0xf0] }
 0x156   : > { %v719_v26 = vmax.f32 %v715_v17, 0.0  ;;  %v4743_v17 = vld [vmem:[#allocation8 + $0x240] sm:$0xf] }
 0x15b   : > { %v716_v18 = vpop.f32.mrf.mxu1 }
 0x15c   : > { %v717_v19 = vadd.f32 %v6349_v16, %v716_v18  ;;  %v4888_v16 = vor.u32 %v5978_v8, %v4887_v7  ;;  %v5942_v18 = vld [vmem:[#allocation8 + $0x24c] sm:$0xf0]  ;;  %v5208_v8 = vor.u32 %v6058_v6, %v5207_v5  ;;  %v5223_v5 = vld [vmem:[#allocation8 + $0x600] sm:$0xf] }
 0x15d   : > { %v6062_v6 = vld [vmem:[#allocation8 + $0x60c] sm:$0xf0] }
 0x15e   : > { %v720_v27 = vmax.f32 %v717_v19, 0.0  ;;  %v4871_v19 = vld [vmem:[#allocation8 + $0x340] sm:$0xf] }
 0x15f   : > { %v4872_v28 = vor.u32 %v5974_v20, %v4871_v19  ;;  %v6054_v19 = vld [vmem:[#allocation8 + $0x5cc] sm:$0xf0] }
 0x160   : > { %v6937_v30 = vpack.c.bf16 %v720_v27, %v719_v26  ;;  %v5910_v26 = vld [vmem:[#allocation8 + $0x14c] sm:$0xf0]  ;;  %v4744_v27 = vor.u32 %v5942_v18, %v4743_v17  ;;  %v5191_v17 = vld [vmem:[#allocation8 + $0x5c0] sm:$0xf] }
 0x161   : > { %v4616_v35 = vor.u32 %v5910_v26, %v4615_v25  ;;  %v5192_v20 = vor.u32 %v6054_v19, %v5191_v17  ;;  %v6110_v25 = vld [vmem:[#allocation8 + $0x78c] sm:$0xf0]  ;;  %v4967_v17 = vld [vmem:[#allocation8 + $0x400] sm:$0xf] }
 0x162   : > { %1114 = vmatmul.bf16.vlgmr.msra.gmra.mxu2 %v6937_v30  ;;  %1128 = vmatmul.bf16.vlgmr.msra.gmra.mxu3 %v6937_v30  ;;  %v5416_v26 = vor.u32 %v6110_v25, %v5415_v23 }
 0x163   : > { %1142 = vmatmul.bf16.vlgmr.msrb.gmra.mxu0 %v6937_v30  ;;  %1156 = vmatmul.bf16.vlgmr.msrb.gmra.mxu1 %v6937_v30 }
 0x164   : > { %2915 = vmatpush.bf16.msrb.mxu0 %v4824_v31  ;;  %2928 = vmatpush.bf16.msrb.mxu1 %v4952_v32  ;;  %v5938_v31 = vld [vmem:[#allocation8 + $0x22c] sm:$0xf0]  ;;  %v4855_v32 = vld [vmem:[#allocation8 + $0x320] sm:$0xf] }
 0x165   : > { %2889 = vmatpush.bf16.msra.mxu2 %v4568_v37  ;;  %2902 = vmatpush.bf16.msra.mxu3 %v4696_v38  ;;  %v5874_v37 = vld [vmem:[#allocation8 + $0x2c] sm:$0xf0]  ;;  %v4599_v38 = vld [vmem:[#allocation8 + $0x120] sm:$0xf]  ;;  %v4728_v40 = vor.u32 %v5938_v31, %v4727_v29 }
 0x166   : > { %v4472_v46 = vor.u32 %v5874_v37, %v4471_v36  ;;  %v4600_v47 = vor.u32 %v5906_v39, %v4599_v38  ;;  %v5175_v29 = vld [vmem:[#allocation8 + $0x5a0] sm:$0xf]  ;;  %v6106_v38 = vld [vmem:[#allocation8 + $0x76c] sm:$0xf0] }
 0x167   : > { %v5399_v36 = vld [vmem:[#allocation8 + $0x760] sm:$0xf] }
 0x168   : > { %2916 = vmatpush.bf16.msrb.mxu0 %v4808_v43  ;;  %2929 = vmatpush.bf16.msrb.mxu1 %v4936_v44  ;;  %v4839_v43 = vld [vmem:[#allocation8 + $0x300] sm:$0xf]  ;;  %v5966_v44 = vld [vmem:[#allocation8 + $0x30c] sm:$0xf0]  ;;  %v5400_v39 = vor.u32 %v6106_v38, %v5399_v36 }
 0x169   : > { %2890 = vmatpush.bf16.msra.mxu2 %v4552_v49  ;;  %2903 = vmatpush.bf16.msra.mxu3 %v4680_v50  ;;  %v5463_v49 = vld [vmem:[#allocation8 + $0x7e0] sm:$0xf]  ;;  %v6122_v50 = vld [vmem:[#allocation8 + $0x7ec] sm:$0xf0]  ;;  %v4840_v52 = vor.u32 %v5966_v44, %v4839_v43 }
 0x16a   : > { %v5464_v54 = vor.u32 %v6122_v50, %v5463_v49  ;;  %v6046_v43 = vld [vmem:[#allocation8 + $0x58c] sm:$0xf0] }
 0x16b   : > { %v5160_v44 = vor.u32 %v6046_v43, %v5159_v41  ;;  %v6102_v49 = vld [vmem:[#allocation8 + $0x74c] sm:$0xf0] }
 0x16c   : > { %2917 = vmatpush.bf16.msrb.mxu0 %v4792_v55  ;;  %2930 = vmatpush.bf16.msrb.mxu1 %v4920_v56  ;;  %v5319_v55 = vld [vmem:[#allocation8 + $0x6c0] sm:$0xf]  ;;  %v6086_v56 = vld [vmem:[#allocation8 + $0x6cc] sm:$0xf0] }
 0x16d   : > { %2891 = vmatpush.bf16.msra.mxu2 %v4536_v61  ;;  %2904 = vmatpush.bf16.msra.mxu3 %v4664_v62  ;;  %v5320_v58 = vor.u32 %v6086_v56, %v5319_v55  ;;  %v5870_v61 = vld [vmem:[#allocation8 + $0xc] sm:$0xf0]  ;;  %v5448_v62 = vor.u32 %v6118_v59, %v5447_v57  ;;  %v5239_v57 = vld [vmem:[#allocation8 + $0x620] sm:$0xf] }
 0x16e   : > { %v4456_v63 = vor.u32 %v5870_v61, %v4455_v60  ;;  %v6042_v55 = vld [vmem:[#allocation8 + $0x56c] sm:$0xf0]  ;;  %v5367_v59 = vld [vmem:[#allocation8 + $0x720] sm:$0xf] }
 0x16f   : > { %v6098_v61 = vld [vmem:[#allocation8 + $0x72c] sm:$0xf0] }
 0x170   : > { %2918 = vmatpush.bf16.msrb.mxu0 %v4776_v3  ;;  %2931 = vmatpush.bf16.msrb.mxu1 %v4904_v4  ;;  %v4584_v3 = vor.u32 %v5902_v1, %v4583_v0  ;;  %v6026_v4 = vld [vmem:[#allocation8 + $0x4ec] sm:$0xf0]  ;;  %v5127_v1 = vld [vmem:[#allocation8 + $0x540] sm:$0xf] }
 0x171   : > { %2892 = vmatpush.bf16.msra.mxu2 %v4520_v9  ;;  %2905 = vmatpush.bf16.msra.mxu3 %v4648_v10  ;;  %v5080_v7 = vor.u32 %v6026_v4, %v5079_v2  ;;  %v5303_v9 = vld [vmem:[#allocation8 + $0x6a0] sm:$0xf]  ;;  %v6082_v10 = vld [vmem:[#allocation8 + $0x6ac] sm:$0xf0] }
 0x172   : > { %1170 = vmatmul.bf16.vlgmr.msrb.gmra.mxu2 %v6937_v30  ;;  %1184 = vmatmul.bf16.vlgmr.msrb.gmra.mxu3 %v6937_v30  ;;  %v5304_v12 = vor.u32 %v6082_v10, %v5303_v9  ;;  %v6006_v0 = vld [vmem:[#allocation8 + $0x44c] sm:$0xf0] }
 0x173   : > { %1198 = vmatmul.bf16.vlgmr.msra.gmra.mxu0 %v6937_v30  ;;  %1212 = vmatmul.bf16.vlgmr.msra.gmra.mxu1 %v6937_v30  ;;  %v4856_v30 = vor.u32 %v5970_v33, %v4855_v32  ;;  %v6050_v32 = vld [vmem:[#allocation8 + $0x5ac] sm:$0xf0] }
 0x174   : > { %2919 = vmatpush.bf16.msrb.mxu0 %v4760_v15  ;;  %2932 = vmatpush.bf16.msrb.mxu1 %v4888_v16  ;;  %v5063_v15 = vld [vmem:[#allocation8 + $0x4c0] sm:$0xf]  ;;  %v6022_v16 = vld [vmem:[#allocation8 + $0x4cc] sm:$0xf0]  ;;  %v5176_v33 = vor.u32 %v6050_v32, %v5175_v29 }
 0x175   : > { %2893 = vmatpush.bf16.msra.mxu2 %v4504_v21  ;;  %2906 = vmatpush.bf16.msra.mxu3 %v4632_v22  ;;  %v5064_v18 = vor.u32 %v6022_v16, %v5063_v15  ;;  %v5287_v21 = vld [vmem:[#allocation8 + $0x680] sm:$0xf]  ;;  %v6078_v22 = vld [vmem:[#allocation8 + $0x68c] sm:$0xf0] }
 0x176   : > { %v5288_v24 = vor.u32 %v6078_v22, %v5287_v21  ;;  %v6094_v9 = vld [vmem:[#allocation8 + $0x70c] sm:$0xf0] }
 0x177   : > { %v6034_v15 = vld [vmem:[#allocation8 + $0x52c] sm:$0xf0] }
 0x178   : > { %2920 = vmatpush.bf16.msrb.mxu0 %v4744_v27  ;;  %2933 = vmatpush.bf16.msrb.mxu1 %v4872_v28  ;;  %v5047_v27 = vld [vmem:[#allocation8 + $0x4a0] sm:$0xf]  ;;  %v6018_v28 = vld [vmem:[#allocation8 + $0x4ac] sm:$0xf0]  ;;  %v5112_v16 = vor.u32 %v6034_v15, %v5111_v13  ;;  %v4809_v13 = vld [vmem:[#allocation8 + $0x2d0] sm:$0xf0] }
 0x179   : > { %2894 = vmatpush.bf16.msra.mxu2 %v4488_v34  ;;  %2907 = vmatpush.bf16.msra.mxu3 %v4616_v35  ;;  %v5048_v31 = vor.u32 %v6018_v28, %v5047_v27  ;;  %v5271_v34 = vld [vmem:[#allocation8 + $0x660] sm:$0xf]  ;;  %v6074_v35 = vld [vmem:[#allocation8 + $0x66c] sm:$0xf0] }
 0x17a   : > { %v5272_v37 = vor.u32 %v6074_v35, %v5271_v34  ;;  %v6030_v21 = vld [vmem:[#allocation8 + $0x50c] sm:$0xf0] }
 0x17c   : > { %2921 = vmatpush.bf16.msrb.mxu0 %v4728_v40  ;;  %2934 = vmatpush.bf16.msrb.mxu1 %v4856_v30  ;;  %v5031_v40 = vld [vmem:[#allocation8 + $0x480] sm:$0xf]  ;;  %v6014_v30 = vld [vmem:[#allocation8 + $0x48c] sm:$0xf0] }
 0x17d   : > { %2895 = vmatpush.bf16.msra.mxu2 %v4472_v46  ;;  %2908 = vmatpush.bf16.msra.mxu3 %v4600_v47  ;;  %v5032_v42 = vor.u32 %v6014_v30, %v5031_v40  ;;  %v6070_v46 = vld [vmem:[#allocation8 + $0x64c] sm:$0xf0]  ;;  %v5383_v47 = vld [vmem:[#allocation8 + $0x740] sm:$0xf] }
 0x17e   : > { %v5256_v48 = vor.u32 %v6070_v46, %v5255_v45  ;;  %v5384_v50 = vor.u32 %v6102_v49, %v5383_v47  ;;  %v6950_v45 = vld [vmem:[%s7094_s6] sm:$0xff] }
 0x180   : > { %2922 = vmatpush.bf16.msrb.mxu0 %v4712_v51  ;;  %2935 = vmatpush.bf16.msrb.mxu1 %v4840_v52  ;;  %v5015_v51 = vld [vmem:[#allocation8 + $0x460] sm:$0xf]  ;;  %v6010_v52 = vld [vmem:[#allocation8 + $0x46c] sm:$0xf0] }
 0x181   : > { %2896 = vmatpush.bf16.msra.mxu2 %v4456_v63  ;;  %2909 = vmatpush.bf16.msra.mxu3 %v4584_v3  ;;  %v4999_v63 = vld [vmem:[#allocation8 + $0x440] sm:$0xf]  ;;  %v6038_v3 = vld [vmem:[#allocation8 + $0x54c] sm:$0xf0] }
 0x182   : > { %v5000_v2 = vor.u32 %v6006_v0, %v4999_v63  ;;  %v5128_v4 = vor.u32 %v6038_v3, %v5127_v1  ;;  %v4953_v63 = vld [vmem:[#allocation8 + $0x3f0] sm:$0xf0] }
 0x184   : > { %2967 = vmatpush.bf16.msra.mxu0 %v5336_v53  ;;  %2980 = vmatpush.bf16.msra.mxu1 %v5464_v54  ;;  %v5143_v53 = vld [vmem:[#allocation8 + $0x560] sm:$0xf]  ;;  %v5016_v54 = vor.u32 %v6010_v52, %v5015_v51  ;;  %v1313_v52 = vperm.slane %v6950_v45, 2 }
 0x185   : > { %2941 = vmatpush.bf16.msrb.mxu2 %v5080_v7  ;;  %2954 = vmatpush.bf16.msrb.mxu3 %v5208_v8  ;;  %v5144_v56 = vor.u32 %v6042_v55, %v5143_v53  ;;  %v5351_v7 = vld [vmem:[#allocation8 + $0x700] sm:$0xf]  ;;  %v5224_v8 = vor.u32 %v6062_v6, %v5223_v5  ;;  %v1314_v53 = vperm.slane %v6950_v45, 3  ;;  %v1312_v5 = vperm.slane %v6950_v45, 1 }
 0x186   : > { %v5352_v10 = vor.u32 %v6094_v9, %v5351_v7 }
 0x188   : > { %2968 = vmatpush.bf16.msra.mxu0 %v5320_v58  ;;  %2981 = vmatpush.bf16.msra.mxu1 %v5448_v62  ;;  %v6066_v58 = vld [vmem:[#allocation8 + $0x62c] sm:$0xf0]  ;;  %v5368_v62 = vor.u32 %v6098_v61, %v5367_v59  ;;  %v4825_v61 = vld [vmem:[#allocation8 + $0x2f0] sm:$0xf0] }
 0x189   : > { %2942 = vmatpush.bf16.msrb.mxu2 %v5064_v18  ;;  %2955 = vmatpush.bf16.msrb.mxu3 %v5192_v20  ;;  %v5240_v60 = vor.u32 %v6066_v58, %v5239_v57  ;;  %v5998_v18 = vld [vmem:[#allocation8 + $0x40c] sm:$0xf0]  ;;  %v5095_v20 = vld [vmem:[#allocation8 + $0x500] sm:$0xf] }
 0x18a   : > { %v4968_v19 = vor.u32 %v5998_v18, %v4967_v17  ;;  %v5988_v18 = vld [vmem:[#allocation8 + $0x3c4] sm:$0xf] }
 0x18c   : > { %2969 = vmatpush.bf16.msra.mxu0 %v5304_v12  ;;  %2982 = vmatpush.bf16.msra.mxu1 %v5432_v14  ;;  %v6002_v12 = vld [vmem:[#allocation8 + $0x42c] sm:$0xf0] }
 0x18d   : > { %2943 = vmatpush.bf16.msrb.mxu2 %v5048_v31  ;;  %2956 = vmatpush.bf16.msrb.mxu3 %v5176_v33  ;;  %v4984_v14 = vor.u32 %v6002_v12, %v4983_v11  ;;  %v5956_v12 = vld [vmem:[#allocation8 + $0x2c4] sm:$0xf] }
 0x190   : > { %2970 = vmatpush.bf16.msra.mxu0 %v5288_v24  ;;  %2983 = vmatpush.bf16.msra.mxu1 %v5416_v26  ;;  %v5096_v24 = vor.u32 %v6030_v21, %v5095_v20  ;;  %v5896_v20 = vld [vmem:[#allocation8 + $0xe4] sm:$0xf] }
 0x191   : > { %2944 = vmatpush.bf16.msrb.mxu2 %v5032_v42  ;;  %2957 = vmatpush.bf16.msrb.mxu3 %v5160_v44 }
 0x194   : > { %2971 = vmatpush.bf16.msra.mxu0 %v5272_v37  ;;  %2984 = vmatpush.bf16.msra.mxu1 %v5400_v39 }
 0x195   : > { %2945 = vmatpush.bf16.msrb.mxu2 %v5016_v54  ;;  %2958 = vmatpush.bf16.msrb.mxu3 %v5144_v56  ;;  %v5960_v56 = vld [vmem:[#allocation8 + $0x2e4] sm:$0xf] }
 0x198   : > { %2972 = vmatpush.bf16.msra.mxu0 %v5256_v48  ;;  %2985 = vmatpush.bf16.msra.mxu1 %v5384_v50 }
 0x199   : > { %2946 = vmatpush.bf16.msrb.mxu2 %v5000_v2  ;;  %2959 = vmatpush.bf16.msrb.mxu3 %v5128_v4  ;;  %v1311_v4 = vperm.slane %v6950_v45, 0 }
 0x19c   : > { %2973 = vmatpush.bf16.msra.mxu0 %v5240_v60  ;;  %2986 = vmatpush.bf16.msra.mxu1 %v5368_v62  ;;  %v5992_v62 = vld [vmem:[#allocation8 + $0x3e4] sm:$0xf] }
 0x19d   : > { %2947 = vmatpush.bf16.msrb.mxu2 %v4984_v14  ;;  %2960 = vmatpush.bf16.msrb.mxu3 %v5112_v16  ;;  %v4956_v11 = vor.u32 %v5992_v62, %v4953_v63  ;;  %v5980_v63 = vld [vmem:[#allocation8 + $0x384] sm:$0xf] }
 0x1a0   : > { %2974 = vmatpush.bf16.msra.mxu0 %v5224_v8  ;;  %2987 = vmatpush.bf16.msra.mxu1 %v5352_v10  ;;  %v4828_v10 = vor.u32 %v5960_v56, %v4825_v61 }
 0x1a1   : > { %2948 = vmatpush.bf16.msrb.mxu2 %v4968_v19  ;;  %2961 = vmatpush.bf16.msrb.mxu3 %v5096_v24  ;;  %v4937_v19 = vld [vmem:[#allocation8 + $0x3d0] sm:$0xf0]  ;;  %v5928_v24 = vld [vmem:[#allocation8 + $0x1e4] sm:$0xf] }
 0x1e0   : > { %v1143_v22 = vpop.f32.mrf.mxu0  ;;  %v1157_v23 = vpop.f32.mrf.mxu1 }
 0x1e5   : > { %v1115_v25 = vpop.f32.mrf.mxu2  ;;  %v1129_v26 = vpop.f32.mrf.mxu3 }
 0x1e8   : > { %v1145_v27 = vpop.f32.mrf.mxu0  ;;  %v1159_v28 = vpop.f32.mrf.mxu1 }
 0x1e9   : > { %v1220_v29 = vmax.f32 %v1143_v22, %v1145_v27  ;;  %v1221_v31 = vmax.f32 %v1157_v23, %v1159_v28  ;;  %v4569_v23 = vld [vmem:[#allocation8 + $0xf0] sm:$0xf0]  ;;  %v4812_v28 = vor.u32 %v5956_v12, %v4809_v13 }
 0x1eb   : > { %v1273_v32 = vrot.slane %v1220_v29, 4  ;;  %v1279_v33 = vrot.slane %v1221_v31, 4 }
 0x1ed   : > { %v1274_v34 = vmax.f32 %v1220_v29, %v1273_v32  ;;  %v1280_v35 = vmax.f32 %v1221_v31, %v1279_v33  ;;  %v1117_v36 = vpop.f32.mrf.mxu2  ;;  %v1131_v37 = vpop.f32.mrf.mxu3  ;;  %v4940_v29 = vor.u32 %v5988_v18, %v4937_v19  ;;  %v5952_v33 = vld [vmem:[#allocation8 + $0x2a4] sm:$0xf] }
 0x1ee   : > { %v1218_v38 = vmax.f32 %v1115_v25, %v1117_v36  ;;  %v1219_v39 = vmax.f32 %v1129_v26, %v1131_v37  ;;  %v4697_v25 = vld [vmem:[#allocation8 + $0x1f0] sm:$0xf0] }
 0x1ef   : > { %v1275_v40 = vrot.slane %v1274_v34, 2  ;;  %v1281_v30 = vrot.slane %v1280_v35, 2 }
 0x1f0   : > { %v1261_v41 = vrot.slane %v1218_v38, 4  ;;  %v1267_v42 = vrot.slane %v1219_v39, 4  ;;  %v1199_v43 = vpop.f32.mrf.mxu0  ;;  %v1213_v44 = vpop.f32.mrf.mxu1 }
 0x1f1   : > { %v1276_v46 = vmax.f32 %v1274_v34, %v1275_v40  ;;  %v1282_v47 = vmax.f32 %v1280_v35, %v1281_v30  ;;  %v4793_v34 = vld [vmem:[#allocation8 + $0x2b0] sm:$0xf0]  ;;  %v5984_v35 = vld [vmem:[#allocation8 + $0x3a4] sm:$0xf]  ;;  %v4572_v40 = vor.u32 %v5896_v20, %v4569_v23  ;;  %v4700_v30 = vor.u32 %v5928_v24, %v4697_v25 }
 0x1f2   : > { %v1262_v48 = vmax.f32 %v1218_v38, %v1261_v41  ;;  %v1268_v49 = vmax.f32 %v1219_v39, %v1267_v42  ;;  %v4921_v41 = vld [vmem:[#allocation8 + $0x3b0] sm:$0xf0]  ;;  %v5892_v42 = vld [vmem:[#allocation8 + $0xc4] sm:$0xf] }
 0x1f3   : > { %v1277_v50 = vrot.slane %v1276_v46, 1  ;;  %v1283_v51 = vrot.slane %v1282_v47, 1  ;;  %v4924_v56 = vor.u32 %v5984_v35, %v4921_v41  ;;  %v4889_v23 = vld [vmem:[#allocation8 + $0x370] sm:$0xf0]  ;;  %v1316_v35 = vperm.slane %v6950_v45, 5 }
 0x1f4   : > { %v1263_v54 = vrot.slane %v1262_v48, 2  ;;  %v1269_v55 = vrot.slane %v1268_v49, 2 }
 0x1f5   : > { %v1278_v57 = vmax.f32 %v1276_v46, %v1277_v50  ;;  %v1284_v58 = vmax.f32 %v1282_v47, %v1283_v51  ;;  %v1171_v59 = vpop.f32.mrf.mxu2  ;;  %v1185_v60 = vpop.f32.mrf.mxu3  ;;  %v4681_v50 = vld [vmem:[#allocation8 + $0x1d0] sm:$0xf0] }
 0x1f6   : > { %v1264_v0 = vmax.f32 %v1262_v48, %v1263_v54  ;;  %v1270_v1 = vmax.f32 %v1268_v49, %v1269_v55  ;;  %v5924_v49 = vld [vmem:[#allocation8 + $0x1c4] sm:$0xf] }
 0x1f7   : > { %v1329_v2 = vadd.f32 %v1313_v52, %v1278_v57  ;;  %v1330_v3 = vadd.f32 %v1314_v53, %v1284_v58  ;;  %v4796_v53 = vor.u32 %v5952_v33, %v4793_v34  ;;  %v5948_v58 = vld [vmem:[#allocation8 + $0x284] sm:$0xf]  ;;  %v4649_v33 = vld [vmem:[#allocation8 + $0x190] sm:$0xf0]  ;;  %v1315_v34 = vperm.slane %v6950_v45, 4 }
 0x1f8   : > { %v1265_v6 = vrot.slane %v1264_v0, 1  ;;  %v1271_v7 = vrot.slane %v1270_v1, 1  ;;  %v1201_v8 = vpop.f32.mrf.mxu0  ;;  %v1215_v9 = vpop.f32.mrf.mxu1 }
 0x1f9   : > { %v1224_v14 = vmax.f32 %v1199_v43, %v1201_v8  ;;  %v1225_v15 = vmax.f32 %v1213_v44, %v1215_v9  ;;  %v6956_v16 = vpack.c.bf16 %v1329_v2, %v1329_v2  ;;  %v6958_v17 = vpack.c.bf16 %v1330_v3, %v1330_v3  ;;  %v4553_v43 = vld [vmem:[#allocation8 + $0xd0] sm:$0xf0]  ;;  %v5888_v3 = vld [vmem:[#allocation8 + $0xa4] sm:$0xf] }
 0x1fa   : > { %v1266_v21 = vmax.f32 %v1264_v0, %v1265_v6  ;;  %v1272_v22 = vmax.f32 %v1270_v1, %v1271_v7  ;;  %v4556_v57 = vor.u32 %v5892_v42, %v4553_v43  ;;  %v4905_v0 = vld [vmem:[#allocation8 + $0x390] sm:$0xf0]  ;;  %v1318_v6 = vperm.slane %v6950_v45, 7  ;;  %v5920_v9 = vld [vmem:[#allocation8 + $0x1a4] sm:$0xf] }
 0x1fb   : > { %v1297_v26 = vrot.slane %v1224_v14, 4  ;;  %v1303_v27 = vrot.slane %v1225_v15, 4  ;;  %2923 = vmatmul.bf16.vlgmr.msrb.gmra.mxu0 %v6956_v16  ;;  %2936 = vmatmul.bf16.vlgmr.msrb.gmra.mxu1 %v6958_v17 }
 0x1fc   : > { %3019 = vmatpush.bf16.msrb.mxu0 %v4828_v10  ;;  %3032 = vmatpush.bf16.msrb.mxu1 %v4956_v11  ;;  %v1327_v31 = vadd.f32 %v1311_v4, %v1266_v21  ;;  %v1328_v32 = vadd.f32 %v1312_v5, %v1272_v22  ;;  %v4537_v4 = vld [vmem:[#allocation8 + $0xb0] sm:$0xf0]  ;;  %v1317_v5 = vperm.slane %v6950_v45, 6  ;;  %v5976_v22 = vld [vmem:[#allocation8 + $0x364] sm:$0xf] }
 0x1fd   : > { %v1298_v36 = vmax.f32 %v1224_v14, %v1297_v26  ;;  %v1304_v37 = vmax.f32 %v1225_v15, %v1303_v27  ;;  %v1173_v38 = vpop.f32.mrf.mxu2  ;;  %v1187_v39 = vpop.f32.mrf.mxu3  ;;  %v4665_v10 = vld [vmem:[#allocation8 + $0x1b0] sm:$0xf0]  ;;  %v4908_v14 = vor.u32 %v5980_v63, %v4905_v0  ;;  %v5944_v15 = vld [vmem:[#allocation8 + $0x264] sm:$0xf]  ;;  %v4540_v20 = vor.u32 %v5888_v3, %v4537_v4 }
 0x1fe   : > { %v1222_v44 = vmax.f32 %v1171_v59, %v1173_v38  ;;  %v1223_v46 = vmax.f32 %v1185_v60, %v1187_v39  ;;  %v6962_v47 = vpack.c.bf16 %v1327_v31, %v1327_v31  ;;  %v6964_v48 = vpack.c.bf16 %v1328_v32, %v1328_v32  ;;  %v4777_v60 = vld [vmem:[#allocation8 + $0x290] sm:$0xf0]  ;;  %v5884_v27 = vld [vmem:[#allocation8 + $0x84] sm:$0xf] }
 0x1ff   : > { %v1299_v51 = vrot.slane %v1298_v36, 2  ;;  %v1305_v52 = vrot.slane %v1304_v37, 2  ;;  %v4684_v59 = vor.u32 %v5924_v49, %v4681_v50  ;;  %v4780_v13 = vor.u32 %v5948_v58, %v4777_v60  ;;  %v4761_v21 = vld [vmem:[#allocation8 + $0x270] sm:$0xf0]  ;;  %v5916_v32 = vld [vmem:[#allocation8 + $0x184] sm:$0xf] }
 0x200   : > { %v1285_v54 = vrot.slane %v1222_v44, 4  ;;  %v1291_v55 = vrot.slane %v1223_v46, 4  ;;  %3020 = vmatpush.bf16.msrb.mxu0 %v4812_v28  ;;  %3033 = vmatpush.bf16.msrb.mxu1 %v4940_v29  ;;  %v4668_v26 = vor.u32 %v5920_v9, %v4665_v10  ;;  %v4521_v28 = vld [vmem:[#allocation8 + $0x90] sm:$0xf0]  ;;  %v4764_v38 = vor.u32 %v5944_v15, %v4761_v21  ;;  %v5968_v60 = vld [vmem:[#allocation8 + $0x324] sm:$0xf] }
 0x201   : > { %v1300_v61 = vmax.f32 %v1298_v36, %v1299_v51  ;;  %v1306_v62 = vmax.f32 %v1304_v37, %v1305_v52  ;;  %2897 = vmatmul.bf16.vlgmr.msra.gmra.mxu2 %v6962_v47  ;;  %2910 = vmatmul.bf16.vlgmr.msra.gmra.mxu3 %v6964_v48  ;;  %v4892_v39 = vor.u32 %v5976_v22, %v4889_v23  ;;  %v5880_v51 = vld [vmem:[#allocation8 + $0x64] sm:$0xf]  ;;  %v4505_v52 = vld [vmem:[#allocation8 + $0x70] sm:$0xf0] }
 0x202   : > { %v1286_v1 = vmax.f32 %v1222_v44, %v1285_v54  ;;  %v1292_v2 = vmax.f32 %v1223_v46, %v1291_v55  ;;  %2993 = vmatpush.bf16.msra.mxu2 %v4572_v40  ;;  %3006 = vmatpush.bf16.msra.mxu3 %v4700_v30  ;;  %v5940_v40 = vld [vmem:[#allocation8 + $0x244] sm:$0xf]  ;;  %v4745_v30 = vld [vmem:[#allocation8 + $0x250] sm:$0xf0]  ;;  %v4524_v43 = vor.u32 %v5884_v27, %v4521_v28 }
 0x203   : > { %v1301_v7 = vrot.slane %v1300_v61, 1  ;;  %v1307_v8 = vrot.slane %v1306_v62, 1  ;;  %v5972_v44 = vld [vmem:[#allocation8 + $0x344] sm:$0xf]  ;;  %v4873_v46 = vld [vmem:[#allocation8 + $0x350] sm:$0xf0]  ;;  %v4652_v45 = vor.u32 %v5916_v32, %v4649_v33 }
 0x204   : > { %v1287_v11 = vrot.slane %v1286_v1, 2  ;;  %v1293_v12 = vrot.slane %v1292_v2, 2  ;;  %3021 = vmatpush.bf16.msrb.mxu0 %v4796_v53  ;;  %3034 = vmatpush.bf16.msrb.mxu1 %v4924_v56  ;;  %v4748_v53 = vor.u32 %v5940_v40, %v4745_v30  ;;  %v5912_v54 = vld [vmem:[#allocation8 + $0x164] sm:$0xf]  ;;  %v4633_v55 = vld [vmem:[#allocation8 + $0x170] sm:$0xf0]  ;;  %v4876_v56 = vor.u32 %v5972_v44, %v4873_v46 }
 0x205   : > { %v1302_v18 = vmax.f32 %v1300_v61, %v1301_v7  ;;  %v1308_v19 = vmax.f32 %v1306_v62, %v1307_v8  ;;  %v5936_v61 = vld [vmem:[#allocation8 + $0x224] sm:$0xf]  ;;  %v4508_v62 = vor.u32 %v5880_v51, %v4505_v52  ;;  %v4857_v63 = vld [vmem:[#allocation8 + $0x330] sm:$0xf0] }
 0x206   : > { %v1288_v24 = vmax.f32 %v1286_v1, %v1287_v11  ;;  %v1294_v25 = vmax.f32 %v1292_v2, %v1293_v12  ;;  %2994 = vmatpush.bf16.msra.mxu2 %v4556_v57  ;;  %3007 = vmatpush.bf16.msra.mxu3 %v4684_v59  ;;  %v4729_v59 = vld [vmem:[#allocation8 + $0x230] sm:$0xf0]  ;;  %v4636_v2 = vor.u32 %v5912_v54, %v4633_v55  ;;  %v5876_v3 = vld [vmem:[#allocation8 + $0x44] sm:$0xf] }
 0x207   : > { %v1333_v29 = vadd.f32 %v1317_v5, %v1302_v18  ;;  %v1334_v31 = vadd.f32 %v1318_v6, %v1308_v19  ;;  %v4489_v4 = vld [vmem:[#allocation8 + $0x50] sm:$0xf0]  ;;  %v5908_v5 = vld [vmem:[#allocation8 + $0x144] sm:$0xf]  ;;  %v4732_v7 = vor.u32 %v5936_v61, %v4729_v59  ;;  %v4860_v8 = vor.u32 %v5968_v60, %v4857_v63 }
 0x208   : > { %v1289_v36 = vrot.slane %v1288_v24, 1  ;;  %v1295_v37 = vrot.slane %v1294_v25, 1  ;;  %3022 = vmatpush.bf16.msrb.mxu0 %v4780_v13  ;;  %3035 = vmatpush.bf16.msrb.mxu1 %v4908_v14  ;;  %v4617_v6 = vld [vmem:[#allocation8 + $0x150] sm:$0xf0]  ;;  %v5932_v9 = vld [vmem:[#allocation8 + $0x204] sm:$0xf]  ;;  %v4492_v15 = vor.u32 %v5876_v3, %v4489_v4 }
 0x209   : > { %v6972_v41 = vpack.c.bf16 %v1333_v29, %v1333_v29  ;;  %v6974_v42 = vpack.c.bf16 %v1334_v31, %v1334_v31  ;;  %v4713_v10 = vld [vmem:[#allocation8 + $0x210] sm:$0xf0]  ;;  %v5964_v11 = vld [vmem:[#allocation8 + $0x304] sm:$0xf]  ;;  %v4620_v18 = vor.u32 %v5908_v5, %v4617_v6 }
 0x20a   : > { %v1290_v49 = vmax.f32 %v1288_v24, %v1289_v36  ;;  %v1296_v50 = vmax.f32 %v1294_v25, %v1295_v37  ;;  %2995 = vmatpush.bf16.msra.mxu2 %v4540_v20  ;;  %3008 = vmatpush.bf16.msra.mxu3 %v4668_v26  ;;  %v4841_v12 = vld [vmem:[#allocation8 + $0x310] sm:$0xf0]  ;;  %v6088_v13 = vld [vmem:[#allocation8 + $0x6e4] sm:$0xf]  ;;  %v4716_v25 = vor.u32 %v5932_v9, %v4713_v10 }
 0x20b   : > { %2975 = vmatmul.bf16.vlgmr.msra.gmra.mxu0 %v6972_v41  ;;  %2988 = vmatmul.bf16.vlgmr.msra.gmra.mxu1 %v6974_v42  ;;  %v5337_v14 = vld [vmem:[#allocation8 + $0x6f0] sm:$0xf0]  ;;  %v6120_v19 = vld [vmem:[#allocation8 + $0x7e4] sm:$0xf]  ;;  %v4844_v26 = vor.u32 %v5964_v11, %v4841_v12 }
 0x20c   : > { %3023 = vmatpush.bf16.msrb.mxu0 %v4764_v38  ;;  %3036 = vmatpush.bf16.msrb.mxu1 %v4892_v39  ;;  %v1331_v57 = vadd.f32 %v1315_v34, %v1290_v49  ;;  %v1332_v58 = vadd.f32 %v1316_v35, %v1296_v50  ;;  %v5465_v20 = vld [vmem:[#allocation8 + $0x7f0] sm:$0xf0]  ;;  %v5872_v21 = vld [vmem:[#allocation8 + $0x24] sm:$0xf]  ;;  %v5340_v27 = vor.u32 %v6088_v13, %v5337_v14 }
 0x20d   : > { %v4473_v22 = vld [vmem:[#allocation8 + $0x30] sm:$0xf0]  ;;  %v5904_v23 = vld [vmem:[#allocation8 + $0x124] sm:$0xf]  ;;  %v5468_v28 = vor.u32 %v6120_v19, %v5465_v20 }
 0x20e   : > { %2996 = vmatpush.bf16.msra.mxu2 %v4524_v43  ;;  %3009 = vmatpush.bf16.msra.mxu3 %v4652_v45  ;;  %v6978_v0 = vpack.c.bf16 %v1331_v57, %v1331_v57  ;;  %v6980_v1 = vpack.c.bf16 %v1332_v58, %v1332_v58  ;;  %v4601_v24 = vld [vmem:[#allocation8 + $0x130] sm:$0xf0]  ;;  %v6084_v29 = vld [vmem:[#allocation8 + $0x6c4] sm:$0xf]  ;;  %v4476_v33 = vor.u32 %v5872_v21, %v4473_v22 }
 0x20f   : > { %v5321_v31 = vld [vmem:[#allocation8 + $0x6d0] sm:$0xf0]  ;;  %v6116_v32 = vld [vmem:[#allocation8 + $0x7c4] sm:$0xf]  ;;  %v4604_v34 = vor.u32 %v5904_v23, %v4601_v24 }
 0x210   : > { %3024 = vmatpush.bf16.msrb.mxu0 %v4748_v53  ;;  %3037 = vmatpush.bf16.msrb.mxu1 %v4876_v56  ;;  %v5449_v35 = vld [vmem:[#allocation8 + $0x7d0] sm:$0xf0]  ;;  %v5868_v36 = vld [vmem:[#allocation8 + $0x4] sm:$0xf]  ;;  %v5324_v46 = vor.u32 %v6084_v29, %v5321_v31 }
 0x211   : > { %2949 = vmatmul.bf16.vlgmr.msrb.gmra.mxu2 %v6978_v0  ;;  %2962 = vmatmul.bf16.vlgmr.msrb.gmra.mxu3 %v6980_v1  ;;  %v4457_v37 = vld [vmem:[#allocation8 + $0x10] sm:$0xf0]  ;;  %v5900_v38 = vld [vmem:[#allocation8 + $0x104] sm:$0xf]  ;;  %v5452_v49 = vor.u32 %v6116_v32, %v5449_v35 }
 0x212   : > { %2997 = vmatpush.bf16.msra.mxu2 %v4508_v62  ;;  %3010 = vmatpush.bf16.msra.mxu3 %v4636_v2  ;;  %v4585_v39 = vld [vmem:[#allocation8 + $0x110] sm:$0xf0]  ;;  %v6024_v40 = vld [vmem:[#allocation8 + $0x4e4] sm:$0xf]  ;;  %v4460_v45 = vor.u32 %v5868_v36, %v4457_v37 }
 0x213   : > { %v5081_v30 = vld [vmem:[#allocation8 + $0x4f0] sm:$0xf0]  ;;  %v6056_v43 = vld [vmem:[#allocation8 + $0x5e4] sm:$0xf]  ;;  %v4588_v51 = vor.u32 %v5900_v38, %v4585_v39 }
 0x214   : > { %3025 = vmatpush.bf16.msrb.mxu0 %v4732_v7  ;;  %3038 = vmatpush.bf16.msrb.mxu1 %v4860_v8  ;;  %v5209_v44 = vld [vmem:[#allocation8 + $0x5f0] sm:$0xf0]  ;;  %v6080_v50 = vld [vmem:[#allocation8 + $0x6a4] sm:$0xf]  ;;  %v5084_v55 = vor.u32 %v6024_v40, %v5081_v30 }
 0x215   : > { %v5305_v52 = vld [vmem:[#allocation8 + $0x6b0] sm:$0xf0]  ;;  %v6112_v53 = vld [vmem:[#allocation8 + $0x7a4] sm:$0xf]  ;;  %v5212_v56 = vor.u32 %v6056_v43, %v5209_v44 }
 0x216   : > { %2998 = vmatpush.bf16.msra.mxu2 %v4492_v15  ;;  %3011 = vmatpush.bf16.msra.mxu3 %v4620_v18  ;;  %v5433_v54 = vld [vmem:[#allocation8 + $0x7b0] sm:$0xf0]  ;;  %v6020_v57 = vld [vmem:[#allocation8 + $0x4c4] sm:$0xf]  ;;  %v5308_v59 = vor.u32 %v6080_v50, %v5305_v52 }
 0x217   : > { %v5065_v58 = vld [vmem:[#allocation8 + $0x4d0] sm:$0xf0]  ;;  %v6052_v61 = vld [vmem:[#allocation8 + $0x5c4] sm:$0xf]  ;;  %v5436_v60 = vor.u32 %v6112_v53, %v5433_v54 }
 0x218   : > { %3026 = vmatpush.bf16.msrb.mxu0 %v4716_v25  ;;  %3039 = vmatpush.bf16.msrb.mxu1 %v4844_v26  ;;  %v5193_v62 = vld [vmem:[#allocation8 + $0x5d0] sm:$0xf0]  ;;  %v6076_v63 = vld [vmem:[#allocation8 + $0x684] sm:$0xf]  ;;  %v5068_v5 = vor.u32 %v6020_v57, %v5065_v58 }
 0x219   : > { %v5289_v2 = vld [vmem:[#allocation8 + $0x690] sm:$0xf0]  ;;  %v6108_v3 = vld [vmem:[#allocation8 + $0x784] sm:$0xf]  ;;  %v5196_v6 = vor.u32 %v6052_v61, %v5193_v62  ;;  %v4831_v61 = vld [vmem:[#allocation8 + $0x2e8] sm:$0xf] }
 0x21a   : > { %2999 = vmatpush.bf16.msra.mxu2 %v4476_v33  ;;  %3012 = vmatpush.bf16.msra.mxu3 %v4604_v34  ;;  %v5417_v4 = vld [vmem:[#allocation8 + $0x790] sm:$0xf0]  ;;  %v6016_v7 = vld [vmem:[#allocation8 + $0x4a4] sm:$0xf]  ;;  %v5292_v11 = vor.u32 %v6076_v63, %v5289_v2  ;;  %v5963_v62 = vld [vmem:[#allocation8 + $0x2f4] sm:$0xf0] }
 0x21b   : > { %3027 = vmatmul.bf16.vlgmr.msrb.gmra.mxu0 %v6956_v16  ;;  %3040 = vmatmul.bf16.vlgmr.msrb.gmra.mxu1 %v6958_v17  ;;  %v5049_v8 = vld [vmem:[#allocation8 + $0x4b0] sm:$0xf0]  ;;  %v6048_v9 = vld [vmem:[#allocation8 + $0x5a4] sm:$0xf]  ;;  %v5420_v12 = vor.u32 %v6108_v3, %v5417_v4  ;;  %v4959_v63 = vld [vmem:[#allocation8 + $0x3e8] sm:$0xf] }
 0x21c   : > { %3071 = vmatpush.bf16.msra.mxu0 %v5340_v27  ;;  %3084 = vmatpush.bf16.msra.mxu1 %v5468_v28  ;;  %v5177_v10 = vld [vmem:[#allocation8 + $0x5b0] sm:$0xf0]  ;;  %v6072_v13 = vld [vmem:[#allocation8 + $0x664] sm:$0xf]  ;;  %v5052_v19 = vor.u32 %v6016_v7, %v5049_v8  ;;  %v5995_v2 = vld [vmem:[#allocation8 + $0x3f4] sm:$0xf0] }
 0x21d   : > { %v5273_v14 = vld [vmem:[#allocation8 + $0x670] sm:$0xf0]  ;;  %v6104_v15 = vld [vmem:[#allocation8 + $0x764] sm:$0xf]  ;;  %v5180_v20 = vor.u32 %v6048_v9, %v5177_v10  ;;  %v4832_v9 = vor.u32 %v5963_v62, %v4831_v61  ;;  %v4960_v10 = vor.u32 %v5995_v2, %v4959_v63  ;;  %v4767_v61 = vld [vmem:[#allocation8 + $0x268] sm:$0xf] }
 0x21e   : > { %3000 = vmatpush.bf16.msra.mxu2 %v4460_v45  ;;  %3013 = vmatpush.bf16.msra.mxu3 %v4588_v51  ;;  %v5401_v18 = vld [vmem:[#allocation8 + $0x770] sm:$0xf0]  ;;  %v6012_v21 = vld [vmem:[#allocation8 + $0x484] sm:$0xf]  ;;  %v5276_v25 = vor.u32 %v6072_v13, %v5273_v14  ;;  %v4943_v13 = vld [vmem:[#allocation8 + $0x3c8] sm:$0xf] }
 0x21f   : > { %v5033_v22 = vld [vmem:[#allocation8 + $0x490] sm:$0xf0]  ;;  %v6044_v23 = vld [vmem:[#allocation8 + $0x584] sm:$0xf]  ;;  %v5404_v26 = vor.u32 %v6104_v15, %v5401_v18  ;;  %v5991_v18 = vld [vmem:[#allocation8 + $0x3d4] sm:$0xf0] }
 0x220   : > { %3072 = vmatpush.bf16.msra.mxu0 %v5324_v46  ;;  %3085 = vmatpush.bf16.msra.mxu1 %v5452_v49  ;;  %v5161_v24 = vld [vmem:[#allocation8 + $0x590] sm:$0xf0]  ;;  %v6068_v27 = vld [vmem:[#allocation8 + $0x644] sm:$0xf]  ;;  %v5036_v32 = vor.u32 %v6012_v21, %v5033_v22  ;;  %v5947_v62 = vld [vmem:[#allocation8 + $0x274] sm:$0xf0] }
 0x221   : > { %3001 = vmatmul.bf16.vlgmr.msra.gmra.mxu2 %v6962_v47  ;;  %3014 = vmatmul.bf16.vlgmr.msra.gmra.mxu3 %v6964_v48  ;;  %v5257_v28 = vld [vmem:[#allocation8 + $0x650] sm:$0xf0]  ;;  %v6100_v29 = vld [vmem:[#allocation8 + $0x744] sm:$0xf]  ;;  %v5164_v33 = vor.u32 %v6044_v23, %v5161_v24  ;;  %v4575_v23 = vld [vmem:[#allocation8 + $0xe8] sm:$0xf] }
 0x222   : > { %3045 = vmatpush.bf16.msrb.mxu2 %v5084_v55  ;;  %3058 = vmatpush.bf16.msrb.mxu3 %v5212_v56  ;;  %v5385_v31 = vld [vmem:[#allocation8 + $0x750] sm:$0xf0]  ;;  %v6008_v34 = vld [vmem:[#allocation8 + $0x464] sm:$0xf]  ;;  %v5260_v38 = vor.u32 %v6068_v27, %v5257_v28  ;;  %v5899_v24 = vld [vmem:[#allocation8 + $0xf4] sm:$0xf0]  ;;  %v4944_v28 = vor.u32 %v5991_v18, %v4943_v13 }
 0x223   : > { %v5017_v35 = vld [vmem:[#allocation8 + $0x470] sm:$0xf0]  ;;  %v6040_v36 = vld [vmem:[#allocation8 + $0x564] sm:$0xf]  ;;  %v5388_v39 = vor.u32 %v6100_v29, %v5385_v31  ;;  %v4895_v63 = vld [vmem:[#allocation8 + $0x368] sm:$0xf] }
 0x224   : > { %3073 = vmatpush.bf16.msra.mxu0 %v5308_v59  ;;  %3086 = vmatpush.bf16.msra.mxu1 %v5436_v60  ;;  %v5145_v37 = vld [vmem:[#allocation8 + $0x570] sm:$0xf0]  ;;  %v6064_v40 = vld [vmem:[#allocation8 + $0x624] sm:$0xf]  ;;  %v5020_v46 = vor.u32 %v6008_v34, %v5017_v35  ;;  %v4576_v34 = vor.u32 %v5899_v24, %v4575_v23  ;;  %v5979_v2 = vld [vmem:[#allocation8 + $0x374] sm:$0xf0] }
 0x225   : > { %v5241_v30 = vld [vmem:[#allocation8 + $0x630] sm:$0xf0]  ;;  %v6096_v43 = vld [vmem:[#allocation8 + $0x724] sm:$0xf]  ;;  %v5148_v49 = vor.u32 %v6040_v36, %v5145_v37  ;;  %v4927_v36 = vld [vmem:[#allocation8 + $0x3a8] sm:$0xf] }
 0x226   : > { %3046 = vmatpush.bf16.msrb.mxu2 %v5068_v5  ;;  %3059 = vmatpush.bf16.msrb.mxu3 %v5196_v6  ;;  %v5369_v44 = vld [vmem:[#allocation8 + $0x730] sm:$0xf0]  ;;  %v6004_v50 = vld [vmem:[#allocation8 + $0x444] sm:$0xf]  ;;  %v5244_v53 = vor.u32 %v6064_v40, %v5241_v30  ;;  %v5987_v37 = vld [vmem:[#allocation8 + $0x3b4] sm:$0xf0] }
 0x227   : > { %v5001_v45 = vld [vmem:[#allocation8 + $0x450] sm:$0xf0]  ;;  %v6036_v51 = vld [vmem:[#allocation8 + $0x544] sm:$0xf]  ;;  %v5372_v54 = vor.u32 %v6096_v43, %v5369_v44  ;;  %v4687_v40 = vld [vmem:[#allocation8 + $0x1c8] sm:$0xf]  ;;  %v4928_v44 = vor.u32 %v5987_v37, %v4927_v36 }
 0x228   : > { %3074 = vmatpush.bf16.msra.mxu0 %v5292_v11  ;;  %3087 = vmatpush.bf16.msra.mxu1 %v5420_v12  ;;  %v5129_v52 = vld [vmem:[#allocation8 + $0x550] sm:$0xf0]  ;;  %v6060_v55 = vld [vmem:[#allocation8 + $0x604] sm:$0xf]  ;;  %v5004_v59 = vor.u32 %v6004_v50, %v5001_v45  ;;  %v4815_v11 = vld [vmem:[#allocation8 + $0x2c8] sm:$0xf] }
 0x229   : > { %v5225_v56 = vld [vmem:[#allocation8 + $0x610] sm:$0xf0]  ;;  %v6092_v57 = vld [vmem:[#allocation8 + $0x704] sm:$0xf]  ;;  %v5132_v60 = vor.u32 %v6036_v51, %v5129_v52  ;;  %v5959_v12 = vld [vmem:[#allocation8 + $0x2d4] sm:$0xf0] }
 0x22a   : > { %3047 = vmatpush.bf16.msrb.mxu2 %v5052_v19  ;;  %3060 = vmatpush.bf16.msrb.mxu3 %v5180_v20  ;;  %v5353_v58 = vld [vmem:[#allocation8 + $0x710] sm:$0xf0]  ;;  %v6000_v3 = vld [vmem:[#allocation8 + $0x424] sm:$0xf]  ;;  %v5228_v7 = vor.u32 %v6060_v55, %v5225_v56  ;;  %v4816_v27 = vor.u32 %v5959_v12, %v4815_v11  ;;  %v5927_v30 = vld [vmem:[#allocation8 + $0x1d4] sm:$0xf0] }
 0x22b   : > { %v4985_v4 = vld [vmem:[#allocation8 + $0x430] sm:$0xf0]  ;;  %v6032_v5 = vld [vmem:[#allocation8 + $0x524] sm:$0xf]  ;;  %v5356_v8 = vor.u32 %v6092_v57, %v5353_v58  ;;  %v4688_v45 = vor.u32 %v5927_v30, %v4687_v40  ;;  %v4911_v51 = vld [vmem:[#allocation8 + $0x388] sm:$0xf] }
 0x22c   : > { %3075 = vmatpush.bf16.msra.mxu0 %v5276_v25  ;;  %3088 = vmatpush.bf16.msra.mxu1 %v5404_v26  ;;  %v5113_v6 = vld [vmem:[#allocation8 + $0x530] sm:$0xf0]  ;;  %v4988_v14 = vor.u32 %v6000_v3, %v4985_v4  ;;  %v5996_v19 = vld [vmem:[#allocation8 + $0x404] sm:$0xf]  ;;  %v4703_v25 = vld [vmem:[#allocation8 + $0x1e8] sm:$0xf] }
 0x22d   : > { %v5116_v15 = vor.u32 %v6032_v5, %v5113_v6  ;;  %v4969_v20 = vld [vmem:[#allocation8 + $0x410] sm:$0xf0]  ;;  %v6028_v21 = vld [vmem:[#allocation8 + $0x504] sm:$0xf]  ;;  %v5931_v26 = vld [vmem:[#allocation8 + $0x1f4] sm:$0xf0] }
 0x22e   : > { %3048 = vmatpush.bf16.msrb.mxu2 %v5036_v32  ;;  %3061 = vmatpush.bf16.msrb.mxu3 %v5164_v33  ;;  %v5097_v22 = vld [vmem:[#allocation8 + $0x510] sm:$0xf0]  ;;  %v4972_v29 = vor.u32 %v5996_v19, %v4969_v20  ;;  %v4799_v32 = vld [vmem:[#allocation8 + $0x2a8] sm:$0xf]  ;;  %v5955_v33 = vld [vmem:[#allocation8 + $0x2b4] sm:$0xf0]  ;;  %v4704_v35 = vor.u32 %v5931_v26, %v4703_v25 }
 0x22f   : > { %v5100_v31 = vor.u32 %v6028_v21, %v5097_v22  ;;  %v4800_v43 = vor.u32 %v5955_v33, %v4799_v32  ;;  %v5983_v52 = vld [vmem:[#allocation8 + $0x394] sm:$0xf0]  ;;  %v4671_v55 = vld [vmem:[#allocation8 + $0x1a8] sm:$0xf] }
 0x230   : > { %3076 = vmatpush.bf16.msra.mxu0 %v5260_v38  ;;  %3089 = vmatpush.bf16.msra.mxu1 %v5388_v39  ;;  %v4559_v38 = vld [vmem:[#allocation8 + $0xc8] sm:$0xf]  ;;  %v5895_v39 = vld [vmem:[#allocation8 + $0xd4] sm:$0xf0]  ;;  %v4912_v58 = vor.u32 %v5983_v52, %v4911_v51 }
 0x231   : > { %v4560_v50 = vor.u32 %v5895_v39, %v4559_v38  ;;  %v5923_v56 = vld [vmem:[#allocation8 + $0x1b4] sm:$0xf0]  ;;  %v4527_v3 = vld [vmem:[#allocation8 + $0x88] sm:$0xf] }
 0x232   : > { %3049 = vmatpush.bf16.msrb.mxu2 %v5020_v46  ;;  %3062 = vmatpush.bf16.msrb.mxu3 %v5148_v49  ;;  %v4783_v46 = vld [vmem:[#allocation8 + $0x288] sm:$0xf]  ;;  %v5951_v49 = vld [vmem:[#allocation8 + $0x294] sm:$0xf0] }
 0x233   : > { %v4784_v57 = vor.u32 %v5951_v49, %v4783_v46  ;;  %v5887_v4 = vld [vmem:[#allocation8 + $0x94] sm:$0xf0]  ;;  %v4655_v5 = vld [vmem:[#allocation8 + $0x188] sm:$0xf] }
 0x234   : > { %3077 = vmatpush.bf16.msra.mxu0 %v5244_v53  ;;  %3090 = vmatpush.bf16.msra.mxu1 %v5372_v54  ;;  %v4543_v53 = vld [vmem:[#allocation8 + $0xa8] sm:$0xf]  ;;  %v5891_v54 = vld [vmem:[#allocation8 + $0xb4] sm:$0xf0]  ;;  %v4528_v11 = vor.u32 %v5887_v4, %v4527_v3 }
 0x235   : > { %v5919_v6 = vld [vmem:[#allocation8 + $0x194] sm:$0xf0]  ;;  %v4879_v13 = vld [vmem:[#allocation8 + $0x348] sm:$0xf] }
 0x236   : > { %3050 = vmatpush.bf16.msrb.mxu2 %v5004_v59  ;;  %3063 = vmatpush.bf16.msrb.mxu3 %v5132_v60  ;;  %v4544_v59 = vor.u32 %v5891_v54, %v4543_v53  ;;  %v4672_v60 = vor.u32 %v5923_v56, %v4671_v55  ;;  %v4656_v12 = vor.u32 %v5919_v6, %v4655_v5  ;;  %v5883_v18 = vld [vmem:[#allocation8 + $0x74] sm:$0xf0]  ;;  %v4639_v19 = vld [vmem:[#allocation8 + $0x168] sm:$0xf] }
 0x237   : > { %v5915_v20 = vld [vmem:[#allocation8 + $0x174] sm:$0xf0]  ;;  %v4735_v23 = vld [vmem:[#allocation8 + $0x228] sm:$0xf] }
 0x238   : > { %3078 = vmatpush.bf16.msra.mxu0 %v5228_v7  ;;  %3091 = vmatpush.bf16.msra.mxu1 %v5356_v8  ;;  %v4768_v7 = vor.u32 %v5947_v62, %v4767_v61  ;;  %v4896_v8 = vor.u32 %v5979_v2, %v4895_v63  ;;  %v5939_v24 = vld [vmem:[#allocation8 + $0x234] sm:$0xf0]  ;;  %v4640_v26 = vor.u32 %v5915_v20, %v4639_v19  ;;  %v4623_v32 = vld [vmem:[#allocation8 + $0x148] sm:$0xf] }
 0x239   : > { %v5911_v33 = vld [vmem:[#allocation8 + $0x154] sm:$0xf0]  ;;  %v4719_v36 = vld [vmem:[#allocation8 + $0x208] sm:$0xf] }
 0x23a   : > { %3051 = vmatpush.bf16.msrb.mxu2 %v4988_v14  ;;  %3064 = vmatpush.bf16.msrb.mxu3 %v5116_v15  ;;  %v5975_v14 = vld [vmem:[#allocation8 + $0x354] sm:$0xf0]  ;;  %v4511_v15 = vld [vmem:[#allocation8 + $0x68] sm:$0xf]  ;;  %v4624_v40 = vor.u32 %v5911_v33, %v4623_v32 }
 0x23b   : > { %3079 = vmatmul.bf16.vlgmr.msra.gmra.mxu0 %v6972_v41  ;;  %3092 = vmatmul.bf16.vlgmr.msra.gmra.mxu1 %v6974_v42  ;;  %v4880_v22 = vor.u32 %v5975_v14, %v4879_v13  ;;  %v4512_v25 = vor.u32 %v5883_v18, %v4511_v15  ;;  %v5935_v37 = vld [vmem:[#allocation8 + $0x214] sm:$0xf0]  ;;  %v4847_v38 = vld [vmem:[#allocation8 + $0x308] sm:$0xf] }
 0x23c   : > { %3123 = vmatpush.bf16.msrb.mxu0 %v4832_v9  ;;  %3136 = vmatpush.bf16.msrb.mxu1 %v4960_v10  ;;  %v4751_v9 = vld [vmem:[#allocation8 + $0x248] sm:$0xf]  ;;  %v5943_v10 = vld [vmem:[#allocation8 + $0x254] sm:$0xf0]  ;;  %v4720_v53 = vor.u32 %v5935_v37, %v4719_v36 }
 0x23d   : > { %v4752_v21 = vor.u32 %v5943_v10, %v4751_v9  ;;  %v5967_v30 = vld [vmem:[#allocation8 + $0x314] sm:$0xf0]  ;;  %v5471_v46 = vld [vmem:[#allocation8 + $0x7e8] sm:$0xf] }
 0x23e   : > { %3052 = vmatpush.bf16.msrb.mxu2 %v4972_v29  ;;  %3065 = vmatpush.bf16.msrb.mxu3 %v5100_v31  ;;  %v4495_v29 = vld [vmem:[#allocation8 + $0x48] sm:$0xf]  ;;  %v5879_v31 = vld [vmem:[#allocation8 + $0x54] sm:$0xf0]  ;;  %v4848_v54 = vor.u32 %v5967_v30, %v4847_v38 }
 0x23f   : > { %v4496_v39 = vor.u32 %v5879_v31, %v4495_v29  ;;  %v6123_v49 = vld [vmem:[#allocation8 + $0x7f4] sm:$0xf0]  ;;  %v4607_v51 = vld [vmem:[#allocation8 + $0x128] sm:$0xf] }
 0x240   : > { %3124 = vmatpush.bf16.msrb.mxu0 %v4816_v27  ;;  %3137 = vmatpush.bf16.msrb.mxu1 %v4944_v28  ;;  %v4863_v27 = vld [vmem:[#allocation8 + $0x328] sm:$0xf]  ;;  %v5971_v28 = vld [vmem:[#allocation8 + $0x334] sm:$0xf0]  ;;  %v5472_v56 = vor.u32 %v6123_v49, %v5471_v46 }
 0x241   : > { %3053 = vmatmul.bf16.vlgmr.msrb.gmra.mxu2 %v6978_v0  ;;  %3066 = vmatmul.bf16.vlgmr.msrb.gmra.mxu3 %v6980_v1  ;;  %v5907_v52 = vld [vmem:[#allocation8 + $0x134] sm:$0xf0]  ;;  %v5455_v61 = vld [vmem:[#allocation8 + $0x7c8] sm:$0xf] }
 0x242   : > { %3097 = vmatpush.bf16.msra.mxu2 %v4576_v34  ;;  %3110 = vmatpush.bf16.msra.mxu3 %v4704_v35  ;;  %v4736_v34 = vor.u32 %v5939_v24, %v4735_v23  ;;  %v4864_v35 = vor.u32 %v5971_v28, %v4863_v27  ;;  %v4463_v63 = vld [vmem:[#allocation8 + $0x8] sm:$0xf]  ;;  %v5871_v2 = vld [vmem:[#allocation8 + $0x14] sm:$0xf0] }
 0x243   : > { %v4591_v3 = vld [vmem:[#allocation8 + $0x108] sm:$0xf]  ;;  %v5903_v4 = vld [vmem:[#allocation8 + $0x114] sm:$0xf0] }
 0x244   : > { %3125 = vmatpush.bf16.msrb.mxu0 %v4800_v43  ;;  %3138 = vmatpush.bf16.msrb.mxu1 %v4928_v44  ;;  %v5343_v43 = vld [vmem:[#allocation8 + $0x6e8] sm:$0xf]  ;;  %v6091_v44 = vld [vmem:[#allocation8 + $0x6f4] sm:$0xf0] }
 0x245   : > { %v5344_v55 = vor.u32 %v6091_v44, %v5343_v43  ;;  %v5087_v5 = vld [vmem:[#allocation8 + $0x4e8] sm:$0xf]  ;;  %v6027_v6 = vld [vmem:[#allocation8 + $0x4f4] sm:$0xf0] }
 0x246   : > { %3098 = vmatpush.bf16.msra.mxu2 %v4560_v50  ;;  %3111 = vmatpush.bf16.msra.mxu3 %v4688_v45  ;;  %v4479_v50 = vld [vmem:[#allocation8 + $0x28] sm:$0xf]  ;;  %v5875_v45 = vld [vmem:[#allocation8 + $0x34] sm:$0xf0]  ;;  %v5088_v15 = vor.u32 %v6027_v6, %v5087_v5 }
 0x247   : > { %v4480_v62 = vor.u32 %v5875_v45, %v4479_v50  ;;  %v5311_v13 = vld [vmem:[#allocation8 + $0x6a8] sm:$0xf]  ;;  %v6083_v14 = vld [vmem:[#allocation8 + $0x6b4] sm:$0xf0] }
 0x248   : > { %3126 = vmatpush.bf16.msrb.mxu0 %v4784_v57  ;;  %3139 = vmatpush.bf16.msrb.mxu1 %v4912_v58  ;;  %v5327_v57 = vld [vmem:[#allocation8 + $0x6c8] sm:$0xf]  ;;  %v6087_v58 = vld [vmem:[#allocation8 + $0x6d4] sm:$0xf0] }
 0x249   : > { %v5328_v9 = vor.u32 %v6087_v58, %v5327_v57  ;;  %v5439_v19 = vld [vmem:[#allocation8 + $0x7a8] sm:$0xf]  ;;  %v6115_v20 = vld [vmem:[#allocation8 + $0x7b4] sm:$0xf0] }
 0x24a   : > { %3099 = vmatpush.bf16.msra.mxu2 %v4544_v59  ;;  %3112 = vmatpush.bf16.msra.mxu3 %v4672_v60  ;;  %v4608_v59 = vor.u32 %v5907_v52, %v4607_v51  ;;  %v6119_v60 = vld [vmem:[#allocation8 + $0x7d4] sm:$0xf0]  ;;  %v5199_v23 = vld [vmem:[#allocation8 + $0x5c8] sm:$0xf] }
 0x24b   : > { %v5456_v10 = vor.u32 %v6119_v60, %v5455_v61  ;;  %v6055_v24 = vld [vmem:[#allocation8 + $0x5d4] sm:$0xf0]  ;;  %v5295_v27 = vld [vmem:[#allocation8 + $0x688] sm:$0xf] }
 0x24c   : > { %3127 = vmatpush.bf16.msrb.mxu0 %v4768_v7  ;;  %3140 = vmatpush.bf16.msrb.mxu1 %v4896_v8  ;;  %v5215_v7 = vld [vmem:[#allocation8 + $0x5e8] sm:$0xf]  ;;  %v6059_v8 = vld [vmem:[#allocation8 + $0x5f4] sm:$0xf0]  ;;  %v5200_v31 = vor.u32 %v6055_v24, %v5199_v23 }
 0x24d   : > { %v5216_v18 = vor.u32 %v6059_v8, %v5215_v7  ;;  %v6079_v28 = vld [vmem:[#allocation8 + $0x694] sm:$0xf0]  ;;  %v5423_v32 = vld [vmem:[#allocation8 + $0x788] sm:$0xf] }
 0x24e   : > { %3100 = vmatpush.bf16.msra.mxu2 %v4528_v11  ;;  %3113 = vmatpush.bf16.msra.mxu3 %v4656_v12  ;;  %v4464_v11 = vor.u32 %v5871_v2, %v4463_v63  ;;  %v4592_v12 = vor.u32 %v5903_v4, %v4591_v3  ;;  %v6111_v33 = vld [vmem:[#allocation8 + $0x794] sm:$0xf0]  ;;  %v5183_v36 = vld [vmem:[#allocation8 + $0x5a8] sm:$0xf]  ;;  %v5296_v38 = vor.u32 %v6079_v28, %v5295_v27  ;;  %v5993_v27 = vld [vmem:[#allocation8 + $0x3ec] sm:$0xf] }
 0x24f   : > { %v6051_v37 = vld [vmem:[#allocation8 + $0x5b4] sm:$0xf0]  ;;  %v5407_v46 = vld [vmem:[#allocation8 + $0x768] sm:$0xf]  ;;  %v4961_v28 = vld [vmem:[#allocation8 + $0x3f8] sm:$0xf0] }
 0x250   : > { %3128 = vmatpush.bf16.msrb.mxu0 %v4752_v21  ;;  %3141 = vmatpush.bf16.msrb.mxu1 %v4880_v22  ;;  %v5071_v21 = vld [vmem:[#allocation8 + $0x4c8] sm:$0xf]  ;;  %v6023_v22 = vld [vmem:[#allocation8 + $0x4d4] sm:$0xf0]  ;;  %v5184_v44 = vor.u32 %v6051_v37, %v5183_v36  ;;  %v4964_v37 = vor.u32 %v5993_v27, %v4961_v28 }
 0x251   : > { %v5072_v29 = vor.u32 %v6023_v22, %v5071_v21  ;;  %v6075_v30 = vld [vmem:[#allocation8 + $0x674] sm:$0xf0]  ;;  %v5039_v50 = vld [vmem:[#allocation8 + $0x488] sm:$0xf] }
 0x252   : > { %3101 = vmatpush.bf16.msra.mxu2 %v4512_v25  ;;  %3114 = vmatpush.bf16.msra.mxu3 %v4640_v26  ;;  %v5312_v25 = vor.u32 %v6083_v14, %v5311_v13  ;;  %v5440_v26 = vor.u32 %v6115_v20, %v5439_v19  ;;  %v6107_v49 = vld [vmem:[#allocation8 + $0x774] sm:$0xf0]  ;;  %v5167_v51 = vld [vmem:[#allocation8 + $0x588] sm:$0xf] }
 0x253   : > { %v6015_v45 = vld [vmem:[#allocation8 + $0x494] sm:$0xf0]  ;;  %v5391_v61 = vld [vmem:[#allocation8 + $0x748] sm:$0xf] }
 0x254   : > { %3129 = vmatpush.bf16.msrb.mxu0 %v4736_v34  ;;  %3142 = vmatpush.bf16.msrb.mxu1 %v4864_v35  ;;  %v5055_v34 = vld [vmem:[#allocation8 + $0x4a8] sm:$0xf]  ;;  %v6019_v35 = vld [vmem:[#allocation8 + $0x4b4] sm:$0xf0]  ;;  %v5040_v57 = vor.u32 %v6015_v45, %v5039_v50 }
 0x255   : > { %v5056_v43 = vor.u32 %v6019_v35, %v5055_v34  ;;  %v6047_v52 = vld [vmem:[#allocation8 + $0x594] sm:$0xf0]  ;;  %v5151_v63 = vld [vmem:[#allocation8 + $0x568] sm:$0xf] }
 0x256   : > { %3102 = vmatpush.bf16.msra.mxu2 %v4496_v39  ;;  %3115 = vmatpush.bf16.msra.mxu3 %v4624_v40  ;;  %v5424_v39 = vor.u32 %v6111_v33, %v5423_v32  ;;  %v5279_v40 = vld [vmem:[#allocation8 + $0x668] sm:$0xf]  ;;  %v5168_v58 = vor.u32 %v6047_v52, %v5167_v51  ;;  %v6011_v60 = vld [vmem:[#allocation8 + $0x474] sm:$0xf0]  ;;  %v5897_v51 = vld [vmem:[#allocation8 + $0xec] sm:$0xf] }
 0x257   : > { %v6043_v2 = vld [vmem:[#allocation8 + $0x574] sm:$0xf0]  ;;  %v5247_v5 = vld [vmem:[#allocation8 + $0x628] sm:$0xf]  ;;  %v4577_v52 = vld [vmem:[#allocation8 + $0xf8] sm:$0xf0] }
 0x258   : > { %3130 = vmatpush.bf16.msrb.mxu0 %v4720_v53  ;;  %3143 = vmatpush.bf16.msrb.mxu1 %v4848_v54  ;;  %v5280_v53 = vor.u32 %v6075_v30, %v5279_v40  ;;  %v5408_v54 = vor.u32 %v6107_v49, %v5407_v46  ;;  %v6067_v6 = vld [vmem:[#allocation8 + $0x634] sm:$0xf0]  ;;  %v5152_v8 = vor.u32 %v6043_v2, %v5151_v63  ;;  %v5135_v13 = vld [vmem:[#allocation8 + $0x548] sm:$0xf]  ;;  %v5989_v40 = vld [vmem:[#allocation8 + $0x3cc] sm:$0xf] }
 0x259   : > { %v6039_v14 = vld [vmem:[#allocation8 + $0x554] sm:$0xf0]  ;;  %v5231_v19 = vld [vmem:[#allocation8 + $0x608] sm:$0xf]  ;;  %v5985_v63 = vld [vmem:[#allocation8 + $0x3ac] sm:$0xf] }
 0x25a   : > { %3103 = vmatpush.bf16.msra.mxu2 %v4480_v62  ;;  %3116 = vmatpush.bf16.msra.mxu3 %v4608_v59  ;;  %v6103_v62 = vld [vmem:[#allocation8 + $0x754] sm:$0xf0]  ;;  %v5023_v59 = vld [vmem:[#allocation8 + $0x468] sm:$0xf]  ;;  %v5136_v23 = vor.u32 %v6039_v14, %v5135_v13  ;;  %v4929_v2 = vld [vmem:[#allocation8 + $0x3b8] sm:$0xf0] }
 0x25b   : > { %3131 = vmatmul.bf16.vlgmr.msrb.gmra.mxu0 %v6956_v16  ;;  %3144 = vmatmul.bf16.vlgmr.msrb.gmra.mxu1 %v6958_v17  ;;  %v5392_v4 = vor.u32 %v6103_v62, %v5391_v61  ;;  %v5024_v7 = vor.u32 %v6011_v60, %v5023_v59  ;;  %v6063_v20 = vld [vmem:[#allocation8 + $0x614] sm:$0xf0]  ;;  %v5359_v21 = vld [vmem:[#allocation8 + $0x708] sm:$0xf]  ;;  %v5953_v61 = vld [vmem:[#allocation8 + $0x2ac] sm:$0xf]  ;;  %v4580_v59 = vor.u32 %v5897_v51, %v4577_v52 }
 0x25c   : > { %3175 = vmatpush.bf16.msra.mxu0 %v5344_v55  ;;  %3188 = vmatpush.bf16.msra.mxu1 %v5472_v56  ;;  %v5263_v55 = vld [vmem:[#allocation8 + $0x648] sm:$0xf]  ;;  %v6071_v56 = vld [vmem:[#allocation8 + $0x654] sm:$0xf0]  ;;  %v5232_v34 = vor.u32 %v6063_v20, %v5231_v19  ;;  %v4801_v62 = vld [vmem:[#allocation8 + $0x2b8] sm:$0xf0] }
 0x25d   : > { %v5264_v3 = vor.u32 %v6071_v56, %v5263_v55  ;;  %v6095_v24 = vld [vmem:[#allocation8 + $0x714] sm:$0xf0]  ;;  %v5119_v32 = vld [vmem:[#allocation8 + $0x528] sm:$0xf]  ;;  %v5889_v19 = vld [vmem:[#allocation8 + $0xac] sm:$0xf] }
 0x25e   : > { %3104 = vmatpush.bf16.msra.mxu2 %v4464_v11  ;;  %3117 = vmatpush.bf16.msra.mxu3 %v4592_v12  ;;  %v5007_v11 = vld [vmem:[#allocation8 + $0x448] sm:$0xf]  ;;  %v6007_v12 = vld [vmem:[#allocation8 + $0x454] sm:$0xf0]  ;;  %v5360_v35 = vor.u32 %v6095_v24, %v5359_v21  ;;  %v4545_v20 = vld [vmem:[#allocation8 + $0xb8] sm:$0xf0] }
 0x25f   : > { %v5008_v22 = vor.u32 %v6007_v12, %v5007_v11  ;;  %v6035_v33 = vld [vmem:[#allocation8 + $0x534] sm:$0xf0]  ;;  %v4975_v46 = vld [vmem:[#allocation8 + $0x408] sm:$0xf]  ;;  %v5921_v21 = vld [vmem:[#allocation8 + $0x1ac] sm:$0xf]  ;;  %v4548_v27 = vor.u32 %v5889_v19, %v4545_v20 }
 0x260   : > { %3176 = vmatpush.bf16.msra.mxu0 %v5328_v9  ;;  %3189 = vmatpush.bf16.msra.mxu1 %v5456_v10  ;;  %v5375_v9 = vld [vmem:[#allocation8 + $0x728] sm:$0xf]  ;;  %v6099_v10 = vld [vmem:[#allocation8 + $0x734] sm:$0xf0]  ;;  %v4513_v51 = vld [vmem:[#allocation8 + $0x78] sm:$0xf0] }
 0x261   : > { %3105 = vmatmul.bf16.vlgmr.msra.gmra.mxu2 %v6962_v47  ;;  %3118 = vmatmul.bf16.vlgmr.msra.gmra.mxu3 %v6964_v48  ;;  %v5999_v49 = vld [vmem:[#allocation8 + $0x414] sm:$0xf0]  ;;  %v5103_v50 = vld [vmem:[#allocation8 + $0x508] sm:$0xf] }
 0x262   : > { %3149 = vmatpush.bf16.msrb.mxu2 %v5088_v15  ;;  %3162 = vmatpush.bf16.msrb.mxu3 %v5216_v18  ;;  %v5248_v15 = vor.u32 %v6067_v6, %v5247_v5  ;;  %v5376_v18 = vor.u32 %v6099_v10, %v5375_v9  ;;  %v6031_v45 = vld [vmem:[#allocation8 + $0x514] sm:$0xf0]  ;;  %v5925_v5 = vld [vmem:[#allocation8 + $0x1cc] sm:$0xf]  ;;  %v4689_v6 = vld [vmem:[#allocation8 + $0x1d8] sm:$0xf0] }
 0x263   : > { %v5949_v9 = vld [vmem:[#allocation8 + $0x28c] sm:$0xf]  ;;  %v4785_v10 = vld [vmem:[#allocation8 + $0x298] sm:$0xf0]  ;;  %v4692_v14 = vor.u32 %v5925_v5, %v4689_v6 }
 0x264   : > { %3177 = vmatpush.bf16.msra.mxu0 %v5312_v25  ;;  %3190 = vmatpush.bf16.msra.mxu1 %v5440_v26  ;;  %v5961_v25 = vld [vmem:[#allocation8 + $0x2ec] sm:$0xf]  ;;  %v4833_v26 = vld [vmem:[#allocation8 + $0x2f8] sm:$0xf0] }
 0x265   : > { %v4836_v36 = vor.u32 %v5961_v25, %v4833_v26  ;;  %v5945_v25 = vld [vmem:[#allocation8 + $0x26c] sm:$0xf]  ;;  %v4769_v26 = vld [vmem:[#allocation8 + $0x278] sm:$0xf0] }
 0x266   : > { %3150 = vmatpush.bf16.msrb.mxu2 %v5072_v29  ;;  %3163 = vmatpush.bf16.msrb.mxu3 %v5200_v31  ;;  %v4991_v29 = vld [vmem:[#allocation8 + $0x428] sm:$0xf]  ;;  %v6003_v31 = vld [vmem:[#allocation8 + $0x434] sm:$0xf0]  ;;  %v4497_v5 = vld [vmem:[#allocation8 + $0x58] sm:$0xf0] }
 0x267   : > { %v4992_v30 = vor.u32 %v6003_v31, %v4991_v29  ;;  %v5977_v29 = vld [vmem:[#allocation8 + $0x36c] sm:$0xf]  ;;  %v4897_v31 = vld [vmem:[#allocation8 + $0x378] sm:$0xf0] }
 0x268   : > { %3178 = vmatpush.bf16.msra.mxu0 %v5296_v38  ;;  %3191 = vmatpush.bf16.msra.mxu1 %v5424_v39  ;;  %v5957_v38 = vld [vmem:[#allocation8 + $0x2cc] sm:$0xf]  ;;  %v4817_v39 = vld [vmem:[#allocation8 + $0x2d8] sm:$0xf0] }
 0x269   : > { %v4820_v55 = vor.u32 %v5957_v38, %v4817_v39  ;;  %v4900_v38 = vor.u32 %v5977_v29, %v4897_v31  ;;  %v5941_v39 = vld [vmem:[#allocation8 + $0x24c] sm:$0xf]  ;;  %v4481_v29 = vld [vmem:[#allocation8 + $0x38] sm:$0xf0] }
 0x26a   : > { %3151 = vmatpush.bf16.msrb.mxu2 %v5056_v43  ;;  %3164 = vmatpush.bf16.msrb.mxu3 %v5184_v44  ;;  %v5120_v43 = vor.u32 %v6035_v33, %v5119_v32  ;;  %v4945_v44 = vld [vmem:[#allocation8 + $0x3d8] sm:$0xf0]  ;;  %v5885_v32 = vld [vmem:[#allocation8 + $0x8c] sm:$0xf] }
 0x26b   : > { %v4948_v56 = vor.u32 %v5989_v40, %v4945_v44  ;;  %v4529_v33 = vld [vmem:[#allocation8 + $0x98] sm:$0xf0]  ;;  %v5909_v6 = vld [vmem:[#allocation8 + $0x14c] sm:$0xf] }
 0x26c   : > { %3179 = vmatpush.bf16.msra.mxu0 %v5280_v53  ;;  %3192 = vmatpush.bf16.msra.mxu1 %v5408_v54  ;;  %v5929_v53 = vld [vmem:[#allocation8 + $0x1ec] sm:$0xf]  ;;  %v4705_v54 = vld [vmem:[#allocation8 + $0x1f8] sm:$0xf0] }
 0x26d   : > { %v4708_v60 = vor.u32 %v5929_v53, %v4705_v54  ;;  %v4753_v40 = vld [vmem:[#allocation8 + $0x258] sm:$0xf0]  ;;  %v5913_v53 = vld [vmem:[#allocation8 + $0x16c] sm:$0xf] }
 0x26e   : > { %3152 = vmatpush.bf16.msrb.mxu2 %v5040_v57  ;;  %3165 = vmatpush.bf16.msrb.mxu3 %v5168_v58  ;;  %v4976_v57 = vor.u32 %v5999_v49, %v4975_v46  ;;  %v5104_v58 = vor.u32 %v6031_v45, %v5103_v50  ;;  %v4532_v46 = vor.u32 %v5885_v32, %v4529_v33  ;;  %v4881_v50 = vld [vmem:[#allocation8 + $0x358] sm:$0xf0]  ;;  %v5881_v45 = vld [vmem:[#allocation8 + $0x6c] sm:$0xf] }
 0x26f   : > { %v4641_v54 = vld [vmem:[#allocation8 + $0x178] sm:$0xf0]  ;;  %v5905_v31 = vld [vmem:[#allocation8 + $0x12c] sm:$0xf] }
 0x270   : > { %3180 = vmatpush.bf16.msra.mxu0 %v5264_v3  ;;  %3193 = vmatpush.bf16.msra.mxu1 %v5392_v4  ;;  %v5893_v3 = vld [vmem:[#allocation8 + $0xcc] sm:$0xf]  ;;  %v4561_v4 = vld [vmem:[#allocation8 + $0xd8] sm:$0xf0] }
 0x271   : > { %v4564_v13 = vor.u32 %v5893_v3, %v4561_v4  ;;  %v5877_v3 = vld [vmem:[#allocation8 + $0x4c] sm:$0xf]  ;;  %v4609_v32 = vld [vmem:[#allocation8 + $0x138] sm:$0xf0] }
 0x272   : > { %3153 = vmatpush.bf16.msrb.mxu2 %v5024_v7  ;;  %3166 = vmatpush.bf16.msrb.mxu3 %v5152_v8  ;;  %v4804_v7 = vor.u32 %v5953_v61, %v4801_v62  ;;  %v4932_v8 = vor.u32 %v5985_v63, %v4929_v2  ;;  %v5969_v63 = vld [vmem:[#allocation8 + $0x32c] sm:$0xf]  ;;  %v4865_v2 = vld [vmem:[#allocation8 + $0x338] sm:$0xf0]  ;;  %v4500_v20 = vor.u32 %v5877_v3, %v4497_v5 }
 0x273   : > { %v5441_v5 = vld [vmem:[#allocation8 + $0x7b8] sm:$0xf0] }
 0x274   : > { %3181 = vmatpush.bf16.msra.mxu0 %v5248_v15  ;;  %3194 = vmatpush.bf16.msra.mxu1 %v5376_v18  ;;  %v5981_v15 = vld [vmem:[#allocation8 + $0x38c] sm:$0xf]  ;;  %v4913_v18 = vld [vmem:[#allocation8 + $0x398] sm:$0xf0] }
 0x275   : > { %v4916_v24 = vor.u32 %v5981_v15, %v4913_v18  ;;  %v5965_v15 = vld [vmem:[#allocation8 + $0x30c] sm:$0xf] }
 0x276   : > { %3154 = vmatpush.bf16.msrb.mxu2 %v5008_v22  ;;  %3167 = vmatpush.bf16.msrb.mxu3 %v5136_v23  ;;  %v4673_v22 = vld [vmem:[#allocation8 + $0x1b8] sm:$0xf0]  ;;  %v4788_v23 = vor.u32 %v5949_v9, %v4785_v10  ;;  %v4868_v10 = vor.u32 %v5969_v63, %v4865_v2 }
 0x277   : > { %v4676_v28 = vor.u32 %v5921_v21, %v4673_v22  ;;  %v4849_v22 = vld [vmem:[#allocation8 + $0x318] sm:$0xf0] }
 0x278   : > { %3182 = vmatpush.bf16.msra.mxu0 %v5232_v34  ;;  %3195 = vmatpush.bf16.msra.mxu1 %v5360_v35  ;;  %v6998_v11 = vpop.f32.mrf.mxu0  ;;  %v7000_v12 = vpop.f32.mrf.mxu1  ;;  %v5917_v34 = vld [vmem:[#allocation8 + $0x18c] sm:$0xf]  ;;  %v4657_v35 = vld [vmem:[#allocation8 + $0x198] sm:$0xf0] }
 0x279   : > { %v4660_v49 = vor.u32 %v5917_v34, %v4657_v35  ;;  %v4852_v34 = vor.u32 %v5965_v15, %v4849_v22  ;;  %v5313_v63 = vld [vmem:[#allocation8 + $0x6b8] sm:$0xf0] }
 0x27a   : > { %3155 = vmatpush.bf16.msrb.mxu2 %v4992_v30  ;;  %3168 = vmatpush.bf16.msrb.mxu3 %v5120_v43  ;;  %v5973_v30 = vld [vmem:[#allocation8 + $0x34c] sm:$0xf] }
 0x27b   : > { %3183 = vmatmul.bf16.vlgmr.msra.gmra.mxu0 %v6972_v41  ;;  %3196 = vmatmul.bf16.vlgmr.msra.gmra.mxu1 %v6974_v42 }
 0x27c   : > { %3227 = vmatpush.bf16.msrb.mxu0 %v4836_v36  ;;  %3240 = vmatpush.bf16.msrb.mxu1 %v4964_v37  ;;  %v7004_v36 = vld [vmem:[#allocation9] sm:$0xf]  ;;  %v4772_v37 = vor.u32 %v5945_v25, %v4769_v26  ;;  %v6121_v26 = vld [vmem:[#allocation8 + $0x7ec] sm:$0xf] }
 0x27d   : > { %v2881_v52 = vperm.slane %v7004_v36, 0 }
 0x27e   : > { %3156 = vmatpush.bf16.msrb.mxu2 %v4976_v57  ;;  %3169 = vmatpush.bf16.msrb.mxu3 %v5104_v58  ;;  %v5937_v57 = vld [vmem:[#allocation8 + $0x22c] sm:$0xf]  ;;  %v4737_v58 = vld [vmem:[#allocation8 + $0x238] sm:$0xf0] }
 0x27f   : > { %v4740_v9 = vor.u32 %v5937_v57, %v4737_v58 }
 0x280   : > { %3228 = vmatpush.bf16.msrb.mxu0 %v4820_v55  ;;  %3241 = vmatpush.bf16.msrb.mxu1 %v4948_v56  ;;  %v2926_v43 = vpop.f32.mrf.mxu0  ;;  %v2939_v44 = vpop.f32.mrf.mxu1  ;;  %v4756_v55 = vor.u32 %v5941_v39, %v4753_v40  ;;  %v4884_v56 = vor.u32 %v5973_v30, %v4881_v50  ;;  %v6085_v30 = vld [vmem:[#allocation8 + $0x6cc] sm:$0xf] }
 0x281   : > { %3157 = vmatmul.bf16.vlgmr.msrb.gmra.mxu2 %v6978_v0  ;;  %3170 = vmatmul.bf16.vlgmr.msrb.gmra.mxu3 %v6980_v1  ;;  %v6117_v43 = vld [vmem:[#allocation8 + $0x7cc] sm:$0xf] }
 0x282   : > { %3201 = vmatpush.bf16.msra.mxu2 %v4580_v59  ;;  %3214 = vmatpush.bf16.msra.mxu3 %v4708_v60  ;;  %v4516_v59 = vor.u32 %v5881_v45, %v4513_v51  ;;  %v4644_v60 = vor.u32 %v5913_v53, %v4641_v54  ;;  %v5869_v50 = vld [vmem:[#allocation8 + $0xc] sm:$0xf]  ;;  %v4465_v45 = vld [vmem:[#allocation8 + $0x18] sm:$0xf0] }
 0x283   : > { %v5901_v51 = vld [vmem:[#allocation8 + $0x10c] sm:$0xf] }
 0x284   : > { %3229 = vmatpush.bf16.msrb.mxu0 %v4804_v7  ;;  %3242 = vmatpush.bf16.msrb.mxu1 %v4932_v8  ;;  %v2898_v61 = vpop.f32.mrf.mxu2  ;;  %v2911_v62 = vpop.f32.mrf.mxu3  ;;  %v4625_v7 = vld [vmem:[#allocation8 + $0x158] sm:$0xf0]  ;;  %v6025_v53 = vld [vmem:[#allocation8 + $0x4ec] sm:$0xf] }
 0x285   : > { %v2899_v4 = vadd.f32 %v2898_v61, %v2881_v52  ;;  %v4628_v21 = vor.u32 %v5909_v6, %v4625_v7  ;;  %v4593_v52 = vld [vmem:[#allocation8 + $0x118] sm:$0xf0]  ;;  %v6057_v54 = vld [vmem:[#allocation8 + $0x5ec] sm:$0xf] }
 0x286   : > { %3202 = vmatpush.bf16.msra.mxu2 %v4564_v13  ;;  %3215 = vmatpush.bf16.msra.mxu3 %v4692_v14  ;;  %v5933_v13 = vld [vmem:[#allocation8 + $0x20c] sm:$0xf]  ;;  %v4721_v14 = vld [vmem:[#allocation8 + $0x218] sm:$0xf0] }
 0x287   : > { %v2912_v8 = vadd.f32 %v2911_v62, %v2899_v4  ;;  %v4724_v33 = vor.u32 %v5933_v13, %v4721_v14  ;;  %v4468_v62 = vor.u32 %v5869_v50, %v4465_v45  ;;  %v6113_v4 = vld [vmem:[#allocation8 + $0x7ac] sm:$0xf]  ;;  %v5073_v7 = vld [vmem:[#allocation8 + $0x4d8] sm:$0xf0] }
 0x288   : > { %3230 = vmatpush.bf16.msrb.mxu0 %v4788_v23  ;;  %3243 = vmatpush.bf16.msrb.mxu1 %v4916_v24  ;;  %v7007_v18 = vpop.f32.mrf.mxu0  ;;  %v7009_v19 = vpop.f32.mrf.mxu1  ;;  %v6089_v23 = vld [vmem:[#allocation8 + $0x6ec] sm:$0xf]  ;;  %v5345_v24 = vld [vmem:[#allocation8 + $0x6f8] sm:$0xf0] }
 0x289   : > { %v2925_v25 = vadd.f32 %v6998_v11, %v2912_v8  ;;  %v5348_v39 = vor.u32 %v6089_v23, %v5345_v24  ;;  %v5329_v11 = vld [vmem:[#allocation8 + $0x6d8] sm:$0xf0]  ;;  %v6021_v6 = vld [vmem:[#allocation8 + $0x4cc] sm:$0xf] }
 0x28a   : > { %3203 = vmatpush.bf16.msra.mxu2 %v4548_v27  ;;  %3216 = vmatpush.bf16.msra.mxu3 %v4676_v28  ;;  %v5473_v27 = vld [vmem:[#allocation8 + $0x7f8] sm:$0xf0]  ;;  %v5873_v28 = vld [vmem:[#allocation8 + $0x2c] sm:$0xf]  ;;  %v5332_v58 = vor.u32 %v6085_v30, %v5329_v11 }
 0x28b   : > { %v2938_v35 = vadd.f32 %v7000_v12, %v2925_v25  ;;  %v5476_v40 = vor.u32 %v6121_v26, %v5473_v27  ;;  %v4484_v44 = vor.u32 %v5873_v28, %v4481_v29  ;;  %v5089_v12 = vld [vmem:[#allocation8 + $0x4f8] sm:$0xf0]  ;;  %v6053_v8 = vld [vmem:[#allocation8 + $0x5cc] sm:$0xf] }
 0x28c   : > { %3231 = vmatpush.bf16.msrb.mxu0 %v4772_v37  ;;  %3244 = vmatpush.bf16.msrb.mxu1 %v4900_v38  ;;  %v2900_v37 = vpop.f32.mrf.mxu2  ;;  %v2913_v38 = vpop.f32.mrf.mxu3  ;;  %v5092_v2 = vor.u32 %v6025_v53, %v5089_v12  ;;  %v6109_v23 = vld [vmem:[#allocation8 + $0x78c] sm:$0xf]  ;;  %v5425_v24 = vld [vmem:[#allocation8 + $0x798] sm:$0xf0] }
 0x28d   : > { %v6017_v25 = vld [vmem:[#allocation8 + $0x4ac] sm:$0xf]  ;;  %v5057_v27 = vld [vmem:[#allocation8 + $0x4b8] sm:$0xf0] }
 0x28e   : > { %3204 = vmatpush.bf16.msra.mxu2 %v4532_v46  ;;  %3217 = vmatpush.bf16.msra.mxu3 %v4660_v49  ;;  %v4612_v46 = vor.u32 %v5905_v31, %v4609_v32  ;;  %v5457_v49 = vld [vmem:[#allocation8 + $0x7d8] sm:$0xf0]  ;;  %v6049_v28 = vld [vmem:[#allocation8 + $0x5ac] sm:$0xf] }
 0x28f   : > { %v5460_v61 = vor.u32 %v6117_v43, %v5457_v49  ;;  %v5185_v29 = vld [vmem:[#allocation8 + $0x5b8] sm:$0xf0]  ;;  %v6073_v37 = vld [vmem:[#allocation8 + $0x66c] sm:$0xf] }
 0x290   : > { %3232 = vmatpush.bf16.msrb.mxu0 %v4756_v55  ;;  %3245 = vmatpush.bf16.msrb.mxu1 %v4884_v56  ;;  %v5217_v55 = vld [vmem:[#allocation8 + $0x5f8] sm:$0xf0]  ;;  %v2978_v56 = vpop.f32.mrf.mxu0  ;;  %v2991_v57 = vpop.f32.mrf.mxu1  ;;  %v6105_v30 = vld [vmem:[#allocation8 + $0x76c] sm:$0xf] }
 0x291   : > { %v5220_v3 = vor.u32 %v6057_v54, %v5217_v55  ;;  %v5281_v38 = vld [vmem:[#allocation8 + $0x678] sm:$0xf0]  ;;  %v6013_v11 = vld [vmem:[#allocation8 + $0x48c] sm:$0xf] }
 0x292   : > { %3205 = vmatpush.bf16.msra.mxu2 %v4516_v59  ;;  %3218 = vmatpush.bf16.msra.mxu3 %v4644_v60  ;;  %v4596_v59 = vor.u32 %v5901_v51, %v4593_v52  ;;  %v6081_v60 = vld [vmem:[#allocation8 + $0x6ac] sm:$0xf]  ;;  %v5041_v43 = vld [vmem:[#allocation8 + $0x498] sm:$0xf0]  ;;  %v5284_v50 = vor.u32 %v6073_v37, %v5281_v38 }
 0x293   : > { %v5316_v15 = vor.u32 %v6081_v60, %v5313_v63  ;;  %v6069_v51 = vld [vmem:[#allocation8 + $0x64c] sm:$0xf]  ;;  %v5265_v52 = vld [vmem:[#allocation8 + $0x658] sm:$0xf0]  ;;  %v5044_v53 = vor.u32 %v6013_v11, %v5041_v43  ;;  %v5599_v11 = vld [vmem:[#allocation11 + $0xf0] sm:$0xf] }
 0x294   : > { %3233 = vmatpush.bf16.msrb.mxu0 %v4740_v9  ;;  %3246 = vmatpush.bf16.msrb.mxu1 %v4868_v10  ;;  %v5201_v9 = vld [vmem:[#allocation8 + $0x5d8] sm:$0xf0]  ;;  %v2950_v10 = vpop.f32.mrf.mxu2  ;;  %v2963_v13 = vpop.f32.mrf.mxu3  ;;  %v6101_v54 = vld [vmem:[#allocation8 + $0x74c] sm:$0xf] }
 0x295   : > { %v2951_v14 = vadd.f32 %v2950_v10, %v2938_v35  ;;  %v5204_v22 = vor.u32 %v6053_v8, %v5201_v9  ;;  %v5428_v35 = vor.u32 %v6109_v23, %v5425_v24  ;;  %v5393_v55 = vld [vmem:[#allocation8 + $0x758] sm:$0xf0]  ;;  %v6009_v56 = vld [vmem:[#allocation8 + $0x46c] sm:$0xf] }
 0x296   : > { %3206 = vmatpush.bf16.msra.mxu2 %v4500_v20  ;;  %3219 = vmatpush.bf16.msra.mxu3 %v4628_v21  ;;  %v5444_v20 = vor.u32 %v6113_v4, %v5441_v5  ;;  %v5297_v21 = vld [vmem:[#allocation8 + $0x698] sm:$0xf0]  ;;  %v6041_v57 = vld [vmem:[#allocation8 + $0x56c] sm:$0xf]  ;;  %v5396_v60 = vor.u32 %v6101_v54, %v5393_v55 }
 0x297   : > { %v2964_v26 = vadd.f32 %v2963_v13, %v2951_v14  ;;  %v6065_v63 = vld [vmem:[#allocation8 + $0x62c] sm:$0xf]  ;;  %v5009_v8 = vld [vmem:[#allocation8 + $0x458] sm:$0xf0] }
 0x298   : > { %3234 = vmatpush.bf16.msrb.mxu0 %v4724_v33  ;;  %3247 = vmatpush.bf16.msrb.mxu1 %v4852_v34  ;;  %v7017_v31 = vpop.f32.mrf.mxu0  ;;  %v7019_v32 = vpop.f32.mrf.mxu1  ;;  %v6097_v5 = vld [vmem:[#allocation8 + $0x72c] sm:$0xf]  ;;  %v5137_v10 = vld [vmem:[#allocation8 + $0x558] sm:$0xf0] }
 0x299   : > { %v2977_v33 = vadd.f32 %v7007_v18, %v2964_v26  ;;  %v6037_v9 = vld [vmem:[#allocation8 + $0x54c] sm:$0xf]  ;;  %v5361_v24 = vld [vmem:[#allocation8 + $0x718] sm:$0xf0] }
 0x29a   : > { %3207 = vmatpush.bf16.msra.mxu2 %v4484_v44  ;;  %3220 = vmatpush.bf16.msra.mxu3 %v4612_v46  ;;  %v6045_v44 = vld [vmem:[#allocation8 + $0x58c] sm:$0xf]  ;;  %v5169_v46 = vld [vmem:[#allocation8 + $0x598] sm:$0xf0] }
 0x29b   : > { %3235 = vmatmul.bf16.vlgmr.msrb.gmra.mxu0 %v6956_v16  ;;  %3248 = vmatmul.bf16.vlgmr.msrb.gmra.mxu1 %v6958_v17  ;;  %v6077_v16 = vld [vmem:[#allocation8 + $0x68c] sm:$0xf]  ;;  %v5076_v17 = vor.u32 %v6021_v6, %v5073_v7  ;;  %v5172_v12 = vor.u32 %v6045_v44, %v5169_v46  ;;  %v5377_v6 = vld [vmem:[#allocation8 + $0x738] sm:$0xf0] }
 0x29c   : > { %3279 = vmatpush.bf16.msra.mxu0 %v5348_v39  ;;  %3292 = vmatpush.bf16.msra.mxu1 %v5476_v40  ;;  %v5300_v34 = vor.u32 %v6077_v16, %v5297_v21  ;;  %v5060_v39 = vor.u32 %v6017_v25, %v5057_v27  ;;  %v5188_v40 = vor.u32 %v6049_v28, %v5185_v29  ;;  %v2952_v18 = vpop.f32.mrf.mxu2  ;;  %v2965_v49 = vpop.f32.mrf.mxu3  ;;  %v6005_v7 = vld [vmem:[#allocation8 + $0x44c] sm:$0xf]  ;;  %v5233_v21 = vld [vmem:[#allocation8 + $0x618] sm:$0xf0] }
 0x29d   : > { %v6061_v16 = vld [vmem:[#allocation8 + $0x60c] sm:$0xf]  ;;  %v4993_v26 = vld [vmem:[#allocation8 + $0x438] sm:$0xf0] }
 0x29e   : > { %3208 = vmatpush.bf16.msra.mxu2 %v4468_v62  ;;  %3221 = vmatpush.bf16.msra.mxu3 %v4596_v59  ;;  %v5268_v59 = vor.u32 %v6069_v51, %v5265_v52  ;;  %v6093_v23 = vld [vmem:[#allocation8 + $0x70c] sm:$0xf]  ;;  %v5121_v28 = vld [vmem:[#allocation8 + $0x538] sm:$0xf0]  ;;  %v5236_v29 = vor.u32 %v6061_v16, %v5233_v21  ;;  %v5527_v52 = vld [vmem:[#allocation11 + $0x60] sm:$0xf] }
 0x29f   : > { %v6001_v25 = vld [vmem:[#allocation8 + $0x42c] sm:$0xf]  ;;  %v4977_v38 = vld [vmem:[#allocation8 + $0x418] sm:$0xf0] }
 0x2a0   : > { %3280 = vmatpush.bf16.msra.mxu0 %v5332_v58  ;;  %3293 = vmatpush.bf16.msra.mxu1 %v5460_v61  ;;  %v5153_v58 = vld [vmem:[#allocation8 + $0x578] sm:$0xf0]  ;;  %v3030_v61 = vpop.f32.mrf.mxu0  ;;  %v3043_v62 = vpop.f32.mrf.mxu1  ;;  %v6033_v27 = vld [vmem:[#allocation8 + $0x52c] sm:$0xf] }
 0x2a1   : > { %3209 = vmatmul.bf16.vlgmr.msra.gmra.mxu2 %v6962_v47  ;;  %3222 = vmatmul.bf16.vlgmr.msra.gmra.mxu3 %v6964_v48  ;;  %v5409_v47 = vld [vmem:[#allocation8 + $0x778] sm:$0xf0]  ;;  %v7023_v48 = vadd.f32 %v7009_v19, %v2977_v33  ;;  %v5156_v4 = vor.u32 %v6041_v57, %v5153_v58  ;;  %v5364_v33 = vor.u32 %v6093_v23, %v5361_v24  ;;  %v5997_v37 = vld [vmem:[#allocation8 + $0x40c] sm:$0xf]  ;;  %v5583_v61 = vld [vmem:[#allocation11 + $0xd0] sm:$0xf] }
 0x2a2   : > { %3253 = vmatpush.bf16.msrb.mxu2 %v5092_v2  ;;  %3266 = vmatpush.bf16.msrb.mxu3 %v5220_v3  ;;  %v5412_v45 = vor.u32 %v6105_v30, %v5409_v47  ;;  %v5025_v19 = vld [vmem:[#allocation8 + $0x478] sm:$0xf0]  ;;  %v5535_v30 = vld [vmem:[#allocation11 + $0x70] sm:$0xf]  ;;  %v4980_v18 = vor.u32 %v5997_v37, %v4977_v38  ;;  %v6153_v54 = vld [vmem:[#allocation11 + $0xe4] sm:$0xf0] }
 0x2a3   : > { %v5249_v2 = vld [vmem:[#allocation8 + $0x638] sm:$0xf0]  ;;  %v5028_v3 = vor.u32 %v6009_v56, %v5025_v19  ;;  %v5519_v19 = vld [vmem:[#allocation11 + $0x50] sm:$0xf]  ;;  %v6129_v24 = vld [vmem:[#allocation11 + $0x24] sm:$0xf0] }
 0x2a4   : > { %3281 = vmatpush.bf16.msra.mxu0 %v5316_v15  ;;  %3294 = vmatpush.bf16.msra.mxu1 %v5444_v20  ;;  %v3002_v13 = vpop.f32.mrf.mxu2  ;;  %v7025_v14 = vpop.f32.mrf.mxu3  ;;  %v5252_v15 = vor.u32 %v6065_v63, %v5249_v2  ;;  %v5380_v20 = vor.u32 %v6097_v5, %v5377_v6  ;;  %v6139_v47 = vld [vmem:[#allocation11 + $0x74] sm:$0xf0]  ;;  %v5511_v63 = vld [vmem:[#allocation11 + $0x40] sm:$0xf]  ;;  %v6149_v5 = vld [vmem:[#allocation11 + $0xc4] sm:$0xf0] }
 0x2a5   : > { %v6155_v43 = vld [vmem:[#allocation11 + $0xf4] sm:$0xf0]  ;;  %v5487_v38 = vld [vmem:[#allocation11 + $0x10] sm:$0xf] }
 0x2a6   : > { %3254 = vmatpush.bf16.msrb.mxu2 %v5076_v17  ;;  %3267 = vmatpush.bf16.msrb.mxu3 %v5204_v22  ;;  %v5012_v17 = vor.u32 %v6005_v7, %v5009_v8  ;;  %v5140_v22 = vor.u32 %v6037_v9, %v5137_v10  ;;  %v5600_v51 = vor.u32 %v6155_v43, %v5599_v11  ;;  %v6135_v58 = vld [vmem:[#allocation11 + $0x54] sm:$0xf0]  ;;  %v5503_v8 = vld [vmem:[#allocation11 + $0x30] sm:$0xf] }
 0x2a7   : > { %v6151_v62 = vld [vmem:[#allocation11 + $0xd4] sm:$0xf0]  ;;  %v5567_v9 = vld [vmem:[#allocation11 + $0xb0] sm:$0xf] }
 0x2a8   : > { %3282 = vmatpush.bf16.msra.mxu0 %v5300_v34  ;;  %3295 = vmatpush.bf16.msra.mxu1 %v5428_v35  ;;  %v4996_v34 = vor.u32 %v6001_v25, %v4993_v26  ;;  %v5124_v35 = vor.u32 %v6033_v27, %v5121_v28  ;;  %v6147_v10 = vld [vmem:[#allocation11 + $0xb4] sm:$0xf0]  ;;  %v5559_v25 = vld [vmem:[#allocation11 + $0xa0] sm:$0xf]  ;;  %v6145_v26 = vld [vmem:[#allocation11 + $0xa4] sm:$0xf0] }
 0x2a9   : > { %v5560_v37 = vor.u32 %v6145_v26, %v5559_v25  ;;  %v6167_v11 = vld [vmem:[#allocation11 + $0x154] sm:$0xf0] }
 0x2aa   : > { %3255 = vmatpush.bf16.msrb.mxu2 %v5060_v39  ;;  %3268 = vmatpush.bf16.msrb.mxu3 %v5188_v40  ;;  %v6029_v39 = vld [vmem:[#allocation8 + $0x50c] sm:$0xf]  ;;  %v5105_v40 = vld [vmem:[#allocation8 + $0x518] sm:$0xf0] }
 0x2ab   : > { %v5108_v49 = vor.u32 %v6029_v39, %v5105_v40  ;;  %v6127_v39 = vld [vmem:[#allocation11 + $0x14] sm:$0xf0]  ;;  %v5551_v40 = vld [vmem:[#allocation11 + $0x90] sm:$0xf] }
 0x2ac   : > { %3283 = vmatpush.bf16.msra.mxu0 %v5284_v50  ;;  %3296 = vmatpush.bf16.msra.mxu1 %v5412_v45  ;;  %v3004_v44 = vpop.f32.mrf.mxu2  ;;  %v3017_v46 = vpop.f32.mrf.mxu3  ;;  %v2882_v50 = vperm.slane %v7004_v36, 1  ;;  %v5536_v45 = vor.u32 %v6139_v47, %v5535_v30  ;;  %v6143_v47 = vld [vmem:[#allocation11 + $0x94] sm:$0xf0] }
 0x2ad   : > { %v5479_v46 = vld [vmem:[#allocation11] sm:$0xf] }
 0x2ae   : > { %3256 = vmatpush.bf16.msrb.mxu2 %v5044_v53  ;;  %3269 = vmatpush.bf16.msrb.mxu3 %v5172_v12  ;;  %v6137_v53 = vld [vmem:[#allocation11 + $0x64] sm:$0xf0]  ;;  %v5591_v12 = vld [vmem:[#allocation11 + $0xe0] sm:$0xf]  ;;  %v3003_v57 = vadd.f32 %v3002_v13, %v2882_v50  ;;  %v5663_v13 = vld [vmem:[#allocation11 + $0x170] sm:$0xf] }
 0x2af   : > { %v5528_v55 = vor.u32 %v6137_v53, %v5527_v52  ;;  %v5592_v56 = vor.u32 %v6153_v54, %v5591_v12  ;;  %v6125_v50 = vld [vmem:[#allocation11 + $0x4] sm:$0xf0]  ;;  %v6138_v53 = vld [vmem:[#allocation11 + $0x74] sm:$0xf]  ;;  %v5639_v12 = vld [vmem:[#allocation11 + $0x140] sm:$0xf] }
 0x2b0   : > { %3284 = vmatpush.bf16.msra.mxu0 %v5268_v59  ;;  %3297 = vmatpush.bf16.msra.mxu1 %v5396_v60  ;;  %v5520_v59 = vor.u32 %v6135_v58, %v5519_v19  ;;  %v5584_v60 = vor.u32 %v6151_v62, %v5583_v61  ;;  %v3016_v2 = vadd.f32 %v7025_v14, %v3003_v57  ;;  %v6165_v54 = vld [vmem:[#allocation11 + $0x144] sm:$0xf0]  ;;  %v5537_v19 = vld [vmem:[#allocation11 + $0x78] sm:$0xf0]  ;;  %v6154_v57 = vld [vmem:[#allocation11 + $0xf4] sm:$0xf] }
 0x2b1   : > { %v5601_v58 = vld [vmem:[#allocation11 + $0xf8] sm:$0xf0]  ;;  %v5640_v61 = vor.u32 %v6165_v54, %v5639_v12  ;;  %v6168_v12 = vld [vmem:[#allocation11 + $0x164] sm:$0xf]  ;;  %v5657_v54 = vld [vmem:[#allocation11 + $0x168] sm:$0xf0] }
 0x2b2   : > { %3257 = vmatpush.bf16.msrb.mxu2 %v5028_v3  ;;  %3270 = vmatpush.bf16.msrb.mxu3 %v5156_v4  ;;  %v6133_v3 = vld [vmem:[#allocation11 + $0x44] sm:$0xf0]  ;;  %v5575_v4 = vld [vmem:[#allocation11 + $0xc0] sm:$0xf] }
 0x2b3   : > { %v5512_v6 = vor.u32 %v6133_v3, %v5511_v63  ;;  %v5576_v7 = vor.u32 %v6149_v5, %v5575_v4  ;;  %v5540_v63 = vor.u32 %v6138_v53, %v5537_v19  ;;  %v5631_v3 = vld [vmem:[#allocation11 + $0x130] sm:$0xf]  ;;  %v6163_v4 = vld [vmem:[#allocation11 + $0x134] sm:$0xf0]  ;;  %v5529_v5 = vld [vmem:[#allocation11 + $0x68] sm:$0xf0]  ;;  %v5660_v19 = vor.u32 %v6168_v12, %v5657_v54 }
 0x2b4   : > { %3285 = vmatpush.bf16.msra.mxu0 %v5252_v15  ;;  %3298 = vmatpush.bf16.msra.mxu1 %v5380_v20  ;;  %v6171_v15 = vld [vmem:[#allocation11 + $0x174] sm:$0xf0]  ;;  %v5561_v53 = vld [vmem:[#allocation11 + $0xa8] sm:$0xf0]  ;;  %v6181_v12 = vld [vmem:[#allocation11 + $0x1c4] sm:$0xf0] }
 0x2b5   : > { %v5664_v21 = vor.u32 %v6171_v15, %v5663_v13  ;;  %v5521_v13 = vld [vmem:[#allocation11 + $0x58] sm:$0xf0]  ;;  %v6150_v15 = vld [vmem:[#allocation11 + $0xd4] sm:$0xf]  ;;  %v5695_v54 = vld [vmem:[#allocation11 + $0x1b0] sm:$0xf] }
 0x2b6   : > { %3258 = vmatpush.bf16.msrb.mxu2 %v5012_v17  ;;  %3271 = vmatpush.bf16.msrb.mxu3 %v5140_v22  ;;  %v5568_v17 = vor.u32 %v6147_v10, %v5567_v9  ;;  %v5495_v22 = vld [vmem:[#allocation11 + $0x20] sm:$0xf]  ;;  %v6134_v10 = vld [vmem:[#allocation11 + $0x54] sm:$0xf] }
 0x2b7   : > { %v5524_v25 = vor.u32 %v6134_v10, %v5521_v13 }
 0x2b8   : > { %3286 = vmatpush.bf16.msra.mxu0 %v5236_v29  ;;  %3299 = vmatpush.bf16.msra.mxu1 %v5364_v33  ;;  %v6169_v29 = vld [vmem:[#allocation11 + $0x164] sm:$0xf0] }
 0x2ba   : > { %3259 = vmatpush.bf16.msrb.mxu2 %v4996_v34  ;;  %3272 = vmatpush.bf16.msrb.mxu3 %v5124_v35  ;;  %v5496_v35 = vor.u32 %v6129_v24, %v5495_v22  ;;  %v6159_v22 = vld [vmem:[#allocation11 + $0x114] sm:$0xf0] }
 0x2bb   : > { %3287 = vmatmul.bf16.vlgmr.msra.gmra.mxu0 %v6972_v41  ;;  %3300 = vmatmul.bf16.vlgmr.msra.gmra.mxu1 %v6974_v42  ;;  %v3080_v41 = vpop.f32.mrf.mxu0  ;;  %v3093_v42 = vpop.f32.mrf.mxu1 }
 0x2bc   : > { %3729 = vmatpush.bf16.msrb.mxu0 %v5664_v21  ;;  %v6161_v21 = vld [vmem:[#allocation11 + $0x124] sm:$0xf0] }
 0x2be   : > { %3260 = vmatpush.bf16.msrb.mxu2 %v4980_v18  ;;  %3273 = vmatpush.bf16.msrb.mxu3 %v5108_v49  ;;  %v5488_v18 = vor.u32 %v6127_v39, %v5487_v38  ;;  %v5552_v49 = vor.u32 %v6143_v47, %v5551_v40  ;;  %v5505_v38 = vld [vmem:[#allocation11 + $0x38] sm:$0xf0]  ;;  %v6146_v39 = vld [vmem:[#allocation11 + $0xb4] sm:$0xf]  ;;  %v6157_v47 = vld [vmem:[#allocation11 + $0x104] sm:$0xf0] }
 0x2bf   : > { %v5569_v40 = vld [vmem:[#allocation11 + $0xb8] sm:$0xf0] }
 0x2c1   : > { %3261 = vmatmul.bf16.vlgmr.msrb.gmra.mxu2 %v6978_v0  ;;  %3274 = vmatmul.bf16.vlgmr.msrb.gmra.mxu3 %v6980_v1  ;;  %v6131_v0 = vld [vmem:[#allocation11 + $0x34] sm:$0xf0]  ;;  %v3029_v1 = vadd.f32 %v7017_v31, %v3016_v2  ;;  %v5655_v31 = vld [vmem:[#allocation11 + $0x160] sm:$0xf]  ;;  %v5604_v2 = vor.u32 %v6154_v57, %v5601_v58 }
 0x2c2   : > { %3703 = vmatpush.bf16.msra.mxu2 %v5536_v45  ;;  %3716 = vmatpush.bf16.msra.mxu3 %v5600_v51  ;;  %v5504_v14 = vor.u32 %v6131_v0, %v5503_v8  ;;  %v5656_v34 = vor.u32 %v6169_v29, %v5655_v31  ;;  %v5543_v45 = vld [vmem:[#allocation11 + $0x80] sm:$0xf]  ;;  %v6141_v51 = vld [vmem:[#allocation11 + $0x84] sm:$0xf0]  ;;  %v5632_v8 = vor.u32 %v6163_v4, %v5631_v3  ;;  %v6148_v31 = vld [vmem:[#allocation11 + $0xc4] sm:$0xf] }
 0x2c3   : > { %v3082_v20 = vpop.f32.mrf.mxu0  ;;  %v3095_v16 = vpop.f32.mrf.mxu1  ;;  %v3042_v23 = vadd.f32 %v7019_v32, %v3029_v1  ;;  %v5647_v32 = vld [vmem:[#allocation11 + $0x150] sm:$0xf]  ;;  %v5577_v29 = vld [vmem:[#allocation11 + $0xc8] sm:$0xf0]  ;;  %v6124_v4 = vld [vmem:[#allocation11 + $0x4] sm:$0xf] }
 0x2c4   : > { %v3054_v27 = vpop.f32.mrf.mxu2  ;;  %v3067_v28 = vpop.f32.mrf.mxu3  ;;  %3730 = vmatpush.bf16.msrb.mxu0 %v5656_v34  ;;  %v5648_v43 = vor.u32 %v6167_v11, %v5647_v32  ;;  %v5585_v20 = vld [vmem:[#allocation11 + $0xd8] sm:$0xf0]  ;;  %v5623_v16 = vld [vmem:[#allocation11 + $0x120] sm:$0xf]  ;;  %v6130_v34 = vld [vmem:[#allocation11 + $0x34] sm:$0xf] }
 0x2c5   : > { %v3055_v33 = vadd.f32 %v3054_v27, %v3042_v23  ;;  %v5588_v26 = vor.u32 %v6150_v15, %v5585_v20  ;;  %v6132_v27 = vld [vmem:[#allocation11 + $0x44] sm:$0xf]  ;;  %v6170_v32 = vld [vmem:[#allocation11 + $0x174] sm:$0xf] }
 0x2c6   : > { %3704 = vmatpush.bf16.msra.mxu2 %v5528_v55  ;;  %3717 = vmatpush.bf16.msra.mxu3 %v5592_v56 }
 0x2c7   : > { %v3068_v30 = vadd.f32 %v3067_v28, %v3055_v33  ;;  %v5513_v28 = vld [vmem:[#allocation11 + $0x48] sm:$0xf0] }
 0x2c8   : > { %3731 = vmatpush.bf16.msrb.mxu0 %v5648_v43  ;;  %v5665_v43 = vld [vmem:[#allocation11 + $0x178] sm:$0xf0] }
 0x2c9   : > { %v3081_v44 = vadd.f32 %v3080_v41, %v3068_v30  ;;  %v3305_v41 = vmax.f32 %v7023_v48, 0.0  ;;  %v5607_v30 = vld [vmem:[#allocation11 + $0x100] sm:$0xf] }
 0x2ca   : > { %3705 = vmatpush.bf16.msra.mxu2 %v5520_v59  ;;  %3718 = vmatpush.bf16.msra.mxu3 %v5584_v60  ;;  %v5480_v59 = vor.u32 %v6125_v50, %v5479_v46  ;;  %v5544_v60 = vor.u32 %v6141_v51, %v5543_v45  ;;  %v5608_v11 = vor.u32 %v6157_v47, %v5607_v30  ;;  %v6128_v45 = vld [vmem:[#allocation11 + $0x24] sm:$0xf]  ;;  %v5497_v51 = vld [vmem:[#allocation11 + $0x28] sm:$0xf0] }
 0x2cb   : > { %v3094_v52 = vadd.f32 %v3093_v42, %v3081_v44  ;;  %v6136_v42 = vld [vmem:[#allocation11 + $0x64] sm:$0xf]  ;;  %v7038_v9 = vpack.c.bf16 %v3305_v41, %v3305_v41  ;;  %v5572_v50 = vor.u32 %v6146_v39, %v5569_v40  ;;  %v5500_v57 = vor.u32 %v6128_v45, %v5497_v51  ;;  %v6142_v41 = vld [vmem:[#allocation11 + $0x94] sm:$0xf]  ;;  %v5727_v39 = vld [vmem:[#allocation11 + $0x1f0] sm:$0xf] }
 0x2cc   : > { %v3056_v55 = vpop.f32.mrf.mxu2  ;;  %v3069_v56 = vpop.f32.mrf.mxu3  ;;  %3732 = vmatpush.bf16.msrb.mxu0 %v5640_v61  ;;  %v5532_v48 = vor.u32 %v6136_v42, %v5529_v5  ;;  %v6126_v61 = vld [vmem:[#allocation11 + $0x14] sm:$0xf]  ;;  %v5481_v5 = vld [vmem:[#allocation11 + $0x8] sm:$0xf0]  ;;  %v6187_v40 = vld [vmem:[#allocation11 + $0x1f4] sm:$0xf0] }
 0x2cd   : > { %v3306_v62 = vmax.f32 %v3094_v52, 0.0  ;;  %v6144_v52 = vld [vmem:[#allocation11 + $0xa4] sm:$0xf]  ;;  %v5484_v15 = vor.u32 %v6124_v4, %v5481_v5  ;;  %v6183_v45 = vld [vmem:[#allocation11 + $0x1d4] sm:$0xf0] }
 0x2ce   : > { %3706 = vmatpush.bf16.msra.mxu2 %v5512_v6  ;;  %3719 = vmatpush.bf16.msra.mxu3 %v5576_v7  ;;  %v6152_v6 = vld [vmem:[#allocation11 + $0xe4] sm:$0xf]  ;;  %v5593_v7 = vld [vmem:[#allocation11 + $0xe8] sm:$0xf0]  ;;  %v5564_v58 = vor.u32 %v6144_v52, %v5561_v53  ;;  %v5671_v5 = vld [vmem:[#allocation11 + $0x180] sm:$0xf] }
 0x2cf   : > { %v7036_v0 = vpack.c.bf16 %v3306_v62, %v3306_v62  ;;  %v5596_v1 = vor.u32 %v6152_v6, %v5593_v7  ;;  %v5489_v62 = vld [vmem:[#allocation11 + $0x18] sm:$0xf0]  ;;  %v6140_v6 = vld [vmem:[#allocation11 + $0x84] sm:$0xf]  ;;  %v5545_v7 = vld [vmem:[#allocation11 + $0x88] sm:$0xf0] }
 0x2d0   : > { %3733 = vmatpush.bf16.msrb.mxu0 %v5632_v8  ;;  %v5492_v42 = vor.u32 %v6126_v61, %v5489_v62  ;;  %v6164_v8 = vld [vmem:[#allocation11 + $0x144] sm:$0xf]  ;;  %v5548_v20 = vor.u32 %v6140_v6, %v5545_v7  ;;  %v6173_v6 = vld [vmem:[#allocation11 + $0x184] sm:$0xf0] }
 0x2d1   : > { %v5672_v7 = vor.u32 %v6173_v6, %v5671_v5 }
 0x2d2   : > { %3707 = vmatpush.bf16.msra.mxu2 %v5504_v14  ;;  %3720 = vmatpush.bf16.msra.mxu3 %v5568_v17  ;;  %v5624_v14 = vor.u32 %v6161_v21, %v5623_v16  ;;  %v5615_v17 = vld [vmem:[#allocation11 + $0x110] sm:$0xf]  ;;  %v6162_v16 = vld [vmem:[#allocation11 + $0x134] sm:$0xf]  ;;  %v5633_v21 = vld [vmem:[#allocation11 + $0x138] sm:$0xf0] }
 0x2d3   : > { %v5616_v33 = vor.u32 %v6159_v22, %v5615_v17  ;;  %v2883_v17 = vperm.slane %v7004_v36, 2  ;;  %v6160_v22 = vld [vmem:[#allocation11 + $0x124] sm:$0xf] }
 0x2d4   : > { %3734 = vmatpush.bf16.msrb.mxu0 %v5624_v14  ;;  %v5636_v14 = vor.u32 %v6162_v16, %v5633_v21  ;;  %v6156_v36 = vld [vmem:[#allocation11 + $0x104] sm:$0xf] }
 0x2d6   : > { %3708 = vmatpush.bf16.msra.mxu2 %v5496_v35  ;;  %3721 = vmatpush.bf16.msra.mxu3 %v5560_v37  ;;  %v5516_v35 = vor.u32 %v6132_v27, %v5513_v28  ;;  %v5580_v37 = vor.u32 %v6148_v31, %v5577_v29  ;;  %v6158_v27 = vld [vmem:[#allocation11 + $0x114] sm:$0xf]  ;;  %v5617_v28 = vld [vmem:[#allocation11 + $0x118] sm:$0xf0] }
 0x2d8   : > { %v7042_v23 = vpop.f32.mrf.mxu0  ;;  %v7044_v24 = vpop.f32.mrf.mxu1  ;;  %3735 = vmatpush.bf16.msrb.mxu0 %v5616_v33 }
 0x2da   : > { %3709 = vmatpush.bf16.msra.mxu2 %v5488_v18  ;;  %3722 = vmatpush.bf16.msra.mxu3 %v5552_v49  ;;  %v5668_v18 = vor.u32 %v6170_v32, %v5665_v43  ;;  %v5508_v49 = vor.u32 %v6130_v34, %v5505_v38  ;;  %v5620_v34 = vor.u32 %v6158_v27, %v5617_v28  ;;  %v5719_v32 = vld [vmem:[#allocation11 + $0x1e0] sm:$0xf]  ;;  %v5705_v27 = vld [vmem:[#allocation11 + $0x1c8] sm:$0xf0] }
 0x2dc   : > { %3736 = vmatpush.bf16.msrb.mxu0 %v5608_v11  ;;  %v6185_v11 = vld [vmem:[#allocation11 + $0x1e4] sm:$0xf0] }
 0x2de   : > { %3710 = vmatpush.bf16.msra.mxu2 %v5480_v59  ;;  %3723 = vmatpush.bf16.msra.mxu3 %v5544_v60  ;;  %v5553_v59 = vld [vmem:[#allocation11 + $0x98] sm:$0xf0]  ;;  %v6166_v60 = vld [vmem:[#allocation11 + $0x154] sm:$0xf] }
 0x2df   : > { %v5556_v3 = vor.u32 %v6142_v41, %v5553_v59  ;;  %v5687_v41 = vld [vmem:[#allocation11 + $0x1a0] sm:$0xf]  ;;  %v6177_v59 = vld [vmem:[#allocation11 + $0x1a4] sm:$0xf0] }
 0x2e0   : > { %v3134_v44 = vpop.f32.mrf.mxu0  ;;  %v3147_v46 = vpop.f32.mrf.mxu1  ;;  %3781 = vmatpush.bf16.msra.mxu0 %v5668_v18 }
 0x2e1   : > { %3711 = vmatmul.bf16.vlgmr.msra.gmra.mxu2 %v7038_v9  ;;  %3724 = vmatmul.bf16.vlgmr.msra.gmra.mxu3 %v7036_v0  ;;  %v5720_v44 = vor.u32 %v6185_v11, %v5719_v32  ;;  %v6172_v32 = vld [vmem:[#allocation11 + $0x184] sm:$0xf]  ;;  %v5673_v11 = vld [vmem:[#allocation11 + $0x188] sm:$0xf0] }
 0x2e2   : > { %3755 = vmatpush.bf16.msrb.mxu2 %v5540_v63  ;;  %3768 = vmatpush.bf16.msrb.mxu3 %v5604_v2  ;;  %v5649_v63 = vld [vmem:[#allocation11 + $0x158] sm:$0xf0] }
 0x2e3   : > { %v5652_v2 = vor.u32 %v6166_v60, %v5649_v63  ;;  %v5688_v60 = vor.u32 %v6177_v59, %v5687_v41  ;;  %v5679_v63 = vld [vmem:[#allocation11 + $0x190] sm:$0xf] }
 0x2e4   : > { %v3106_v55 = vpop.f32.mrf.mxu2  ;;  %v3119_v56 = vpop.f32.mrf.mxu3  ;;  %3782 = vmatpush.bf16.msra.mxu0 %v5660_v19  ;;  %v6179_v19 = vld [vmem:[#allocation11 + $0x1b4] sm:$0xf0] }
 0x2e5   : > { %v3107_v31 = vadd.f32 %v3106_v55, %v2883_v17  ;;  %v5696_v61 = vor.u32 %v6179_v19, %v5695_v54  ;;  %v6182_v17 = vld [vmem:[#allocation11 + $0x1d4] sm:$0xf] }
 0x2e6   : > { %3756 = vmatpush.bf16.msrb.mxu2 %v5532_v48  ;;  %3769 = vmatpush.bf16.msrb.mxu3 %v5596_v1  ;;  %v5641_v48 = vld [vmem:[#allocation11 + $0x148] sm:$0xf0] }
 0x2e7   : > { %v5644_v13 = vor.u32 %v6164_v8, %v5641_v48  ;;  %v6186_v8 = vld [vmem:[#allocation11 + $0x1f4] sm:$0xf]  ;;  %v5729_v48 = vld [vmem:[#allocation11 + $0x1f8] sm:$0xf0] }
 0x2e8   : > { %3783 = vmatpush.bf16.msra.mxu0 %v5652_v2  ;;  %v6175_v2 = vld [vmem:[#allocation11 + $0x194] sm:$0xf0] }
 0x2ea   : > { %3757 = vmatpush.bf16.msrb.mxu2 %v5524_v25  ;;  %3770 = vmatpush.bf16.msrb.mxu3 %v5588_v26  ;;  %v5625_v25 = vld [vmem:[#allocation11 + $0x128] sm:$0xf0] }
 0x2eb   : > { %v5628_v26 = vor.u32 %v6160_v22, %v5625_v25  ;;  %v5713_v22 = vld [vmem:[#allocation11 + $0x1d8] sm:$0xf0] }
 0x2ec   : > { %v3108_v1 = vpop.f32.mrf.mxu2  ;;  %v3121_v10 = vpop.f32.mrf.mxu3  ;;  %3784 = vmatpush.bf16.msra.mxu0 %v5644_v13  ;;  %v5716_v25 = vor.u32 %v6182_v17, %v5713_v22  ;;  %v6190_v17 = vld [vmem:[#allocation14 + $0x10] sm:$0xff] }
 0x2ed   : > { %v5732_v1 = vor.u32 %v6186_v8, %v5729_v48  ;;  %v6195_v48 = vld [vmem:[#allocation14 + $0x38] sm:$0xff] }
 0x2ee   : > { %3758 = vmatpush.bf16.msrb.mxu2 %v5516_v35  ;;  %3771 = vmatpush.bf16.msrb.mxu3 %v5580_v37  ;;  %v3120_v35 = vadd.f32 %v3119_v56, %v3107_v31  ;;  %v5609_v37 = vld [vmem:[#allocation11 + $0x108] sm:$0xf0] }
 0x2ef   : > { %v5612_v38 = vor.u32 %v6156_v36, %v5609_v37  ;;  %v6176_v36 = vld [vmem:[#allocation11 + $0x1a4] sm:$0xf]  ;;  %v5689_v37 = vld [vmem:[#allocation11 + $0x1a8] sm:$0xf0] }
 0x2f0   : > { %3785 = vmatpush.bf16.msra.mxu0 %v5636_v14  ;;  %v3133_v30 = vadd.f32 %v7042_v23, %v3120_v35  ;;  %v5703_v23 = vld [vmem:[#allocation11 + $0x1c0] sm:$0xf] }
 0x2f1   : > { %v5704_v56 = vor.u32 %v6181_v12, %v5703_v23 }
 0x2f2   : > { %3759 = vmatpush.bf16.msrb.mxu2 %v5508_v49  ;;  %3772 = vmatpush.bf16.msrb.mxu3 %v5572_v50  ;;  %v3146_v43 = vadd.f32 %v7044_v24, %v3133_v30  ;;  %v5711_v50 = vld [vmem:[#allocation11 + $0x1d0] sm:$0xf]  ;;  %v6174_v30 = vld [vmem:[#allocation11 + $0x194] sm:$0xf] }
 0x2f3   : > { %v5712_v52 = vor.u32 %v6183_v45, %v5711_v50 }
 0x2f4   : > { %3786 = vmatpush.bf16.msra.mxu0 %v5628_v26  ;;  %v6180_v26 = vld [vmem:[#allocation11 + $0x1c4] sm:$0xf] }
 0x2f5   : > { %v5708_v28 = vor.u32 %v6180_v26, %v5705_v27  ;;  %v6189_v26 = vld [vmem:[#allocation14 + $0x8] sm:$0xff] }
 0x2f6   : > { %3760 = vmatpush.bf16.msrb.mxu2 %v5500_v57  ;;  %3773 = vmatpush.bf16.msrb.mxu3 %v5564_v58  ;;  %v6201_v27 = vld [vmem:[#allocation14 + $0x68] sm:$0xff] }
 0x2f8   : > { %v3184_v29 = vpop.f32.mrf.mxu0  ;;  %v3197_v33 = vpop.f32.mrf.mxu1  ;;  %3787 = vmatpush.bf16.msra.mxu0 %v5620_v34  ;;  %v5697_v34 = vld [vmem:[#allocation11 + $0x1b8] sm:$0xf0] }
 0x2fa   : > { %3761 = vmatpush.bf16.msrb.mxu2 %v5492_v42  ;;  %3774 = vmatpush.bf16.msrb.mxu3 %v5556_v3  ;;  %v5680_v42 = vor.u32 %v6175_v2, %v5679_v63 }
 0x2fc   : > { %3788 = vmatpush.bf16.msra.mxu0 %v5612_v38  ;;  %v6354_v38 = vld [vmem:[#allocation9] sm:$0xf] }
 0x2fe   : > { %3762 = vmatpush.bf16.msrb.mxu2 %v5484_v15  ;;  %3775 = vmatpush.bf16.msrb.mxu3 %v5548_v20  ;;  %v6184_v15 = vld [vmem:[#allocation11 + $0x1e4] sm:$0xf]  ;;  %v5721_v20 = vld [vmem:[#allocation11 + $0x1e8] sm:$0xf0] }
 0x2ff   : > { %v5724_v16 = vor.u32 %v6184_v15, %v5721_v20  ;;  %v6193_v15 = vld [vmem:[#allocation14 + $0x28] sm:$0xff] }
 0x300   : > { %v3186_v47 = vpop.f32.mrf.mxu0 }
 0x301   : > { %3763 = vmatmul.bf16.vlgmr.msrb.gmra.mxu2 %v7038_v9  ;;  %3776 = vmatmul.bf16.vlgmr.msrb.gmra.mxu3 %v7036_v0  ;;  %v5728_v9 = vor.u32 %v6187_v40, %v5727_v39  ;;  %v3199_v0 = vpop.f32.mrf.mxu1  ;;  %v2884_v39 = vperm.slane %v6354_v38, 3  ;;  %v5692_v40 = vor.u32 %v6176_v36, %v5689_v37 }
 0x302   : > { %3940 = vmatpush.bf16.msra.mxu2 %v6195_v48 }
 0x303   : > { %3742 = vmatpush.bf16.msrb.mxu1 %v5728_v9  ;;  %v5681_v9 = vld [vmem:[#allocation11 + $0x198] sm:$0xf0] }
 0x304   : > { %v3158_v46 = vpop.f32.mrf.mxu2  ;;  %v3171_v18 = vpop.f32.mrf.mxu3  ;;  %v5684_v0 = vor.u32 %v6174_v30, %v5681_v9 }
 0x305   : > { %v3159_v49 = vadd.f32 %v3158_v46, %v3146_v43 }
 0x307   : > { %3743 = vmatpush.bf16.msrb.mxu1 %v5720_v44  ;;  %v3172_v51 = vadd.f32 %v3171_v18, %v3159_v49  ;;  %v5676_v18 = vor.u32 %v6172_v32, %v5673_v11 }
 0x309   : > { %v3185_v53 = vadd.f32 %v3184_v29, %v3172_v51 }
 0x30b   : > { %3744 = vmatpush.bf16.msrb.mxu1 %v5712_v52  ;;  %v3198_v55 = vadd.f32 %v3197_v33, %v3185_v53  ;;  %v6178_v33 = vld [vmem:[#allocation11 + $0x1b4] sm:$0xf] }
 0x30c   : > { %v3160_v57 = vpop.f32.mrf.mxu2  ;;  %v3173_v58 = vpop.f32.mrf.mxu3  ;;  %v5700_v35 = vor.u32 %v6178_v33, %v5697_v34  ;;  %v6198_v33 = vld [vmem:[#allocation14 + $0x50] sm:$0xff]  ;;  %v6197_v34 = vld [vmem:[#allocation14 + $0x48] sm:$0xff] }
 0x30d   : > { %v3307_v24 = vmax.f32 %v3198_v55, 0.0 }
 0x30f   : > { %3745 = vmatpush.bf16.msrb.mxu1 %v5704_v56  ;;  %v3311_v62 = vpack.c.bf16 %v3307_v24, %v3307_v24  ;;  %v3377_v24 = vld [vmem:[#allocation12] sm:$0x3] }
 0x311   : > { %3737 = vmatmul.bf16.vlgmr.msrb.gmra.mxu0 %v3311_v62 }
 0x313   : > { %3746 = vmatpush.bf16.msrb.mxu1 %v5696_v61  ;;  %v3699_v61 = vperm.slane %v3377_v24, 0 }
 0x317   : > { %3747 = vmatpush.bf16.msrb.mxu1 %v5688_v60 }
 0x318   : > { %v3236_v3 = vpop.f32.mrf.mxu0  ;;  %v3249_v4 = vpop.f32.mrf.mxu1 }
 0x31b   : > { %3748 = vmatpush.bf16.msrb.mxu1 %v5680_v42  ;;  %v3700_v42 = vperm.slane %v3377_v24, 1 }
 0x31f   : > { %3749 = vmatpush.bf16.msrb.mxu1 %v5672_v7 }
 0x320   : > { %v3238_v10 = vpop.f32.mrf.mxu0  ;;  %v3251_v13 = vpop.f32.mrf.mxu1 }
 0x321   : > { %3789 = vmatmul.bf16.vlgmr.msra.gmra.mxu0 %v3311_v62  ;;  %v6194_v10 = vld [vmem:[#allocation14 + $0x30] sm:$0xff] }
 0x322   : > { %v6202_v13 = vld [vmem:[#allocation14 + $0x70] sm:$0xff]  ;;  %3941 = vmatpush.bf16.msra.mxu2 %v6194_v10 }
 0x323   : > { %3794 = vmatpush.bf16.msra.mxu1 %v5732_v1  ;;  %v6203_v1 = vld [vmem:[#allocation14 + $0x78] sm:$0xff] }
 0x324   : > { %v3210_v21 = vpop.f32.mrf.mxu2  ;;  %v3223_v14 = vpop.f32.mrf.mxu3  ;;  %3953 = vmatpush.bf16.msra.mxu3 %v6203_v1 }
 0x325   : > { %v3211_v47 = vadd.f32 %v3210_v21, %v2884_v39  ;;  %v6191_v21 = vld [vmem:[#allocation14 + $0x18] sm:$0xff] }
 0x326   : > { %3942 = vmatpush.bf16.msra.mxu2 %v6193_v15 }
 0x327   : > { %3795 = vmatpush.bf16.msra.mxu1 %v5724_v16  ;;  %v3224_v46 = vadd.f32 %v3223_v14, %v3211_v47  ;;  %v6192_v16 = vld [vmem:[#allocation14 + $0x20] sm:$0xff] }
 0x328   : > { %3954 = vmatpush.bf16.msra.mxu3 %v6202_v13 }
 0x329   : > { %v3237_v49 = vadd.f32 %v3236_v3, %v3224_v46 }
 0x32a   : > { %3943 = vmatpush.bf16.msra.mxu2 %v6192_v16 }
 0x32b   : > { %3796 = vmatpush.bf16.msra.mxu1 %v5716_v25  ;;  %v3250_v51 = vadd.f32 %v3249_v4, %v3237_v49 }
 0x32c   : > { %v3212_v31 = vpop.f32.mrf.mxu2  ;;  %v3225_v29 = vpop.f32.mrf.mxu3  ;;  %3955 = vmatpush.bf16.msra.mxu3 %v6201_v27 }
 0x32d   : > { %v6200_v31 = vld [vmem:[#allocation14 + $0x60] sm:$0xff]  ;;  %v6199_v29 = vld [vmem:[#allocation14 + $0x58] sm:$0xff] }
 0x32e   : > { %3944 = vmatpush.bf16.msra.mxu2 %v6191_v21 }
 0x32f   : > { %3797 = vmatpush.bf16.msra.mxu1 %v5708_v28  ;;  %v6188_v28 = vld [vmem:[#allocation14] sm:$0xff] }
 0x330   : > { %3956 = vmatpush.bf16.msra.mxu3 %v6200_v31 }
 0x332   : > { %3945 = vmatpush.bf16.msra.mxu2 %v6190_v17 }
 0x333   : > { %3798 = vmatpush.bf16.msra.mxu1 %v5700_v35  ;;  %v6196_v35 = vld [vmem:[#allocation14 + $0x40] sm:$0xff] }
 0x334   : > { %3957 = vmatpush.bf16.msra.mxu3 %v6199_v29 }
 0x336   : > { %3946 = vmatpush.bf16.msra.mxu2 %v6189_v26 }
 0x337   : > { %3799 = vmatpush.bf16.msra.mxu1 %v5692_v40 }
 0x338   : > { %v3288_v43 = vpop.f32.mrf.mxu0  ;;  %v3301_v44 = vpop.f32.mrf.mxu1  ;;  %3958 = vmatpush.bf16.msra.mxu3 %v6198_v33 }
 0x33a   : > { %3947 = vmatpush.bf16.msra.mxu2 %v6188_v28 }
 0x33b   : > { %3800 = vmatpush.bf16.msra.mxu1 %v5684_v0 }
 0x33c   : > { %3959 = vmatpush.bf16.msra.mxu3 %v6197_v34 }
 0x33f   : > { %3801 = vmatpush.bf16.msra.mxu1 %v5676_v18  ;;  %v3843_v18 = vld [vmem:[#allocation15] sm:$0x1] }
 0x340   : > { %v3290_v50 = vpop.f32.mrf.mxu0  ;;  %v3303_v45 = vpop.f32.mrf.mxu1  ;;  %3960 = vmatpush.bf16.msra.mxu3 %v6196_v35 }
 0x344   : > { %v3262_v52 = vpop.f32.mrf.mxu2  ;;  %v3275_v53 = vpop.f32.mrf.mxu3 }
 0x345   : > { %v3263_v23 = vadd.f32 %v3262_v52, %v3250_v51 }
 0x347   : > { %v3276_v12 = vadd.f32 %v3275_v53, %v3263_v23 }
 0x349   : > { %v3289_v54 = vadd.f32 %v3288_v43, %v3276_v12 }
 0x34b   : > { %v3302_v55 = vadd.f32 %v3301_v44, %v3289_v54 }
 0x34c   : > { %v3264_v56 = vpop.f32.mrf.mxu2  ;;  %v3277_v19 = vpop.f32.mrf.mxu3 }
 0x34d   : > { %v3308_v57 = vmax.f32 %v3302_v55, 0.0 }
 0x34f   : > { %v3312_v58 = vpack.c.bf16 %v3308_v57, %v3308_v57 }
 0x351   : > { %3750 = vmatmul.bf16.vlgmr.msrb.gmra.mxu1 %v3312_v58 }
 0x361   : > { %3802 = vmatmul.bf16.vlgmr.msra.gmra.mxu1 %v3312_v58 }
 0x364   : > { %v3712_v62 = vpop.f32.mrf.mxu2  ;;  %v3725_v41 = vpop.f32.mrf.mxu3 }
 0x365   : > { %v3713_v59 = vadd.f32 %v3712_v62, %v3699_v61 }
 0x367   : > { %v3726_v60 = vadd.f32 %v3725_v41, %v3713_v59 }
 0x36c   : > { %v3714_v63 = vpop.f32.mrf.mxu2  ;;  %v3727_v2 = vpop.f32.mrf.mxu3 }
 0x384   : > { %v3764_v3 = vpop.f32.mrf.mxu2  ;;  %v3777_v4 = vpop.f32.mrf.mxu3 }
 0x385   : > { %v3765_v5 = vadd.f32 %v3764_v3, %v3700_v42 }
 0x387   : > { %v3778_v6 = vadd.f32 %v3777_v4, %v3765_v5 }
 0x38c   : > { %v3766_v7 = vpop.f32.mrf.mxu2  ;;  %v3779_v8 = vpop.f32.mrf.mxu3 }
 0x38e   : > { %v3738_v20 = vpop.f32.mrf.mxu0 }
 0x38f   : > { %v3739_v36 = vadd.f32 %v3738_v20, %v3726_v60 }
 0x396   : > { %v3740_v14 = vpop.f32.mrf.mxu0 }
 0x39e   : > { %v3790_v22 = vpop.f32.mrf.mxu0 }
 0x39f   : > { %v3791_v9 = vadd.f32 %v3790_v22, %v3778_v6 }
 0x3a6   : > { %v3792_v25 = vpop.f32.mrf.mxu0 }
 0x3ce   : > { %v3751_v37 = vpop.f32.mrf.mxu1 }
 0x3cf   : > { %v3752_v38 = vadd.f32 %v3751_v37, %v3739_v36 }
 0x3d1   : > { %v3807_v39 = vmax.f32 %v3752_v38, 0.0 }
 0x3d3   : > { %v3809_v40 = vpack.c.bf16 %v3807_v39, %v3807_v39 }
 0x3d5   : > { %3948 = vmatmul.bf16.vlgmr.msra.gmra.mxu2 %v3809_v40 }
 0x3d6   : > { %v3753_v30 = vpop.f32.mrf.mxu1 }
 0x3de   : > { %v3803_v47 = vpop.f32.mrf.mxu1 }
 0x3df   : > { %v3804_v0 = vadd.f32 %v3803_v47, %v3791_v9 }
 0x3e1   : > { %v3808_v32 = vmax.f32 %v3804_v0, 0.0 }
 0x3e3   : > { %v3810_v11 = vpack.c.bf16 %v3808_v32, %v3808_v32 }
 0x3e5   : > { %3961 = vmatmul.bf16.vlgmr.msra.gmra.mxu3 %v3810_v11 }
 0x3e6   : > { %v3805_v43 = vpop.f32.mrf.mxu1 }
 0x458   : > { %v3949_v44 = vpop.f32.mrf.mxu2 }
 0x459   : > { %v3950_v49 = vadd.f32 %v3949_v44, %v3843_v18 }
 0x460   : > { %v3951_v46 = vpop.f32.mrf.mxu2 }
 0x468   : > { %v3962_v50 = vpop.f32.mrf.mxu3 }
 0x469   : > { %v3963_v45 = vadd.f32 %v3962_v50, %v3950_v49 }
 0x46b   : > { %v3967_v51 = vsel %vm3966_vm3, %v3963_v45, -inf }
 0x46c   : > { %3968 = vmax.xlane.f32.xlu0 %v3967_v51 }
 0x470   : > { %v3964_v52 = vpop.f32.mrf.mxu3 }
 0x4df   : > { %v3969_v53 = vpop.xlane.xlu0 %3968 }
 0x4e0   : > { %v3970_v23 = vsub.f32 %v3963_v45, %v3969_v53 }
 0x4e2   : > { %v3971_v12 = vmul.f32 1.442695, %v3970_v23 }
 0x4e4   : > { %6350 = vpow2.f32 %v3971_v12 }
 0x4ea   : > { %v6351_v54 = vpop.eup %6350 }
 0x4eb   : > { %v3973_v55 = vsel %vm3966_vm3, %v6351_v54, 0.0 }
 0x4ec   : > { %3974 = vadd.xlane.f32.xlu0 %v3973_v55 }
 0x55f   : > { %v3975_v56 = vpop.xlane.xlu0 %3974 }
 0x560   : > { %6352 = vlog2.f32 %v3975_v56 }
 0x566   : > { %v6353_v19 = vpop.eup %6352 }
 0x567   : > { %v3977_v57 = vmul.f32 0.6931472, %v6353_v19 }
 0x569   : > { %v3978_v58 = vsub.f32 %v3970_v23, %v3977_v57 }
 0x56b   : > { %3979 = vst [vmem:[%s593_s13] sm:$0x1] %v3978_v58 }
 0x56c   : > { %6622 = shalt.err (!%p6619_p9)
}
 0x56d   : > { %6236 = dma.vmem_to_hbm [thread:$0]  (%p6821_p4), %s3992_s20, 16, %s3994_s24, %s3981_s16  }
 0x56e PF: > { %s7130_s27 = sld [smem:[#allocation27_spill]] }
 0x56f   : > { %s7131_s19 = sld [smem:[#allocation24_spill]] }
 0x574   : > { %p6283_p10 = scmp.ge.s32.totalorder %s7130_s27, 2 }
 0x575   : > { %s4005_s30 = sand.u32 1, %s7131_s19  }
 0x576   : > { %p6264_p11 = pnand %p6283_p10, %p6828_p8  ;;  %s4006_s23 = scalar_lea.sflag [#allocation5], %s4005_s30 }
 0x578   : > { %p6265_p12 = pneg %p6264_p11 }
 0x57a   : > { %6668 = dma.done.wait (%p6265_p12), %s4006_s23, 16  }
 0x57b   : > { %6670 = vsyncadd (%p6265_p12), %s4006_s23, 4294967280  ;;  %s31_s30 = sadd.s32 1, %s7130_s27   ;;  %s7133_s13 = sld [smem:[#allocation25_spill]] }
 0x57c   : > { %p28_p13 = scmp.ge.s32.totalorder %s31_s30, 4   ;;  %s7134_s27 = sld [smem:[#allocation31_spill]] }
 0x57d   : > { %s7135_s28 = sld [smem:[#allocation26_spill]]  ;;  %s7137_s25 = smov %s6677_s26 }
 0x57e   : > { %s7136_s29 = sld [smem:[#allocation28_spill]]  ;;  %30 = sbr.rel (!%p28_p13) target bundleno = 12 (0xc), region = 151 }
 0x581   : > { %s7138_s26 = smov %s7133_s13 }
 0x583   :  { %4011 = vsyncpa [#allocation4], 1 }
 0x584   :  { %4013 = vsyncpa [#allocation4 + $0x1], 1 }
 0x585   :  { %4014 = vsyncpa [#allocation7], 1 }
 0x586   :  { %4015 = vsyncpa [#allocation10], 1 }
 0x587   :  { %4016 = vsyncpa [#allocation13], 1 }
 0x588   :  { %4017 = vsyncpa [#allocation16], 1 }
 0x589   :  { %4018 = vsyncpa [#allocation5], 1 }
 0x58a   :  { %4020 = vsyncpa [#allocation5 + $0x1], 1 }

// kernel: pointnet_cls_forward.2
= control target key start
LH: loop header
LB: loop body
LE: loop exit
PB: predicated region body
PF: predicated region fallthrough
CT: control target
= control target key end

     0   :  { %s6743_s0 = inlined_call_operand.vmem [shape: f32[2,16,3], index: 0, kind: input, shape index: {}]   ;;  %s6744_s1 = inlined_call_operand.vmem [shape: f32[1,3,64], index: 1, kind: input, shape index: {}]   ;;  %s6745_s2 = inlined_call_operand.vmem [shape: f32[1,64], index: 2, kind: input, shape index: {}]   ;;  %s6746_s3 = inlined_call_operand.vmem [shape: bf16[64,128], index: 3, kind: input, shape index: {}]   ;;  %s6747_s4 = inlined_call_operand.vmem [shape: f32[1,128], index: 4, kind: input, shape index: {}]   ;;  %s6748_s5 = inlined_call_operand.hbm [shape: bf16[128,1024], index: 5, kind: input, shape index: {}]   ;;  %s6749_s6 = inlined_call_operand.vmem [shape: f32[1,1024], index: 6, kind: input, shape index: {}]   ;;  %s6750_s7 = inlined_call_operand.hbm [shape: bf16[1024,512], index: 7, kind: input, shape index: {}]   ;;  %s6751_s8 = inlined_call_operand.vmem [shape: f32[1,512], index: 8, kind: input, shape index: {}]   ;;  %s6752_s9 = inlined_call_operand.hbm [shape: bf16[512,256], index: 9, kind: input, shape index: {}]   ;;  %s6753_s10 = inlined_call_operand.hbm [shape: f32[1,256], index: 10, kind: input, shape index: {}]   ;;  %s6754_s11 = inlined_call_operand.hbm [shape: bf16[256,128], index: 11, kind: input, shape index: {}]   ;;  %s6755_s12 = inlined_call_operand.hbm [shape: f32[1,128], index: 12, kind: input, shape index: {}]   ;;  %s6756_s13 = inlined_call_operand.vmem [shape: f32[2,1,128], index: 13, kind: output, shape index: {}]  }
   0x1   :  { %6758 = sst [smem:[#allocation18_spill]] %s6748_s5 }
   0x2   :  { %6759 = sst [smem:[#allocation19_spill]] %s6750_s7 }
   0x3   :  { %6760 = sst [smem:[#allocation20_spill]] %s6753_s10 }
   0x4   :  { %18 = vsyncpa [#allocation4], 0 }
   0x5   :  { %19 = vsyncpa [#allocation6], 0 }
   0x6   :  { %20 = vsyncpa [#allocation9], 0 }
   0x7   :  { %21 = vsyncpa [#allocation12], 0  ;;  %s6496_s25 = smov 0   ;;  %s6498_s26 = smov 0  }
   0x8   :  { %s6500_s27 = smov 0  }
   0x9 LB: > { %6761 = sst [smem:[#allocation17_spill]] %s6410_s27  ;;  %s4050_s14 = sadd.s32 4294967295, %s6410_s27   ;;  %s6410_s27 = sphi %s6500_s27, %s27_s27   ;;  %s6406_s26 = sphi %s6498_s26, %s6770_s26   ;;  %s6402_s25 = sphi %s6496_s25, %s6769_s25  }
   0xa   : > { %s6762_s7 = sld [smem:[#allocation19_spill]]  ;;  %p4052_p0 = scmp.ge.s32.totalorder %s6410_s27, 1 }
   0xb   : > { %p350_p1 = scmp.lt.s32.totalorder %s6410_s27, 3  ;;  %p6517_p2 = scmp.eq.s32.totalorder %s4050_s14, 0 }
   0xc   : > { %s6412_s17 = smov [#allocation5]   ;;  %s6765_s10 = sld [smem:[#allocation20_spill]] }
   0xd   : > { %p6521_p3 = pnand %p4052_p0, %p350_p1  ;;  %s392_s18 = sshll.u32 %s6412_s17, 4  ;;  %s393_s18 = int_to_ptr.vmem [resolvable:$true] %s392_s18 }
   0xe   : > { %s6413_s23 = smov [#allocation8]   ;;  %s6414_s28 = smov 256  }
   0xf   : > { %p6120_p4 = pneg %p6521_p3  ;;  %s424_s24 = sshll.u32 %s6413_s23, 4  ;;  %s425_s24 = int_to_ptr.vmem [resolvable:$true] %s424_s24 }
  0x10   : > { %s390_s30 = sshll.u32 %s6762_s7, 4  ;;  %s6415_s29 = smov 16   ;;  %s391_s30 = int_to_ptr.hbm [resolvable:$true] %s390_s30 }
  0x11   : > { %p6532_p5 = pnand %p6517_p2, %p6120_p4  ;;  %s6767_s5 = sld [smem:[#allocation18_spill]] }
  0x12   : > { %s422_s21 = sshll.u32 %s6765_s10, 4  ;;  %s39_s20 = sadd.s32 1, %s6406_s26  ;;  %s423_s21 = int_to_ptr.hbm [resolvable:$true] %s422_s21 }
  0x13   : > { %6126 = dma.hbm_to_vmem [thread:$0]  (!%p6532_p5), %s391_s30, 32768, %s393_s18, [#allocation6], %s6414_s28, %s6414_s28, %s6415_s29  }
  0x14   : > { %6132 = dma.hbm_to_vmem [thread:$0]  (!%p6532_p5), %s423_s21, 32, %s425_s24, [#allocation9]  }
  0x15   : > { %p41_p6 = scmp.ge.s32.totalorder %s39_s20, 2  ;;  %s6416_s7 = smov [#allocation3]  }
  0x16   : > { %s375_s10 = sshll.u32 %s6416_s7, 4  ;;  %s6417_s23 = smov 512   ;;  %s376_s10 = int_to_ptr.vmem [resolvable:$true] %s375_s10 }
  0x17   : > { %s373_s19 = sshll.u32 %s6767_s5, 4  ;;  %s6772_s20 = smov (%p41_p6, %s39_s20), 0  ;;  %s374_s19 = int_to_ptr.hbm [resolvable:$true] %s373_s19 }
  0x18   : > { %s6418_s27 = smov 32   ;;  %s407_s21 = sshll.u32 %s6752_s9, 4  ;;  %s408_s21 = int_to_ptr.hbm [resolvable:$true] %s407_s21 }
  0x19   : > { %6123 = dma.hbm_to_vmem [thread:$0]  (!%p6532_p5), %s374_s19, 8192, %s376_s10, [#allocation4], %s6417_s23, %s6417_s23, %s6418_s27  }
  0x1a   : > { %s6419_s24 = smov [#allocation7]   ;;  %s433_s7 = sshll.u32 %s6754_s11, 4  ;;  %s434_s7 = int_to_ptr.hbm [resolvable:$true] %s433_s7 }
  0x1b   : > { %s409_s28 = sshll.u32 %s6419_s24, 4  ;;  %s6420_s17 = smov 128   ;;  %s410_s28 = int_to_ptr.vmem [resolvable:$true] %s409_s28 }
  0x1c   : > { %s6421_s5 = smov 8   ;;  %s6422_s10 = smov [#allocation10]  }
  0x1d   : > { %6129 = dma.hbm_to_vmem [thread:$0]  (!%p6532_p5), %s408_s21, 8192, %s410_s28, [#allocation6], %s6420_s17, %s6420_s17, %s6421_s5  }
  0x1e   : > { %s435_s27 = sshll.u32 %s6422_s10, 4  ;;  %s6423_s19 = smov 64   ;;  %s436_s27 = int_to_ptr.vmem [resolvable:$true] %s435_s27 }
  0x1f   : > { %s6424_s23 = smov 4   ;;  %s448_s24 = sshll.u32 %s6755_s12, 4  ;;  %s449_s24 = int_to_ptr.hbm [resolvable:$true] %s448_s24 }
  0x20   : > { %6135 = dma.hbm_to_vmem [thread:$0]  (!%p6532_p5), %s434_s7, 2048, %s436_s27, [#allocation9], %s6423_s19, %s6423_s19, %s6424_s23  }
  0x21   : > { %s6425_s29 = smov [#allocation11]   ;;  %476 = sbr.rel (%p6521_p3) target bundleno = 1116 (0x45c), region = 72 }
  0x22   : > { %s450_s14 = sshll.u32 %s6425_s29, 4  ;;  %s451_s14 = int_to_ptr.vmem [resolvable:$true] %s450_s14 }
  0x23   : > { %6138 = dma.hbm_to_vmem [thread:$0]  (!%p6532_p5), %s449_s24, 16, %s451_s14, [#allocation12]  }
  0x26   : > { %6385 = dma.done.wait (%p6517_p2), [#allocation4], 8192  }
  0x27   : > { %6387 = vsyncadd (%p6517_p2), [#allocation4], 4294959104 }
  0x28   : > { %6389 = dma.done.wait (%p6517_p2), [#allocation6], 40960  }
  0x29   : > { %6391 = vsyncadd (%p6517_p2), [#allocation6], 4294926336 }
  0x2a   : > { %6393 = dma.done.wait (%p6517_p2), [#allocation9], 2080  }
  0x2b   : > { %6395 = vsyncadd (%p6517_p2), [#allocation9], 4294965216 }
  0x2c   : > { %6397 = dma.done.wait (%p6517_p2), [#allocation12], 16  }
  0x2d   : > { %6399 = vsyncadd (%p6517_p2), [#allocation12], 4294967280  ;;  %p549_p7 = scmp.lt.s32.totalorder %s6402_s25, 1  ;;  %vm588_vm0 = vcmask 1042432   ;;  %vm581_vm1 = vcmask 23552   ;;  %v5695_v3 = vld [vmem:[%s6746_s3 + $0x18] sm:$0xff] }
  0x2e   : > { %v576_v0 = vld [vmem:[%s6744_s1] sm:$0x7]  ;;  %662 = vmatpush.bf16.msra.mxu1 %v5695_v3  ;;  %v5694_v4 = vld [vmem:[%s6746_s3 + $0x10] sm:$0xff]  ;;  %v5693_v5 = vld [vmem:[%s6746_s3 + $0x8] sm:$0xff]  ;;  %vm654_vm2 = vcmask 523264  }
  0x2f   : > { %s6774_s25 = smov (!%p549_p7, %s6402_s25), 1  ;;  %4069 = vmatpush.msk.msra.mxu0 %vm588_vm0, %v576_v0  ;;  %v5692_v6 = vld [vmem:[%s6746_s3] sm:$0xff]  ;;  %v4323_v12 = vld [vmem:[#allocation3 + $0x1c8] sm:$0xf]  ;;  %v5753_v16 = vld [vmem:[#allocation3 + $0x1cc] sm:$0xf] }
  0x30   : > { %s5691_s5 = sshll.u32 %s6774_s25, 4  ;;  %v4315_v7 = vld [vmem:[#allocation3 + $0x1c0] sm:$0xf]  ;;  %v5752_v9 = vld [vmem:[#allocation3 + $0x1c4] sm:$0xf]  ;;  %s560_s27 = scalar_lea.vmem %s6756_s13, %s6774_s25 }
  0x31   : > { %s556_s21 = scalar_lea.vmem %s6743_s0, %s5691_s5  ;;  %v5756_v8 = vld [vmem:[#allocation3 + $0x1dc] sm:$0xf0]  ;;  %v4317_v11 = vld [vmem:[#allocation3 + $0x1e0] sm:$0xf0]  ;;  %v5757_v13 = vld [vmem:[#allocation3 + $0x1e4] sm:$0xf0] }
  0x32   : > { %v574_v1 = vld [vmem:[%s556_s21] sm:$0xff]  ;;  %v575_v2 = vld [vmem:[%s556_s21 + $0x8] sm:$0xff]  ;;  %663 = vmatpush.bf16.msra.mxu1 %v5694_v4  ;;  %v4316_v10 = vor.u32 %v5756_v8, %v4315_v7  ;;  %v4320_v14 = vor.u32 %v5752_v9, %v4317_v11  ;;  %v4324_v15 = vor.u32 %v5757_v13, %v4323_v12 }
  0x33   : > { %4070 = vmatmul.msk.f32.vlgmr.msra.gmra.mxu0 %vm581_vm1, %v574_v1  ;;  %v4325_v17 = vld [vmem:[#allocation3 + $0x1e8] sm:$0xf0]  ;;  %v4283_v18 = vld [vmem:[#allocation3 + $0x180] sm:$0xf]  ;;  %v5744_v21 = vld [vmem:[#allocation3 + $0x184] sm:$0xf] }
  0x34   : > { %1059 = vmatpush.bf16.msra.mxu2 %v4316_v10  ;;  %v4328_v19 = vor.u32 %v5753_v16, %v4325_v17  ;;  %v5748_v20 = vld [vmem:[#allocation3 + $0x19c] sm:$0xf0]  ;;  %v4285_v22 = vld [vmem:[#allocation3 + $0x1a0] sm:$0xf0]  ;;  %1073 = vmatpush.bf16.msra.mxu3 %v4320_v14  ;;  %v4291_v25 = vld [vmem:[#allocation3 + $0x188] sm:$0xf] }
  0x35   : > { %1087 = vmatpush.bf16.msrb.mxu0 %v4324_v15  ;;  %v4284_v23 = vor.u32 %v5748_v20, %v4283_v18  ;;  %v4288_v24 = vor.u32 %v5744_v21, %v4285_v22  ;;  %v5749_v26 = vld [vmem:[#allocation3 + $0x1a4] sm:$0xf0]  ;;  %v5745_v27 = vld [vmem:[#allocation3 + $0x18c] sm:$0xf]  ;;  %v4251_v30 = vld [vmem:[#allocation3 + $0x140] sm:$0xf] }
  0x36   : > { %664 = vmatpush.bf16.msra.mxu1 %v5693_v5  ;;  %v4292_v28 = vor.u32 %v5749_v26, %v4291_v25  ;;  %v4293_v29 = vld [vmem:[#allocation3 + $0x1a8] sm:$0xf0]  ;;  %v5740_v31 = vld [vmem:[#allocation3 + $0x15c] sm:$0xf0]  ;;  %v5736_v33 = vld [vmem:[#allocation3 + $0x144] sm:$0xf] }
  0x37   : > { %v4296_v32 = vor.u32 %v5745_v27, %v4293_v29  ;;  %v4253_v34 = vld [vmem:[#allocation3 + $0x160] sm:$0xf0]  ;;  %v4259_v35 = vld [vmem:[#allocation3 + $0x148] sm:$0xf]  ;;  %v4252_v36 = vor.u32 %v5740_v31, %v4251_v30  ;;  %v5737_v38 = vld [vmem:[#allocation3 + $0x14c] sm:$0xf] }
  0x38   : > { %1060 = vmatpush.bf16.msra.mxu2 %v4284_v23  ;;  %v5741_v37 = vld [vmem:[#allocation3 + $0x164] sm:$0xf0]  ;;  %v4261_v39 = vld [vmem:[#allocation3 + $0x168] sm:$0xf0]  ;;  %1074 = vmatpush.bf16.msra.mxu3 %v4288_v24  ;;  %v4256_v40 = vor.u32 %v5736_v33, %v4253_v34  ;;  %v4219_v42 = vld [vmem:[#allocation3 + $0x100] sm:$0xf] }
  0x39   : > { %1088 = vmatpush.bf16.msrb.mxu0 %v4292_v28  ;;  %v4260_v41 = vor.u32 %v5741_v37, %v4259_v35  ;;  %v5732_v43 = vld [vmem:[#allocation3 + $0x11c] sm:$0xf0]  ;;  %v5728_v44 = vld [vmem:[#allocation3 + $0x104] sm:$0xf]  ;;  %v4264_v45 = vor.u32 %v5737_v38, %v4261_v39  ;;  %v4227_v47 = vld [vmem:[#allocation3 + $0x108] sm:$0xf] }
  0x3a   : > { %665 = vmatpush.bf16.msra.mxu1 %v5692_v6  ;;  %v4221_v46 = vld [vmem:[#allocation3 + $0x120] sm:$0xf0]  ;;  %v5733_v48 = vld [vmem:[#allocation3 + $0x124] sm:$0xf0]  ;;  %v5729_v49 = vld [vmem:[#allocation3 + $0x10c] sm:$0xf]  ;;  %v4220_v51 = vor.u32 %v5732_v43, %v4219_v42 }
  0x3b   : > { %4071 = vmatmul.msk.f32.gmra.mxu0 %vm581_vm1, %v575_v2  ;;  %v4229_v50 = vld [vmem:[#allocation3 + $0x128] sm:$0xf0]  ;;  %v4224_v52 = vor.u32 %v5728_v44, %v4221_v46  ;;  %v4228_v53 = vor.u32 %v5733_v48, %v4227_v47  ;;  %v4187_v54 = vld [vmem:[#allocation3 + $0xc0] sm:$0xf]  ;;  %v5720_v56 = vld [vmem:[#allocation3 + $0xc4] sm:$0xf] }
  0x3c   : > { %1061 = vmatpush.bf16.msra.mxu2 %v4252_v36  ;;  %1075 = vmatpush.bf16.msra.mxu3 %v4256_v40  ;;  %v5724_v55 = vld [vmem:[#allocation3 + $0xdc] sm:$0xf0]  ;;  %v4232_v57 = vor.u32 %v5729_v49, %v4229_v50  ;;  %v4189_v58 = vld [vmem:[#allocation3 + $0xe0] sm:$0xf0]  ;;  %v4195_v59 = vld [vmem:[#allocation3 + $0xc8] sm:$0xf] }
  0x3d   : > { %1089 = vmatpush.bf16.msrb.mxu0 %v4260_v41  ;;  %v5725_v60 = vld [vmem:[#allocation3 + $0xe4] sm:$0xf0]  ;;  %v5721_v61 = vld [vmem:[#allocation3 + $0xcc] sm:$0xf]  ;;  %v4188_v63 = vor.u32 %v5724_v55, %v4187_v54  ;;  %v4192_v0 = vor.u32 %v5720_v56, %v4189_v58  ;;  %v4155_v2 = vld [vmem:[#allocation3 + $0x80] sm:$0xf] }
  0x3e   : > { %1101 = vmatpush.bf16.msrb.mxu1 %v4328_v19  ;;  %v4197_v62 = vld [vmem:[#allocation3 + $0xe8] sm:$0xf0]  ;;  %v4196_v1 = vor.u32 %v5725_v60, %v4195_v59  ;;  %v5716_v3 = vld [vmem:[#allocation3 + $0x9c] sm:$0xf0]  ;;  %v5712_v4 = vld [vmem:[#allocation3 + $0x84] sm:$0xf] }
  0x3f   : > { %v4200_v6 = vor.u32 %v5721_v61, %v4197_v62  ;;  %v4157_v7 = vld [vmem:[#allocation3 + $0xa0] sm:$0xf0]  ;;  %v4163_v8 = vld [vmem:[#allocation3 + $0x88] sm:$0xf]  ;;  %v5713_v10 = vld [vmem:[#allocation3 + $0x8c] sm:$0xf]  ;;  %v4156_v13 = vor.u32 %v5716_v3, %v4155_v2 }
  0x40   : > { %1062 = vmatpush.bf16.msra.mxu2 %v4220_v51  ;;  %1076 = vmatpush.bf16.msra.mxu3 %v4224_v52  ;;  %v5717_v9 = vld [vmem:[#allocation3 + $0xa4] sm:$0xf0]  ;;  %v4165_v11 = vld [vmem:[#allocation3 + $0xa8] sm:$0xf0]  ;;  %v6189_v12 = vld [vmem:[%s6745_s2] ss:$0 sm:$0xff]  ;;  %v4160_v14 = vor.u32 %v5712_v4, %v4157_v7 }
  0x41   : > { %1090 = vmatpush.bf16.msrb.mxu0 %v4228_v53  ;;  %v4164_v15 = vor.u32 %v5717_v9, %v4163_v8  ;;  %v4123_v16 = vld [vmem:[#allocation3 + $0x40] sm:$0xf]  ;;  %v5704_v18 = vld [vmem:[#allocation3 + $0x44] sm:$0xf]  ;;  %v4168_v19 = vor.u32 %v5713_v10, %v4165_v11  ;;  %v4131_v21 = vld [vmem:[#allocation3 + $0x48] sm:$0xf] }
  0x42   : > { %1102 = vmatpush.bf16.msrb.mxu1 %v4296_v32  ;;  %v5708_v17 = vld [vmem:[#allocation3 + $0x5c] sm:$0xf0]  ;;  %v4125_v20 = vld [vmem:[#allocation3 + $0x60] sm:$0xf0]  ;;  %v5709_v22 = vld [vmem:[#allocation3 + $0x64] sm:$0xf0] }
  0x43   : > { %v5705_v23 = vld [vmem:[#allocation3 + $0x4c] sm:$0xf]  ;;  %v4124_v25 = vor.u32 %v5708_v17, %v4123_v16  ;;  %v4128_v27 = vor.u32 %v5704_v18, %v4125_v20  ;;  %v4132_v28 = vor.u32 %v5709_v22, %v4131_v21  ;;  %v4091_v29 = vld [vmem:[#allocation3] sm:$0xf]  ;;  %v5696_v33 = vld [vmem:[#allocation3 + $0x4] sm:$0xf] }
  0x44   : > { %1063 = vmatpush.bf16.msra.mxu2 %v4188_v63  ;;  %1077 = vmatpush.bf16.msra.mxu3 %v4192_v0  ;;  %v4133_v24 = vld [vmem:[#allocation3 + $0x68] sm:$0xf0]  ;;  %v5700_v30 = vld [vmem:[#allocation3 + $0x1c] sm:$0xf0]  ;;  %v4093_v34 = vld [vmem:[#allocation3 + $0x20] sm:$0xf0] }
  0x45   : > { %1091 = vmatpush.bf16.msrb.mxu0 %v4196_v1  ;;  %v4136_v32 = vor.u32 %v5705_v23, %v4133_v24  ;;  %v4099_v35 = vld [vmem:[#allocation3 + $0x8] sm:$0xf]  ;;  %v5697_v38 = vld [vmem:[#allocation3 + $0xc] sm:$0xf]  ;;  %v4092_v40 = vor.u32 %v5700_v30, %v4091_v29  ;;  %v4096_v43 = vor.u32 %v5696_v33, %v4093_v34  ;;  %v4331_v47 = vld [vmem:[#allocation3 + $0x1d0] sm:$0xf] }
  0x46   : > { %1103 = vmatpush.bf16.msrb.mxu1 %v4264_v45  ;;  %v5701_v37 = vld [vmem:[#allocation3 + $0x24] sm:$0xf0]  ;;  %v4101_v39 = vld [vmem:[#allocation3 + $0x28] sm:$0xf0]  ;;  %v5758_v48 = vld [vmem:[#allocation3 + $0x1ec] sm:$0xf0] }
  0x47   : > { %v4100_v44 = vor.u32 %v5701_v37, %v4099_v35  ;;  %v4104_v45 = vor.u32 %v5697_v38, %v4101_v39  ;;  %v5754_v49 = vld [vmem:[#allocation3 + $0x1d4] sm:$0xf]  ;;  %v4332_v50 = vor.u32 %v5758_v48, %v4331_v47  ;;  %v4339_v52 = vld [vmem:[#allocation3 + $0x1d8] sm:$0xf]  ;;  %v5755_v56 = vld [vmem:[#allocation3 + $0x1dc] sm:$0xf] }
  0x48   : > { %1064 = vmatpush.bf16.msra.mxu2 %v4156_v13  ;;  %1078 = vmatpush.bf16.msra.mxu3 %v4160_v14  ;;  %v4333_v51 = vld [vmem:[#allocation3 + $0x1f0] sm:$0xf0]  ;;  %v5759_v53 = vld [vmem:[#allocation3 + $0x1f4] sm:$0xf0]  ;;  %v4299_v59 = vld [vmem:[#allocation3 + $0x190] sm:$0xf] }
  0x49   : > { %1092 = vmatpush.bf16.msrb.mxu0 %v4164_v15  ;;  %v4336_v54 = vor.u32 %v5754_v49, %v4333_v51  ;;  %v4340_v55 = vor.u32 %v5759_v53, %v4339_v52  ;;  %v5750_v60 = vld [vmem:[#allocation3 + $0x1ac] sm:$0xf0]  ;;  %v5746_v61 = vld [vmem:[#allocation3 + $0x194] sm:$0xf]  ;;  %v4307_v0 = vld [vmem:[#allocation3 + $0x198] sm:$0xf] }
  0x4a   : > { %1104 = vmatpush.bf16.msrb.mxu1 %v4232_v57  ;;  %v4341_v57 = vld [vmem:[#allocation3 + $0x1f8] sm:$0xf0]  ;;  %v4300_v62 = vor.u32 %v5750_v60, %v4299_v59  ;;  %v4301_v63 = vld [vmem:[#allocation3 + $0x1b0] sm:$0xf0]  ;;  %v5751_v1 = vld [vmem:[#allocation3 + $0x1b4] sm:$0xf0] }
  0x4b   : > { %v4344_v58 = vor.u32 %v5755_v56, %v4341_v57  ;;  %v4304_v2 = vor.u32 %v5746_v61, %v4301_v63  ;;  %v4308_v3 = vor.u32 %v5751_v1, %v4307_v0  ;;  %v5747_v4 = vld [vmem:[#allocation3 + $0x19c] sm:$0xf]  ;;  %v4267_v7 = vld [vmem:[#allocation3 + $0x150] sm:$0xf]  ;;  %v5738_v9 = vld [vmem:[#allocation3 + $0x154] sm:$0xf] }
  0x4c   : > { %1065 = vmatpush.bf16.msra.mxu2 %v4124_v25  ;;  %1079 = vmatpush.bf16.msra.mxu3 %v4128_v27  ;;  %v5742_v8 = vld [vmem:[#allocation3 + $0x16c] sm:$0xf0]  ;;  %v4269_v11 = vld [vmem:[#allocation3 + $0x170] sm:$0xf0]  ;;  %v5743_v13 = vld [vmem:[#allocation3 + $0x174] sm:$0xf0] }
  0x4d   : > { %1093 = vmatpush.bf16.msrb.mxu0 %v4132_v28  ;;  %v4268_v10 = vor.u32 %v5742_v8, %v4267_v7  ;;  %v4272_v14 = vor.u32 %v5738_v9, %v4269_v11  ;;  %v5739_v16 = vld [vmem:[#allocation3 + $0x15c] sm:$0xf]  ;;  %v5734_v20 = vld [vmem:[#allocation3 + $0x12c] sm:$0xf0]  ;;  %v5730_v21 = vld [vmem:[#allocation3 + $0x114] sm:$0xf] }
  0x4e   : > { %1105 = vmatpush.bf16.msrb.mxu1 %v4200_v6  ;;  %v4277_v17 = vld [vmem:[#allocation3 + $0x178] sm:$0xf0]  ;;  %v4237_v23 = vld [vmem:[#allocation3 + $0x130] sm:$0xf0]  ;;  %v4243_v24 = vld [vmem:[#allocation3 + $0x118] sm:$0xf] }
  0x4f   : > { %v4280_v18 = vor.u32 %v5739_v16, %v4277_v17  ;;  %v5735_v25 = vld [vmem:[#allocation3 + $0x134] sm:$0xf0]  ;;  %v5731_v28 = vld [vmem:[#allocation3 + $0x11c] sm:$0xf]  ;;  %v5722_v33 = vld [vmem:[#allocation3 + $0xd4] sm:$0xf] }
  0x50   : > { %1066 = vmatpush.bf16.msra.mxu2 %v4092_v40  ;;  %1080 = vmatpush.bf16.msra.mxu3 %v4096_v43  ;;  %v4244_v27 = vor.u32 %v5735_v25, %v4243_v24  ;;  %v4245_v29 = vld [vmem:[#allocation3 + $0x138] sm:$0xf0]  ;;  %v4205_v35 = vld [vmem:[#allocation3 + $0xf0] sm:$0xf0]  ;;  %v5727_v37 = vld [vmem:[#allocation3 + $0xf4] sm:$0xf0] }
  0x51   : > { %1094 = vmatpush.bf16.msrb.mxu0 %v4100_v44  ;;  %v4248_v30 = vor.u32 %v5731_v28, %v4245_v29  ;;  %v4208_v38 = vor.u32 %v5722_v33, %v4205_v35  ;;  %v5723_v40 = vld [vmem:[#allocation3 + $0xdc] sm:$0xf]  ;;  %v5718_v44 = vld [vmem:[#allocation3 + $0xac] sm:$0xf0]  ;;  %v4179_v49 = vld [vmem:[#allocation3 + $0x98] sm:$0xf] }
  0x52   : > { %1106 = vmatpush.bf16.msrb.mxu1 %v4168_v19  ;;  %v4235_v19 = vld [vmem:[#allocation3 + $0x110] sm:$0xf]  ;;  %v5715_v51 = vld [vmem:[#allocation3 + $0x9c] sm:$0xf]  ;;  %v5706_v57 = vld [vmem:[#allocation3 + $0x54] sm:$0xf] }
  0x53   : > { %v4236_v22 = vor.u32 %v5734_v20, %v4235_v19  ;;  %v4181_v53 = vld [vmem:[#allocation3 + $0xb8] sm:$0xf0]  ;;  %v4147_v59 = vld [vmem:[#allocation3 + $0x58] sm:$0xf]  ;;  %v6190_v16 = vld [vmem:[%s6747_s4] ss:$0 sm:$0xff] }
  0x54   : > { %1115 = vmatpush.bf16.msrb.mxu2 %v4332_v50  ;;  %1129 = vmatpush.bf16.msrb.mxu3 %v4336_v54  ;;  %v5719_v50 = vld [vmem:[#allocation3 + $0xb4] sm:$0xf0]  ;;  %v4139_v54 = vld [vmem:[#allocation3 + $0x50] sm:$0xf]  ;;  %v4184_v56 = vor.u32 %v5715_v51, %v4181_v53  ;;  %v4149_v63 = vld [vmem:[#allocation3 + $0x78] sm:$0xf0] }
  0x55   : > { %1143 = vmatpush.bf16.msra.mxu0 %v4340_v55  ;;  %v4180_v52 = vor.u32 %v5719_v50, %v4179_v49  ;;  %v5710_v55 = vld [vmem:[#allocation3 + $0x6c] sm:$0xf0]  ;;  %v5711_v61 = vld [vmem:[#allocation3 + $0x74] sm:$0xf0]  ;;  %v5699_v9 = vld [vmem:[#allocation3 + $0x1c] sm:$0xf] }
  0x56   : > { %1107 = vmatpush.bf16.msrb.mxu1 %v4136_v32  ;;  %v5726_v32 = vld [vmem:[#allocation3 + $0xec] sm:$0xf0]  ;;  %v4140_v60 = vor.u32 %v5710_v55, %v4139_v54  ;;  %v4148_v1 = vor.u32 %v5711_v61, %v4147_v59  ;;  %v4115_v7 = vld [vmem:[#allocation3 + $0x18] sm:$0xf]  ;;  %v4715_v20 = vld [vmem:[#allocation5 + $0x2e0] sm:$0xf] }
  0x57   : > { %v5703_v8 = vld [vmem:[#allocation3 + $0x34] sm:$0xf0]  ;;  %v4459_v24 = vld [vmem:[#allocation5 + $0xe0] sm:$0xf]  ;;  %v5790_v25 = vld [vmem:[#allocation5 + $0xec] sm:$0xf0] }
  0x58   : > { %1116 = vmatpush.bf16.msrb.mxu2 %v4300_v62  ;;  %1130 = vmatpush.bf16.msrb.mxu3 %v4304_v2  ;;  %v5707_v62 = vld [vmem:[#allocation3 + $0x5c] sm:$0xf]  ;;  %v4107_v2 = vld [vmem:[#allocation3 + $0x10] sm:$0xf]  ;;  %v4587_v28 = vld [vmem:[#allocation5 + $0x1e0] sm:$0xf] }
  0x59   : > { %1144 = vmatpush.bf16.msra.mxu0 %v4308_v3  ;;  %v5702_v3 = vld [vmem:[#allocation3 + $0x2c] sm:$0xf0]  ;;  %v4699_v33 = vld [vmem:[#allocation5 + $0x2c0] sm:$0xf] }
  0x5a   : > { %1108 = vmatpush.bf16.msrb.mxu1 %v4104_v45  ;;  %v5714_v45 = vld [vmem:[#allocation3 + $0x94] sm:$0xf]  ;;  %v4108_v11 = vor.u32 %v5702_v3, %v4107_v2  ;;  %v5822_v29 = vld [vmem:[#allocation5 + $0x1ec] sm:$0xf0]  ;;  %v4827_v35 = vld [vmem:[#allocation5 + $0x3c0] sm:$0xf] }
  0x5b   : > { %v4427_v51 = vld [vmem:[#allocation5 + $0xa0] sm:$0xf]  ;;  %v5814_v54 = vld [vmem:[#allocation5 + $0x1ac] sm:$0xf0] }
  0x5c   : > { %1117 = vmatpush.bf16.msrb.mxu2 %v4268_v10  ;;  %1131 = vmatpush.bf16.msrb.mxu3 %v4272_v14  ;;  %v4117_v10 = vld [vmem:[#allocation3 + $0x38] sm:$0xf0]  ;;  %v4555_v53 = vld [vmem:[#allocation5 + $0x1a0] sm:$0xf]  ;;  %v5810_v2 = vld [vmem:[#allocation5 + $0x18c] sm:$0xf0] }
  0x5d   : > { %v4120_v14 = vor.u32 %v5699_v9, %v4117_v10  ;;  %v4795_v59 = vld [vmem:[#allocation5 + $0x380] sm:$0xf] }
  0x60   : > { %1118 = vmatpush.bf16.msrb.mxu2 %v4236_v22  ;;  %v4843_v22 = vld [vmem:[#allocation5 + $0x3e0] sm:$0xf] }
  0xb0   : > { %v609_v5 = vpop.f32.mrf.mxu0 }
  0xb1   : > { %v610_v26 = vadd.f32 %v6189_v12, %v609_v5  ;;  %v4309_v5 = vld [vmem:[#allocation3 + $0x1b8] sm:$0xf0] }
  0xb2   : > { %v4312_v6 = vor.u32 %v5747_v4, %v4309_v5  ;;  %v5698_v4 = vld [vmem:[#allocation3 + $0x14] sm:$0xf]  ;;  %v4152_v5 = vor.u32 %v5707_v62, %v4149_v63  ;;  %v4556_v62 = vor.u32 %v5814_v54, %v4555_v53  ;;  %v4411_v63 = vld [vmem:[#allocation5 + $0x80] sm:$0xf]  ;;  %v5798_v53 = vld [vmem:[#allocation5 + $0x12c] sm:$0xf0] }
  0xb3   : > { %v615_v41 = vmax.f32 %v610_v26, 0.0  ;;  %v4240_v26 = vor.u32 %v5730_v21, %v4237_v23  ;;  %v5854_v21 = vld [vmem:[#allocation5 + $0x2ec] sm:$0xf0] }
  0xb4   : > { %v5886_v23 = vld [vmem:[#allocation5 + $0x3ec] sm:$0xf0] }
  0xb5   : > { %1132 = vmatpush.bf16.msrb.mxu3 %v4240_v26 }
  0xb8   : > { %v612_v31 = vpop.f32.mrf.mxu0 }
  0xb9   : > { %v613_v36 = vadd.f32 %v6189_v12, %v612_v31  ;;  %v4275_v12 = vld [vmem:[#allocation3 + $0x158] sm:$0xf]  ;;  %v4203_v31 = vld [vmem:[#allocation3 + $0xd0] sm:$0xf]  ;;  %1133 = vmatpush.bf16.msrb.mxu3 %v4208_v38  ;;  %v4588_v38 = vor.u32 %v5822_v29, %v4587_v28  ;;  %v4619_v29 = vld [vmem:[#allocation5 + $0x220] sm:$0xf] }
  0xba   : > { %v4276_v15 = vor.u32 %v5743_v13, %v4275_v12  ;;  %v4204_v34 = vor.u32 %v5726_v32, %v4203_v31  ;;  %v4116_v13 = vor.u32 %v5703_v8, %v4115_v7  ;;  %v4716_v31 = vor.u32 %v5854_v21, %v4715_v20  ;;  %v4779_v7 = vld [vmem:[#allocation5 + $0x360] sm:$0xf]  ;;  %v5870_v8 = vld [vmem:[#allocation5 + $0x36c] sm:$0xf0] }
  0xbb   : > { %v616_v42 = vmax.f32 %v613_v36, 0.0  ;;  %v4211_v36 = vld [vmem:[#allocation3 + $0xd8] sm:$0xf]  ;;  %v4844_v32 = vor.u32 %v5886_v23, %v4843_v22  ;;  %v5866_v20 = vld [vmem:[#allocation5 + $0x34c] sm:$0xf0] }
  0xbc   : > { %1145 = vmatpush.bf16.msra.mxu0 %v4276_v15  ;;  %v4212_v39 = vor.u32 %v5727_v37, %v4211_v36  ;;  %1119 = vmatpush.bf16.msrb.mxu2 %v4204_v34  ;;  %v5850_v34 = vld [vmem:[#allocation5 + $0x2cc] sm:$0xf0]  ;;  %v4460_v37 = vor.u32 %v5790_v25, %v4459_v24  ;;  %v4379_v23 = vld [vmem:[#allocation5 + $0x40] sm:$0xf] }
  0xbd   : > { %v617_v46 = vpack.c.bf16 %v616_v42, %v615_v41  ;;  %v4213_v41 = vld [vmem:[#allocation3 + $0xf8] sm:$0xf0]  ;;  %v4171_v42 = vld [vmem:[#allocation3 + $0x90] sm:$0xf]  ;;  %v4507_v25 = vld [vmem:[#allocation5 + $0x140] sm:$0xf] }
  0xbe   : > { %v4216_v43 = vor.u32 %v5723_v40, %v4213_v41  ;;  %v4172_v47 = vor.u32 %v5718_v44, %v4171_v42  ;;  %v5882_v36 = vld [vmem:[#allocation5 + $0x3cc] sm:$0xf0]  ;;  %v4571_v41 = vld [vmem:[#allocation5 + $0x1c0] sm:$0xf] }
  0xbf   : > { %4088 = vmatmul.msk.bf16.vlgmr.msra.gmra.mxu1 %vm654_vm2, %v617_v46  ;;  %v4173_v46 = vld [vmem:[#allocation3 + $0xb0] sm:$0xf0]  ;;  %v5786_v40 = vld [vmem:[#allocation5 + $0xcc] sm:$0xf0]  ;;  %v4828_v44 = vor.u32 %v5882_v36, %v4827_v35 }
  0xc0   : > { %1157 = vmatpush.bf16.msra.mxu1 %v4344_v58  ;;  %1146 = vmatpush.bf16.msra.mxu0 %v4244_v27  ;;  %v4176_v48 = vor.u32 %v5714_v45, %v4173_v46  ;;  %v4141_v58 = vld [vmem:[#allocation3 + $0x70] sm:$0xf0]  ;;  %v5818_v42 = vld [vmem:[#allocation5 + $0x1cc] sm:$0xf0]  ;;  %v4683_v45 = vld [vmem:[#allocation5 + $0x2a0] sm:$0xf] }
  0xc1   : > { %1120 = vmatpush.bf16.msrb.mxu2 %v4172_v47  ;;  %v4144_v0 = vor.u32 %v5706_v57, %v4141_v58  ;;  %v5846_v46 = vld [vmem:[#allocation5 + $0x2ac] sm:$0xf0]  ;;  %v4811_v47 = vld [vmem:[#allocation5 + $0x3a0] sm:$0xf]  ;;  %v4572_v50 = vor.u32 %v5818_v42, %v4571_v41 }
  0xc2   : > { %1134 = vmatpush.bf16.msrb.mxu3 %v4176_v48  ;;  %v5878_v48 = vld [vmem:[#allocation5 + $0x3ac] sm:$0xf0]  ;;  %v4684_v55 = vor.u32 %v5846_v46, %v4683_v45  ;;  %v4667_v57 = vld [vmem:[#allocation5 + $0x280] sm:$0xf] }
  0xc3   : > { %v5842_v58 = vld [vmem:[#allocation5 + $0x28c] sm:$0xf0]  ;;  %v5355_v45 = vld [vmem:[#allocation5 + $0x7e0] sm:$0xf] }
  0xc4   : > { %1158 = vmatpush.bf16.msra.mxu1 %v4312_v6  ;;  %1147 = vmatpush.bf16.msra.mxu0 %v4212_v39  ;;  %v4109_v6 = vld [vmem:[#allocation3 + $0x30] sm:$0xf0]  ;;  %v4443_v39 = vld [vmem:[#allocation5 + $0xc0] sm:$0xf]  ;;  %v4668_v3 = vor.u32 %v5842_v58, %v4667_v57  ;;  %v5770_v24 = vld [vmem:[#allocation5 + $0x4c] sm:$0xf0] }
  0xc5   : > { %1121 = vmatpush.bf16.msrb.mxu2 %v4140_v60  ;;  %v4112_v12 = vor.u32 %v5698_v4, %v4109_v6  ;;  %v4444_v49 = vor.u32 %v5786_v40, %v4443_v39  ;;  %v5874_v60 = vld [vmem:[#allocation5 + $0x38c] sm:$0xf0]  ;;  %v4731_v39 = vld [vmem:[#allocation5 + $0x300] sm:$0xf] }
  0xc6   : > { %1135 = vmatpush.bf16.msrb.mxu3 %v4144_v0  ;;  %v5778_v0 = vld [vmem:[#allocation5 + $0x8c] sm:$0xf0]  ;;  %v4796_v4 = vor.u32 %v5874_v60, %v4795_v59  ;;  %v5339_v57 = vld [vmem:[#allocation5 + $0x7c0] sm:$0xf] }
  0xc7   : > { %v5838_v6 = vld [vmem:[#allocation5 + $0x26c] sm:$0xf0]  ;;  %v4412_v9 = vor.u32 %v5778_v0, %v4411_v63  ;;  %v4347_v60 = vld [vmem:[#allocation5] sm:$0xf] }
  0xc8   : > { %1159 = vmatpush.bf16.msra.mxu1 %v4280_v18  ;;  %1148 = vmatpush.bf16.msra.mxu0 %v4180_v52  ;;  %v5782_v52 = vld [vmem:[#allocation5 + $0xac] sm:$0xf0]  ;;  %v4475_v0 = vld [vmem:[#allocation5 + $0x100] sm:$0xf] }
  0xc9   : > { %1122 = vmatpush.bf16.msrb.mxu2 %v4108_v11  ;;  %v4428_v61 = vor.u32 %v5782_v52, %v4427_v51  ;;  %v4395_v11 = vld [vmem:[#allocation5 + $0x60] sm:$0xf]  ;;  %v5858_v40 = vld [vmem:[#allocation5 + $0x30c] sm:$0xf0] }
  0xca   : > { %1136 = vmatpush.bf16.msrb.mxu3 %v4112_v12  ;;  %v5774_v12 = vld [vmem:[#allocation5 + $0x6c] sm:$0xf0]  ;;  %v4732_v42 = vor.u32 %v5858_v40, %v4731_v39  ;;  %v4491_v52 = vld [vmem:[#allocation5 + $0x120] sm:$0xf] }
  0xcb   : > { %v4396_v21 = vor.u32 %v5774_v12, %v4395_v11  ;;  %v4492_v54 = vor.u32 %v5798_v53, %v4491_v52  ;;  %v6010_v59 = vld [vmem:[#allocation5 + $0x7cc] sm:$0xf0]  ;;  %v5323_v11 = vld [vmem:[#allocation5 + $0x7a0] sm:$0xf] }
  0xcc   : > { %1160 = vmatpush.bf16.msra.mxu1 %v4248_v30  ;;  %1149 = vmatpush.bf16.msra.mxu0 %v4148_v1  ;;  %v4539_v1 = vld [vmem:[#allocation5 + $0x180] sm:$0xf]  ;;  %v5906_v40 = vld [vmem:[#allocation5 + $0x48c] sm:$0xf0] }
  0xcd   : > { %v4540_v10 = vor.u32 %v5810_v2, %v4539_v1  ;;  %v5794_v1 = vld [vmem:[#allocation5 + $0x10c] sm:$0xf0]  ;;  %v4923_v39 = vld [vmem:[#allocation5 + $0x480] sm:$0xf] }
  0xce   : > { %v4476_v2 = vor.u32 %v5794_v1, %v4475_v0  ;;  %v5902_v52 = vld [vmem:[#allocation5 + $0x46c] sm:$0xf0]  ;;  %v5035_v53 = vld [vmem:[#allocation5 + $0x560] sm:$0xf] }
  0xcf   : > { %v5898_v0 = vld [vmem:[#allocation5 + $0x44c] sm:$0xf0]  ;;  %v5019_v1 = vld [vmem:[#allocation5 + $0x540] sm:$0xf] }
  0xd0   : > { %1161 = vmatpush.bf16.msra.mxu1 %v4216_v43  ;;  %1150 = vmatpush.bf16.msra.mxu0 %v4116_v13  ;;  %v4700_v43 = vor.u32 %v5850_v34, %v4699_v33  ;;  %v4523_v13 = vld [vmem:[#allocation5 + $0x160] sm:$0xf]  ;;  %v5862_v33 = vld [vmem:[#allocation5 + $0x32c] sm:$0xf0]  ;;  %v4380_v34 = vor.u32 %v5770_v24, %v4379_v23 }
  0xd1   : > { %v5307_v23 = vld [vmem:[#allocation5 + $0x780] sm:$0xf] }
  0xd4   : > { %1162 = vmatpush.bf16.msra.mxu1 %v4184_v56  ;;  %v4812_v56 = vor.u32 %v5878_v48, %v4811_v47  ;;  %v6014_v47 = vld [vmem:[#allocation5 + $0x7ec] sm:$0xf0]  ;;  %v4363_v48 = vld [vmem:[#allocation5 + $0x20] sm:$0xf] }
  0xd8   : > { %1163 = vmatpush.bf16.msra.mxu1 %v4152_v5  ;;  %v4651_v5 = vld [vmem:[#allocation5 + $0x260] sm:$0xf] }
  0xdc   : > { %1164 = vmatpush.bf16.msra.mxu1 %v4120_v14  ;;  %v5806_v14 = vld [vmem:[#allocation5 + $0x16c] sm:$0xf0] }
  0xdd   : > { %v4524_v22 = vor.u32 %v5806_v14, %v4523_v13  ;;  %v6006_v13 = vld [vmem:[#allocation5 + $0x7ac] sm:$0xf0] }
  0xde   : > { %v5324_v14 = vor.u32 %v6006_v13, %v5323_v11  ;;  %v4875_v11 = vld [vmem:[#allocation5 + $0x420] sm:$0xf] }
  0xdf   : > { %v5003_v13 = vld [vmem:[#allocation5 + $0x520] sm:$0xf] }
 0x13c   : > { %v667_v15 = vpop.f32.mrf.mxu1 }
 0x13d   : > { %v668_v17 = vadd.f32 %v6190_v16, %v667_v15  ;;  %v4652_v15 = vor.u32 %v5838_v6, %v4651_v5  ;;  %v5099_v5 = vld [vmem:[#allocation5 + $0x5e0] sm:$0xf] }
 0x13f   : > { %v672_v26 = vmax.f32 %v668_v17, 0.0  ;;  %v4635_v17 = vld [vmem:[#allocation5 + $0x240] sm:$0xf] }
 0x144   : > { %v669_v18 = vpop.f32.mrf.mxu1 }
 0x145   : > { %v670_v19 = vadd.f32 %v6190_v16, %v669_v18  ;;  %v4780_v16 = vor.u32 %v5870_v8, %v4779_v7  ;;  %v5834_v18 = vld [vmem:[#allocation5 + $0x24c] sm:$0xf0] }
 0x146   : > { %v5950_v7 = vld [vmem:[#allocation5 + $0x5ec] sm:$0xf0] }
 0x147   : > { %v673_v27 = vmax.f32 %v670_v19, 0.0  ;;  %v4763_v19 = vld [vmem:[#allocation5 + $0x340] sm:$0xf]  ;;  %v5100_v8 = vor.u32 %v5950_v7, %v5099_v5 }
 0x148   : > { %v4764_v28 = vor.u32 %v5866_v20, %v4763_v19  ;;  %v5946_v19 = vld [vmem:[#allocation5 + $0x5cc] sm:$0xf0]  ;;  %v5115_v5 = vld [vmem:[#allocation5 + $0x600] sm:$0xf] }
 0x149   : > { %v6610_v30 = vpack.c.bf16 %v673_v27, %v672_v26  ;;  %v5802_v26 = vld [vmem:[#allocation5 + $0x14c] sm:$0xf0]  ;;  %v4636_v27 = vor.u32 %v5834_v18, %v4635_v17  ;;  %v5083_v17 = vld [vmem:[#allocation5 + $0x5c0] sm:$0xf] }
 0x14a   : > { %v4508_v35 = vor.u32 %v5802_v26, %v4507_v25  ;;  %v5084_v20 = vor.u32 %v5946_v19, %v5083_v17  ;;  %v6002_v25 = vld [vmem:[#allocation5 + $0x78c] sm:$0xf0]  ;;  %v5243_v7 = vld [vmem:[#allocation5 + $0x700] sm:$0xf] }
 0x14b   : > { %1067 = vmatmul.bf16.vlgmr.msra.gmra.mxu2 %v6610_v30  ;;  %1081 = vmatmul.bf16.vlgmr.msra.gmra.mxu3 %v6610_v30  ;;  %v5308_v26 = vor.u32 %v6002_v25, %v5307_v23  ;;  %v4859_v19 = vld [vmem:[#allocation5 + $0x400] sm:$0xf]  ;;  %v5922_v23 = vld [vmem:[#allocation5 + $0x50c] sm:$0xf0] }
 0x14c   : > { %1095 = vmatmul.bf16.vlgmr.msrb.gmra.mxu0 %v6610_v30  ;;  %1109 = vmatmul.bf16.vlgmr.msrb.gmra.mxu1 %v6610_v30 }
 0x14d   : > { %2876 = vmatpush.bf16.msrb.mxu0 %v4716_v31  ;;  %2889 = vmatpush.bf16.msrb.mxu1 %v4844_v32  ;;  %v5830_v31 = vld [vmem:[#allocation5 + $0x22c] sm:$0xf0]  ;;  %v4747_v32 = vld [vmem:[#allocation5 + $0x320] sm:$0xf] }
 0x14e   : > { %2850 = vmatpush.bf16.msra.mxu2 %v4460_v37  ;;  %2863 = vmatpush.bf16.msra.mxu3 %v4588_v38  ;;  %v4620_v36 = vor.u32 %v5830_v31, %v4619_v29  ;;  %v4748_v37 = vor.u32 %v5862_v33, %v4747_v32  ;;  %v4603_v38 = vld [vmem:[#allocation5 + $0x200] sm:$0xf]  ;;  %v5942_v32 = vld [vmem:[#allocation5 + $0x5ac] sm:$0xf0] }
 0x14f   : > { %v5067_v29 = vld [vmem:[#allocation5 + $0x5a0] sm:$0xf] }
 0x150   : > { %v5068_v33 = vor.u32 %v5942_v32, %v5067_v29 }
 0x151   : > { %2877 = vmatpush.bf16.msrb.mxu0 %v4700_v43  ;;  %2890 = vmatpush.bf16.msrb.mxu1 %v4828_v44  ;;  %v5227_v43 = vld [vmem:[#allocation5 + $0x6e0] sm:$0xf]  ;;  %v5982_v44 = vld [vmem:[#allocation5 + $0x6ec] sm:$0xf0] }
 0x152   : > { %2851 = vmatpush.bf16.msra.mxu2 %v4444_v49  ;;  %2864 = vmatpush.bf16.msra.mxu3 %v4572_v50  ;;  %v5228_v46 = vor.u32 %v5982_v44, %v5227_v43  ;;  %v5766_v49 = vld [vmem:[#allocation5 + $0x2c] sm:$0xf0]  ;;  %v5356_v50 = vor.u32 %v6014_v47, %v5355_v45  ;;  %v5147_v45 = vld [vmem:[#allocation5 + $0x640] sm:$0xf] }
 0x153   : > { %v4364_v51 = vor.u32 %v5766_v49, %v4363_v48  ;;  %v5938_v43 = vld [vmem:[#allocation5 + $0x58c] sm:$0xf0]  ;;  %v5275_v47 = vld [vmem:[#allocation5 + $0x740] sm:$0xf] }
 0x154   : > { %v5994_v49 = vld [vmem:[#allocation5 + $0x74c] sm:$0xf0] }
 0x155   : > { %2878 = vmatpush.bf16.msrb.mxu0 %v4684_v55  ;;  %2891 = vmatpush.bf16.msrb.mxu1 %v4812_v56  ;;  %v5211_v55 = vld [vmem:[#allocation5 + $0x6c0] sm:$0xf]  ;;  %v5978_v56 = vld [vmem:[#allocation5 + $0x6cc] sm:$0xf0] }
 0x156   : > { %2852 = vmatpush.bf16.msra.mxu2 %v4428_v61  ;;  %2865 = vmatpush.bf16.msra.mxu3 %v4556_v62  ;;  %v5212_v58 = vor.u32 %v5978_v56, %v5211_v55  ;;  %v5762_v61 = vld [vmem:[#allocation5 + $0xc] sm:$0xf0]  ;;  %v5340_v62 = vor.u32 %v6010_v59, %v5339_v57  ;;  %v5131_v57 = vld [vmem:[#allocation5 + $0x620] sm:$0xf] }
 0x157   : > { %v4348_v63 = vor.u32 %v5762_v61, %v4347_v60  ;;  %v5934_v55 = vld [vmem:[#allocation5 + $0x56c] sm:$0xf0]  ;;  %v5259_v59 = vld [vmem:[#allocation5 + $0x720] sm:$0xf] }
 0x158   : > { %v5036_v56 = vor.u32 %v5934_v55, %v5035_v53  ;;  %v5990_v61 = vld [vmem:[#allocation5 + $0x72c] sm:$0xf0] }
 0x159   : > { %2879 = vmatpush.bf16.msrb.mxu0 %v4668_v3  ;;  %2892 = vmatpush.bf16.msrb.mxu1 %v4796_v4  ;;  %v4971_v3 = vld [vmem:[#allocation5 + $0x4e0] sm:$0xf]  ;;  %v5918_v4 = vld [vmem:[#allocation5 + $0x4ec] sm:$0xf0] }
 0x15a   : > { %2853 = vmatpush.bf16.msra.mxu2 %v4412_v9  ;;  %2866 = vmatpush.bf16.msra.mxu3 %v4540_v10  ;;  %v4972_v6 = vor.u32 %v5918_v4, %v4971_v3  ;;  %v5195_v9 = vld [vmem:[#allocation5 + $0x6a0] sm:$0xf]  ;;  %v5974_v10 = vld [vmem:[#allocation5 + $0x6ac] sm:$0xf0] }
 0x15b   : > { %1123 = vmatmul.bf16.vlgmr.msrb.gmra.mxu2 %v6610_v30  ;;  %1137 = vmatmul.bf16.vlgmr.msrb.gmra.mxu3 %v6610_v30  ;;  %v5196_v12 = vor.u32 %v5974_v10, %v5195_v9  ;;  %v5930_v3 = vld [vmem:[#allocation5 + $0x54c] sm:$0xf0] }
 0x15c   : > { %1151 = vmatmul.bf16.vlgmr.msra.gmra.mxu0 %v6610_v30  ;;  %1165 = vmatmul.bf16.vlgmr.msra.gmra.mxu1 %v6610_v30  ;;  %v5826_v30 = vld [vmem:[#allocation5 + $0x20c] sm:$0xf0]  ;;  %v5020_v4 = vor.u32 %v5930_v3, %v5019_v1  ;;  %v4717_v1 = vld [vmem:[#allocation5 + $0x2f0] sm:$0xf0] }
 0x15d   : > { %2880 = vmatpush.bf16.msrb.mxu0 %v4652_v15  ;;  %2893 = vmatpush.bf16.msrb.mxu1 %v4780_v16  ;;  %v4604_v41 = vor.u32 %v5826_v30, %v4603_v38  ;;  %v4955_v15 = vld [vmem:[#allocation5 + $0x4c0] sm:$0xf]  ;;  %v5914_v16 = vld [vmem:[#allocation5 + $0x4cc] sm:$0xf0]  ;;  %v4845_v3 = vld [vmem:[#allocation5 + $0x3f0] sm:$0xf0] }
 0x15e   : > { %2854 = vmatpush.bf16.msra.mxu2 %v4396_v21  ;;  %2867 = vmatpush.bf16.msra.mxu3 %v4524_v22  ;;  %v4956_v18 = vor.u32 %v5914_v16, %v4955_v15  ;;  %v5179_v21 = vld [vmem:[#allocation5 + $0x680] sm:$0xf]  ;;  %v5970_v22 = vld [vmem:[#allocation5 + $0x68c] sm:$0xf0] }
 0x15f   : > { %v5180_v24 = vor.u32 %v5970_v22, %v5179_v21  ;;  %v5998_v38 = vld [vmem:[#allocation5 + $0x76c] sm:$0xf0]  ;;  %v4987_v22 = vld [vmem:[#allocation5 + $0x500] sm:$0xf] }
 0x160   : > { %v5986_v9 = vld [vmem:[#allocation5 + $0x70c] sm:$0xf0] }
 0x161   : > { %2881 = vmatpush.bf16.msrb.mxu0 %v4636_v27  ;;  %2894 = vmatpush.bf16.msrb.mxu1 %v4764_v28  ;;  %v4939_v27 = vld [vmem:[#allocation5 + $0x4a0] sm:$0xf]  ;;  %v5910_v28 = vld [vmem:[#allocation5 + $0x4ac] sm:$0xf0]  ;;  %v5244_v10 = vor.u32 %v5986_v9, %v5243_v7 }
 0x162   : > { %2855 = vmatpush.bf16.msra.mxu2 %v4380_v34  ;;  %2868 = vmatpush.bf16.msra.mxu3 %v4508_v35  ;;  %v4940_v31 = vor.u32 %v5910_v28, %v4939_v27  ;;  %v5163_v34 = vld [vmem:[#allocation5 + $0x660] sm:$0xf]  ;;  %v5966_v35 = vld [vmem:[#allocation5 + $0x66c] sm:$0xf0] }
 0x163   : > { %v5926_v15 = vld [vmem:[#allocation5 + $0x52c] sm:$0xf0] }
 0x164   : > { %v5004_v16 = vor.u32 %v5926_v15, %v5003_v13  ;;  %v4701_v15 = vld [vmem:[#allocation5 + $0x2d0] sm:$0xf0] }
 0x165   : > { %2882 = vmatpush.bf16.msrb.mxu0 %v4620_v36  ;;  %2895 = vmatpush.bf16.msrb.mxu1 %v4748_v37  ;;  %v5291_v36 = vld [vmem:[#allocation5 + $0x760] sm:$0xf]  ;;  %v5164_v37 = vor.u32 %v5966_v35, %v5163_v34 }
 0x166   : > { %2856 = vmatpush.bf16.msra.mxu2 %v4364_v51  ;;  %2869 = vmatpush.bf16.msra.mxu3 %v4492_v54  ;;  %v5292_v30 = vor.u32 %v5998_v38, %v5291_v36  ;;  %v4907_v51 = vld [vmem:[#allocation5 + $0x460] sm:$0xf] }
 0x167   : > { %v4908_v54 = vor.u32 %v5902_v52, %v4907_v51 }
 0x169   : > { %2883 = vmatpush.bf16.msrb.mxu0 %v4604_v41  ;;  %2896 = vmatpush.bf16.msrb.mxu1 %v4732_v42  ;;  %v5051_v41 = vld [vmem:[#allocation5 + $0x580] sm:$0xf]  ;;  %v4924_v42 = vor.u32 %v5906_v40, %v4923_v39 }
 0x16a   : > { %2857 = vmatpush.bf16.msra.mxu2 %v4348_v63  ;;  %2870 = vmatpush.bf16.msra.mxu3 %v4476_v2  ;;  %v5052_v44 = vor.u32 %v5938_v43, %v5051_v41  ;;  %v4891_v63 = vld [vmem:[#allocation5 + $0x440] sm:$0xf] }
 0x16b   : > { %v4892_v2 = vor.u32 %v5898_v0, %v4891_v63 }
 0x16d   : > { %2928 = vmatpush.bf16.msra.mxu0 %v5228_v46  ;;  %2941 = vmatpush.bf16.msra.mxu1 %v5356_v50  ;;  %v5962_v46 = vld [vmem:[#allocation5 + $0x64c] sm:$0xf0]  ;;  %v5276_v50 = vor.u32 %v5994_v49, %v5275_v47 }
 0x16e   : > { %2902 = vmatpush.bf16.msrb.mxu2 %v4972_v6  ;;  %2915 = vmatpush.bf16.msrb.mxu3 %v5100_v8  ;;  %v5148_v48 = vor.u32 %v5962_v46, %v5147_v45  ;;  %v5954_v6 = vld [vmem:[#allocation5 + $0x60c] sm:$0xf0]  ;;  %v6623_v45 = vld [vmem:[%s6749_s6] sm:$0xff] }
 0x16f   : > { %v5116_v8 = vor.u32 %v5954_v6, %v5115_v5  ;;  %v1266_v52 = vperm.slane %v6623_v45, 2  ;;  %v1267_v53 = vperm.slane %v6623_v45, 3  ;;  %v1265_v9 = vperm.slane %v6623_v45, 1 }
 0x171   : > { %2929 = vmatpush.bf16.msra.mxu0 %v5212_v58  ;;  %2942 = vmatpush.bf16.msra.mxu1 %v5340_v62  ;;  %v5958_v58 = vld [vmem:[#allocation5 + $0x62c] sm:$0xf0]  ;;  %v5260_v62 = vor.u32 %v5990_v61, %v5259_v59 }
 0x172   : > { %2903 = vmatpush.bf16.msrb.mxu2 %v4956_v18  ;;  %2916 = vmatpush.bf16.msrb.mxu3 %v5084_v20  ;;  %v5132_v60 = vor.u32 %v5958_v58, %v5131_v57  ;;  %v5890_v20 = vld [vmem:[#allocation5 + $0x40c] sm:$0xf0] }
 0x173   : > { %v4860_v21 = vor.u32 %v5890_v20, %v4859_v19  ;;  %v5880_v20 = vld [vmem:[#allocation5 + $0x3c4] sm:$0xf] }
 0x175   : > { %2930 = vmatpush.bf16.msra.mxu0 %v5196_v12  ;;  %2943 = vmatpush.bf16.msra.mxu1 %v5324_v14  ;;  %v5894_v12 = vld [vmem:[#allocation5 + $0x42c] sm:$0xf0] }
 0x176   : > { %2904 = vmatpush.bf16.msrb.mxu2 %v4940_v31  ;;  %2917 = vmatpush.bf16.msrb.mxu3 %v5068_v33  ;;  %v4876_v14 = vor.u32 %v5894_v12, %v4875_v11 }
 0x179   : > { %2931 = vmatpush.bf16.msra.mxu0 %v5180_v24  ;;  %2944 = vmatpush.bf16.msra.mxu1 %v5308_v26  ;;  %v4988_v24 = vor.u32 %v5922_v23, %v4987_v22 }
 0x17a   : > { %2905 = vmatpush.bf16.msrb.mxu2 %v4924_v42  ;;  %2918 = vmatpush.bf16.msrb.mxu3 %v5052_v44 }
 0x17d   : > { %2932 = vmatpush.bf16.msra.mxu0 %v5164_v37  ;;  %2945 = vmatpush.bf16.msra.mxu1 %v5292_v30 }
 0x17e   : > { %2906 = vmatpush.bf16.msrb.mxu2 %v4908_v54  ;;  %2919 = vmatpush.bf16.msrb.mxu3 %v5036_v56 }
 0x181   : > { %2933 = vmatpush.bf16.msra.mxu0 %v5148_v48  ;;  %2946 = vmatpush.bf16.msra.mxu1 %v5276_v50 }
 0x182   : > { %2907 = vmatpush.bf16.msrb.mxu2 %v4892_v2  ;;  %2920 = vmatpush.bf16.msrb.mxu3 %v5020_v4  ;;  %v5884_v2 = vld [vmem:[#allocation5 + $0x3e4] sm:$0xf] }
 0x183   : > { %v4848_v19 = vor.u32 %v5884_v2, %v4845_v3  ;;  %v4669_v2 = vld [vmem:[#allocation5 + $0x290] sm:$0xf0]  ;;  %v1270_v3 = vperm.slane %v6623_v45, 6 }
 0x185   : > { %2934 = vmatpush.bf16.msra.mxu0 %v5132_v60  ;;  %2947 = vmatpush.bf16.msra.mxu1 %v5260_v62  ;;  %v5852_v62 = vld [vmem:[#allocation5 + $0x2e4] sm:$0xf] }
 0x186   : > { %2908 = vmatpush.bf16.msrb.mxu2 %v4876_v14  ;;  %2921 = vmatpush.bf16.msrb.mxu3 %v5004_v16  ;;  %v5848_v14 = vld [vmem:[#allocation5 + $0x2c4] sm:$0xf] }
 0x189   : > { %2935 = vmatpush.bf16.msra.mxu0 %v5116_v8  ;;  %2948 = vmatpush.bf16.msra.mxu1 %v5244_v10  ;;  %v1264_v8 = vperm.slane %v6623_v45, 0 }
 0x18a   : > { %2909 = vmatpush.bf16.msrb.mxu2 %v4860_v21  ;;  %2922 = vmatpush.bf16.msrb.mxu3 %v4988_v24  ;;  %v4829_v21 = vld [vmem:[#allocation5 + $0x3d0] sm:$0xf0] }
 0x1c9   : > { %v1096_v17 = vpop.f32.mrf.mxu0  ;;  %v1110_v18 = vpop.f32.mrf.mxu1 }
 0x1ce   : > { %v1068_v25 = vpop.f32.mrf.mxu2  ;;  %v1082_v26 = vpop.f32.mrf.mxu3 }
 0x1d1   : > { %v1098_v27 = vpop.f32.mrf.mxu0  ;;  %v1112_v28 = vpop.f32.mrf.mxu1 }
 0x1d2   : > { %v1173_v29 = vmax.f32 %v1096_v17, %v1098_v27  ;;  %v1174_v31 = vmax.f32 %v1110_v18, %v1112_v28  ;;  %v4720_v18 = vor.u32 %v5852_v62, %v4717_v1  ;;  %v4704_v27 = vor.u32 %v5848_v14, %v4701_v15  ;;  %v4573_v62 = vld [vmem:[#allocation5 + $0x1d0] sm:$0xf0]  ;;  %v5840_v1 = vld [vmem:[#allocation5 + $0x284] sm:$0xf] }
 0x1d4   : > { %v1226_v32 = vrot.slane %v1173_v29, 4  ;;  %v1232_v33 = vrot.slane %v1174_v31, 4 }
 0x1d6   : > { %v1227_v34 = vmax.f32 %v1173_v29, %v1226_v32  ;;  %v1233_v35 = vmax.f32 %v1174_v31, %v1232_v33  ;;  %v1070_v36 = vpop.f32.mrf.mxu2  ;;  %v1084_v37 = vpop.f32.mrf.mxu3  ;;  %v4461_v31 = vld [vmem:[#allocation5 + $0xf0] sm:$0xf0]  ;;  %v5820_v32 = vld [vmem:[#allocation5 + $0x1e4] sm:$0xf] }
 0x1d7   : > { %v1171_v38 = vmax.f32 %v1068_v25, %v1070_v36  ;;  %v1172_v30 = vmax.f32 %v1082_v26, %v1084_v37  ;;  %v5788_v26 = vld [vmem:[#allocation5 + $0xe4] sm:$0xf]  ;;  %v4589_v33 = vld [vmem:[#allocation5 + $0x1f0] sm:$0xf0] }
 0x1d8   : > { %v1228_v39 = vrot.slane %v1227_v34, 2  ;;  %v1234_v40 = vrot.slane %v1233_v35, 2 }
 0x1d9   : > { %v1214_v41 = vrot.slane %v1171_v38, 4  ;;  %v1220_v42 = vrot.slane %v1172_v30, 4  ;;  %v1152_v43 = vpop.f32.mrf.mxu0  ;;  %v1166_v44 = vpop.f32.mrf.mxu1 }
 0x1da   : > { %v1229_v46 = vmax.f32 %v1227_v34, %v1228_v39  ;;  %v1235_v47 = vmax.f32 %v1233_v35, %v1234_v40  ;;  %v4685_v39 = vld [vmem:[#allocation5 + $0x2b0] sm:$0xf0] }
 0x1db   : > { %v1215_v48 = vmax.f32 %v1171_v38, %v1214_v41  ;;  %v1221_v49 = vmax.f32 %v1172_v30, %v1220_v42  ;;  %v4832_v38 = vor.u32 %v5880_v20, %v4829_v21  ;;  %v5844_v30 = vld [vmem:[#allocation5 + $0x2a4] sm:$0xf] }
 0x1dc   : > { %v1230_v50 = vrot.slane %v1229_v46, 1  ;;  %v1236_v51 = vrot.slane %v1235_v47, 1 }
 0x1dd   : > { %v1216_v54 = vrot.slane %v1215_v48, 2  ;;  %v1222_v55 = vrot.slane %v1221_v49, 2 }
 0x1de   : > { %v1231_v56 = vmax.f32 %v1229_v46, %v1230_v50  ;;  %v1237_v57 = vmax.f32 %v1235_v47, %v1236_v51  ;;  %v1124_v58 = vpop.f32.mrf.mxu2  ;;  %v1138_v59 = vpop.f32.mrf.mxu3  ;;  %v4813_v46 = vld [vmem:[#allocation5 + $0x3b0] sm:$0xf0]  ;;  %v4592_v50 = vor.u32 %v5820_v32, %v4589_v33  ;;  %v1268_v32 = vperm.slane %v6623_v45, 4 }
 0x1df   : > { %v1217_v60 = vmax.f32 %v1215_v48, %v1216_v54  ;;  %v1223_v61 = vmax.f32 %v1221_v49, %v1222_v55  ;;  %v4464_v49 = vor.u32 %v5788_v26, %v4461_v31  ;;  %v5784_v55 = vld [vmem:[#allocation5 + $0xc4] sm:$0xf]  ;;  %v4653_v26 = vld [vmem:[#allocation5 + $0x270] sm:$0xf0]  ;;  %v1269_v33 = vperm.slane %v6623_v45, 5 }
 0x1e0   : > { %v1282_v63 = vadd.f32 %v1266_v52, %v1231_v56  ;;  %v1283_v0 = vadd.f32 %v1267_v53, %v1237_v57  ;;  %v4781_v31 = vld [vmem:[#allocation5 + $0x370] sm:$0xf0] }
 0x1e1   : > { %v1218_v4 = vrot.slane %v1217_v60, 1  ;;  %v1224_v5 = vrot.slane %v1223_v61, 1  ;;  %v1154_v6 = vpop.f32.mrf.mxu0  ;;  %v1168_v7 = vpop.f32.mrf.mxu1 }
 0x1e2   : > { %v1177_v10 = vmax.f32 %v1152_v43, %v1154_v6  ;;  %v1178_v11 = vmax.f32 %v1166_v44, %v1168_v7  ;;  %v1290_v12 = vmax.f32 %v1282_v63, 0.0  ;;  %v1291_v13 = vmax.f32 %v1283_v0, 0.0  ;;  %v5876_v44 = vld [vmem:[#allocation5 + $0x3a4] sm:$0xf] }
 0x1e3   : > { %v1219_v16 = vmax.f32 %v1217_v60, %v1218_v4  ;;  %v1225_v17 = vmax.f32 %v1223_v61, %v1224_v5  ;;  %v4688_v60 = vor.u32 %v5844_v30, %v4685_v39  ;;  %v5816_v61 = vld [vmem:[#allocation5 + $0x1c4] sm:$0xf]  ;;  %v1271_v4 = vperm.slane %v6623_v45, 7  ;;  %v4413_v30 = vld [vmem:[#allocation5 + $0x90] sm:$0xf0] }
 0x1e4   : > { %v1250_v22 = vrot.slane %v1177_v10, 4  ;;  %v1256_v23 = vrot.slane %v1178_v11, 4  ;;  %v6629_v24 = vpack.c.bf16 %v1290_v12, %v1290_v12  ;;  %v6631_v25 = vpack.c.bf16 %v1291_v13, %v1291_v13  ;;  %v5872_v7 = vld [vmem:[#allocation5 + $0x384] sm:$0xf] }
 0x1e5   : > { %v1280_v28 = vadd.f32 %v1264_v8, %v1219_v16  ;;  %v1281_v29 = vadd.f32 %v1265_v9, %v1225_v17  ;;  %v4797_v8 = vld [vmem:[#allocation5 + $0x390] sm:$0xf0]  ;;  %v4576_v12 = vor.u32 %v5816_v61, %v4573_v62  ;;  %v5780_v13 = vld [vmem:[#allocation5 + $0xa4] sm:$0xf]  ;;  %v4672_v16 = vor.u32 %v5840_v1, %v4669_v2 }
 0x1e6   : > { %v1251_v34 = vmax.f32 %v1177_v10, %v1250_v22  ;;  %v1257_v35 = vmax.f32 %v1178_v11, %v1256_v23  ;;  %2884 = vmatmul.bf16.vlgmr.msrb.gmra.mxu0 %v6629_v24  ;;  %2897 = vmatmul.bf16.vlgmr.msrb.gmra.mxu1 %v6631_v25  ;;  %v1126_v36 = vpop.f32.mrf.mxu2  ;;  %v1140_v37 = vpop.f32.mrf.mxu3  ;;  %v4429_v17 = vld [vmem:[#allocation5 + $0xb0] sm:$0xf0]  ;;  %v4800_v22 = vor.u32 %v5872_v7, %v4797_v8  ;;  %v5836_v23 = vld [vmem:[#allocation5 + $0x264] sm:$0xf] }
 0x1e7   : > { %2980 = vmatpush.bf16.msrb.mxu0 %v4720_v18  ;;  %2993 = vmatpush.bf16.msrb.mxu1 %v4848_v19  ;;  %v1175_v40 = vmax.f32 %v1124_v58, %v1126_v36  ;;  %v1176_v41 = vmax.f32 %v1138_v59, %v1140_v37  ;;  %v1288_v42 = vmax.f32 %v1280_v28, 0.0  ;;  %v1289_v43 = vmax.f32 %v1281_v29, 0.0  ;;  %v4445_v59 = vld [vmem:[#allocation5 + $0xd0] sm:$0xf0]  ;;  %v5812_v18 = vld [vmem:[#allocation5 + $0x1a4] sm:$0xf] }
 0x1e8   : > { %v1252_v47 = vrot.slane %v1251_v34, 2  ;;  %v1258_v48 = vrot.slane %v1257_v35, 2  ;;  %v4816_v58 = vor.u32 %v5876_v44, %v4813_v46  ;;  %v4448_v11 = vor.u32 %v5784_v55, %v4445_v59  ;;  %v4557_v19 = vld [vmem:[#allocation5 + $0x1b0] sm:$0xf0]  ;;  %v5868_v29 = vld [vmem:[#allocation5 + $0x364] sm:$0xf] }
 0x1e9   : > { %v1238_v51 = vrot.slane %v1175_v40, 4  ;;  %v1244_v52 = vrot.slane %v1176_v41, 4  ;;  %v6635_v53 = vpack.c.bf16 %v1288_v42, %v1288_v42  ;;  %v6637_v54 = vpack.c.bf16 %v1289_v43, %v1289_v43  ;;  %v5808_v42 = vld [vmem:[#allocation5 + $0x184] sm:$0xf]  ;;  %v4541_v43 = vld [vmem:[#allocation5 + $0x190] sm:$0xf0] }
 0x1ea   : > { %v1253_v56 = vmax.f32 %v1251_v34, %v1252_v47  ;;  %v1259_v57 = vmax.f32 %v1257_v35, %v1258_v48  ;;  %v4432_v36 = vor.u32 %v5780_v13, %v4429_v17  ;;  %v4560_v37 = vor.u32 %v5812_v18, %v4557_v19  ;;  %v5832_v48 = vld [vmem:[#allocation5 + $0x244] sm:$0xf]  ;;  %v4765_v55 = vld [vmem:[#allocation5 + $0x350] sm:$0xf0] }
 0x1eb   : > { %v1239_v63 = vmax.f32 %v1175_v40, %v1238_v51  ;;  %v1245_v0 = vmax.f32 %v1176_v41, %v1244_v52  ;;  %2981 = vmatpush.bf16.msrb.mxu0 %v4704_v27  ;;  %2994 = vmatpush.bf16.msrb.mxu1 %v4832_v38  ;;  %v5776_v38 = vld [vmem:[#allocation5 + $0x84] sm:$0xf]  ;;  %v4656_v41 = vor.u32 %v5836_v23, %v4653_v26  ;;  %v4637_v51 = vld [vmem:[#allocation5 + $0x250] sm:$0xf0] }
 0x1ec   : > { %v1254_v5 = vrot.slane %v1253_v56, 1  ;;  %v1260_v6 = vrot.slane %v1259_v57, 1  ;;  %2858 = vmatmul.bf16.vlgmr.msra.gmra.mxu2 %v6635_v53  ;;  %2871 = vmatmul.bf16.vlgmr.msra.gmra.mxu3 %v6637_v54  ;;  %v4784_v47 = vor.u32 %v5868_v29, %v4781_v31  ;;  %v5864_v52 = vld [vmem:[#allocation5 + $0x344] sm:$0xf]  ;;  %v4397_v59 = vld [vmem:[#allocation5 + $0x70] sm:$0xf0] }
 0x1ed   : > { %v1240_v9 = vrot.slane %v1239_v63, 2  ;;  %v1246_v10 = vrot.slane %v1245_v0, 2  ;;  %2954 = vmatpush.bf16.msra.mxu2 %v4464_v49  ;;  %2967 = vmatpush.bf16.msra.mxu3 %v4592_v50  ;;  %v4416_v50 = vor.u32 %v5776_v38, %v4413_v30  ;;  %v5804_v61 = vld [vmem:[#allocation5 + $0x164] sm:$0xf]  ;;  %v4525_v62 = vld [vmem:[#allocation5 + $0x170] sm:$0xf0] }
 0x1ee   : > { %v1255_v14 = vmax.f32 %v1253_v56, %v1254_v5  ;;  %v1261_v15 = vmax.f32 %v1259_v57, %v1260_v6  ;;  %v4544_v56 = vor.u32 %v5808_v42, %v4541_v43  ;;  %v4621_v5 = vld [vmem:[#allocation5 + $0x230] sm:$0xf0]  ;;  %v5860_v6 = vld [vmem:[#allocation5 + $0x324] sm:$0xf] }
 0x1ef   : > { %v1241_v20 = vmax.f32 %v1239_v63, %v1240_v9  ;;  %v1247_v21 = vmax.f32 %v1245_v0, %v1246_v10  ;;  %2982 = vmatpush.bf16.msrb.mxu0 %v4688_v60  ;;  %2995 = vmatpush.bf16.msrb.mxu1 %v4816_v58  ;;  %v5772_v58 = vld [vmem:[#allocation5 + $0x64] sm:$0xf]  ;;  %v4640_v63 = vor.u32 %v5832_v48, %v4637_v51  ;;  %v4749_v7 = vld [vmem:[#allocation5 + $0x330] sm:$0xf0] }
 0x1f0   : > { %v1286_v27 = vadd.f32 %v1270_v3, %v1255_v14  ;;  %v1287_v28 = vadd.f32 %v1271_v4, %v1261_v15  ;;  %v4768_v0 = vor.u32 %v5864_v52, %v4765_v55  ;;  %v5828_v3 = vld [vmem:[#allocation5 + $0x224] sm:$0xf]  ;;  %v4400_v4 = vor.u32 %v5772_v58, %v4397_v59  ;;  %v4509_v14 = vld [vmem:[#allocation5 + $0x150] sm:$0xf0] }
 0x1f1   : > { %v1242_v34 = vrot.slane %v1241_v20, 1  ;;  %v1248_v35 = vrot.slane %v1247_v21, 1  ;;  %2955 = vmatpush.bf16.msra.mxu2 %v4448_v11  ;;  %2968 = vmatpush.bf16.msra.mxu3 %v4576_v12  ;;  %v4528_v10 = vor.u32 %v5804_v61, %v4525_v62  ;;  %v5768_v11 = vld [vmem:[#allocation5 + $0x44] sm:$0xf]  ;;  %v4381_v12 = vld [vmem:[#allocation5 + $0x50] sm:$0xf0]  ;;  %v4624_v15 = vor.u32 %v5828_v3, %v4621_v5 }
 0x1f2   : > { %v1294_v39 = vmax.f32 %v1286_v27, 0.0  ;;  %v1295_v40 = vmax.f32 %v1287_v28, 0.0  ;;  %v5800_v13 = vld [vmem:[#allocation5 + $0x144] sm:$0xf]  ;;  %v4605_v18 = vld [vmem:[#allocation5 + $0x210] sm:$0xf0]  ;;  %v4384_v23 = vor.u32 %v5768_v11, %v4381_v12 }
 0x1f3   : > { %v1243_v44 = vmax.f32 %v1241_v20, %v1242_v34  ;;  %v1249_v46 = vmax.f32 %v1247_v21, %v1248_v35  ;;  %2983 = vmatpush.bf16.msrb.mxu0 %v4672_v16  ;;  %2996 = vmatpush.bf16.msrb.mxu1 %v4800_v22  ;;  %v4752_v16 = vor.u32 %v5860_v6, %v4749_v7  ;;  %v5824_v17 = vld [vmem:[#allocation5 + $0x204] sm:$0xf]  ;;  %v4733_v20 = vld [vmem:[#allocation5 + $0x310] sm:$0xf0] }
 0x1f4   : > { %v6645_v45 = vpack.c.bf16 %v1294_v39, %v1294_v39  ;;  %v6647_v49 = vpack.c.bf16 %v1295_v40, %v1295_v40  ;;  %v5856_v19 = vld [vmem:[#allocation5 + $0x304] sm:$0xf]  ;;  %v5229_v22 = vld [vmem:[#allocation5 + $0x6f0] sm:$0xf0]  ;;  %v4512_v26 = vor.u32 %v5800_v13, %v4509_v14  ;;  %v4608_v34 = vor.u32 %v5824_v17, %v4605_v18 }
 0x1f5   : > { %2956 = vmatpush.bf16.msra.mxu2 %v4432_v36  ;;  %2969 = vmatpush.bf16.msra.mxu3 %v4560_v37  ;;  %v1284_v57 = vadd.f32 %v1268_v32, %v1243_v44  ;;  %v1285_v60 = vadd.f32 %v1269_v33, %v1249_v46  ;;  %v5980_v21 = vld [vmem:[#allocation5 + $0x6e4] sm:$0xf]  ;;  %v5357_v28 = vld [vmem:[#allocation5 + $0x7f0] sm:$0xf0]  ;;  %v4736_v35 = vor.u32 %v5856_v19, %v4733_v20 }
 0x1f6   : > { %2936 = vmatmul.bf16.vlgmr.msra.gmra.mxu0 %v6645_v45  ;;  %2949 = vmatmul.bf16.vlgmr.msra.gmra.mxu1 %v6647_v49  ;;  %v6012_v27 = vld [vmem:[#allocation5 + $0x7e4] sm:$0xf]  ;;  %v4365_v31 = vld [vmem:[#allocation5 + $0x30] sm:$0xf0]  ;;  %v5232_v36 = vor.u32 %v5980_v21, %v5229_v22 }
 0x1f7   : > { %2984 = vmatpush.bf16.msrb.mxu0 %v4656_v41  ;;  %2997 = vmatpush.bf16.msrb.mxu1 %v4784_v47  ;;  %v1292_v1 = vmax.f32 %v1284_v57, 0.0  ;;  %v1293_v2 = vmax.f32 %v1285_v60, 0.0  ;;  %v5764_v29 = vld [vmem:[#allocation5 + $0x24] sm:$0xf]  ;;  %v4493_v33 = vld [vmem:[#allocation5 + $0x130] sm:$0xf0]  ;;  %v5360_v37 = vor.u32 %v6012_v27, %v5357_v28 }
 0x1f8   : > { %v5796_v32 = vld [vmem:[#allocation5 + $0x124] sm:$0xf]  ;;  %v5213_v30 = vld [vmem:[#allocation5 + $0x6d0] sm:$0xf0]  ;;  %v4368_v40 = vor.u32 %v5764_v29, %v4365_v31 }
 0x1f9   : > { %2957 = vmatpush.bf16.msra.mxu2 %v4416_v50  ;;  %2970 = vmatpush.bf16.msra.mxu3 %v4544_v56  ;;  %v6651_v8 = vpack.c.bf16 %v1292_v1, %v1292_v1  ;;  %v6653_v9 = vpack.c.bf16 %v1293_v2, %v1293_v2  ;;  %v5976_v38 = vld [vmem:[#allocation5 + $0x6c4] sm:$0xf]  ;;  %v4496_v41 = vor.u32 %v5796_v32, %v4493_v33  ;;  %v5341_v42 = vld [vmem:[#allocation5 + $0x7d0] sm:$0xf0] }
 0x1fa   : > { %v6008_v39 = vld [vmem:[#allocation5 + $0x7c4] sm:$0xf]  ;;  %v4349_v44 = vld [vmem:[#allocation5 + $0x10] sm:$0xf0]  ;;  %v5216_v55 = vor.u32 %v5976_v38, %v5213_v30 }
 0x1fb   : > { %2985 = vmatpush.bf16.msrb.mxu0 %v4640_v63  ;;  %2998 = vmatpush.bf16.msrb.mxu1 %v4768_v0  ;;  %v5760_v43 = vld [vmem:[#allocation5 + $0x4] sm:$0xf]  ;;  %v4477_v47 = vld [vmem:[#allocation5 + $0x110] sm:$0xf0]  ;;  %v5344_v56 = vor.u32 %v6008_v39, %v5341_v42 }
 0x1fc   : > { %2910 = vmatmul.bf16.vlgmr.msrb.gmra.mxu2 %v6651_v8  ;;  %2923 = vmatmul.bf16.vlgmr.msrb.gmra.mxu3 %v6653_v9  ;;  %v5792_v46 = vld [vmem:[#allocation5 + $0x104] sm:$0xf]  ;;  %v4973_v50 = vld [vmem:[#allocation5 + $0x4f0] sm:$0xf0]  ;;  %v4352_v60 = vor.u32 %v5760_v43, %v4349_v44 }
 0x1fd   : > { %2958 = vmatpush.bf16.msra.mxu2 %v4400_v4  ;;  %2971 = vmatpush.bf16.msra.mxu3 %v4528_v10  ;;  %v5916_v48 = vld [vmem:[#allocation5 + $0x4e4] sm:$0xf]  ;;  %v5101_v52 = vld [vmem:[#allocation5 + $0x5f0] sm:$0xf0]  ;;  %v4480_v58 = vor.u32 %v5792_v46, %v4477_v47 }
 0x1fe   : > { %v5948_v51 = vld [vmem:[#allocation5 + $0x5e4] sm:$0xf]  ;;  %v5197_v59 = vld [vmem:[#allocation5 + $0x6b0] sm:$0xf0]  ;;  %v4976_v63 = vor.u32 %v5916_v48, %v4973_v50 }
 0x1ff   : > { %2986 = vmatpush.bf16.msrb.mxu0 %v4624_v15  ;;  %2999 = vmatpush.bf16.msrb.mxu1 %v4752_v16  ;;  %v5972_v57 = vld [vmem:[#allocation5 + $0x6a4] sm:$0xf]  ;;  %v5325_v62 = vld [vmem:[#allocation5 + $0x7b0] sm:$0xf0]  ;;  %v5104_v0 = vor.u32 %v5948_v51, %v5101_v52 }
 0x200   : > { %v6004_v61 = vld [vmem:[#allocation5 + $0x7a4] sm:$0xf]  ;;  %v4957_v2 = vld [vmem:[#allocation5 + $0x4d0] sm:$0xf0]  ;;  %v5200_v5 = vor.u32 %v5972_v57, %v5197_v59 }
 0x201   : > { %2959 = vmatpush.bf16.msra.mxu2 %v4384_v23  ;;  %2972 = vmatpush.bf16.msra.mxu3 %v4512_v26  ;;  %v5912_v1 = vld [vmem:[#allocation5 + $0x4c4] sm:$0xf]  ;;  %v5085_v4 = vld [vmem:[#allocation5 + $0x5d0] sm:$0xf0]  ;;  %v5328_v6 = vor.u32 %v6004_v61, %v5325_v62 }
 0x202   : > { %v5944_v3 = vld [vmem:[#allocation5 + $0x5c4] sm:$0xf]  ;;  %v5181_v10 = vld [vmem:[#allocation5 + $0x690] sm:$0xf0]  ;;  %v4960_v13 = vor.u32 %v5912_v1, %v4957_v2 }
 0x203   : > { %2987 = vmatpush.bf16.msrb.mxu0 %v4608_v34  ;;  %3000 = vmatpush.bf16.msrb.mxu1 %v4736_v35  ;;  %v5968_v7 = vld [vmem:[#allocation5 + $0x684] sm:$0xf]  ;;  %v5309_v12 = vld [vmem:[#allocation5 + $0x790] sm:$0xf0]  ;;  %v5088_v14 = vor.u32 %v5944_v3, %v5085_v4  ;;  %v4723_v3 = vld [vmem:[#allocation5 + $0x2e8] sm:$0xf] }
 0x204   : > { %v6000_v11 = vld [vmem:[#allocation5 + $0x784] sm:$0xf]  ;;  %v4941_v16 = vld [vmem:[#allocation5 + $0x4b0] sm:$0xf0]  ;;  %v5184_v19 = vor.u32 %v5968_v7, %v5181_v10  ;;  %v5855_v4 = vld [vmem:[#allocation5 + $0x2f4] sm:$0xf0] }
 0x205   : > { %2960 = vmatpush.bf16.msra.mxu2 %v4368_v40  ;;  %2973 = vmatpush.bf16.msra.mxu3 %v4496_v41  ;;  %v5908_v15 = vld [vmem:[#allocation5 + $0x4a4] sm:$0xf]  ;;  %v5069_v18 = vld [vmem:[#allocation5 + $0x5b0] sm:$0xf0]  ;;  %v5312_v20 = vor.u32 %v6000_v11, %v5309_v12  ;;  %v4851_v7 = vld [vmem:[#allocation5 + $0x3e8] sm:$0xf] }
 0x206   : > { %2988 = vmatmul.bf16.vlgmr.msrb.gmra.mxu0 %v6629_v24  ;;  %3001 = vmatmul.bf16.vlgmr.msrb.gmra.mxu1 %v6631_v25  ;;  %v5940_v17 = vld [vmem:[#allocation5 + $0x5a4] sm:$0xf]  ;;  %v5165_v22 = vld [vmem:[#allocation5 + $0x670] sm:$0xf0]  ;;  %v4944_v27 = vor.u32 %v5908_v15, %v4941_v16  ;;  %v5887_v10 = vld [vmem:[#allocation5 + $0x3f4] sm:$0xf0] }
 0x207   : > { %3032 = vmatpush.bf16.msra.mxu0 %v5232_v36  ;;  %3045 = vmatpush.bf16.msra.mxu1 %v5360_v37  ;;  %v5964_v21 = vld [vmem:[#allocation5 + $0x664] sm:$0xf]  ;;  %v5293_v26 = vld [vmem:[#allocation5 + $0x770] sm:$0xf0]  ;;  %v5072_v28 = vor.u32 %v5940_v17, %v5069_v18  ;;  %v4724_v17 = vor.u32 %v5855_v4, %v4723_v3  ;;  %v4852_v18 = vor.u32 %v5887_v10, %v4851_v7  ;;  %v4659_v3 = vld [vmem:[#allocation5 + $0x268] sm:$0xf] }
 0x208   : > { %v5996_v23 = vld [vmem:[#allocation5 + $0x764] sm:$0xf]  ;;  %v4925_v31 = vld [vmem:[#allocation5 + $0x490] sm:$0xf0]  ;;  %v5168_v34 = vor.u32 %v5964_v21, %v5165_v22  ;;  %v4835_v21 = vld [vmem:[#allocation5 + $0x3c8] sm:$0xf] }
 0x209   : > { %2961 = vmatpush.bf16.msra.mxu2 %v4352_v60  ;;  %2974 = vmatpush.bf16.msra.mxu3 %v4480_v58  ;;  %v5904_v29 = vld [vmem:[#allocation5 + $0x484] sm:$0xf]  ;;  %v5053_v33 = vld [vmem:[#allocation5 + $0x590] sm:$0xf0]  ;;  %v5296_v35 = vor.u32 %v5996_v23, %v5293_v26  ;;  %v5883_v26 = vld [vmem:[#allocation5 + $0x3d4] sm:$0xf0] }
 0x20a   : > { %v5936_v32 = vld [vmem:[#allocation5 + $0x584] sm:$0xf]  ;;  %v5149_v37 = vld [vmem:[#allocation5 + $0x650] sm:$0xf0]  ;;  %v4928_v39 = vor.u32 %v5904_v29, %v4925_v31  ;;  %v5839_v4 = vld [vmem:[#allocation5 + $0x274] sm:$0xf0] }
 0x20b   : > { %3033 = vmatpush.bf16.msra.mxu0 %v5216_v55  ;;  %3046 = vmatpush.bf16.msra.mxu1 %v5344_v56  ;;  %v5960_v36 = vld [vmem:[#allocation5 + $0x644] sm:$0xf]  ;;  %v5277_v30 = vld [vmem:[#allocation5 + $0x750] sm:$0xf0]  ;;  %v5056_v40 = vor.u32 %v5936_v32, %v5053_v33  ;;  %v4467_v32 = vld [vmem:[#allocation5 + $0xe8] sm:$0xf] }
 0x20c   : > { %2962 = vmatmul.bf16.vlgmr.msra.gmra.mxu2 %v6635_v53  ;;  %2975 = vmatmul.bf16.vlgmr.msra.gmra.mxu3 %v6637_v54  ;;  %v5992_v38 = vld [vmem:[#allocation5 + $0x744] sm:$0xf]  ;;  %v4909_v42 = vld [vmem:[#allocation5 + $0x470] sm:$0xf0]  ;;  %v5152_v46 = vor.u32 %v5960_v36, %v5149_v37  ;;  %v5791_v33 = vld [vmem:[#allocation5 + $0xf4] sm:$0xf0]  ;;  %v4836_v37 = vor.u32 %v5883_v26, %v4835_v21 }
 0x20d   : > { %3006 = vmatpush.bf16.msrb.mxu2 %v4976_v63  ;;  %3019 = vmatpush.bf16.msrb.mxu3 %v5104_v0  ;;  %v5900_v41 = vld [vmem:[#allocation5 + $0x464] sm:$0xf]  ;;  %v5037_v44 = vld [vmem:[#allocation5 + $0x570] sm:$0xf0]  ;;  %v5280_v47 = vor.u32 %v5992_v38, %v5277_v30  ;;  %v4787_v7 = vld [vmem:[#allocation5 + $0x368] sm:$0xf] }
 0x20e   : > { %v5932_v43 = vld [vmem:[#allocation5 + $0x564] sm:$0xf]  ;;  %v5133_v50 = vld [vmem:[#allocation5 + $0x630] sm:$0xf0]  ;;  %v4912_v55 = vor.u32 %v5900_v41, %v4909_v42  ;;  %v4468_v41 = vor.u32 %v5791_v33, %v4467_v32  ;;  %v5871_v10 = vld [vmem:[#allocation5 + $0x374] sm:$0xf0] }
 0x20f   : > { %3034 = vmatpush.bf16.msra.mxu0 %v5200_v5  ;;  %3047 = vmatpush.bf16.msra.mxu1 %v5328_v6  ;;  %v5956_v48 = vld [vmem:[#allocation5 + $0x624] sm:$0xf]  ;;  %v5261_v52 = vld [vmem:[#allocation5 + $0x730] sm:$0xf0]  ;;  %v5040_v56 = vor.u32 %v5932_v43, %v5037_v44  ;;  %v4819_v43 = vld [vmem:[#allocation5 + $0x3a8] sm:$0xf] }
 0x210   : > { %v5988_v51 = vld [vmem:[#allocation5 + $0x724] sm:$0xf]  ;;  %v4893_v60 = vld [vmem:[#allocation5 + $0x450] sm:$0xf0]  ;;  %v5136_v61 = vor.u32 %v5956_v48, %v5133_v50  ;;  %v5879_v44 = vld [vmem:[#allocation5 + $0x3b4] sm:$0xf0] }
 0x211   : > { %3007 = vmatpush.bf16.msrb.mxu2 %v4960_v13  ;;  %3020 = vmatpush.bf16.msrb.mxu3 %v5088_v14  ;;  %v5896_v57 = vld [vmem:[#allocation5 + $0x444] sm:$0xf]  ;;  %v5021_v59 = vld [vmem:[#allocation5 + $0x550] sm:$0xf0]  ;;  %v5264_v62 = vor.u32 %v5988_v51, %v5261_v52  ;;  %v4579_v48 = vld [vmem:[#allocation5 + $0x1c8] sm:$0xf]  ;;  %v4820_v52 = vor.u32 %v5879_v44, %v4819_v43 }
 0x212   : > { %v5928_v58 = vld [vmem:[#allocation5 + $0x544] sm:$0xf]  ;;  %v5117_v0 = vld [vmem:[#allocation5 + $0x610] sm:$0xf0]  ;;  %v4896_v5 = vor.u32 %v5896_v57, %v4893_v60  ;;  %v5819_v50 = vld [vmem:[#allocation5 + $0x1d4] sm:$0xf0] }
 0x213   : > { %3035 = vmatpush.bf16.msra.mxu0 %v5184_v19  ;;  %3048 = vmatpush.bf16.msra.mxu1 %v5312_v20  ;;  %v5952_v63 = vld [vmem:[#allocation5 + $0x604] sm:$0xf]  ;;  %v5245_v2 = vld [vmem:[#allocation5 + $0x710] sm:$0xf0]  ;;  %v5024_v6 = vor.u32 %v5928_v58, %v5021_v59  ;;  %v4707_v19 = vld [vmem:[#allocation5 + $0x2c8] sm:$0xf]  ;;  %v4580_v60 = vor.u32 %v5819_v50, %v4579_v48 }
 0x214   : > { %v5984_v1 = vld [vmem:[#allocation5 + $0x704] sm:$0xf]  ;;  %v4877_v12 = vld [vmem:[#allocation5 + $0x430] sm:$0xf0]  ;;  %v5120_v15 = vor.u32 %v5952_v63, %v5117_v0  ;;  %v5851_v20 = vld [vmem:[#allocation5 + $0x2d4] sm:$0xf0] }
 0x215   : > { %3008 = vmatpush.bf16.msrb.mxu2 %v4944_v27  ;;  %3021 = vmatpush.bf16.msrb.mxu3 %v5072_v28  ;;  %v5892_v11 = vld [vmem:[#allocation5 + $0x424] sm:$0xf]  ;;  %v5005_v14 = vld [vmem:[#allocation5 + $0x530] sm:$0xf0]  ;;  %v5248_v16 = vor.u32 %v5984_v1, %v5245_v2  ;;  %v4708_v36 = vor.u32 %v5851_v20, %v4707_v19  ;;  %v4803_v58 = vld [vmem:[#allocation5 + $0x388] sm:$0xf] }
 0x216   : > { %v5924_v13 = vld [vmem:[#allocation5 + $0x524] sm:$0xf]  ;;  %v4880_v22 = vor.u32 %v5892_v11, %v4877_v12  ;;  %v4861_v28 = vld [vmem:[#allocation5 + $0x410] sm:$0xf0]  ;;  %v5875_v59 = vld [vmem:[#allocation5 + $0x394] sm:$0xf0] }
 0x217   : > { %3036 = vmatpush.bf16.msra.mxu0 %v5168_v34  ;;  %3049 = vmatpush.bf16.msra.mxu1 %v5296_v35  ;;  %v5008_v23 = vor.u32 %v5924_v13, %v5005_v14  ;;  %v5888_v27 = vld [vmem:[#allocation5 + $0x404] sm:$0xf]  ;;  %v4989_v31 = vld [vmem:[#allocation5 + $0x510] sm:$0xf0]  ;;  %v4595_v34 = vld [vmem:[#allocation5 + $0x1e8] sm:$0xf]  ;;  %v4804_v2 = vor.u32 %v5875_v59, %v4803_v58 }
 0x218   : > { %v5920_v29 = vld [vmem:[#allocation5 + $0x504] sm:$0xf]  ;;  %v5823_v35 = vld [vmem:[#allocation5 + $0x1f4] sm:$0xf0]  ;;  %v4864_v38 = vor.u32 %v5888_v27, %v4861_v28  ;;  %v4563_v63 = vld [vmem:[#allocation5 + $0x1a8] sm:$0xf] }
 0x219   : > { %3009 = vmatpush.bf16.msrb.mxu2 %v4928_v39  ;;  %3022 = vmatpush.bf16.msrb.mxu3 %v5056_v40  ;;  %v4992_v30 = vor.u32 %v5920_v29, %v4989_v31  ;;  %v4691_v39 = vld [vmem:[#allocation5 + $0x2a8] sm:$0xf]  ;;  %v5847_v40 = vld [vmem:[#allocation5 + $0x2b4] sm:$0xf0]  ;;  %v4596_v42 = vor.u32 %v5823_v35, %v4595_v34 }
 0x21a   : > { %v4692_v51 = vor.u32 %v5847_v40, %v4691_v39  ;;  %v5815_v0 = vld [vmem:[#allocation5 + $0x1b4] sm:$0xf0]  ;;  %v4419_v11 = vld [vmem:[#allocation5 + $0x88] sm:$0xf] }
 0x21b   : > { %3037 = vmatpush.bf16.msra.mxu0 %v5152_v46  ;;  %3050 = vmatpush.bf16.msra.mxu1 %v5280_v47  ;;  %v4451_v46 = vld [vmem:[#allocation5 + $0xc8] sm:$0xf]  ;;  %v5787_v47 = vld [vmem:[#allocation5 + $0xd4] sm:$0xf0] }
 0x21c   : > { %v4452_v57 = vor.u32 %v5787_v47, %v4451_v46  ;;  %v5779_v12 = vld [vmem:[#allocation5 + $0x94] sm:$0xf0]  ;;  %v4547_v13 = vld [vmem:[#allocation5 + $0x188] sm:$0xf] }
 0x21d   : > { %3010 = vmatpush.bf16.msrb.mxu2 %v4912_v55  ;;  %3023 = vmatpush.bf16.msrb.mxu3 %v5040_v56  ;;  %v4675_v55 = vld [vmem:[#allocation5 + $0x288] sm:$0xf]  ;;  %v5843_v56 = vld [vmem:[#allocation5 + $0x294] sm:$0xf0]  ;;  %v4420_v19 = vor.u32 %v5779_v12, %v4419_v11 }
 0x21e   : > { %v4676_v1 = vor.u32 %v5843_v56, %v4675_v55  ;;  %v5811_v14 = vld [vmem:[#allocation5 + $0x194] sm:$0xf0]  ;;  %v4771_v21 = vld [vmem:[#allocation5 + $0x348] sm:$0xf] }
 0x21f   : > { %3038 = vmatpush.bf16.msra.mxu0 %v5136_v61  ;;  %3051 = vmatpush.bf16.msra.mxu1 %v5264_v62  ;;  %v4435_v61 = vld [vmem:[#allocation5 + $0xa8] sm:$0xf]  ;;  %v5783_v62 = vld [vmem:[#allocation5 + $0xb4] sm:$0xf0]  ;;  %v4548_v20 = vor.u32 %v5811_v14, %v4547_v13 }
 0x220   : > { %v5775_v26 = vld [vmem:[#allocation5 + $0x74] sm:$0xf0]  ;;  %v4531_v27 = vld [vmem:[#allocation5 + $0x168] sm:$0xf] }
 0x221   : > { %3011 = vmatpush.bf16.msrb.mxu2 %v4896_v5  ;;  %3024 = vmatpush.bf16.msrb.mxu3 %v5024_v6  ;;  %v4436_v5 = vor.u32 %v5783_v62, %v4435_v61  ;;  %v4564_v6 = vor.u32 %v5815_v0, %v4563_v63  ;;  %v5807_v28 = vld [vmem:[#allocation5 + $0x174] sm:$0xf0]  ;;  %v4627_v32 = vld [vmem:[#allocation5 + $0x228] sm:$0xf] }
 0x222   : > { %v5831_v33 = vld [vmem:[#allocation5 + $0x234] sm:$0xf0]  ;;  %v4532_v35 = vor.u32 %v5807_v28, %v4531_v27  ;;  %v4515_v39 = vld [vmem:[#allocation5 + $0x148] sm:$0xf] }
 0x223   : > { %3039 = vmatpush.bf16.msra.mxu0 %v5120_v15  ;;  %3052 = vmatpush.bf16.msra.mxu1 %v5248_v16  ;;  %v4660_v15 = vor.u32 %v5839_v4, %v4659_v3  ;;  %v4788_v16 = vor.u32 %v5871_v10, %v4787_v7  ;;  %v5803_v40 = vld [vmem:[#allocation5 + $0x154] sm:$0xf0]  ;;  %v4611_v43 = vld [vmem:[#allocation5 + $0x208] sm:$0xf] }
 0x224   : > { %v5827_v44 = vld [vmem:[#allocation5 + $0x214] sm:$0xf0]  ;;  %v4739_v46 = vld [vmem:[#allocation5 + $0x308] sm:$0xf]  ;;  %v4516_v48 = vor.u32 %v5803_v40, %v4515_v39 }
 0x225   : > { %3012 = vmatpush.bf16.msrb.mxu2 %v4880_v22  ;;  %3025 = vmatpush.bf16.msrb.mxu3 %v5008_v23  ;;  %v5867_v22 = vld [vmem:[#allocation5 + $0x354] sm:$0xf0]  ;;  %v4403_v23 = vld [vmem:[#allocation5 + $0x68] sm:$0xf]  ;;  %v4612_v61 = vor.u32 %v5827_v44, %v4611_v43 }
 0x226   : > { %3040 = vmatmul.bf16.vlgmr.msra.gmra.mxu0 %v6645_v45  ;;  %3053 = vmatmul.bf16.vlgmr.msra.gmra.mxu1 %v6647_v49  ;;  %v4772_v31 = vor.u32 %v5867_v22, %v4771_v21  ;;  %v4404_v34 = vor.u32 %v5775_v26, %v4403_v23  ;;  %v5859_v50 = vld [vmem:[#allocation5 + $0x314] sm:$0xf0]  ;;  %v5363_v55 = vld [vmem:[#allocation5 + $0x7e8] sm:$0xf] }
 0x227   : > { %3084 = vmatpush.bf16.msrb.mxu0 %v4724_v17  ;;  %3097 = vmatpush.bf16.msrb.mxu1 %v4852_v18  ;;  %v4643_v17 = vld [vmem:[#allocation5 + $0x248] sm:$0xf]  ;;  %v5835_v18 = vld [vmem:[#allocation5 + $0x254] sm:$0xf0]  ;;  %v4740_v62 = vor.u32 %v5859_v50, %v4739_v46 }
 0x228   : > { %v4644_v29 = vor.u32 %v5835_v18, %v4643_v17  ;;  %v6015_v56 = vld [vmem:[#allocation5 + $0x7f4] sm:$0xf0]  ;;  %v4499_v58 = vld [vmem:[#allocation5 + $0x128] sm:$0xf] }
 0x229   : > { %3013 = vmatpush.bf16.msrb.mxu2 %v4864_v38  ;;  %3026 = vmatpush.bf16.msrb.mxu3 %v4992_v30  ;;  %v4387_v38 = vld [vmem:[#allocation5 + $0x48] sm:$0xf]  ;;  %v5771_v30 = vld [vmem:[#allocation5 + $0x54] sm:$0xf0]  ;;  %v5364_v0 = vor.u32 %v6015_v56, %v5363_v55 }
 0x22a   : > { %v4388_v47 = vor.u32 %v5771_v30, %v4387_v38  ;;  %v5799_v59 = vld [vmem:[#allocation5 + $0x134] sm:$0xf0]  ;;  %v5347_v3 = vld [vmem:[#allocation5 + $0x7c8] sm:$0xf] }
 0x22b   : > { %3085 = vmatpush.bf16.msrb.mxu0 %v4708_v36  ;;  %3098 = vmatpush.bf16.msrb.mxu1 %v4836_v37  ;;  %v4755_v36 = vld [vmem:[#allocation5 + $0x328] sm:$0xf]  ;;  %v5863_v37 = vld [vmem:[#allocation5 + $0x334] sm:$0xf0] }
 0x22c   : > { %3014 = vmatmul.bf16.vlgmr.msrb.gmra.mxu2 %v6651_v8  ;;  %3027 = vmatmul.bf16.vlgmr.msrb.gmra.mxu3 %v6653_v9  ;;  %v4355_v7 = vld [vmem:[#allocation5 + $0x8] sm:$0xf]  ;;  %v5763_v10 = vld [vmem:[#allocation5 + $0x14] sm:$0xf0] }
 0x22d   : > { %3058 = vmatpush.bf16.msra.mxu2 %v4468_v41  ;;  %3071 = vmatpush.bf16.msra.mxu3 %v4596_v42  ;;  %v4628_v41 = vor.u32 %v5831_v33, %v4627_v32  ;;  %v4756_v42 = vor.u32 %v5863_v37, %v4755_v36  ;;  %v4483_v11 = vld [vmem:[#allocation5 + $0x108] sm:$0xf]  ;;  %v5795_v12 = vld [vmem:[#allocation5 + $0x114] sm:$0xf0] }
 0x22e   : > { %v4979_v13 = vld [vmem:[#allocation5 + $0x4e8] sm:$0xf]  ;;  %v5919_v14 = vld [vmem:[#allocation5 + $0x4f4] sm:$0xf0] }
 0x22f   : > { %3086 = vmatpush.bf16.msrb.mxu0 %v4692_v51  ;;  %3099 = vmatpush.bf16.msrb.mxu1 %v4820_v52  ;;  %v5235_v51 = vld [vmem:[#allocation5 + $0x6e8] sm:$0xf]  ;;  %v5983_v52 = vld [vmem:[#allocation5 + $0x6f4] sm:$0xf0]  ;;  %v4980_v23 = vor.u32 %v5919_v14, %v4979_v13 }
 0x230   : > { %v5236_v63 = vor.u32 %v5983_v52, %v5235_v51  ;;  %v5203_v21 = vld [vmem:[#allocation5 + $0x6a8] sm:$0xf]  ;;  %v5975_v22 = vld [vmem:[#allocation5 + $0x6b4] sm:$0xf0] }
 0x231   : > { %3059 = vmatpush.bf16.msra.mxu2 %v4452_v57  ;;  %3072 = vmatpush.bf16.msra.mxu3 %v4580_v60  ;;  %v4371_v57 = vld [vmem:[#allocation5 + $0x28] sm:$0xf]  ;;  %v5767_v60 = vld [vmem:[#allocation5 + $0x34] sm:$0xf0] }
 0x232   : > { %v4372_v4 = vor.u32 %v5767_v60, %v4371_v57  ;;  %v5331_v27 = vld [vmem:[#allocation5 + $0x7a8] sm:$0xf]  ;;  %v6007_v28 = vld [vmem:[#allocation5 + $0x7b4] sm:$0xf0] }
 0x233   : > { %3087 = vmatpush.bf16.msrb.mxu0 %v4676_v1  ;;  %3100 = vmatpush.bf16.msrb.mxu1 %v4804_v2  ;;  %v5219_v1 = vld [vmem:[#allocation5 + $0x6c8] sm:$0xf]  ;;  %v5979_v2 = vld [vmem:[#allocation5 + $0x6d4] sm:$0xf0] }
 0x234   : > { %v5220_v17 = vor.u32 %v5979_v2, %v5219_v1  ;;  %v5091_v32 = vld [vmem:[#allocation5 + $0x5c8] sm:$0xf]  ;;  %v5947_v33 = vld [vmem:[#allocation5 + $0x5d4] sm:$0xf0] }
 0x235   : > { %3060 = vmatpush.bf16.msra.mxu2 %v4436_v5  ;;  %3073 = vmatpush.bf16.msra.mxu3 %v4564_v6  ;;  %v4500_v5 = vor.u32 %v5799_v59, %v4499_v58  ;;  %v6011_v6 = vld [vmem:[#allocation5 + $0x7d4] sm:$0xf0]  ;;  %v5187_v36 = vld [vmem:[#allocation5 + $0x688] sm:$0xf]  ;;  %v5092_v30 = vor.u32 %v5947_v33, %v5091_v32 }
 0x236   : > { %v5348_v18 = vor.u32 %v6011_v6, %v5347_v3  ;;  %v5971_v37 = vld [vmem:[#allocation5 + $0x694] sm:$0xf0]  ;;  %v5315_v39 = vld [vmem:[#allocation5 + $0x788] sm:$0xf] }
 0x237   : > { %3088 = vmatpush.bf16.msrb.mxu0 %v4660_v15  ;;  %3101 = vmatpush.bf16.msrb.mxu1 %v4788_v16  ;;  %v5107_v15 = vld [vmem:[#allocation5 + $0x5e8] sm:$0xf]  ;;  %v5951_v16 = vld [vmem:[#allocation5 + $0x5f4] sm:$0xf0]  ;;  %v5188_v46 = vor.u32 %v5971_v37, %v5187_v36  ;;  %v5885_v36 = vld [vmem:[#allocation5 + $0x3ec] sm:$0xf] }
 0x238   : > { %v5108_v26 = vor.u32 %v5951_v16, %v5107_v15  ;;  %v6003_v40 = vld [vmem:[#allocation5 + $0x794] sm:$0xf0]  ;;  %v5075_v43 = vld [vmem:[#allocation5 + $0x5a8] sm:$0xf]  ;;  %v4853_v37 = vld [vmem:[#allocation5 + $0x3f8] sm:$0xf0] }
 0x239   : > { %3061 = vmatpush.bf16.msra.mxu2 %v4420_v19  ;;  %3074 = vmatpush.bf16.msra.mxu3 %v4548_v20  ;;  %v4356_v19 = vor.u32 %v5763_v10, %v4355_v7  ;;  %v4484_v20 = vor.u32 %v5795_v12, %v4483_v11  ;;  %v5943_v44 = vld [vmem:[#allocation5 + $0x5b4] sm:$0xf0]  ;;  %v5299_v55 = vld [vmem:[#allocation5 + $0x768] sm:$0xf] }
 0x23a   : > { %v5967_v50 = vld [vmem:[#allocation5 + $0x674] sm:$0xf0]  ;;  %v5076_v52 = vor.u32 %v5943_v44, %v5075_v43  ;;  %v4931_v57 = vld [vmem:[#allocation5 + $0x488] sm:$0xf]  ;;  %v4856_v44 = vor.u32 %v5885_v36, %v4853_v37 }
 0x23b   : > { %3089 = vmatpush.bf16.msrb.mxu0 %v4644_v29  ;;  %3102 = vmatpush.bf16.msrb.mxu1 %v4772_v31  ;;  %v4963_v29 = vld [vmem:[#allocation5 + $0x4c8] sm:$0xf]  ;;  %v5915_v31 = vld [vmem:[#allocation5 + $0x4d4] sm:$0xf0] }
 0x23c   : > { %v4964_v38 = vor.u32 %v5915_v31, %v4963_v29  ;;  %v5999_v56 = vld [vmem:[#allocation5 + $0x774] sm:$0xf0]  ;;  %v5059_v58 = vld [vmem:[#allocation5 + $0x588] sm:$0xf] }
 0x23d   : > { %3062 = vmatpush.bf16.msra.mxu2 %v4404_v34  ;;  %3075 = vmatpush.bf16.msra.mxu3 %v4532_v35  ;;  %v5204_v34 = vor.u32 %v5975_v22, %v5203_v21  ;;  %v5332_v35 = vor.u32 %v6007_v28, %v5331_v27  ;;  %v5907_v60 = vld [vmem:[#allocation5 + $0x494] sm:$0xf0]  ;;  %v5283_v3 = vld [vmem:[#allocation5 + $0x748] sm:$0xf] }
 0x23e   : > { %v5939_v59 = vld [vmem:[#allocation5 + $0x594] sm:$0xf0]  ;;  %v4932_v1 = vor.u32 %v5907_v60, %v4931_v57  ;;  %v5043_v7 = vld [vmem:[#allocation5 + $0x568] sm:$0xf] }
 0x23f   : > { %3090 = vmatpush.bf16.msrb.mxu0 %v4628_v41  ;;  %3103 = vmatpush.bf16.msrb.mxu1 %v4756_v42  ;;  %v4947_v41 = vld [vmem:[#allocation5 + $0x4a8] sm:$0xf]  ;;  %v5911_v42 = vld [vmem:[#allocation5 + $0x4b4] sm:$0xf0]  ;;  %v5060_v2 = vor.u32 %v5939_v59, %v5059_v58  ;;  %v5789_v58 = vld [vmem:[#allocation5 + $0xec] sm:$0xf] }
 0x240   : > { %v4948_v51 = vor.u32 %v5911_v42, %v4947_v41  ;;  %v5903_v6 = vld [vmem:[#allocation5 + $0x474] sm:$0xf0]  ;;  %v5139_v13 = vld [vmem:[#allocation5 + $0x628] sm:$0xf]  ;;  %v4469_v59 = vld [vmem:[#allocation5 + $0xf8] sm:$0xf0] }
 0x241   : > { %3063 = vmatpush.bf16.msra.mxu2 %v4388_v47  ;;  %3076 = vmatpush.bf16.msra.mxu3 %v4516_v48  ;;  %v5316_v47 = vor.u32 %v6003_v40, %v5315_v39  ;;  %v5171_v48 = vld [vmem:[#allocation5 + $0x668] sm:$0xf]  ;;  %v5935_v10 = vld [vmem:[#allocation5 + $0x574] sm:$0xf0] }
 0x242   : > { %v5959_v14 = vld [vmem:[#allocation5 + $0x634] sm:$0xf0]  ;;  %v5044_v16 = vor.u32 %v5935_v10, %v5043_v7  ;;  %v5027_v21 = vld [vmem:[#allocation5 + $0x548] sm:$0xf]  ;;  %v5877_v7 = vld [vmem:[#allocation5 + $0x3ac] sm:$0xf] }
 0x243   : > { %3091 = vmatpush.bf16.msrb.mxu0 %v4612_v61  ;;  %3104 = vmatpush.bf16.msrb.mxu1 %v4740_v62  ;;  %v5172_v61 = vor.u32 %v5967_v50, %v5171_v48  ;;  %v5300_v62 = vor.u32 %v5999_v56, %v5299_v55  ;;  %v5931_v22 = vld [vmem:[#allocation5 + $0x554] sm:$0xf0]  ;;  %v5123_v27 = vld [vmem:[#allocation5 + $0x608] sm:$0xf]  ;;  %v5881_v48 = vld [vmem:[#allocation5 + $0x3cc] sm:$0xf] }
 0x244   : > { %v5955_v28 = vld [vmem:[#allocation5 + $0x614] sm:$0xf0]  ;;  %v5251_v29 = vld [vmem:[#allocation5 + $0x708] sm:$0xf]  ;;  %v5028_v32 = vor.u32 %v5931_v22, %v5027_v21  ;;  %v4821_v10 = vld [vmem:[#allocation5 + $0x3b8] sm:$0xf0] }
 0x245   : > { %3064 = vmatpush.bf16.msra.mxu2 %v4372_v4  ;;  %3077 = vmatpush.bf16.msra.mxu3 %v4500_v5  ;;  %v5995_v4 = vld [vmem:[#allocation5 + $0x754] sm:$0xf0]  ;;  %v4915_v5 = vld [vmem:[#allocation5 + $0x468] sm:$0xf]  ;;  %v5124_v41 = vor.u32 %v5955_v28, %v5123_v27  ;;  %v5781_v27 = vld [vmem:[#allocation5 + $0xac] sm:$0xf] }
 0x246   : > { %3092 = vmatmul.bf16.vlgmr.msrb.gmra.mxu0 %v6629_v24  ;;  %3105 = vmatmul.bf16.vlgmr.msrb.gmra.mxu1 %v6631_v25  ;;  %v5284_v12 = vor.u32 %v5995_v4, %v5283_v3  ;;  %v4916_v15 = vor.u32 %v5903_v6, %v4915_v5  ;;  %v5987_v33 = vld [vmem:[#allocation5 + $0x714] sm:$0xf0]  ;;  %v5011_v39 = vld [vmem:[#allocation5 + $0x528] sm:$0xf]  ;;  %v5845_v3 = vld [vmem:[#allocation5 + $0x2ac] sm:$0xf]  ;;  %v4472_v5 = vor.u32 %v5789_v58, %v4469_v59 }
 0x247   : > { %3136 = vmatpush.bf16.msra.mxu0 %v5236_v63  ;;  %3149 = vmatpush.bf16.msra.mxu1 %v5364_v0  ;;  %v5155_v63 = vld [vmem:[#allocation5 + $0x648] sm:$0xf]  ;;  %v5963_v0 = vld [vmem:[#allocation5 + $0x654] sm:$0xf0]  ;;  %v5252_v42 = vor.u32 %v5987_v33, %v5251_v29  ;;  %v4693_v4 = vld [vmem:[#allocation5 + $0x2b8] sm:$0xf0] }
 0x248   : > { %v5156_v11 = vor.u32 %v5963_v0, %v5155_v63  ;;  %v5927_v40 = vld [vmem:[#allocation5 + $0x534] sm:$0xf0]  ;;  %v4867_v55 = vld [vmem:[#allocation5 + $0x408] sm:$0xf]  ;;  %v4437_v28 = vld [vmem:[#allocation5 + $0xb8] sm:$0xf0] }
 0x249   : > { %3065 = vmatpush.bf16.msra.mxu2 %v4356_v19  ;;  %3078 = vmatpush.bf16.msra.mxu3 %v4484_v20  ;;  %v4899_v19 = vld [vmem:[#allocation5 + $0x448] sm:$0xf]  ;;  %v5899_v20 = vld [vmem:[#allocation5 + $0x454] sm:$0xf0]  ;;  %v5813_v29 = vld [vmem:[#allocation5 + $0x1ac] sm:$0xf]  ;;  %v4440_v36 = vor.u32 %v5781_v27, %v4437_v28 }
 0x24a   : > { %v4900_v31 = vor.u32 %v5899_v20, %v4899_v19  ;;  %v5891_v56 = vld [vmem:[#allocation5 + $0x414] sm:$0xf0]  ;;  %v4995_v57 = vld [vmem:[#allocation5 + $0x508] sm:$0xf]  ;;  %v4405_v58 = vld [vmem:[#allocation5 + $0x78] sm:$0xf0] }
 0x24b   : > { %3137 = vmatpush.bf16.msra.mxu0 %v5220_v17  ;;  %3150 = vmatpush.bf16.msra.mxu1 %v5348_v18  ;;  %v5267_v17 = vld [vmem:[#allocation5 + $0x728] sm:$0xf]  ;;  %v5991_v18 = vld [vmem:[#allocation5 + $0x734] sm:$0xf0] }
 0x24c   : > { %3066 = vmatmul.bf16.vlgmr.msra.gmra.mxu2 %v6635_v53  ;;  %3079 = vmatmul.bf16.vlgmr.msra.gmra.mxu3 %v6637_v54  ;;  %v5923_v60 = vld [vmem:[#allocation5 + $0x514] sm:$0xf0] }
 0x24d   : > { %3110 = vmatpush.bf16.msrb.mxu2 %v4980_v23  ;;  %3123 = vmatpush.bf16.msrb.mxu3 %v5108_v26  ;;  %v5140_v23 = vor.u32 %v5959_v14, %v5139_v13  ;;  %v5268_v26 = vor.u32 %v5991_v18, %v5267_v17  ;;  %v5817_v13 = vld [vmem:[#allocation5 + $0x1cc] sm:$0xf]  ;;  %v4581_v14 = vld [vmem:[#allocation5 + $0x1d8] sm:$0xf0] }
 0x24e   : > { %v5841_v17 = vld [vmem:[#allocation5 + $0x28c] sm:$0xf]  ;;  %v4677_v18 = vld [vmem:[#allocation5 + $0x298] sm:$0xf0]  ;;  %v4584_v22 = vor.u32 %v5817_v13, %v4581_v14 }
 0x24f   : > { %3138 = vmatpush.bf16.msra.mxu0 %v5204_v34  ;;  %3151 = vmatpush.bf16.msra.mxu1 %v5332_v35  ;;  %v5853_v34 = vld [vmem:[#allocation5 + $0x2ec] sm:$0xf]  ;;  %v4725_v35 = vld [vmem:[#allocation5 + $0x2f8] sm:$0xf0] }
 0x250   : > { %v4728_v43 = vor.u32 %v5853_v34, %v4725_v35  ;;  %v5837_v34 = vld [vmem:[#allocation5 + $0x26c] sm:$0xf]  ;;  %v4661_v35 = vld [vmem:[#allocation5 + $0x278] sm:$0xf0] }
 0x251   : > { %3111 = vmatpush.bf16.msrb.mxu2 %v4964_v38  ;;  %3124 = vmatpush.bf16.msrb.mxu3 %v5092_v30  ;;  %v4883_v38 = vld [vmem:[#allocation5 + $0x428] sm:$0xf]  ;;  %v5895_v30 = vld [vmem:[#allocation5 + $0x434] sm:$0xf0]  ;;  %v4389_v13 = vld [vmem:[#allocation5 + $0x58] sm:$0xf0] }
 0x252   : > { %v4884_v50 = vor.u32 %v5895_v30, %v4883_v38  ;;  %v5869_v38 = vld [vmem:[#allocation5 + $0x36c] sm:$0xf]  ;;  %v4789_v30 = vld [vmem:[#allocation5 + $0x378] sm:$0xf0] }
 0x253   : > { %3139 = vmatpush.bf16.msra.mxu0 %v5188_v46  ;;  %3152 = vmatpush.bf16.msra.mxu1 %v5316_v47  ;;  %v5849_v46 = vld [vmem:[#allocation5 + $0x2cc] sm:$0xf]  ;;  %v4709_v47 = vld [vmem:[#allocation5 + $0x2d8] sm:$0xf0] }
 0x254   : > { %v4712_v63 = vor.u32 %v5849_v46, %v4709_v47  ;;  %v4792_v46 = vor.u32 %v5869_v38, %v4789_v30  ;;  %v5833_v47 = vld [vmem:[#allocation5 + $0x24c] sm:$0xf]  ;;  %v4373_v38 = vld [vmem:[#allocation5 + $0x38] sm:$0xf0] }
 0x255   : > { %3112 = vmatpush.bf16.msrb.mxu2 %v4948_v51  ;;  %3125 = vmatpush.bf16.msrb.mxu3 %v5076_v52  ;;  %v5012_v51 = vor.u32 %v5927_v40, %v5011_v39  ;;  %v4837_v52 = vld [vmem:[#allocation5 + $0x3d8] sm:$0xf0]  ;;  %v5777_v39 = vld [vmem:[#allocation5 + $0x8c] sm:$0xf] }
 0x256   : > { %v4840_v0 = vor.u32 %v5881_v48, %v4837_v52  ;;  %v4421_v40 = vld [vmem:[#allocation5 + $0x98] sm:$0xf0]  ;;  %v5801_v14 = vld [vmem:[#allocation5 + $0x14c] sm:$0xf] }
 0x257   : > { %3140 = vmatpush.bf16.msra.mxu0 %v5172_v61  ;;  %3153 = vmatpush.bf16.msra.mxu1 %v5300_v62  ;;  %v5821_v61 = vld [vmem:[#allocation5 + $0x1ec] sm:$0xf]  ;;  %v4597_v62 = vld [vmem:[#allocation5 + $0x1f8] sm:$0xf0] }
 0x258   : > { %v4600_v6 = vor.u32 %v5821_v61, %v4597_v62  ;;  %v4645_v48 = vld [vmem:[#allocation5 + $0x258] sm:$0xf0]  ;;  %v5805_v61 = vld [vmem:[#allocation5 + $0x16c] sm:$0xf] }
 0x259   : > { %3113 = vmatpush.bf16.msrb.mxu2 %v4932_v1  ;;  %3126 = vmatpush.bf16.msrb.mxu3 %v5060_v2  ;;  %v4868_v1 = vor.u32 %v5891_v56, %v4867_v55  ;;  %v4996_v2 = vor.u32 %v5923_v60, %v4995_v57  ;;  %v4424_v55 = vor.u32 %v5777_v39, %v4421_v40  ;;  %v4773_v57 = vld [vmem:[#allocation5 + $0x358] sm:$0xf0]  ;;  %v5773_v60 = vld [vmem:[#allocation5 + $0x6c] sm:$0xf] }
 0x25a   : > { %v4533_v62 = vld [vmem:[#allocation5 + $0x178] sm:$0xf0]  ;;  %v5797_v30 = vld [vmem:[#allocation5 + $0x12c] sm:$0xf] }
 0x25b   : > { %3141 = vmatpush.bf16.msra.mxu0 %v5156_v11  ;;  %3154 = vmatpush.bf16.msra.mxu1 %v5284_v12  ;;  %v5785_v11 = vld [vmem:[#allocation5 + $0xcc] sm:$0xf]  ;;  %v4453_v12 = vld [vmem:[#allocation5 + $0xd8] sm:$0xf0] }
 0x25c   : > { %v4456_v21 = vor.u32 %v5785_v11, %v4453_v12  ;;  %v5769_v11 = vld [vmem:[#allocation5 + $0x4c] sm:$0xf]  ;;  %v4501_v39 = vld [vmem:[#allocation5 + $0x138] sm:$0xf0] }
 0x25d   : > { %3114 = vmatpush.bf16.msrb.mxu2 %v4916_v15  ;;  %3127 = vmatpush.bf16.msrb.mxu3 %v5044_v16  ;;  %v4696_v15 = vor.u32 %v5845_v3, %v4693_v4  ;;  %v4824_v16 = vor.u32 %v5877_v7, %v4821_v10  ;;  %v5861_v7 = vld [vmem:[#allocation5 + $0x32c] sm:$0xf]  ;;  %v4757_v10 = vld [vmem:[#allocation5 + $0x338] sm:$0xf0]  ;;  %v4392_v28 = vor.u32 %v5769_v11, %v4389_v13 }
 0x25e   : > { %v5333_v13 = vld [vmem:[#allocation5 + $0x7b8] sm:$0xf0] }
 0x25f   : > { %3142 = vmatpush.bf16.msra.mxu0 %v5140_v23  ;;  %3155 = vmatpush.bf16.msra.mxu1 %v5268_v26  ;;  %v5873_v23 = vld [vmem:[#allocation5 + $0x38c] sm:$0xf]  ;;  %v4805_v26 = vld [vmem:[#allocation5 + $0x398] sm:$0xf0] }
 0x260   : > { %v4808_v33 = vor.u32 %v5873_v23, %v4805_v26  ;;  %v5857_v23 = vld [vmem:[#allocation5 + $0x30c] sm:$0xf] }
 0x261   : > { %3115 = vmatpush.bf16.msrb.mxu2 %v4900_v31  ;;  %3128 = vmatpush.bf16.msrb.mxu3 %v5028_v32  ;;  %v4565_v31 = vld [vmem:[#allocation5 + $0x1b8] sm:$0xf0]  ;;  %v4680_v32 = vor.u32 %v5841_v17, %v4677_v18  ;;  %v4760_v18 = vor.u32 %v5861_v7, %v4757_v10 }
 0x262   : > { %v4568_v37 = vor.u32 %v5813_v29, %v4565_v31  ;;  %v4741_v31 = vld [vmem:[#allocation5 + $0x318] sm:$0xf0] }
 0x263   : > { %3143 = vmatpush.bf16.msra.mxu0 %v5124_v41  ;;  %3156 = vmatpush.bf16.msra.mxu1 %v5252_v42  ;;  %v6671_v19 = vpop.f32.mrf.mxu0  ;;  %v6673_v20 = vpop.f32.mrf.mxu1  ;;  %v5809_v41 = vld [vmem:[#allocation5 + $0x18c] sm:$0xf]  ;;  %v4549_v42 = vld [vmem:[#allocation5 + $0x198] sm:$0xf0] }
 0x264   : > { %v4552_v56 = vor.u32 %v5809_v41, %v4549_v42  ;;  %v4744_v41 = vor.u32 %v5857_v23, %v4741_v31  ;;  %v5205_v7 = vld [vmem:[#allocation5 + $0x6b8] sm:$0xf0] }
 0x265   : > { %3116 = vmatpush.bf16.msrb.mxu2 %v4884_v50  ;;  %3129 = vmatpush.bf16.msrb.mxu3 %v5012_v51  ;;  %v5865_v50 = vld [vmem:[#allocation5 + $0x34c] sm:$0xf] }
 0x266   : > { %3144 = vmatmul.bf16.vlgmr.msra.gmra.mxu0 %v6645_v45  ;;  %3157 = vmatmul.bf16.vlgmr.msra.gmra.mxu1 %v6647_v49 }
 0x267   : > { %3188 = vmatpush.bf16.msrb.mxu0 %v4728_v43  ;;  %3201 = vmatpush.bf16.msrb.mxu1 %v4856_v44  ;;  %v6680_v43 = vld [vmem:[%s6751_s8] sm:$0xf]  ;;  %v4664_v44 = vor.u32 %v5837_v34, %v4661_v35  ;;  %v6013_v35 = vld [vmem:[#allocation5 + $0x7ec] sm:$0xf] }
 0x268   : > { %v2842_v59 = vperm.slane %v6680_v43, 0 }
 0x269   : > { %3117 = vmatpush.bf16.msrb.mxu2 %v4868_v1  ;;  %3130 = vmatpush.bf16.msrb.mxu3 %v4996_v2  ;;  %v5829_v1 = vld [vmem:[#allocation5 + $0x22c] sm:$0xf]  ;;  %v4629_v2 = vld [vmem:[#allocation5 + $0x238] sm:$0xf0] }
 0x26a   : > { %v4632_v17 = vor.u32 %v5829_v1, %v4629_v2 }
 0x26b   : > { %3189 = vmatpush.bf16.msrb.mxu0 %v4712_v63  ;;  %3202 = vmatpush.bf16.msrb.mxu1 %v4840_v0  ;;  %v2887_v51 = vpop.f32.mrf.mxu0  ;;  %v2900_v52 = vpop.f32.mrf.mxu1  ;;  %v4648_v63 = vor.u32 %v5833_v47, %v4645_v48  ;;  %v4776_v0 = vor.u32 %v5865_v50, %v4773_v57  ;;  %v5977_v50 = vld [vmem:[#allocation5 + $0x6cc] sm:$0xf] }
 0x26c   : > { %3118 = vmatmul.bf16.vlgmr.msrb.gmra.mxu2 %v6651_v8  ;;  %3131 = vmatmul.bf16.vlgmr.msrb.gmra.mxu3 %v6653_v9  ;;  %v6009_v51 = vld [vmem:[#allocation5 + $0x7cc] sm:$0xf] }
 0x26d   : > { %3162 = vmatpush.bf16.msra.mxu2 %v4472_v5  ;;  %3175 = vmatpush.bf16.msra.mxu3 %v4600_v6  ;;  %v4408_v5 = vor.u32 %v5773_v60, %v4405_v58  ;;  %v4536_v6 = vor.u32 %v5805_v61, %v4533_v62  ;;  %v5761_v57 = vld [vmem:[#allocation5 + $0xc] sm:$0xf]  ;;  %v4357_v60 = vld [vmem:[#allocation5 + $0x18] sm:$0xf0] }
 0x26e   : > { %v5793_v58 = vld [vmem:[#allocation5 + $0x10c] sm:$0xf] }
 0x26f   : > { %3190 = vmatpush.bf16.msrb.mxu0 %v4696_v15  ;;  %3203 = vmatpush.bf16.msrb.mxu1 %v4824_v16  ;;  %v2859_v3 = vpop.f32.mrf.mxu2  ;;  %v2872_v4 = vpop.f32.mrf.mxu3  ;;  %v4517_v15 = vld [vmem:[#allocation5 + $0x158] sm:$0xf0]  ;;  %v5917_v61 = vld [vmem:[#allocation5 + $0x4ec] sm:$0xf] }
 0x270   : > { %v2860_v12 = vadd.f32 %v2859_v3, %v2842_v59  ;;  %v4520_v29 = vor.u32 %v5801_v14, %v4517_v15  ;;  %v4485_v59 = vld [vmem:[#allocation5 + $0x118] sm:$0xf0]  ;;  %v5949_v62 = vld [vmem:[#allocation5 + $0x5ec] sm:$0xf] }
 0x271   : > { %3163 = vmatpush.bf16.msra.mxu2 %v4456_v21  ;;  %3176 = vmatpush.bf16.msra.mxu3 %v4584_v22  ;;  %v5825_v21 = vld [vmem:[#allocation5 + $0x20c] sm:$0xf]  ;;  %v4613_v22 = vld [vmem:[#allocation5 + $0x218] sm:$0xf0] }
 0x272   : > { %v2873_v16 = vadd.f32 %v2872_v4, %v2860_v12  ;;  %v4616_v40 = vor.u32 %v5825_v21, %v4613_v22  ;;  %v4360_v4 = vor.u32 %v5761_v57, %v4357_v60  ;;  %v6005_v12 = vld [vmem:[#allocation5 + $0x7ac] sm:$0xf]  ;;  %v4965_v15 = vld [vmem:[#allocation5 + $0x4d8] sm:$0xf0] }
 0x273   : > { %3191 = vmatpush.bf16.msrb.mxu0 %v4680_v32  ;;  %3204 = vmatpush.bf16.msrb.mxu1 %v4808_v33  ;;  %v6683_v26 = vpop.f32.mrf.mxu0  ;;  %v6685_v27 = vpop.f32.mrf.mxu1  ;;  %v5981_v32 = vld [vmem:[#allocation5 + $0x6ec] sm:$0xf]  ;;  %v5237_v33 = vld [vmem:[#allocation5 + $0x6f8] sm:$0xf0] }
 0x274   : > { %v2886_v34 = vadd.f32 %v6671_v19, %v2873_v16  ;;  %v5240_v47 = vor.u32 %v5981_v32, %v5237_v33  ;;  %v5221_v19 = vld [vmem:[#allocation5 + $0x6d8] sm:$0xf0]  ;;  %v5913_v14 = vld [vmem:[#allocation5 + $0x4cc] sm:$0xf] }
 0x275   : > { %3164 = vmatpush.bf16.msra.mxu2 %v4440_v36  ;;  %3177 = vmatpush.bf16.msra.mxu3 %v4568_v37  ;;  %v5365_v36 = vld [vmem:[#allocation5 + $0x7f8] sm:$0xf0]  ;;  %v5765_v37 = vld [vmem:[#allocation5 + $0x2c] sm:$0xf]  ;;  %v5224_v2 = vor.u32 %v5977_v50, %v5221_v19 }
 0x276   : > { %v2899_v42 = vadd.f32 %v6673_v20, %v2886_v34  ;;  %v5368_v48 = vor.u32 %v6013_v35, %v5365_v36  ;;  %v4376_v52 = vor.u32 %v5765_v37, %v4373_v38  ;;  %v4981_v20 = vld [vmem:[#allocation5 + $0x4f8] sm:$0xf0]  ;;  %v5945_v16 = vld [vmem:[#allocation5 + $0x5cc] sm:$0xf] }
 0x277   : > { %3192 = vmatpush.bf16.msrb.mxu0 %v4664_v44  ;;  %3205 = vmatpush.bf16.msrb.mxu1 %v4792_v46  ;;  %v2861_v44 = vpop.f32.mrf.mxu2  ;;  %v2874_v46 = vpop.f32.mrf.mxu3  ;;  %v4984_v10 = vor.u32 %v5917_v61, %v4981_v20  ;;  %v6001_v32 = vld [vmem:[#allocation5 + $0x78c] sm:$0xf]  ;;  %v5317_v33 = vld [vmem:[#allocation5 + $0x798] sm:$0xf0] }
 0x278   : > { %v5909_v34 = vld [vmem:[#allocation5 + $0x4ac] sm:$0xf]  ;;  %v4949_v36 = vld [vmem:[#allocation5 + $0x4b8] sm:$0xf0] }
 0x279   : > { %3165 = vmatpush.bf16.msra.mxu2 %v4424_v55  ;;  %3178 = vmatpush.bf16.msra.mxu3 %v4552_v56  ;;  %v4504_v55 = vor.u32 %v5797_v30, %v4501_v39  ;;  %v5349_v56 = vld [vmem:[#allocation5 + $0x7d8] sm:$0xf0]  ;;  %v5941_v37 = vld [vmem:[#allocation5 + $0x5ac] sm:$0xf] }
 0x27a   : > { %v5352_v3 = vor.u32 %v6009_v51, %v5349_v56  ;;  %v5077_v38 = vld [vmem:[#allocation5 + $0x5b8] sm:$0xf0]  ;;  %v5965_v44 = vld [vmem:[#allocation5 + $0x66c] sm:$0xf] }
 0x27b   : > { %3193 = vmatpush.bf16.msrb.mxu0 %v4648_v63  ;;  %3206 = vmatpush.bf16.msrb.mxu1 %v4776_v0  ;;  %v5109_v63 = vld [vmem:[#allocation5 + $0x5f8] sm:$0xf0]  ;;  %v2939_v0 = vpop.f32.mrf.mxu0  ;;  %v2952_v1 = vpop.f32.mrf.mxu1  ;;  %v5997_v50 = vld [vmem:[#allocation5 + $0x76c] sm:$0xf] }
 0x27c   : > { %v5112_v11 = vor.u32 %v5949_v62, %v5109_v63  ;;  %v5173_v46 = vld [vmem:[#allocation5 + $0x678] sm:$0xf0]  ;;  %v5905_v19 = vld [vmem:[#allocation5 + $0x48c] sm:$0xf] }
 0x27d   : > { %3166 = vmatpush.bf16.msra.mxu2 %v4408_v5  ;;  %3179 = vmatpush.bf16.msra.mxu3 %v4536_v6  ;;  %v4488_v5 = vor.u32 %v5793_v58, %v4485_v59  ;;  %v5973_v6 = vld [vmem:[#allocation5 + $0x6ac] sm:$0xf]  ;;  %v4933_v51 = vld [vmem:[#allocation5 + $0x498] sm:$0xf0]  ;;  %v5176_v57 = vor.u32 %v5965_v44, %v5173_v46 }
 0x27e   : > { %v5208_v23 = vor.u32 %v5973_v6, %v5205_v7  ;;  %v5961_v58 = vld [vmem:[#allocation5 + $0x64c] sm:$0xf]  ;;  %v5157_v59 = vld [vmem:[#allocation5 + $0x658] sm:$0xf0]  ;;  %v4936_v61 = vor.u32 %v5905_v19, %v4933_v51  ;;  %v5491_v19 = vld [vmem:[#allocation7 + $0xf0] sm:$0xf] }
 0x27f   : > { %3194 = vmatpush.bf16.msrb.mxu0 %v4632_v17  ;;  %3207 = vmatpush.bf16.msrb.mxu1 %v4760_v18  ;;  %v5093_v17 = vld [vmem:[#allocation5 + $0x5d8] sm:$0xf0]  ;;  %v2911_v18 = vpop.f32.mrf.mxu2  ;;  %v2924_v21 = vpop.f32.mrf.mxu3  ;;  %v5993_v62 = vld [vmem:[#allocation5 + $0x74c] sm:$0xf]  ;;  %v6047_v51 = vld [vmem:[#allocation7 + $0xf4] sm:$0xf0] }
 0x280   : > { %v2912_v22 = vadd.f32 %v2911_v18, %v2899_v42  ;;  %v5096_v31 = vor.u32 %v5945_v16, %v5093_v17  ;;  %v5320_v42 = vor.u32 %v6001_v32, %v5317_v33  ;;  %v5285_v63 = vld [vmem:[#allocation5 + $0x758] sm:$0xf0]  ;;  %v5901_v0 = vld [vmem:[#allocation5 + $0x46c] sm:$0xf] }
 0x281   : > { %3167 = vmatpush.bf16.msra.mxu2 %v4392_v28  ;;  %3180 = vmatpush.bf16.msra.mxu3 %v4520_v29  ;;  %v5336_v28 = vor.u32 %v6005_v12, %v5333_v13  ;;  %v5189_v29 = vld [vmem:[#allocation5 + $0x698] sm:$0xf0]  ;;  %v5933_v1 = vld [vmem:[#allocation5 + $0x56c] sm:$0xf]  ;;  %v5288_v6 = vor.u32 %v5993_v62, %v5285_v63  ;;  %v6045_v62 = vld [vmem:[#allocation7 + $0xe4] sm:$0xf0] }
 0x282   : > { %v2925_v35 = vadd.f32 %v2924_v21, %v2912_v22  ;;  %v5957_v7 = vld [vmem:[#allocation5 + $0x62c] sm:$0xf]  ;;  %v4901_v16 = vld [vmem:[#allocation5 + $0x458] sm:$0xf0] }
 0x283   : > { %3195 = vmatpush.bf16.msrb.mxu0 %v4616_v40  ;;  %3208 = vmatpush.bf16.msrb.mxu1 %v4744_v41  ;;  %v6693_v30 = vpop.f32.mrf.mxu0  ;;  %v6695_v39 = vpop.f32.mrf.mxu1  ;;  %v5989_v13 = vld [vmem:[#allocation5 + $0x72c] sm:$0xf]  ;;  %v5029_v18 = vld [vmem:[#allocation5 + $0x558] sm:$0xf0] }
 0x284   : > { %v2938_v40 = vadd.f32 %v6683_v26, %v2925_v35  ;;  %v5929_v17 = vld [vmem:[#allocation5 + $0x54c] sm:$0xf]  ;;  %v5253_v33 = vld [vmem:[#allocation5 + $0x718] sm:$0xf0] }
 0x285   : > { %3168 = vmatpush.bf16.msra.mxu2 %v4376_v52  ;;  %3181 = vmatpush.bf16.msra.mxu3 %v4504_v55  ;;  %v5937_v52 = vld [vmem:[#allocation5 + $0x58c] sm:$0xf]  ;;  %v5061_v55 = vld [vmem:[#allocation5 + $0x598] sm:$0xf0] }
 0x286   : > { %3196 = vmatmul.bf16.vlgmr.msrb.gmra.mxu0 %v6629_v24  ;;  %3209 = vmatmul.bf16.vlgmr.msrb.gmra.mxu1 %v6631_v25  ;;  %v5969_v24 = vld [vmem:[#allocation5 + $0x68c] sm:$0xf]  ;;  %v4968_v25 = vor.u32 %v5913_v14, %v4965_v15  ;;  %v5064_v20 = vor.u32 %v5937_v52, %v5061_v55  ;;  %v5269_v14 = vld [vmem:[#allocation5 + $0x738] sm:$0xf0] }
 0x287   : > { %3240 = vmatpush.bf16.msra.mxu0 %v5240_v47  ;;  %3253 = vmatpush.bf16.msra.mxu1 %v5368_v48  ;;  %v5192_v41 = vor.u32 %v5969_v24, %v5189_v29  ;;  %v4952_v47 = vor.u32 %v5909_v34, %v4949_v36  ;;  %v5080_v48 = vor.u32 %v5941_v37, %v5077_v38  ;;  %v2913_v26 = vpop.f32.mrf.mxu2  ;;  %v2926_v56 = vpop.f32.mrf.mxu3  ;;  %v5897_v15 = vld [vmem:[#allocation5 + $0x44c] sm:$0xf]  ;;  %v5125_v29 = vld [vmem:[#allocation5 + $0x618] sm:$0xf0] }
 0x288   : > { %v5953_v24 = vld [vmem:[#allocation5 + $0x60c] sm:$0xf]  ;;  %v4885_v35 = vld [vmem:[#allocation5 + $0x438] sm:$0xf0] }
 0x289   : > { %3169 = vmatpush.bf16.msra.mxu2 %v4360_v4  ;;  %3182 = vmatpush.bf16.msra.mxu3 %v4488_v5  ;;  %v5160_v5 = vor.u32 %v5961_v58, %v5157_v59  ;;  %v5985_v32 = vld [vmem:[#allocation5 + $0x70c] sm:$0xf]  ;;  %v5013_v37 = vld [vmem:[#allocation5 + $0x538] sm:$0xf0]  ;;  %v5128_v38 = vor.u32 %v5953_v24, %v5125_v29  ;;  %v5492_v58 = vor.u32 %v6047_v51, %v5491_v19  ;;  %v5419_v59 = vld [vmem:[#allocation7 + $0x60] sm:$0xf] }
 0x28a   : > { %v5893_v34 = vld [vmem:[#allocation5 + $0x42c] sm:$0xf]  ;;  %v4869_v46 = vld [vmem:[#allocation5 + $0x418] sm:$0xf0]  ;;  %v6059_v19 = vld [vmem:[#allocation7 + $0x154] sm:$0xf0] }
 0x28b   : > { %3241 = vmatpush.bf16.msra.mxu0 %v5224_v2  ;;  %3254 = vmatpush.bf16.msra.mxu1 %v5352_v3  ;;  %v5045_v2 = vld [vmem:[#allocation5 + $0x578] sm:$0xf0]  ;;  %v2991_v3 = vpop.f32.mrf.mxu0  ;;  %v3004_v4 = vpop.f32.mrf.mxu1  ;;  %v5925_v36 = vld [vmem:[#allocation5 + $0x52c] sm:$0xf] }
 0x28c   : > { %3170 = vmatmul.bf16.vlgmr.msra.gmra.mxu2 %v6635_v53  ;;  %3183 = vmatmul.bf16.vlgmr.msra.gmra.mxu3 %v6637_v54  ;;  %v5301_v53 = vld [vmem:[#allocation5 + $0x778] sm:$0xf0]  ;;  %v6699_v54 = vadd.f32 %v6685_v27, %v2938_v40  ;;  %v5048_v12 = vor.u32 %v5933_v1, %v5045_v2  ;;  %v5256_v40 = vor.u32 %v5985_v32, %v5253_v33  ;;  %v5889_v44 = vld [vmem:[#allocation5 + $0x40c] sm:$0xf]  ;;  %v6027_v2 = vld [vmem:[#allocation7 + $0x54] sm:$0xf0] }
 0x28d   : > { %3214 = vmatpush.bf16.msrb.mxu2 %v4984_v10  ;;  %3227 = vmatpush.bf16.msrb.mxu3 %v5112_v11  ;;  %v5304_v60 = vor.u32 %v5997_v50, %v5301_v53  ;;  %v4917_v27 = vld [vmem:[#allocation5 + $0x478] sm:$0xf0]  ;;  %v5427_v50 = vld [vmem:[#allocation7 + $0x70] sm:$0xf]  ;;  %v6031_v53 = vld [vmem:[#allocation7 + $0x74] sm:$0xf0]  ;;  %v4872_v26 = vor.u32 %v5889_v44, %v4869_v46 }
 0x28e   : > { %v5141_v10 = vld [vmem:[#allocation5 + $0x638] sm:$0xf0]  ;;  %v4920_v11 = vor.u32 %v5901_v0, %v4917_v27  ;;  %v5411_v27 = vld [vmem:[#allocation7 + $0x50] sm:$0xf]  ;;  %v6043_v4 = vld [vmem:[#allocation7 + $0xd4] sm:$0xf0] }
 0x28f   : > { %3242 = vmatpush.bf16.msra.mxu0 %v5208_v23  ;;  %3255 = vmatpush.bf16.msra.mxu1 %v5336_v28  ;;  %v2963_v21 = vpop.f32.mrf.mxu2  ;;  %v6701_v22 = vpop.f32.mrf.mxu3  ;;  %v5144_v23 = vor.u32 %v5957_v7, %v5141_v10  ;;  %v5272_v28 = vor.u32 %v5989_v13, %v5269_v14  ;;  %v5475_v3 = vld [vmem:[#allocation7 + $0xd0] sm:$0xf]  ;;  %v5403_v7 = vld [vmem:[#allocation7 + $0x40] sm:$0xf]  ;;  %v6041_v13 = vld [vmem:[#allocation7 + $0xc4] sm:$0xf0] }
 0x290   : > { %v6021_v33 = vld [vmem:[#allocation7 + $0x24] sm:$0xf0]  ;;  %v5379_v46 = vld [vmem:[#allocation7 + $0x10] sm:$0xf] }
 0x291   : > { %3215 = vmatpush.bf16.msrb.mxu2 %v4968_v25  ;;  %3228 = vmatpush.bf16.msrb.mxu3 %v5096_v31  ;;  %v4904_v25 = vor.u32 %v5897_v15, %v4901_v16  ;;  %v5032_v31 = vor.u32 %v5929_v17, %v5029_v18  ;;  %v5395_v16 = vld [vmem:[#allocation7 + $0x30] sm:$0xf]  ;;  %v6039_v18 = vld [vmem:[#allocation7 + $0xb4] sm:$0xf0] }
 0x292   : > { %v5459_v17 = vld [vmem:[#allocation7 + $0xb0] sm:$0xf] }
 0x293   : > { %3243 = vmatpush.bf16.msra.mxu0 %v5192_v41  ;;  %3256 = vmatpush.bf16.msra.mxu1 %v5320_v42  ;;  %v4888_v41 = vor.u32 %v5893_v34, %v4885_v35  ;;  %v5016_v42 = vor.u32 %v5925_v36, %v5013_v37  ;;  %v5451_v34 = vld [vmem:[#allocation7 + $0xa0] sm:$0xf]  ;;  %v6037_v35 = vld [vmem:[#allocation7 + $0xa4] sm:$0xf0] }
 0x294   : > { %v5452_v44 = vor.u32 %v6037_v35, %v5451_v34 }
 0x295   : > { %3216 = vmatpush.bf16.msrb.mxu2 %v4952_v47  ;;  %3229 = vmatpush.bf16.msrb.mxu3 %v5080_v48  ;;  %v5921_v47 = vld [vmem:[#allocation5 + $0x50c] sm:$0xf]  ;;  %v4997_v48 = vld [vmem:[#allocation5 + $0x518] sm:$0xf0] }
 0x296   : > { %v5000_v56 = vor.u32 %v5921_v47, %v4997_v48  ;;  %v6019_v47 = vld [vmem:[#allocation7 + $0x14] sm:$0xf0]  ;;  %v5443_v48 = vld [vmem:[#allocation7 + $0x90] sm:$0xf] }
 0x297   : > { %3244 = vmatpush.bf16.msra.mxu0 %v5176_v57  ;;  %3257 = vmatpush.bf16.msra.mxu1 %v5304_v60  ;;  %v2965_v52 = vpop.f32.mrf.mxu2  ;;  %v2978_v55 = vpop.f32.mrf.mxu3  ;;  %v2843_v57 = vperm.slane %v6680_v43, 1  ;;  %v5428_v60 = vor.u32 %v6031_v53, %v5427_v50  ;;  %v6035_v53 = vld [vmem:[#allocation7 + $0x94] sm:$0xf0] }
 0x298   : > { %v5371_v55 = vld [vmem:[#allocation7] sm:$0xf] }
 0x299   : > { %3217 = vmatpush.bf16.msrb.mxu2 %v4936_v61  ;;  %3230 = vmatpush.bf16.msrb.mxu3 %v5064_v20  ;;  %v6029_v61 = vld [vmem:[#allocation7 + $0x64] sm:$0xf0]  ;;  %v5483_v20 = vld [vmem:[#allocation7 + $0xe0] sm:$0xf]  ;;  %v2964_v1 = vadd.f32 %v2963_v21, %v2843_v57  ;;  %v5555_v21 = vld [vmem:[#allocation7 + $0x170] sm:$0xf] }
 0x29a   : > { %v5420_v63 = vor.u32 %v6029_v61, %v5419_v59  ;;  %v5484_v0 = vor.u32 %v6045_v62, %v5483_v20  ;;  %v6017_v57 = vld [vmem:[#allocation7 + $0x4] sm:$0xf0]  ;;  %v6030_v61 = vld [vmem:[#allocation7 + $0x74] sm:$0xf]  ;;  %v5531_v20 = vld [vmem:[#allocation7 + $0x140] sm:$0xf] }
 0x29b   : > { %3245 = vmatpush.bf16.msra.mxu0 %v5160_v5  ;;  %3258 = vmatpush.bf16.msra.mxu1 %v5288_v6  ;;  %v5412_v5 = vor.u32 %v6027_v2, %v5411_v27  ;;  %v5476_v6 = vor.u32 %v6043_v4, %v5475_v3  ;;  %v2977_v10 = vadd.f32 %v6701_v22, %v2964_v1  ;;  %v6057_v62 = vld [vmem:[#allocation7 + $0x144] sm:$0xf0]  ;;  %v5429_v27 = vld [vmem:[#allocation7 + $0x78] sm:$0xf0]  ;;  %v6046_v1 = vld [vmem:[#allocation7 + $0xf4] sm:$0xf] }
 0x29c   : > { %v5493_v2 = vld [vmem:[#allocation7 + $0xf8] sm:$0xf0]  ;;  %v5532_v3 = vor.u32 %v6057_v62, %v5531_v20  ;;  %v6060_v20 = vld [vmem:[#allocation7 + $0x164] sm:$0xf]  ;;  %v5549_v62 = vld [vmem:[#allocation7 + $0x168] sm:$0xf0] }
 0x29d   : > { %3218 = vmatpush.bf16.msrb.mxu2 %v4920_v11  ;;  %3231 = vmatpush.bf16.msrb.mxu3 %v5048_v12  ;;  %v6025_v11 = vld [vmem:[#allocation7 + $0x44] sm:$0xf0]  ;;  %v5467_v12 = vld [vmem:[#allocation7 + $0xc0] sm:$0xf] }
 0x29e   : > { %v5404_v14 = vor.u32 %v6025_v11, %v5403_v7  ;;  %v5468_v15 = vor.u32 %v6041_v13, %v5467_v12  ;;  %v5432_v7 = vor.u32 %v6030_v61, %v5429_v27  ;;  %v5523_v11 = vld [vmem:[#allocation7 + $0x130] sm:$0xf]  ;;  %v6055_v12 = vld [vmem:[#allocation7 + $0x134] sm:$0xf0]  ;;  %v5421_v13 = vld [vmem:[#allocation7 + $0x68] sm:$0xf0]  ;;  %v5552_v27 = vor.u32 %v6060_v20, %v5549_v62 }
 0x29f   : > { %3246 = vmatpush.bf16.msra.mxu0 %v5144_v23  ;;  %3259 = vmatpush.bf16.msra.mxu1 %v5272_v28  ;;  %v6063_v23 = vld [vmem:[#allocation7 + $0x174] sm:$0xf0]  ;;  %v5453_v61 = vld [vmem:[#allocation7 + $0xa8] sm:$0xf0]  ;;  %v6073_v20 = vld [vmem:[#allocation7 + $0x1c4] sm:$0xf0] }
 0x2a0   : > { %v5556_v29 = vor.u32 %v6063_v23, %v5555_v21  ;;  %v5413_v21 = vld [vmem:[#allocation7 + $0x58] sm:$0xf0]  ;;  %v6042_v23 = vld [vmem:[#allocation7 + $0xd4] sm:$0xf]  ;;  %v5587_v62 = vld [vmem:[#allocation7 + $0x1b0] sm:$0xf] }
 0x2a1   : > { %3219 = vmatpush.bf16.msrb.mxu2 %v4904_v25  ;;  %3232 = vmatpush.bf16.msrb.mxu3 %v5032_v31  ;;  %v5460_v25 = vor.u32 %v6039_v18, %v5459_v17  ;;  %v5387_v31 = vld [vmem:[#allocation7 + $0x20] sm:$0xf]  ;;  %v6026_v18 = vld [vmem:[#allocation7 + $0x54] sm:$0xf] }
 0x2a2   : > { %v5416_v34 = vor.u32 %v6026_v18, %v5413_v21 }
 0x2a3   : > { %3247 = vmatpush.bf16.msra.mxu0 %v5128_v38  ;;  %3260 = vmatpush.bf16.msra.mxu1 %v5256_v40  ;;  %v6061_v38 = vld [vmem:[#allocation7 + $0x164] sm:$0xf0] }
 0x2a5   : > { %3220 = vmatpush.bf16.msrb.mxu2 %v4888_v41  ;;  %3233 = vmatpush.bf16.msrb.mxu3 %v5016_v42  ;;  %v5388_v42 = vor.u32 %v6021_v33, %v5387_v31  ;;  %v6051_v31 = vld [vmem:[#allocation7 + $0x114] sm:$0xf0] }
 0x2a6   : > { %3248 = vmatmul.bf16.vlgmr.msra.gmra.mxu0 %v6645_v45  ;;  %3261 = vmatmul.bf16.vlgmr.msra.gmra.mxu1 %v6647_v49  ;;  %v3041_v45 = vpop.f32.mrf.mxu0  ;;  %v3054_v49 = vpop.f32.mrf.mxu1 }
 0x2a7   : > { %3690 = vmatpush.bf16.msrb.mxu0 %v5556_v29  ;;  %v6053_v29 = vld [vmem:[#allocation7 + $0x124] sm:$0xf0] }
 0x2a9   : > { %3221 = vmatpush.bf16.msrb.mxu2 %v4872_v26  ;;  %3234 = vmatpush.bf16.msrb.mxu3 %v5000_v56  ;;  %v5380_v26 = vor.u32 %v6019_v47, %v5379_v46  ;;  %v5444_v56 = vor.u32 %v6035_v53, %v5443_v48  ;;  %v5397_v46 = vld [vmem:[#allocation7 + $0x38] sm:$0xf0]  ;;  %v6038_v47 = vld [vmem:[#allocation7 + $0xb4] sm:$0xf]  ;;  %v6049_v53 = vld [vmem:[#allocation7 + $0x104] sm:$0xf0] }
 0x2aa   : > { %v5461_v48 = vld [vmem:[#allocation7 + $0xb8] sm:$0xf0] }
 0x2ac   : > { %3222 = vmatmul.bf16.vlgmr.msrb.gmra.mxu2 %v6651_v8  ;;  %3235 = vmatmul.bf16.vlgmr.msrb.gmra.mxu3 %v6653_v9  ;;  %v6023_v8 = vld [vmem:[#allocation7 + $0x34] sm:$0xf0]  ;;  %v2990_v9 = vadd.f32 %v6693_v30, %v2977_v10  ;;  %v5547_v30 = vld [vmem:[#allocation7 + $0x160] sm:$0xf]  ;;  %v5496_v10 = vor.u32 %v6046_v1, %v5493_v2 }
 0x2ad   : > { %3664 = vmatpush.bf16.msra.mxu2 %v5428_v60  ;;  %3677 = vmatpush.bf16.msra.mxu3 %v5492_v58  ;;  %v5396_v22 = vor.u32 %v6023_v8, %v5395_v16  ;;  %v5548_v41 = vor.u32 %v6061_v38, %v5547_v30  ;;  %v5435_v60 = vld [vmem:[#allocation7 + $0x80] sm:$0xf]  ;;  %v6033_v58 = vld [vmem:[#allocation7 + $0x84] sm:$0xf0]  ;;  %v5524_v16 = vor.u32 %v6055_v12, %v5523_v11  ;;  %v6040_v30 = vld [vmem:[#allocation7 + $0xc4] sm:$0xf] }
 0x2ae   : > { %v3043_v28 = vpop.f32.mrf.mxu0  ;;  %v3056_v24 = vpop.f32.mrf.mxu1  ;;  %v3003_v32 = vadd.f32 %v6695_v39, %v2990_v9  ;;  %v5539_v39 = vld [vmem:[#allocation7 + $0x150] sm:$0xf]  ;;  %v5469_v38 = vld [vmem:[#allocation7 + $0xc8] sm:$0xf0]  ;;  %v6016_v12 = vld [vmem:[#allocation7 + $0x4] sm:$0xf] }
 0x2af   : > { %v3015_v36 = vpop.f32.mrf.mxu2  ;;  %v3028_v37 = vpop.f32.mrf.mxu3  ;;  %3691 = vmatpush.bf16.msrb.mxu0 %v5548_v41  ;;  %v5540_v51 = vor.u32 %v6059_v19, %v5539_v39  ;;  %v5477_v28 = vld [vmem:[#allocation7 + $0xd8] sm:$0xf0]  ;;  %v5515_v24 = vld [vmem:[#allocation7 + $0x120] sm:$0xf]  ;;  %v6022_v41 = vld [vmem:[#allocation7 + $0x34] sm:$0xf] }
 0x2b0   : > { %v3016_v40 = vadd.f32 %v3015_v36, %v3003_v32  ;;  %v5480_v35 = vor.u32 %v6042_v23, %v5477_v28  ;;  %v6024_v36 = vld [vmem:[#allocation7 + $0x44] sm:$0xf]  ;;  %v6062_v39 = vld [vmem:[#allocation7 + $0x174] sm:$0xf] }
 0x2b1   : > { %3665 = vmatpush.bf16.msra.mxu2 %v5420_v63  ;;  %3678 = vmatpush.bf16.msra.mxu3 %v5484_v0 }
 0x2b2   : > { %v3029_v50 = vadd.f32 %v3028_v37, %v3016_v40  ;;  %v5405_v37 = vld [vmem:[#allocation7 + $0x48] sm:$0xf0] }
 0x2b3   : > { %3692 = vmatpush.bf16.msrb.mxu0 %v5540_v51  ;;  %v5557_v51 = vld [vmem:[#allocation7 + $0x178] sm:$0xf0] }
 0x2b4   : > { %v3042_v52 = vadd.f32 %v3041_v45, %v3029_v50  ;;  %v3266_v45 = vmax.f32 %v6699_v54, 0.0  ;;  %v5499_v50 = vld [vmem:[#allocation7 + $0x100] sm:$0xf] }
 0x2b5   : > { %3666 = vmatpush.bf16.msra.mxu2 %v5412_v5  ;;  %3679 = vmatpush.bf16.msra.mxu3 %v5476_v6  ;;  %v5372_v5 = vor.u32 %v6017_v57, %v5371_v55  ;;  %v5436_v6 = vor.u32 %v6033_v58, %v5435_v60  ;;  %v5500_v19 = vor.u32 %v6049_v53, %v5499_v50  ;;  %v6020_v60 = vld [vmem:[#allocation7 + $0x24] sm:$0xf]  ;;  %v5389_v58 = vld [vmem:[#allocation7 + $0x28] sm:$0xf0] }
 0x2b6   : > { %v3055_v59 = vadd.f32 %v3054_v49, %v3042_v52  ;;  %v6028_v49 = vld [vmem:[#allocation7 + $0x64] sm:$0xf]  ;;  %v6714_v17 = vpack.c.bf16 %v3266_v45, %v3266_v45  ;;  %v5464_v57 = vor.u32 %v6038_v47, %v5461_v48  ;;  %v5392_v1 = vor.u32 %v6020_v60, %v5389_v58  ;;  %v6034_v45 = vld [vmem:[#allocation7 + $0x94] sm:$0xf]  ;;  %v5619_v47 = vld [vmem:[#allocation7 + $0x1f0] sm:$0xf] }
 0x2b7   : > { %v3017_v63 = vpop.f32.mrf.mxu2  ;;  %v3030_v0 = vpop.f32.mrf.mxu3  ;;  %3693 = vmatpush.bf16.msrb.mxu0 %v5532_v3  ;;  %v5424_v54 = vor.u32 %v6028_v49, %v5421_v13  ;;  %v6018_v3 = vld [vmem:[#allocation7 + $0x14] sm:$0xf]  ;;  %v5373_v13 = vld [vmem:[#allocation7 + $0x8] sm:$0xf0]  ;;  %v6079_v48 = vld [vmem:[#allocation7 + $0x1f4] sm:$0xf0] }
 0x2b8   : > { %v3267_v4 = vmax.f32 %v3055_v59, 0.0  ;;  %v6036_v59 = vld [vmem:[#allocation7 + $0xa4] sm:$0xf]  ;;  %v5376_v23 = vor.u32 %v6016_v12, %v5373_v13  ;;  %v6075_v60 = vld [vmem:[#allocation7 + $0x1d4] sm:$0xf0] }
 0x2b9   : > { %3667 = vmatpush.bf16.msra.mxu2 %v5404_v14  ;;  %3680 = vmatpush.bf16.msra.mxu3 %v5468_v15  ;;  %v6044_v14 = vld [vmem:[#allocation7 + $0xe4] sm:$0xf]  ;;  %v5485_v15 = vld [vmem:[#allocation7 + $0xe8] sm:$0xf0]  ;;  %v5456_v2 = vor.u32 %v6036_v59, %v5453_v61  ;;  %v5563_v13 = vld [vmem:[#allocation7 + $0x180] sm:$0xf] }
 0x2ba   : > { %v6712_v8 = vpack.c.bf16 %v3267_v4, %v3267_v4  ;;  %v5488_v9 = vor.u32 %v6044_v14, %v5485_v15  ;;  %v5381_v4 = vld [vmem:[#allocation7 + $0x18] sm:$0xf0]  ;;  %v6032_v14 = vld [vmem:[#allocation7 + $0x84] sm:$0xf]  ;;  %v5437_v15 = vld [vmem:[#allocation7 + $0x88] sm:$0xf0] }
 0x2bb   : > { %3694 = vmatpush.bf16.msrb.mxu0 %v5524_v16  ;;  %v5384_v49 = vor.u32 %v6018_v3, %v5381_v4  ;;  %v6056_v16 = vld [vmem:[#allocation7 + $0x144] sm:$0xf]  ;;  %v5440_v28 = vor.u32 %v6032_v14, %v5437_v15  ;;  %v6065_v14 = vld [vmem:[#allocation7 + $0x184] sm:$0xf0] }
 0x2bc   : > { %v5564_v15 = vor.u32 %v6065_v14, %v5563_v13 }
 0x2bd   : > { %3668 = vmatpush.bf16.msra.mxu2 %v5396_v22  ;;  %3681 = vmatpush.bf16.msra.mxu3 %v5460_v25  ;;  %v5516_v22 = vor.u32 %v6053_v29, %v5515_v24  ;;  %v5507_v25 = vld [vmem:[#allocation7 + $0x110] sm:$0xf]  ;;  %v6054_v24 = vld [vmem:[#allocation7 + $0x134] sm:$0xf]  ;;  %v5525_v29 = vld [vmem:[#allocation7 + $0x138] sm:$0xf0] }
 0x2be   : > { %v5508_v40 = vor.u32 %v6051_v31, %v5507_v25  ;;  %v2844_v25 = vperm.slane %v6680_v43, 2  ;;  %v6052_v31 = vld [vmem:[#allocation7 + $0x124] sm:$0xf] }
 0x2bf   : > { %3695 = vmatpush.bf16.msrb.mxu0 %v5516_v22  ;;  %v5528_v22 = vor.u32 %v6054_v24, %v5525_v29  ;;  %v6048_v43 = vld [vmem:[#allocation7 + $0x104] sm:$0xf] }
 0x2c1   : > { %3669 = vmatpush.bf16.msra.mxu2 %v5388_v42  ;;  %3682 = vmatpush.bf16.msra.mxu3 %v5452_v44  ;;  %v5408_v42 = vor.u32 %v6024_v36, %v5405_v37  ;;  %v5472_v44 = vor.u32 %v6040_v30, %v5469_v38  ;;  %v6050_v36 = vld [vmem:[#allocation7 + $0x114] sm:$0xf]  ;;  %v5509_v37 = vld [vmem:[#allocation7 + $0x118] sm:$0xf0] }
 0x2c3   : > { %v6718_v32 = vpop.f32.mrf.mxu0  ;;  %v6720_v33 = vpop.f32.mrf.mxu1  ;;  %3696 = vmatpush.bf16.msrb.mxu0 %v5508_v40 }
 0x2c5   : > { %3670 = vmatpush.bf16.msra.mxu2 %v5380_v26  ;;  %3683 = vmatpush.bf16.msra.mxu3 %v5444_v56  ;;  %v5560_v26 = vor.u32 %v6062_v39, %v5557_v51  ;;  %v5400_v56 = vor.u32 %v6022_v41, %v5397_v46  ;;  %v5512_v41 = vor.u32 %v6050_v36, %v5509_v37  ;;  %v5611_v39 = vld [vmem:[#allocation7 + $0x1e0] sm:$0xf]  ;;  %v5597_v36 = vld [vmem:[#allocation7 + $0x1c8] sm:$0xf0] }
 0x2c7   : > { %3697 = vmatpush.bf16.msrb.mxu0 %v5500_v19  ;;  %v6077_v19 = vld [vmem:[#allocation7 + $0x1e4] sm:$0xf0] }
 0x2c9   : > { %3671 = vmatpush.bf16.msra.mxu2 %v5372_v5  ;;  %3684 = vmatpush.bf16.msra.mxu3 %v5436_v6  ;;  %v5445_v5 = vld [vmem:[#allocation7 + $0x98] sm:$0xf0]  ;;  %v6058_v6 = vld [vmem:[#allocation7 + $0x154] sm:$0xf] }
 0x2ca   : > { %v5448_v11 = vor.u32 %v6034_v45, %v5445_v5  ;;  %v5579_v45 = vld [vmem:[#allocation7 + $0x1a0] sm:$0xf]  ;;  %v6069_v5 = vld [vmem:[#allocation7 + $0x1a4] sm:$0xf0] }
 0x2cb   : > { %v3095_v52 = vpop.f32.mrf.mxu0  ;;  %v3108_v55 = vpop.f32.mrf.mxu1  ;;  %3742 = vmatpush.bf16.msra.mxu0 %v5560_v26 }
 0x2cc   : > { %3672 = vmatmul.bf16.vlgmr.msra.gmra.mxu2 %v6714_v17  ;;  %3685 = vmatmul.bf16.vlgmr.msra.gmra.mxu3 %v6712_v8  ;;  %v5612_v52 = vor.u32 %v6077_v19, %v5611_v39  ;;  %v6064_v39 = vld [vmem:[#allocation7 + $0x184] sm:$0xf]  ;;  %v5565_v19 = vld [vmem:[#allocation7 + $0x188] sm:$0xf0] }
 0x2cd   : > { %3716 = vmatpush.bf16.msrb.mxu2 %v5432_v7  ;;  %3729 = vmatpush.bf16.msrb.mxu3 %v5496_v10  ;;  %v5541_v7 = vld [vmem:[#allocation7 + $0x158] sm:$0xf0] }
 0x2ce   : > { %v5544_v10 = vor.u32 %v6058_v6, %v5541_v7  ;;  %v5580_v6 = vor.u32 %v6069_v5, %v5579_v45  ;;  %v5571_v7 = vld [vmem:[#allocation7 + $0x190] sm:$0xf] }
 0x2cf   : > { %v3067_v63 = vpop.f32.mrf.mxu2  ;;  %v3080_v0 = vpop.f32.mrf.mxu3  ;;  %3743 = vmatpush.bf16.msra.mxu0 %v5552_v27  ;;  %v6071_v27 = vld [vmem:[#allocation7 + $0x1b4] sm:$0xf0] }
 0x2d0   : > { %v3068_v30 = vadd.f32 %v3067_v63, %v2844_v25  ;;  %v5588_v3 = vor.u32 %v6071_v27, %v5587_v62  ;;  %v6074_v25 = vld [vmem:[#allocation7 + $0x1d4] sm:$0xf] }
 0x2d1   : > { %3717 = vmatpush.bf16.msrb.mxu2 %v5424_v54  ;;  %3730 = vmatpush.bf16.msrb.mxu3 %v5488_v9  ;;  %v5533_v54 = vld [vmem:[#allocation7 + $0x148] sm:$0xf0] }
 0x2d2   : > { %v5536_v21 = vor.u32 %v6056_v16, %v5533_v54  ;;  %v6078_v16 = vld [vmem:[#allocation7 + $0x1f4] sm:$0xf]  ;;  %v5621_v54 = vld [vmem:[#allocation7 + $0x1f8] sm:$0xf0] }
 0x2d3   : > { %3744 = vmatpush.bf16.msra.mxu0 %v5544_v10  ;;  %v6067_v10 = vld [vmem:[#allocation7 + $0x194] sm:$0xf0] }
 0x2d5   : > { %3718 = vmatpush.bf16.msrb.mxu2 %v5416_v34  ;;  %3731 = vmatpush.bf16.msrb.mxu3 %v5480_v35  ;;  %v5517_v34 = vld [vmem:[#allocation7 + $0x128] sm:$0xf0] }
 0x2d6   : > { %v5520_v35 = vor.u32 %v6052_v31, %v5517_v34  ;;  %v5605_v31 = vld [vmem:[#allocation7 + $0x1d8] sm:$0xf0] }
 0x2d7   : > { %v3069_v9 = vpop.f32.mrf.mxu2  ;;  %v3082_v18 = vpop.f32.mrf.mxu3  ;;  %3745 = vmatpush.bf16.msra.mxu0 %v5536_v21  ;;  %v5608_v34 = vor.u32 %v6074_v25, %v5605_v31  ;;  %v6082_v25 = vld [vmem:[#allocation10 + $0x10] sm:$0xff] }
 0x2d8   : > { %v5624_v9 = vor.u32 %v6078_v16, %v5621_v54  ;;  %v6087_v54 = vld [vmem:[#allocation10 + $0x38] sm:$0xff] }
 0x2d9   : > { %3719 = vmatpush.bf16.msrb.mxu2 %v5408_v42  ;;  %3732 = vmatpush.bf16.msrb.mxu3 %v5472_v44  ;;  %v3081_v42 = vadd.f32 %v3080_v0, %v3068_v30  ;;  %v5501_v44 = vld [vmem:[#allocation7 + $0x108] sm:$0xf0] }
 0x2da   : > { %v5504_v46 = vor.u32 %v6048_v43, %v5501_v44  ;;  %v6068_v43 = vld [vmem:[#allocation7 + $0x1a4] sm:$0xf]  ;;  %v5581_v44 = vld [vmem:[#allocation7 + $0x1a8] sm:$0xf0] }
 0x2db   : > { %3746 = vmatpush.bf16.msra.mxu0 %v5528_v22  ;;  %v3094_v50 = vadd.f32 %v6718_v32, %v3081_v42  ;;  %v5595_v32 = vld [vmem:[#allocation7 + $0x1c0] sm:$0xf] }
 0x2dc   : > { %v5596_v0 = vor.u32 %v6073_v20, %v5595_v32 }
 0x2dd   : > { %3720 = vmatpush.bf16.msrb.mxu2 %v5400_v56  ;;  %3733 = vmatpush.bf16.msrb.mxu3 %v5464_v57  ;;  %v3107_v51 = vadd.f32 %v6720_v33, %v3094_v50  ;;  %v5603_v57 = vld [vmem:[#allocation7 + $0x1d0] sm:$0xf]  ;;  %v6066_v50 = vld [vmem:[#allocation7 + $0x194] sm:$0xf] }
 0x2de   : > { %v5604_v59 = vor.u32 %v6075_v60, %v5603_v57 }
 0x2df   : > { %3747 = vmatpush.bf16.msra.mxu0 %v5520_v35  ;;  %v6072_v35 = vld [vmem:[#allocation7 + $0x1c4] sm:$0xf] }
 0x2e0   : > { %v5600_v37 = vor.u32 %v6072_v35, %v5597_v36  ;;  %v6081_v35 = vld [vmem:[#allocation10 + $0x8] sm:$0xff] }
 0x2e1   : > { %3721 = vmatpush.bf16.msrb.mxu2 %v5392_v1  ;;  %3734 = vmatpush.bf16.msrb.mxu3 %v5456_v2  ;;  %v6093_v36 = vld [vmem:[#allocation10 + $0x68] sm:$0xff] }
 0x2e3   : > { %v3145_v38 = vpop.f32.mrf.mxu0  ;;  %v3158_v40 = vpop.f32.mrf.mxu1  ;;  %3748 = vmatpush.bf16.msra.mxu0 %v5512_v41  ;;  %v5589_v41 = vld [vmem:[#allocation7 + $0x1b8] sm:$0xf0] }
 0x2e5   : > { %3722 = vmatpush.bf16.msrb.mxu2 %v5384_v49  ;;  %3735 = vmatpush.bf16.msrb.mxu3 %v5448_v11  ;;  %v5572_v49 = vor.u32 %v6067_v10, %v5571_v7 }
 0x2e7   : > { %3749 = vmatpush.bf16.msra.mxu0 %v5504_v46  ;;  %v6191_v46 = vld [vmem:[%s6751_s8] sm:$0xf] }
 0x2e9   : > { %3723 = vmatpush.bf16.msrb.mxu2 %v5376_v23  ;;  %3736 = vmatpush.bf16.msrb.mxu3 %v5440_v28  ;;  %v6076_v23 = vld [vmem:[#allocation7 + $0x1e4] sm:$0xf]  ;;  %v5613_v28 = vld [vmem:[#allocation7 + $0x1e8] sm:$0xf0] }
 0x2ea   : > { %v5616_v24 = vor.u32 %v6076_v23, %v5613_v28  ;;  %v6085_v23 = vld [vmem:[#allocation10 + $0x28] sm:$0xff] }
 0x2eb   : > { %v3147_v53 = vpop.f32.mrf.mxu0 }
 0x2ec   : > { %3724 = vmatmul.bf16.vlgmr.msrb.gmra.mxu2 %v6714_v17  ;;  %3737 = vmatmul.bf16.vlgmr.msrb.gmra.mxu3 %v6712_v8  ;;  %v5620_v17 = vor.u32 %v6079_v48, %v5619_v47  ;;  %v3160_v8 = vpop.f32.mrf.mxu1  ;;  %v2845_v47 = vperm.slane %v6191_v46, 3  ;;  %v5584_v48 = vor.u32 %v6068_v43, %v5581_v44 }
 0x2ed   : > { %3901 = vmatpush.bf16.msra.mxu2 %v6087_v54 }
 0x2ee   : > { %3703 = vmatpush.bf16.msrb.mxu1 %v5620_v17  ;;  %v5573_v17 = vld [vmem:[#allocation7 + $0x198] sm:$0xf0] }
 0x2ef   : > { %v3119_v55 = vpop.f32.mrf.mxu2  ;;  %v3132_v26 = vpop.f32.mrf.mxu3  ;;  %v5576_v8 = vor.u32 %v6066_v50, %v5573_v17 }
 0x2f0   : > { %v3120_v56 = vadd.f32 %v3119_v55, %v3107_v51 }
 0x2f2   : > { %3704 = vmatpush.bf16.msrb.mxu1 %v5612_v52  ;;  %v3133_v58 = vadd.f32 %v3132_v26, %v3120_v56  ;;  %v5568_v26 = vor.u32 %v6064_v39, %v5565_v19 }
 0x2f4   : > { %v3146_v61 = vadd.f32 %v3145_v38, %v3133_v58 }
 0x2f6   : > { %3705 = vmatpush.bf16.msrb.mxu1 %v5604_v59  ;;  %v3159_v63 = vadd.f32 %v3158_v40, %v3146_v61  ;;  %v6070_v40 = vld [vmem:[#allocation7 + $0x1b4] sm:$0xf] }
 0x2f7   : > { %v3121_v1 = vpop.f32.mrf.mxu2  ;;  %v3134_v2 = vpop.f32.mrf.mxu3  ;;  %v5592_v42 = vor.u32 %v6070_v40, %v5589_v41  ;;  %v6090_v40 = vld [vmem:[#allocation10 + $0x50] sm:$0xff]  ;;  %v6089_v41 = vld [vmem:[#allocation10 + $0x48] sm:$0xff] }
 0x2f8   : > { %v3268_v33 = vmax.f32 %v3159_v63, 0.0 }
 0x2fa   : > { %3706 = vmatpush.bf16.msrb.mxu1 %v5596_v0  ;;  %v3272_v4 = vpack.c.bf16 %v3268_v33, %v3268_v33  ;;  %v3338_v33 = vld [vmem:[#allocation8] sm:$0x3] }
 0x2fc   : > { %3698 = vmatmul.bf16.vlgmr.msrb.gmra.mxu0 %v3272_v4 }
 0x2fe   : > { %3707 = vmatpush.bf16.msrb.mxu1 %v5588_v3  ;;  %v3660_v3 = vperm.slane %v3338_v33, 0 }
 0x302   : > { %3708 = vmatpush.bf16.msrb.mxu1 %v5580_v6 }
 0x303   : > { %v3197_v11 = vpop.f32.mrf.mxu0  ;;  %v3210_v12 = vpop.f32.mrf.mxu1 }
 0x306   : > { %3709 = vmatpush.bf16.msrb.mxu1 %v5572_v49  ;;  %v3661_v49 = vperm.slane %v3338_v33, 1 }
 0x30a   : > { %3710 = vmatpush.bf16.msrb.mxu1 %v5564_v15 }
 0x30b   : > { %v3199_v18 = vpop.f32.mrf.mxu0  ;;  %v3212_v21 = vpop.f32.mrf.mxu1 }
 0x30c   : > { %3750 = vmatmul.bf16.vlgmr.msra.gmra.mxu0 %v3272_v4  ;;  %v6086_v18 = vld [vmem:[#allocation10 + $0x30] sm:$0xff] }
 0x30d   : > { %v6094_v21 = vld [vmem:[#allocation10 + $0x70] sm:$0xff]  ;;  %3902 = vmatpush.bf16.msra.mxu2 %v6086_v18 }
 0x30e   : > { %3755 = vmatpush.bf16.msra.mxu1 %v5624_v9  ;;  %v6095_v9 = vld [vmem:[#allocation10 + $0x78] sm:$0xff] }
 0x30f   : > { %v3171_v29 = vpop.f32.mrf.mxu2  ;;  %v3184_v22 = vpop.f32.mrf.mxu3  ;;  %3914 = vmatpush.bf16.msra.mxu3 %v6095_v9 }
 0x310   : > { %v3172_v53 = vadd.f32 %v3171_v29, %v2845_v47  ;;  %v6083_v29 = vld [vmem:[#allocation10 + $0x18] sm:$0xff] }
 0x311   : > { %3903 = vmatpush.bf16.msra.mxu2 %v6085_v23 }
 0x312   : > { %3756 = vmatpush.bf16.msra.mxu1 %v5616_v24  ;;  %v3185_v55 = vadd.f32 %v3184_v22, %v3172_v53  ;;  %v6084_v24 = vld [vmem:[#allocation10 + $0x20] sm:$0xff] }
 0x313   : > { %3915 = vmatpush.bf16.msra.mxu3 %v6094_v21 }
 0x314   : > { %v3198_v56 = vadd.f32 %v3197_v11, %v3185_v55 }
 0x315   : > { %3904 = vmatpush.bf16.msra.mxu2 %v6084_v24 }
 0x316   : > { %3757 = vmatpush.bf16.msra.mxu1 %v5608_v34  ;;  %v3211_v58 = vadd.f32 %v3210_v12, %v3198_v56 }
 0x317   : > { %v3173_v30 = vpop.f32.mrf.mxu2  ;;  %v3186_v38 = vpop.f32.mrf.mxu3  ;;  %3916 = vmatpush.bf16.msra.mxu3 %v6093_v36 }
 0x318   : > { %v6092_v30 = vld [vmem:[#allocation10 + $0x60] sm:$0xff]  ;;  %v6091_v38 = vld [vmem:[#allocation10 + $0x58] sm:$0xff] }
 0x319   : > { %3905 = vmatpush.bf16.msra.mxu2 %v6083_v29 }
 0x31a   : > { %3758 = vmatpush.bf16.msra.mxu1 %v5600_v37  ;;  %v6080_v37 = vld [vmem:[#allocation10] sm:$0xff] }
 0x31b   : > { %3917 = vmatpush.bf16.msra.mxu3 %v6092_v30 }
 0x31d   : > { %3906 = vmatpush.bf16.msra.mxu2 %v6082_v25 }
 0x31e   : > { %3759 = vmatpush.bf16.msra.mxu1 %v5592_v42  ;;  %v6088_v42 = vld [vmem:[#allocation10 + $0x40] sm:$0xff] }
 0x31f   : > { %3918 = vmatpush.bf16.msra.mxu3 %v6091_v38 }
 0x321   : > { %3907 = vmatpush.bf16.msra.mxu2 %v6081_v35 }
 0x322   : > { %3760 = vmatpush.bf16.msra.mxu1 %v5584_v48 }
 0x323   : > { %v3249_v51 = vpop.f32.mrf.mxu0  ;;  %v3262_v52 = vpop.f32.mrf.mxu1  ;;  %3919 = vmatpush.bf16.msra.mxu3 %v6090_v40 }
 0x325   : > { %3908 = vmatpush.bf16.msra.mxu2 %v6080_v37 }
 0x326   : > { %3761 = vmatpush.bf16.msra.mxu1 %v5576_v8 }
 0x327   : > { %3920 = vmatpush.bf16.msra.mxu3 %v6089_v41 }
 0x32a   : > { %3762 = vmatpush.bf16.msra.mxu1 %v5568_v26  ;;  %v3804_v26 = vld [vmem:[#allocation11] sm:$0x1] }
 0x32b   : > { %v3251_v57 = vpop.f32.mrf.mxu0  ;;  %v3264_v60 = vpop.f32.mrf.mxu1  ;;  %3921 = vmatpush.bf16.msra.mxu3 %v6088_v42 }
 0x32f   : > { %v3223_v59 = vpop.f32.mrf.mxu2  ;;  %v3236_v61 = vpop.f32.mrf.mxu3 }
 0x330   : > { %v3224_v32 = vadd.f32 %v3223_v59, %v3211_v58 }
 0x332   : > { %v3237_v20 = vadd.f32 %v3236_v61, %v3224_v32 }
 0x334   : > { %v3250_v62 = vadd.f32 %v3249_v51, %v3237_v20 }
 0x336   : > { %v3263_v63 = vadd.f32 %v3262_v52, %v3250_v62 }
 0x337   : > { %v3225_v0 = vpop.f32.mrf.mxu2  ;;  %v3238_v27 = vpop.f32.mrf.mxu3 }
 0x338   : > { %v3269_v1 = vmax.f32 %v3263_v63, 0.0 }
 0x33a   : > { %v3273_v2 = vpack.c.bf16 %v3269_v1, %v3269_v1 }
 0x33c   : > { %3711 = vmatmul.bf16.vlgmr.msrb.gmra.mxu1 %v3273_v2 }
 0x34c   : > { %3763 = vmatmul.bf16.vlgmr.msra.gmra.mxu1 %v3273_v2 }
 0x34f   : > { %v3673_v4 = vpop.f32.mrf.mxu2  ;;  %v3686_v45 = vpop.f32.mrf.mxu3 }
 0x350   : > { %v3674_v5 = vadd.f32 %v3673_v4, %v3660_v3 }
 0x352   : > { %v3687_v6 = vadd.f32 %v3686_v45, %v3674_v5 }
 0x357   : > { %v3675_v7 = vpop.f32.mrf.mxu2  ;;  %v3688_v10 = vpop.f32.mrf.mxu3 }
 0x36f   : > { %v3725_v11 = vpop.f32.mrf.mxu2  ;;  %v3738_v12 = vpop.f32.mrf.mxu3 }
 0x370   : > { %v3726_v13 = vadd.f32 %v3725_v11, %v3661_v49 }
 0x372   : > { %v3739_v14 = vadd.f32 %v3738_v12, %v3726_v13 }
 0x377   : > { %v3727_v15 = vpop.f32.mrf.mxu2  ;;  %v3740_v16 = vpop.f32.mrf.mxu3 }
 0x379   : > { %v3699_v28 = vpop.f32.mrf.mxu0 }
 0x37a   : > { %v3700_v43 = vadd.f32 %v3699_v28, %v3687_v6 }
 0x381   : > { %v3701_v22 = vpop.f32.mrf.mxu0 }
 0x389   : > { %v3751_v31 = vpop.f32.mrf.mxu0 }
 0x38a   : > { %v3752_v17 = vadd.f32 %v3751_v31, %v3739_v14 }
 0x391   : > { %v3753_v34 = vpop.f32.mrf.mxu0 }
 0x3b9   : > { %v3712_v44 = vpop.f32.mrf.mxu1 }
 0x3ba   : > { %v3713_v46 = vadd.f32 %v3712_v44, %v3700_v43 }
 0x3bc   : > { %v3768_v47 = vmax.f32 %v3713_v46, 0.0 }
 0x3be   : > { %v3770_v48 = vpack.c.bf16 %v3768_v47, %v3768_v47 }
 0x3c0   : > { %3909 = vmatmul.bf16.vlgmr.msra.gmra.mxu2 %v3770_v48 }
 0x3c1   : > { %v3714_v50 = vpop.f32.mrf.mxu1 }
 0x3c9   : > { %v3764_v53 = vpop.f32.mrf.mxu1 }
 0x3ca   : > { %v3765_v8 = vadd.f32 %v3764_v53, %v3752_v17 }
 0x3cc   : > { %v3769_v39 = vmax.f32 %v3765_v8, 0.0 }
 0x3ce   : > { %v3771_v19 = vpack.c.bf16 %v3769_v39, %v3769_v39 }
 0x3d0   : > { %3922 = vmatmul.bf16.vlgmr.msra.gmra.mxu3 %v3771_v19 }
 0x3d1   : > { %v3766_v51 = vpop.f32.mrf.mxu1 }
 0x443   : > { %v3910_v52 = vpop.f32.mrf.mxu2 }
 0x444   : > { %v3911_v56 = vadd.f32 %v3910_v52, %v3804_v26 }
 0x44b   : > { %v3912_v55 = vpop.f32.mrf.mxu2 }
 0x453   : > { %v3923_v57 = vpop.f32.mrf.mxu3 }
 0x454   : > { %v3924_v60 = vadd.f32 %v3923_v57, %v3911_v56 }
 0x456   : > { %3927 = vst [vmem:[%s560_s27] sm:$0x1] %v3924_v60 }
 0x45b   : > { %v3925_v58 = vpop.f32.mrf.mxu3 }
 0x45c PF: > { %s6768_s19 = sld [smem:[#allocation17_spill]]  ;;  %s6769_s25 = smov %s6406_s26 }
 0x45d   : > { %s6770_s26 = smov %s6772_s20 }
 0x462   : > { %s27_s27 = sadd.s32 1, %s6768_s19  }
 0x463   : > { %p24_p8 = scmp.ge.s32.totalorder %s27_s27, 4  }
 0x465   :  { %26 = sbr.rel (!%p24_p8) target bundleno = 9 (0x9), region = 135 }
 0x46a   :  { %3945 = vsyncpa [#allocation4], 1 }
 0x46b   :  { %3947 = vsyncpa [#allocation4 + $0x1], 1 }
 0x46c   :  { %3948 = vsyncpa [#allocation6], 1 }
 0x46d   :  { %3949 = vsyncpa [#allocation9], 1 }
 0x46e   :  { %3950 = vsyncpa [#allocation12], 1 }

</bundles_post_ra>
